<compile_context>
chip_gen: v6e
topology: v6e:2x2x1
jax: 0.10.0
libtpu: 0.0.40
codegen_flags: <defaults>
</compile_context>

<pallas_src>
import jax
import jax.numpy as jnp
from jax.experimental import pallas as pl
from jax.experimental.pallas import tpu as pltpu


def _rbb_kernel(x_ref, top_ref, bot_ref, w1_ref, b1_ref, w2_ref, b2_ref,
                w3_ref, b3_ref, o_ref, hp_ref):
    # x_ref / o_ref : (TH, W, B, C)   top_ref/bot_ref : (1, W, B, C)
    # w1: (C, Cm) bf16   w2: (9, Cm, Cm) bf16   w3: (Cm, C) bf16
    # b1/b2: (1, Cm) f32  b3: (1, C) f32
    # hp_ref: (TH+2, W+2, B, Cm) bf16 scratch slab (conv2 input, zero-padded)
    TH, W, B, C = x_ref.shape
    Cm = w1_ref.shape[1]
    i = pl.program_id(0)
    n = pl.num_programs(0)

    w1 = w1_ref[...]
    b1 = b1_ref[...]

    # --- conv1 (1x1) + ReLU for the tile rows, written into the slab interior
    x_bf = x_ref[...].astype(jnp.bfloat16)
    h1 = jnp.dot(x_bf.reshape(TH * W * B, C), w1,
                 preferred_element_type=jnp.float32)
    h1 = jnp.maximum(h1 + b1, 0.0)
    hp_ref[1:TH + 1, 1:W + 1] = h1.astype(jnp.bfloat16).reshape(TH, W, B, Cm)

    # --- conv1 on the two halo rows (tiny dots), written into slab rows 0/TH+1
    def conv1_row(row_bf):                      # (1, W, B, C) -> (1, W, B, Cm)
        r = jnp.dot(row_bf.reshape(W * B, C), w1,
                    preferred_element_type=jnp.float32)
        return jnp.maximum(r + b1, 0.0).astype(jnp.bfloat16).reshape(1, W, B, Cm)

    hp_ref[0:1, 1:W + 1] = conv1_row(top_ref[...].astype(jnp.bfloat16))
    hp_ref[TH + 1:TH + 2, 1:W + 1] = conv1_row(bot_ref[...].astype(jnp.bfloat16))

    # Image-boundary halo rows are conv2's zero padding (padding applied AFTER
    # conv1+ReLU), so overwrite them with zeros on the edge tiles only.
    @pl.when(i == 0)
    def _():
        hp_ref[0:1, 1:W + 1] = jnp.zeros((1, W, B, Cm), jnp.bfloat16)

    @pl.when(i == n - 1)
    def _():
        hp_ref[TH + 1:TH + 2, 1:W + 1] = jnp.zeros((1, W, B, Cm), jnp.bfloat16)

    # Zero-pad columns (kx borders).  Rewritten every step (cheap: 2 columns),
    # so the kernel is correct however the parallel grid axis is sharded.
    zcol = jnp.zeros((TH + 2, 1, B, Cm), jnp.bfloat16)
    hp_ref[:, 0:1] = zcol
    hp_ref[:, W + 1:W + 2] = zcol

    # --- conv2 (3x3, stride 1): 9 shifted-window bf16 matmuls, f32 accumulate
    acc = None
    for ky in range(3):
        for kx in range(3):
            win = hp_ref[ky:ky + TH, kx:kx + W].reshape(TH * W * B, Cm)
            part = jnp.dot(win, w2_ref[3 * ky + kx],
                           preferred_element_type=jnp.float32)
            acc = part if acc is None else acc + part
    h2 = jnp.maximum(acc + b2_ref[...], 0.0).astype(jnp.bfloat16)

    # --- conv3 (1x1) + residual add (identity re-read from x_ref, f32) -------
    out = jnp.dot(h2, w3_ref[...], preferred_element_type=jnp.float32) + b3_ref[...]
    o_ref[...] = (out.reshape(TH, W, B, C) + x_ref[...]).astype(o_ref.dtype)


def _vmem_limit_bytes():
    """Generation-aware VMEM limit: ~96 MiB on 128 MiB parts, 48 MiB on 64 MiB."""
    try:
        cap = int(pltpu.get_tpu_info().vmem_capacity_bytes)
    except Exception:
        cap = 64 << 20
    return max(int(min(cap * 3 // 4, cap - (16 << 20))), 16 << 20)


def _pick_row_tile(H, W, B, C, Cm, vmem_limit):
    """Largest row-tile TH dividing H that keeps the per-tile live set in budget."""
    f32, bf16 = 4, 2
    per_row = (
        2 * (2 * W * B * C * f32)                  # double-buffered x in + out blocks
        + (W + 2) * B * Cm * bf16                  # padded conv1 slab (interior rows)
        + W * B * Cm * (f32 + bf16)                # conv1 pre-ReLU f32 + bf16 copy
        + W * B * Cm * (bf16 + 2 * f32 + bf16)     # conv2 window, acc, partial, h2
        + W * B * C * f32                          # conv3 f32 output
    )
    fixed = (
        2 * 2 * (C * Cm + 9 * Cm * Cm + Cm * C) * bf16   # weights (assume dbl-buffered)
        + 2 * 2 * 2 * W * B * C * f32                    # halo row blocks
        + 2 * (W + 2) * B * Cm * bf16                    # slab pad rows
    )
    budget = int(vmem_limit * 0.6) - fixed
    budget_rows = max(budget // max(per_row, 1), 1)
    cap_rows = int(min(budget_rows, max(H // 2, 1)))     # keep >= 2 tiles
    best, best_even = 1, None
    for th in range(1, cap_rows + 1):
        if H % th == 0:
            best = th
            if (H // th) % 2 == 0:
                best_even = th
    # Prefer an even tile count so the "parallel" axis balances across 2 TCs (v7x).
    # TODO(synk): allow a ragged last tile so a prime H doesn't collapse to TH=1.
    return best_even if best_even is not None else best


def residual_bottleneck_block_hwbc(x_hwbc, params):
    """x_hwbc: (H, W, B, C) float32 — kernel-native layout (no transposes)."""
    w1, b1, w2, b2, w3, b3 = params
    H, W, B, C = x_hwbc.shape
    Cm = w1.shape[1]

    vmem_limit = _vmem_limit_bytes()
    TH = _pick_row_tile(H, W, B, C, Cm, vmem_limit)
    nT = H // TH

    # bf16 weight copies (cast once, VMEM-resident across all tiles).
    w1_b = w1.astype(jnp.bfloat16)
    w2_b = w2.reshape(9, Cm, Cm).astype(jnp.bfloat16)          # (ky*3+kx, cin, cout)
    w3_b = w3.astype(jnp.bfloat16)
    b1_2 = b1.reshape(1, Cm).astype(jnp.float32)
    b2_2 = b2.reshape(1, Cm).astype(jnp.float32)
    b3_2 = b3.reshape(1, C).astype(jnp.float32)

    const2 = lambda i: (0, 0)
    out_hwbc = pl.pallas_call(
        _rbb_kernel,
        grid=(nT,),
        in_specs=[
            pl.BlockSpec((TH, W, B, C), lambda i: (i, 0, 0, 0)),
            # Halo rows fetched straight from x in HBM (clamped at the image
            # boundary; the kernel zeroes those slab rows on the edge tiles).
            pl.BlockSpec((1, W, B, C),
                         lambda i: (jnp.maximum(i * TH - 1, 0), 0, 0, 0)),
            pl.BlockSpec((1, W, B, C),
                         lambda i: (jnp.minimum((i + 1) * TH, H - 1), 0, 0, 0)),
            pl.BlockSpec((C, Cm), const2),
            pl.BlockSpec((1, Cm), const2),
            pl.BlockSpec((9, Cm, Cm), lambda i: (0, 0, 0)),
            pl.BlockSpec((1, Cm), const2),
            pl.BlockSpec((Cm, C), const2),
            pl.BlockSpec((1, C), const2),
        ],
        out_specs=pl.BlockSpec((TH, W, B, C), lambda i: (i, 0, 0, 0)),
        out_shape=jax.ShapeDtypeStruct((H, W, B, C), x_hwbc.dtype),
        scratch_shapes=[pltpu.VMEM((TH + 2, W + 2, B, Cm), jnp.bfloat16)],
        compiler_params=pltpu.CompilerParams(
            dimension_semantics=("parallel",),
            vmem_limit_bytes=vmem_limit),
    )(x_hwbc, x_hwbc, x_hwbc, w1_b, b1_2, w2_b, b2_2, w3_b, b3_2)
    return out_hwbc


def residual_bottleneck_block(x_nchw, params):
    """x_nchw: (B, C, H, W) float32 — matches the PyTorch module interface."""
    # TODO(synk): accept HWBC/NHWC activations directly from the producer to
    # drop these two full-tensor HBM transposes (use residual_bottleneck_block_hwbc).
    x_hwbc = jnp.transpose(x_nchw, (2, 3, 0, 1))               # (H, W, B, C)
    out_hwbc = residual_bottleneck_block_hwbc(x_hwbc, params)
    return jnp.transpose(out_hwbc, (2, 3, 0, 1))               # back to NCHW


def init_params(key, in_ch):
    """Deterministic synthetic parameters matching the PyTorch module shapes."""
    mid = in_ch // 2
    ks = jax.random.split(key, 6)
    w1 = jax.random.normal(ks[0], (in_ch, mid), jnp.float32) * 0.3       # conv1 (1x1)
    b1 = jax.random.normal(ks[1], (mid,), jnp.float32) * 0.1
    w2 = jax.random.normal(ks[2], (3, 3, mid, mid), jnp.float32) * 0.3   # (ky,kx,cin,cout)
    b2 = jax.random.normal(ks[3], (mid,), jnp.float32) * 0.1
    w3 = jax.random.normal(ks[4], (mid, in_ch), jnp.float32) * 0.3       # conv3 (1x1)
    b3 = jax.random.normal(ks[5], (in_ch,), jnp.float32) * 0.1
    return w1, b1, w2, b2, w3, b3


def reference(x_nchw, params):
    """Pure-JAX f32 reference mirroring the PyTorch forward (cross-correlation)."""
    w1, b1, w2, b2, w3, b3 = params

    def conv(x, w_oihw, b, pad):
        y = jax.lax.conv_general_dilated(
            x, w_oihw, window_strides=(1, 1),
            padding=[(pad, pad), (pad, pad)],
            dimension_numbers=("NCHW", "OIHW", "NCHW"))
        return y + b[None, :, None, None]

    h = jax.nn.relu(conv(x_nchw, jnp.transpose(w1)[:, :, None, None], b1, 0))
    h = jax.nn.relu(conv(h, jnp.transpose(w2, (3, 2, 0, 1)), b2, 1))
    h = conv(h, jnp.transpose(w3)[:, :, None, None], b3, 0)
    return h + x_nchw


if __name__ == "__main__":
    key = jax.random.PRNGKey(0)
    B, C, H, W = 2, 4, 16, 16
    k_x, k_p = jax.random.split(key)
    x = jax.random.normal(k_x, (B, C, H, W), jnp.float32)
    params = init_params(k_p, C)

    run = jax.jit(residual_bottleneck_block)
    out = jax.block_until_ready(run(x, params))

    ref = reference(x, params)
    assert out.shape == x.shape and out.dtype == x.dtype
    max_err = float(jnp.max(jnp.abs(out - ref)))
    # bf16 matmul operands (f32 accumulation) -> relaxed tolerance vs f32 reference.
    if not jnp.allclose(out, ref, atol=5e-2, rtol=5e-2):
        raise AssertionError(f"Pallas kernel mismatch vs reference, max abs err={max_err}")
    print("KERNEL_OK")
</pallas_src>

<mosaic_0001>
module attributes {stable_mosaic.version = 11 : i64} {
  func.func @_rbb_kernel(%arg0: i32, %arg1: memref<8x16x2x4xf32, #tpu.memory_space<vmem>>, %arg2: memref<1x16x2x4xf32, #tpu.memory_space<vmem>>, %arg3: memref<1x16x2x4xf32, #tpu.memory_space<vmem>>, %arg4: memref<4x2xbf16, #tpu.memory_space<vmem>>, %arg5: memref<1x2xf32, #tpu.memory_space<vmem>>, %arg6: memref<9x2x2xbf16, #tpu.memory_space<vmem>>, %arg7: memref<1x2xf32, #tpu.memory_space<vmem>>, %arg8: memref<2x4xbf16, #tpu.memory_space<vmem>>, %arg9: memref<1x4xf32, #tpu.memory_space<vmem>>, %arg10: memref<8x16x2x4xf32, #tpu.memory_space<vmem>>, %arg11: memref<10x18x2x2xbf16, #tpu.memory_space<vmem>>) attributes {dimension_semantics = [#tpu.dimension_semantics<parallel>], iteration_bounds = array<i64: 2>, scalar_prefetch = 0 : i64, scratch_operands = 1 : i64, tpu.core_type = #tpu.core_type<tc>, window_params = [{transform_indices = @transform_0, window_bounds = array<i64: 8, 16, 2, 4>}, {transform_indices = @transform_1, window_bounds = array<i64: 1, 16, 2, 4>}, {transform_indices = @transform_2, window_bounds = array<i64: 1, 16, 2, 4>}, {pipeline_mode = #tpu.pipeline_mode<synchronous>, transform_indices = @transform_3, window_bounds = array<i64: 4, 2>}, {pipeline_mode = #tpu.pipeline_mode<synchronous>, transform_indices = @transform_4, window_bounds = array<i64: 1, 2>}, {pipeline_mode = #tpu.pipeline_mode<synchronous>, transform_indices = @transform_5, window_bounds = array<i64: 9, 2, 2>}, {pipeline_mode = #tpu.pipeline_mode<synchronous>, transform_indices = @transform_6, window_bounds = array<i64: 1, 2>}, {pipeline_mode = #tpu.pipeline_mode<synchronous>, transform_indices = @transform_7, window_bounds = array<i64: 2, 4>}, {pipeline_mode = #tpu.pipeline_mode<synchronous>, transform_indices = @transform_8, window_bounds = array<i64: 1, 4>}, {transform_indices = @transform_9, window_bounds = array<i64: 8, 16, 2, 4>}]} {
    %c0 = arith.constant 0 : index
    %c0_0 = arith.constant 0 : index
    %0 = vector.load %arg4[%c0, %c0_0] : memref<4x2xbf16, #tpu.memory_space<vmem>>, vector<4x2xbf16>
    %c0_1 = arith.constant 0 : index
    %c0_2 = arith.constant 0 : index
    %1 = vector.load %arg5[%c0_1, %c0_2] : memref<1x2xf32, #tpu.memory_space<vmem>>, vector<1x2xf32>
    %c0_3 = arith.constant 0 : index
    %c0_4 = arith.constant 0 : index
    %c0_5 = arith.constant 0 : index
    %c0_6 = arith.constant 0 : index
    %2 = vector.load %arg1[%c0_3, %c0_4, %c0_5, %c0_6] : memref<8x16x2x4xf32, #tpu.memory_space<vmem>>, vector<8x16x2x4xf32>
    %3 = arith.truncf %2 : vector<8x16x2x4xf32> to vector<8x16x2x4xbf16>
    %4 = vector.shape_cast %3 : vector<8x16x2x4xbf16> to vector<256x4xbf16>
    %cst = arith.constant dense<0.000000e+00> : vector<256x2xf32>
    %5 = tpu.matmul %4, %0, %cst {dimension_numbers = #tpu.dot_dimension_numbers<[1], [0], [0], [1], [0, 0, 1, 1], [], []>} : vector<256x4xbf16>, vector<4x2xbf16>, vector<256x2xf32> -> vector<256x2xf32>
    %6 = vector.broadcast %1 : vector<1x2xf32> to vector<256x2xf32>
    %7 = arith.addf %5, %6 : vector<256x2xf32>
    %cst_7 = arith.constant 0.000000e+00 : f32
    %8 = vector.broadcast %cst_7 : f32 to vector<256x2xf32>
    %9 = arith.maximumf %7, %8 : vector<256x2xf32>
    %10 = arith.truncf %9 : vector<256x2xf32> to vector<256x2xbf16>
    %11 = vector.shape_cast %10 : vector<256x2xbf16> to vector<8x16x2x2xbf16>
    %c1 = arith.constant 1 : index
    %c1_8 = arith.constant 1 : index
    %c0_9 = arith.constant 0 : index
    %c0_10 = arith.constant 0 : index
    %12 = vector.load %arg11[%c1, %c1_8, %c0_9, %c0_10] : memref<10x18x2x2xbf16, #tpu.memory_space<vmem>>, vector<8x16x2x2xbf16>
    tpu.vector_store %arg11[%c1, %c1_8, %c0_9, %c0_10], %11 {strides = array<i32>} : memref<10x18x2x2xbf16, #tpu.memory_space<vmem>>, vector<8x16x2x2xbf16>,
    %c0_11 = arith.constant 0 : index
    %c0_12 = arith.constant 0 : index
    %c0_13 = arith.constant 0 : index
    %c0_14 = arith.constant 0 : index
    %13 = vector.load %arg2[%c0_11, %c0_12, %c0_13, %c0_14] : memref<1x16x2x4xf32, #tpu.memory_space<vmem>>, vector<1x16x2x4xf32>
    %14 = arith.truncf %13 : vector<1x16x2x4xf32> to vector<1x16x2x4xbf16>
    %15 = vector.shape_cast %14 : vector<1x16x2x4xbf16> to vector<32x4xbf16>
    %cst_15 = arith.constant dense<0.000000e+00> : vector<32x2xf32>
    %16 = tpu.matmul %15, %0, %cst_15 {dimension_numbers = #tpu.dot_dimension_numbers<[1], [0], [0], [1], [0, 0, 1, 1], [], []>} : vector<32x4xbf16>, vector<4x2xbf16>, vector<32x2xf32> -> vector<32x2xf32>
    %17 = vector.broadcast %1 : vector<1x2xf32> to vector<32x2xf32>
    %18 = arith.addf %16, %17 : vector<32x2xf32>
    %cst_16 = arith.constant 0.000000e+00 : f32
    %19 = vector.broadcast %cst_16 : f32 to vector<32x2xf32>
    %20 = arith.maximumf %18, %19 : vector<32x2xf32>
    %21 = arith.truncf %20 : vector<32x2xf32> to vector<32x2xbf16>
    %22 = vector.shape_cast %21 : vector<32x2xbf16> to vector<1x16x2x2xbf16>
    %c0_17 = arith.constant 0 : index
    %c1_18 = arith.constant 1 : index
    %c0_19 = arith.constant 0 : index
    %c0_20 = arith.constant 0 : index
    %23 = vector.load %arg11[%c0_17, %c1_18, %c0_19, %c0_20] : memref<10x18x2x2xbf16, #tpu.memory_space<vmem>>, vector<1x16x2x2xbf16>
    tpu.vector_store %arg11[%c0_17, %c1_18, %c0_19, %c0_20], %22 {strides = array<i32>} : memref<10x18x2x2xbf16, #tpu.memory_space<vmem>>, vector<1x16x2x2xbf16>,
    %c0_21 = arith.constant 0 : index
    %c0_22 = arith.constant 0 : index
    %c0_23 = arith.constant 0 : index
    %c0_24 = arith.constant 0 : index
    %24 = vector.load %arg3[%c0_21, %c0_22, %c0_23, %c0_24] : memref<1x16x2x4xf32, #tpu.memory_space<vmem>>, vector<1x16x2x4xf32>
    %25 = arith.truncf %24 : vector<1x16x2x4xf32> to vector<1x16x2x4xbf16>
    %26 = vector.shape_cast %25 : vector<1x16x2x4xbf16> to vector<32x4xbf16>
    %cst_25 = arith.constant dense<0.000000e+00> : vector<32x2xf32>
    %27 = tpu.matmul %26, %0, %cst_25 {dimension_numbers = #tpu.dot_dimension_numbers<[1], [0], [0], [1], [0, 0, 1, 1], [], []>} : vector<32x4xbf16>, vector<4x2xbf16>, vector<32x2xf32> -> vector<32x2xf32>
    %28 = vector.broadcast %1 : vector<1x2xf32> to vector<32x2xf32>
    %29 = arith.addf %27, %28 : vector<32x2xf32>
    %cst_26 = arith.constant 0.000000e+00 : f32
    %30 = vector.broadcast %cst_26 : f32 to vector<32x2xf32>
    %31 = arith.maximumf %29, %30 : vector<32x2xf32>
    %32 = arith.truncf %31 : vector<32x2xf32> to vector<32x2xbf16>
    %33 = vector.shape_cast %32 : vector<32x2xbf16> to vector<1x16x2x2xbf16>
    %c9 = arith.constant 9 : index
    %c1_27 = arith.constant 1 : index
    %c0_28 = arith.constant 0 : index
    %c0_29 = arith.constant 0 : index
    %34 = vector.load %arg11[%c9, %c1_27, %c0_28, %c0_29] : memref<10x18x2x2xbf16, #tpu.memory_space<vmem>>, vector<1x16x2x2xbf16>
    tpu.vector_store %arg11[%c9, %c1_27, %c0_28, %c0_29], %33 {strides = array<i32>} : memref<10x18x2x2xbf16, #tpu.memory_space<vmem>>, vector<1x16x2x2xbf16>,
    %c0_i32 = arith.constant 0 : i32
    %35 = arith.cmpi eq, %arg0, %c0_i32 : i32
    %36 = arith.extui %35 : i1 to i32
    %c0_i32_30 = arith.constant 0 : i32
    %37 = arith.cmpi ne, %36, %c0_i32_30 : i32
    scf.if %37 {
      %cst_121 = arith.constant 0.000000e+00 : bf16
      %112 = vector.broadcast %cst_121 : bf16 to vector<1x16x2x2xbf16>
      %c0_122 = arith.constant 0 : index
      %c1_123 = arith.constant 1 : index
      %c0_124 = arith.constant 0 : index
      %c0_125 = arith.constant 0 : index
      %113 = vector.load %arg11[%c0_122, %c1_123, %c0_124, %c0_125] : memref<10x18x2x2xbf16, #tpu.memory_space<vmem>>, vector<1x16x2x2xbf16>
      tpu.vector_store %arg11[%c0_122, %c1_123, %c0_124, %c0_125], %112 {strides = array<i32>} : memref<10x18x2x2xbf16, #tpu.memory_space<vmem>>, vector<1x16x2x2xbf16>,
    } else {
    }
    %c1_i32 = arith.constant 1 : i32
    %38 = arith.cmpi eq, %arg0, %c1_i32 : i32
    %39 = arith.extui %38 : i1 to i32
    %c0_i32_31 = arith.constant 0 : i32
    %40 = arith.cmpi ne, %39, %c0_i32_31 : i32
    scf.if %40 {
      %cst_121 = arith.constant 0.000000e+00 : bf16
      %112 = vector.broadcast %cst_121 : bf16 to vector<1x16x2x2xbf16>
      %c9_122 = arith.constant 9 : index
      %c1_123 = arith.constant 1 : index
      %c0_124 = arith.constant 0 : index
      %c0_125 = arith.constant 0 : index
      %113 = vector.load %arg11[%c9_122, %c1_123, %c0_124, %c0_125] : memref<10x18x2x2xbf16, #tpu.memory_space<vmem>>, vector<1x16x2x2xbf16>
      tpu.vector_store %arg11[%c9_122, %c1_123, %c0_124, %c0_125], %112 {strides = array<i32>} : memref<10x18x2x2xbf16, #tpu.memory_space<vmem>>, vector<1x16x2x2xbf16>,
    } else {
    }
    %cst_32 = arith.constant 0.000000e+00 : bf16
    %41 = vector.broadcast %cst_32 : bf16 to vector<10x1x2x2xbf16>
    %c0_33 = arith.constant 0 : index
    %c0_34 = arith.constant 0 : index
    %c0_35 = arith.constant 0 : index
    %c0_36 = arith.constant 0 : index
    %42 = vector.load %arg11[%c0_33, %c0_34, %c0_35, %c0_36] : memref<10x18x2x2xbf16, #tpu.memory_space<vmem>>, vector<10x1x2x2xbf16>
    tpu.vector_store %arg11[%c0_33, %c0_34, %c0_35, %c0_36], %41 {strides = array<i32>} : memref<10x18x2x2xbf16, #tpu.memory_space<vmem>>, vector<10x1x2x2xbf16>,
    %c0_37 = arith.constant 0 : index
    %c17 = arith.constant 17 : index
    %c0_38 = arith.constant 0 : index
    %c0_39 = arith.constant 0 : index
    %43 = vector.load %arg11[%c0_37, %c17, %c0_38, %c0_39] : memref<10x18x2x2xbf16, #tpu.memory_space<vmem>>, vector<10x1x2x2xbf16>
    tpu.vector_store %arg11[%c0_37, %c17, %c0_38, %c0_39], %41 {strides = array<i32>} : memref<10x18x2x2xbf16, #tpu.memory_space<vmem>>, vector<10x1x2x2xbf16>,
    %c0_40 = arith.constant 0 : index
    %c0_41 = arith.constant 0 : index
    %c0_42 = arith.constant 0 : index
    %c0_43 = arith.constant 0 : index
    %44 = vector.load %arg11[%c0_40, %c0_41, %c0_42, %c0_43] : memref<10x18x2x2xbf16, #tpu.memory_space<vmem>>, vector<8x16x2x2xbf16>
    %45 = vector.shape_cast %44 : vector<8x16x2x2xbf16> to vector<256x2xbf16>
    %c0_44 = arith.constant 0 : index
    %c0_45 = arith.constant 0 : index
    %c0_46 = arith.constant 0 : index
    %46 = vector.load %arg6[%c0_44, %c0_45, %c0_46] : memref<9x2x2xbf16, #tpu.memory_space<vmem>>, vector<1x2x2xbf16>
    %47 = vector.shape_cast %46 : vector<1x2x2xbf16> to vector<2x2xbf16>
    %cst_47 = arith.constant dense<0.000000e+00> : vector<256x2xf32>
    %48 = tpu.matmul %45, %47, %cst_47 {dimension_numbers = #tpu.dot_dimension_numbers<[1], [0], [0], [1], [0, 0, 1, 1], [], []>} : vector<256x2xbf16>, vector<2x2xbf16>, vector<256x2xf32> -> vector<256x2xf32>
    %c0_48 = arith.constant 0 : index
    %c1_49 = arith.constant 1 : index
    %c0_50 = arith.constant 0 : index
    %c0_51 = arith.constant 0 : index
    %49 = vector.load %arg11[%c0_48, %c1_49, %c0_50, %c0_51] : memref<10x18x2x2xbf16, #tpu.memory_space<vmem>>, vector<8x16x2x2xbf16>
    %50 = vector.shape_cast %49 : vector<8x16x2x2xbf16> to vector<256x2xbf16>
    %c1_52 = arith.constant 1 : index
    %c0_53 = arith.constant 0 : index
    %c0_54 = arith.constant 0 : index
    %51 = vector.load %arg6[%c1_52, %c0_53, %c0_54] : memref<9x2x2xbf16, #tpu.memory_space<vmem>>, vector<1x2x2xbf16>
    %52 = vector.shape_cast %51 : vector<1x2x2xbf16> to vector<2x2xbf16>
    %cst_55 = arith.constant dense<0.000000e+00> : vector<256x2xf32>
    %53 = tpu.matmul %50, %52, %cst_55 {dimension_numbers = #tpu.dot_dimension_numbers<[1], [0], [0], [1], [0, 0, 1, 1], [], []>} : vector<256x2xbf16>, vector<2x2xbf16>, vector<256x2xf32> -> vector<256x2xf32>
    %54 = arith.addf %48, %53 : vector<256x2xf32>
    %c0_56 = arith.constant 0 : index
    %c2 = arith.constant 2 : index
    %c0_57 = arith.constant 0 : index
    %c0_58 = arith.constant 0 : index
    %55 = vector.load %arg11[%c0_56, %c2, %c0_57, %c0_58] : memref<10x18x2x2xbf16, #tpu.memory_space<vmem>>, vector<8x16x2x2xbf16>
    %56 = vector.shape_cast %55 : vector<8x16x2x2xbf16> to vector<256x2xbf16>
    %c2_59 = arith.constant 2 : index
    %c0_60 = arith.constant 0 : index
    %c0_61 = arith.constant 0 : index
    %57 = vector.load %arg6[%c2_59, %c0_60, %c0_61] : memref<9x2x2xbf16, #tpu.memory_space<vmem>>, vector<1x2x2xbf16>
    %58 = vector.shape_cast %57 : vector<1x2x2xbf16> to vector<2x2xbf16>
    %cst_62 = arith.constant dense<0.000000e+00> : vector<256x2xf32>
    %59 = tpu.matmul %56, %58, %cst_62 {dimension_numbers = #tpu.dot_dimension_numbers<[1], [0], [0], [1], [0, 0, 1, 1], [], []>} : vector<256x2xbf16>, vector<2x2xbf16>, vector<256x2xf32> -> vector<256x2xf32>
    %60 = arith.addf %54, %59 : vector<256x2xf32>
    %c1_63 = arith.constant 1 : index
    %c0_64 = arith.constant 0 : index
    %c0_65 = arith.constant 0 : index
    %c0_66 = arith.constant 0 : index
    %61 = vector.load %arg11[%c1_63, %c0_64, %c0_65, %c0_66] : memref<10x18x2x2xbf16, #tpu.memory_space<vmem>>, vector<8x16x2x2xbf16>
    %62 = vector.shape_cast %61 : vector<8x16x2x2xbf16> to vector<256x2xbf16>
    %c3 = arith.constant 3 : index
    %c0_67 = arith.constant 0 : index
    %c0_68 = arith.constant 0 : index
    %63 = vector.load %arg6[%c3, %c0_67, %c0_68] : memref<9x2x2xbf16, #tpu.memory_space<vmem>>, vector<1x2x2xbf16>
    %64 = vector.shape_cast %63 : vector<1x2x2xbf16> to vector<2x2xbf16>
    %cst_69 = arith.constant dense<0.000000e+00> : vector<256x2xf32>
    %65 = tpu.matmul %62, %64, %cst_69 {dimension_numbers = #tpu.dot_dimension_numbers<[1], [0], [0], [1], [0, 0, 1, 1], [], []>} : vector<256x2xbf16>, vector<2x2xbf16>, vector<256x2xf32> -> vector<256x2xf32>
    %66 = arith.addf %60, %65 : vector<256x2xf32>
    %c1_70 = arith.constant 1 : index
    %c1_71 = arith.constant 1 : index
    %c0_72 = arith.constant 0 : index
    %c0_73 = arith.constant 0 : index
    %67 = vector.load %arg11[%c1_70, %c1_71, %c0_72, %c0_73] : memref<10x18x2x2xbf16, #tpu.memory_space<vmem>>, vector<8x16x2x2xbf16>
    %68 = vector.shape_cast %67 : vector<8x16x2x2xbf16> to vector<256x2xbf16>
    %c4 = arith.constant 4 : index
    %c0_74 = arith.constant 0 : index
    %c0_75 = arith.constant 0 : index
    %69 = vector.load %arg6[%c4, %c0_74, %c0_75] : memref<9x2x2xbf16, #tpu.memory_space<vmem>>, vector<1x2x2xbf16>
    %70 = vector.shape_cast %69 : vector<1x2x2xbf16> to vector<2x2xbf16>
    %cst_76 = arith.constant dense<0.000000e+00> : vector<256x2xf32>
    %71 = tpu.matmul %68, %70, %cst_76 {dimension_numbers = #tpu.dot_dimension_numbers<[1], [0], [0], [1], [0, 0, 1, 1], [], []>} : vector<256x2xbf16>, vector<2x2xbf16>, vector<256x2xf32> -> vector<256x2xf32>
    %72 = arith.addf %66, %71 : vector<256x2xf32>
    %c1_77 = arith.constant 1 : index
    %c2_78 = arith.constant 2 : index
    %c0_79 = arith.constant 0 : index
    %c0_80 = arith.constant 0 : index
    %73 = vector.load %arg11[%c1_77, %c2_78, %c0_79, %c0_80] : memref<10x18x2x2xbf16, #tpu.memory_space<vmem>>, vector<8x16x2x2xbf16>
    %74 = vector.shape_cast %73 : vector<8x16x2x2xbf16> to vector<256x2xbf16>
    %c5 = arith.constant 5 : index
    %c0_81 = arith.constant 0 : index
    %c0_82 = arith.constant 0 : index
    %75 = vector.load %arg6[%c5, %c0_81, %c0_82] : memref<9x2x2xbf16, #tpu.memory_space<vmem>>, vector<1x2x2xbf16>
    %76 = vector.shape_cast %75 : vector<1x2x2xbf16> to vector<2x2xbf16>
    %cst_83 = arith.constant dense<0.000000e+00> : vector<256x2xf32>
    %77 = tpu.matmul %74, %76, %cst_83 {dimension_numbers = #tpu.dot_dimension_numbers<[1], [0], [0], [1], [0, 0, 1, 1], [], []>} : vector<256x2xbf16>, vector<2x2xbf16>, vector<256x2xf32> -> vector<256x2xf32>
    %78 = arith.addf %72, %77 : vector<256x2xf32>
    %c2_84 = arith.constant 2 : index
    %c0_85 = arith.constant 0 : index
    %c0_86 = arith.constant 0 : index
    %c0_87 = arith.constant 0 : index
    %79 = vector.load %arg11[%c2_84, %c0_85, %c0_86, %c0_87] : memref<10x18x2x2xbf16, #tpu.memory_space<vmem>>, vector<8x16x2x2xbf16>
    %80 = vector.shape_cast %79 : vector<8x16x2x2xbf16> to vector<256x2xbf16>
    %c6 = arith.constant 6 : index
    %c0_88 = arith.constant 0 : index
    %c0_89 = arith.constant 0 : index
    %81 = vector.load %arg6[%c6, %c0_88, %c0_89] : memref<9x2x2xbf16, #tpu.memory_space<vmem>>, vector<1x2x2xbf16>
    %82 = vector.shape_cast %81 : vector<1x2x2xbf16> to vector<2x2xbf16>
    %cst_90 = arith.constant dense<0.000000e+00> : vector<256x2xf32>
    %83 = tpu.matmul %80, %82, %cst_90 {dimension_numbers = #tpu.dot_dimension_numbers<[1], [0], [0], [1], [0, 0, 1, 1], [], []>} : vector<256x2xbf16>, vector<2x2xbf16>, vector<256x2xf32> -> vector<256x2xf32>
    %84 = arith.addf %78, %83 : vector<256x2xf32>
    %c2_91 = arith.constant 2 : index
    %c1_92 = arith.constant 1 : index
    %c0_93 = arith.constant 0 : index
    %c0_94 = arith.constant 0 : index
    %85 = vector.load %arg11[%c2_91, %c1_92, %c0_93, %c0_94] : memref<10x18x2x2xbf16, #tpu.memory_space<vmem>>, vector<8x16x2x2xbf16>
    %86 = vector.shape_cast %85 : vector<8x16x2x2xbf16> to vector<256x2xbf16>
    %c7 = arith.constant 7 : index
    %c0_95 = arith.constant 0 : index
    %c0_96 = arith.constant 0 : index
    %87 = vector.load %arg6[%c7, %c0_95, %c0_96] : memref<9x2x2xbf16, #tpu.memory_space<vmem>>, vector<1x2x2xbf16>
    %88 = vector.shape_cast %87 : vector<1x2x2xbf16> to vector<2x2xbf16>
    %cst_97 = arith.constant dense<0.000000e+00> : vector<256x2xf32>
    %89 = tpu.matmul %86, %88, %cst_97 {dimension_numbers = #tpu.dot_dimension_numbers<[1], [0], [0], [1], [0, 0, 1, 1], [], []>} : vector<256x2xbf16>, vector<2x2xbf16>, vector<256x2xf32> -> vector<256x2xf32>
    %90 = arith.addf %84, %89 : vector<256x2xf32>
    %c2_98 = arith.constant 2 : index
    %c2_99 = arith.constant 2 : index
    %c0_100 = arith.constant 0 : index
    %c0_101 = arith.constant 0 : index
    %91 = vector.load %arg11[%c2_98, %c2_99, %c0_100, %c0_101] : memref<10x18x2x2xbf16, #tpu.memory_space<vmem>>, vector<8x16x2x2xbf16>
    %92 = vector.shape_cast %91 : vector<8x16x2x2xbf16> to vector<256x2xbf16>
    %c8 = arith.constant 8 : index
    %c0_102 = arith.constant 0 : index
    %c0_103 = arith.constant 0 : index
    %93 = vector.load %arg6[%c8, %c0_102, %c0_103] : memref<9x2x2xbf16, #tpu.memory_space<vmem>>, vector<1x2x2xbf16>
    %94 = vector.shape_cast %93 : vector<1x2x2xbf16> to vector<2x2xbf16>
    %cst_104 = arith.constant dense<0.000000e+00> : vector<256x2xf32>
    %95 = tpu.matmul %92, %94, %cst_104 {dimension_numbers = #tpu.dot_dimension_numbers<[1], [0], [0], [1], [0, 0, 1, 1], [], []>} : vector<256x2xbf16>, vector<2x2xbf16>, vector<256x2xf32> -> vector<256x2xf32>
    %96 = arith.addf %90, %95 : vector<256x2xf32>
    %c0_105 = arith.constant 0 : index
    %c0_106 = arith.constant 0 : index
    %97 = vector.load %arg7[%c0_105, %c0_106] : memref<1x2xf32, #tpu.memory_space<vmem>>, vector<1x2xf32>
    %98 = vector.broadcast %97 : vector<1x2xf32> to vector<256x2xf32>
    %99 = arith.addf %96, %98 : vector<256x2xf32>
    %cst_107 = arith.constant 0.000000e+00 : f32
    %100 = vector.broadcast %cst_107 : f32 to vector<256x2xf32>
    %101 = arith.maximumf %99, %100 : vector<256x2xf32>
    %102 = arith.truncf %101 : vector<256x2xf32> to vector<256x2xbf16>
    %c0_108 = arith.constant 0 : index
    %c0_109 = arith.constant 0 : index
    %103 = vector.load %arg8[%c0_108, %c0_109] : memref<2x4xbf16, #tpu.memory_space<vmem>>, vector<2x4xbf16>
    %cst_110 = arith.constant dense<0.000000e+00> : vector<256x4xf32>
    %104 = tpu.matmul %102, %103, %cst_110 {dimension_numbers = #tpu.dot_dimension_numbers<[1], [0], [0], [1], [0, 0, 1, 1], [], []>} : vector<256x2xbf16>, vector<2x4xbf16>, vector<256x4xf32> -> vector<256x4xf32>
    %c0_111 = arith.constant 0 : index
    %c0_112 = arith.constant 0 : index
    %105 = vector.load %arg9[%c0_111, %c0_112] : memref<1x4xf32, #tpu.memory_space<vmem>>, vector<1x4xf32>
    %106 = vector.broadcast %105 : vector<1x4xf32> to vector<256x4xf32>
    %107 = arith.addf %104, %106 : vector<256x4xf32>
    %108 = vector.shape_cast %107 : vector<256x4xf32> to vector<8x16x2x4xf32>
    %c0_113 = arith.constant 0 : index
    %c0_114 = arith.constant 0 : index
    %c0_115 = arith.constant 0 : index
    %c0_116 = arith.constant 0 : index
    %109 = vector.load %arg1[%c0_113, %c0_114, %c0_115, %c0_116] : memref<8x16x2x4xf32, #tpu.memory_space<vmem>>, vector<8x16x2x4xf32>
    %110 = arith.addf %108, %109 : vector<8x16x2x4xf32>
    %c0_117 = arith.constant 0 : index
    %c0_118 = arith.constant 0 : index
    %c0_119 = arith.constant 0 : index
    %c0_120 = arith.constant 0 : index
    %111 = vector.load %arg10[%c0_117, %c0_118, %c0_119, %c0_120] : memref<8x16x2x4xf32, #tpu.memory_space<vmem>>, vector<8x16x2x4xf32>
    tpu.vector_store %arg10[%c0_117, %c0_118, %c0_119, %c0_120], %110 {strides = array<i32>} : memref<8x16x2x4xf32, #tpu.memory_space<vmem>>, vector<8x16x2x4xf32>,
    return
  }
  func.func @transform_0(%arg0: i32) -> (i32, i32, i32, i32) {
    %c0_i32 = arith.constant 0 : i32
    %c0_i32_0 = arith.constant 0 : i32
    %c0_i32_1 = arith.constant 0 : i32
    %c0_i32_2 = arith.constant 0 : i32
    return %arg0, %c0_i32, %c0_i32_0, %c0_i32_1 : i32, i32, i32, i32
  }
  func.func @transform_1(%arg0: i32) -> (i32, i32, i32, i32) {
    %c8_i32 = arith.constant 8 : i32
    %0 = arith.muli %arg0, %c8_i32 : i32
    %c1_i32 = arith.constant 1 : i32
    %1 = arith.subi %0, %c1_i32 : i32
    %c0_i32 = arith.constant 0 : i32
    %2 = arith.maxsi %1, %c0_i32 : i32
    %c0_i32_0 = arith.constant 0 : i32
    %c0_i32_1 = arith.constant 0 : i32
    %c0_i32_2 = arith.constant 0 : i32
    %c0_i32_3 = arith.constant 0 : i32
    return %2, %c0_i32_0, %c0_i32_1, %c0_i32_2 : i32, i32, i32, i32
  }
  func.func @transform_2(%arg0: i32) -> (i32, i32, i32, i32) {
    %c1_i32 = arith.constant 1 : i32
    %0 = arith.addi %arg0, %c1_i32 : i32
    %c8_i32 = arith.constant 8 : i32
    %1 = arith.muli %0, %c8_i32 : i32
    %c15_i32 = arith.constant 15 : i32
    %2 = arith.minsi %1, %c15_i32 : i32
    %c0_i32 = arith.constant 0 : i32
    %c0_i32_0 = arith.constant 0 : i32
    %c0_i32_1 = arith.constant 0 : i32
    %c0_i32_2 = arith.constant 0 : i32
    return %2, %c0_i32, %c0_i32_0, %c0_i32_1 : i32, i32, i32, i32
  }
  func.func @transform_3(%arg0: i32) -> (i32, i32) {
    %c0_i32 = arith.constant 0 : i32
    %c0_i32_0 = arith.constant 0 : i32
    %c0_i32_1 = arith.constant 0 : i32
    return %c0_i32, %c0_i32_0 : i32, i32
  }
  func.func @transform_4(%arg0: i32) -> (i32, i32) {
    %c0_i32 = arith.constant 0 : i32
    %c0_i32_0 = arith.constant 0 : i32
    %c0_i32_1 = arith.constant 0 : i32
    return %c0_i32, %c0_i32_0 : i32, i32
  }
  func.func @transform_5(%arg0: i32) -> (i32, i32, i32) {
    %c0_i32 = arith.constant 0 : i32
    %c0_i32_0 = arith.constant 0 : i32
    %c0_i32_1 = arith.constant 0 : i32
    %c0_i32_2 = arith.constant 0 : i32
    return %c0_i32, %c0_i32_0, %c0_i32_1 : i32, i32, i32
  }
  func.func @transform_6(%arg0: i32) -> (i32, i32) {
    %c0_i32 = arith.constant 0 : i32
    %c0_i32_0 = arith.constant 0 : i32
    %c0_i32_1 = arith.constant 0 : i32
    return %c0_i32, %c0_i32_0 : i32, i32
  }
  func.func @transform_7(%arg0: i32) -> (i32, i32) {
    %c0_i32 = arith.constant 0 : i32
    %c0_i32_0 = arith.constant 0 : i32
    %c0_i32_1 = arith.constant 0 : i32
    return %c0_i32, %c0_i32_0 : i32, i32
  }
  func.func @transform_8(%arg0: i32) -> (i32, i32) {
    %c0_i32 = arith.constant 0 : i32
    %c0_i32_0 = arith.constant 0 : i32
    %c0_i32_1 = arith.constant 0 : i32
    return %c0_i32, %c0_i32_0 : i32, i32
  }
  func.func @transform_9(%arg0: i32) -> (i32, i32, i32, i32) {
    %c0_i32 = arith.constant 0 : i32
    %c0_i32_0 = arith.constant 0 : i32
    %c0_i32_1 = arith.constant 0 : i32
    %c0_i32_2 = arith.constant 0 : i32
    return %arg0, %c0_i32, %c0_i32_0, %c0_i32_1 : i32, i32, i32, i32
  }
}

</mosaic_0001>

<bundles_post_ra>
// kernel: residual_bottleneck_block.1
= control target key start
LH: loop header
LB: loop body
LE: loop exit
PB: predicated region body
PF: predicated region fallthrough
CT: control target
= control target key end

     0   :  { %s17684_s30 = smov 0   ;;  %s20980_s0 = inlined_call_operand.vmem [shape: f32[16,16,2,4], index: 0, kind: input, shape index: {}, may-alias: {0,1,2}]   ;;  %s20981_s1 = inlined_call_operand.vmem [shape: f32[16,16,2,4], index: 1, kind: input, shape index: {}, may-alias: {0,1,2}]   ;;  %s20982_s2 = inlined_call_operand.vmem [shape: f32[16,16,2,4], index: 2, kind: input, shape index: {}, may-alias: {0,1,2}]   ;;  %s20983_s3 = inlined_call_operand.vmem [shape: bf16[4,2], index: 3, kind: input, shape index: {}]   ;;  %s20984_s4 = inlined_call_operand.vmem [shape: f32[1,2], index: 4, kind: input, shape index: {}]   ;;  %s20985_s5 = inlined_call_operand.vmem [shape: bf16[9,2,2], index: 5, kind: input, shape index: {}]   ;;  %s20986_s6 = inlined_call_operand.vmem [shape: f32[1,2], index: 6, kind: input, shape index: {}]   ;;  %s20987_s7 = inlined_call_operand.vmem [shape: bf16[2,4], index: 7, kind: input, shape index: {}]   ;;  %s20988_s8 = inlined_call_operand.vmem [shape: f32[1,4], index: 8, kind: input, shape index: {}]   ;;  %s20989_s9 = inlined_call_operand.vmem [shape: f32[16,16,2,4], index: 9, kind: output, shape index: {}]  }
   0x1 LB: > { %s17690_s10 = sadd.s32 4294967295, %s17627_s30   ;;  %p16680_p0 = scmp.ge.s32.totalorder %s17627_s30, 1  ;;  %s17627_s30 = sphi %s17684_s30, %s19_s30  }
   0x2   : > { %p341_p1 = scmp.lt.s32.totalorder %s17627_s30, 3 }
   0x4   : > { %p342_p2 = pnand %p16680_p0, %p341_p1 }
   0x6   : > { %345 = sbr.rel (%p342_p2) target bundleno = 1316 (0x524), region = 56 }
   0xb   : > { %v17697_v0 = vld [vmem:[%s20983_s3] sm:$0x3]  ;;  %vm1663_vm0 = vcmask 1041408   ;;  %s17700_s13 = sshll.u32 %s17690_s10, 3  ;;  %v837_v1 = vlaneseq  ;;  %v17629_v3 = vmov 1966171168  }
   0xc   : > { %17593 = vmatprep.subr.msk.bf16.mxu1 %vm1663_vm0, %v17697_v0  ;;  %17592 = vmatprep.subr.msk.bf16.mxu0 %vm1663_vm0, %v17697_v0  ;;  %v17708_v2 = vsel %vm1663_vm0, %v17697_v0, 0  ;;  %p398_p3 = scmp.lt.s32.totalorder %s17700_s13, 15  ;;  %v835_v4 = vunpack.c.l.s4 %v17629_v3  ;;  %vm1614_vm1 = vcmask 31744   ;;  %s17840_s22 = sadd.s32 4294967295, %s17700_s13  ;;  %vm2805_vm2 = vcmask 8192  }
   0xd   : > { %17591 = vmatpush3.bf16.msra.mxu1 %v17708_v2  ;;  %17205 = vmatpush3.bf16.msra.mxu0 %v17708_v2  ;;  %v17713_v5 = vshrl.u32 %v837_v1, 7  ;;  %p406_p4 = scmp.gt.s32.totalorder %s17840_s22, 0  ;;  %p16686_p5 = scmp.lt.s32.totalorder %s17840_s22, 15 }
   0xe   : > { %s399_s14 = scalar_select %p398_p3, %s17700_s13, 15  ;;  %v836_v6 = vunpack.c.0.s8 %v835_v4  ;;  %17594 = vmatprep.subr.msk.bf16.mxu1 %vm1663_vm0, %v17697_v0 }
   0xf   : > { %20991 = vst [vmem:[#allocation3_spill] sm:$0xff] %v17713_v5  ;;  %s407_s23 = scalar_select %p406_p4, %s17840_s22, 0 }
  0x10   : > { %s17003_s15 = sshll.u32 %s399_s14, 5  ;;  %v17729_v7 = vsub.s32 %v836_v6, %v17713_v5  ;;  %s17008_s28 = sadd.s32 8, %s17700_s13 }
  0x11   : > { %s17721_s18 = scalar_lea.vmem %s20980_s0, %s17003_s15  ;;  %s17726_s21 = scalar_lea.vmem %s20989_s9, %s17003_s15 }
  0x12   : > { %v440_v8 = vld [vmem:[%s17721_s18] sm:$0x3]  ;;  %v441_v9 = vld [vmem:[%s17721_s18 + $0x2] sm:$0x3]  ;;  %v442_v10 = vld [vmem:[%s17721_s18 + $0x4] sm:$0x3] }
  0x13   : > { %v443_v11 = vld [vmem:[%s17721_s18 + $0x6] sm:$0x3]  ;;  %v444_v12 = vld [vmem:[%s17721_s18 + $0x8] sm:$0x3]  ;;  %v445_v13 = vld [vmem:[%s17721_s18 + $0xa] sm:$0x3]  ;;  %v16703_v14 = vpack.c.bf16 %v441_v9, %v440_v8 }
  0x14   : > { %v446_v15 = vld [vmem:[%s17721_s18 + $0xc] sm:$0x3]  ;;  %v447_v16 = vld [vmem:[%s17721_s18 + $0xe] sm:$0x3]  ;;  %v16704_v17 = vpack.c.bf16 %v443_v11, %v442_v10  ;;  %v16705_v18 = vpack.c.bf16 %v445_v13, %v444_v12  ;;  %v520_v19 = vld [vmem:[%s17721_s18 + $0xa0] sm:$0x3] }
  0x15   : > { %v16706_v20 = vpack.c.bf16 %v447_v16, %v446_v15  ;;  %v840_v21 = vrot.slane %v16703_v14, %v17729_v7  ;;  %v521_v22 = vld [vmem:[%s17721_s18 + $0xa2] sm:$0x3]  ;;  %v522_v23 = vld [vmem:[%s17721_s18 + $0xa4] sm:$0x3]  ;;  %v523_v24 = vld [vmem:[%s17721_s18 + $0xa6] sm:$0x3] }
  0x16   : > { %v847_v25 = vrot.slane %v16704_v17, %v17729_v7  ;;  %v854_v26 = vrot.slane %v16705_v18, %v17729_v7  ;;  %v524_v27 = vld [vmem:[%s17721_s18 + $0xa8] sm:$0x3]  ;;  %v525_v28 = vld [vmem:[%s17721_s18 + $0xaa] sm:$0x3]  ;;  %v526_v29 = vld [vmem:[%s17721_s18 + $0xac] sm:$0x3]  ;;  %v16743_v30 = vpack.c.bf16 %v521_v22, %v520_v19  ;;  %v16744_v31 = vpack.c.bf16 %v523_v24, %v522_v23 }
  0x17   : > { %v861_v32 = vrot.slane %v16706_v20, %v17729_v7  ;;  %v527_v33 = vld [vmem:[%s17721_s18 + $0xae] sm:$0x3]  ;;  %v16745_v34 = vpack.c.bf16 %v525_v28, %v524_v27  ;;  %v448_v35 = vld [vmem:[%s17721_s18 + $0x10] sm:$0x3]  ;;  %v449_v36 = vld [vmem:[%s17721_s18 + $0x12] sm:$0x3] }
  0x18   : > { %v862_v37 = vcombine.low %v840_v21, %v847_v25  ;;  %v16746_v38 = vpack.c.bf16 %v527_v33, %v526_v29  ;;  %v1330_v39 = vrot.slane %v16743_v30, %v17729_v7  ;;  %v1337_v40 = vrot.slane %v16744_v31, %v17729_v7  ;;  %v450_v41 = vld [vmem:[%s17721_s18 + $0x14] sm:$0x3]  ;;  %v451_v42 = vld [vmem:[%s17721_s18 + $0x16] sm:$0x3]  ;;  %v452_v43 = vld [vmem:[%s17721_s18 + $0x18] sm:$0x3] }
  0x19   : > { %v863_v44 = vcombine.low %v854_v26, %v861_v32  ;;  %v1344_v45 = vrot.slane %v16745_v34, %v17729_v7  ;;  %v453_v46 = vld [vmem:[%s17721_s18 + $0x1a] sm:$0x3]  ;;  %v454_v47 = vld [vmem:[%s17721_s18 + $0x1c] sm:$0x3]  ;;  %v455_v48 = vld [vmem:[%s17721_s18 + $0x1e] sm:$0x3]  ;;  %v16707_v49 = vpack.c.bf16 %v449_v36, %v448_v35  ;;  %v16708_v50 = vpack.c.bf16 %v451_v42, %v450_v41 }
  0x1a   : > { %v870_v51 = vrot.slane %v862_v37, %v17729_v7  ;;  %v1351_v52 = vrot.slane %v16746_v38, %v17729_v7  ;;  %v1352_v53 = vcombine.low %v1330_v39, %v1337_v40  ;;  %v16709_v54 = vpack.c.bf16 %v453_v46, %v452_v43  ;;  %v528_v55 = vld [vmem:[%s17721_s18 + $0xb0] sm:$0x3]  ;;  %v529_v56 = vld [vmem:[%s17721_s18 + $0xb2] sm:$0x3]  ;;  %v530_v57 = vld [vmem:[%s17721_s18 + $0xb4] sm:$0x3] }
  0x1b   : > { %v877_v58 = vrot.slane %v863_v44, %v17729_v7  ;;  %v16710_v59 = vpack.c.bf16 %v455_v48, %v454_v47  ;;  %v889_v60 = vrot.slane %v16707_v49, %v17729_v7  ;;  %v896_v61 = vrot.slane %v16708_v50, %v17729_v7  ;;  %v531_v62 = vld [vmem:[%s17721_s18 + $0xb6] sm:$0x3]  ;;  %v532_v63 = vld [vmem:[%s17721_s18 + $0xb8] sm:$0x3]  ;;  %v533_v1 = vld [vmem:[%s17721_s18 + $0xba] sm:$0x3] }
  0x1c   : > { %v1353_v3 = vcombine.low %v1344_v45, %v1351_v52  ;;  %v1360_v4 = vrot.slane %v1352_v53, %v17729_v7  ;;  %v903_v6 = vrot.slane %v16709_v54, %v17729_v7  ;;  %v534_v8 = vld [vmem:[%s17721_s18 + $0xbc] sm:$0x3]  ;;  %v535_v9 = vld [vmem:[%s17721_s18 + $0xbe] sm:$0x3]  ;;  %v16747_v10 = vpack.c.bf16 %v529_v56, %v528_v55  ;;  %v456_v11 = vld [vmem:[%s17721_s18 + $0x20] sm:$0x3] }
  0x1d   : > { %v878_v12 = vcombine.low %v870_v51, %v877_v58  ;;  %v910_v13 = vrot.slane %v16710_v59, %v17729_v7  ;;  %v911_v14 = vcombine.low %v889_v60, %v896_v61  ;;  %v16748_v15 = vpack.c.bf16 %v531_v62, %v530_v57  ;;  %v457_v16 = vld [vmem:[%s17721_s18 + $0x22] sm:$0x3]  ;;  %v458_v17 = vld [vmem:[%s17721_s18 + $0x24] sm:$0x3]  ;;  %v459_v18 = vld [vmem:[%s17721_s18 + $0x26] sm:$0x3] }
  0x1e   : > { %v1367_v19 = vrot.slane %v1353_v3, %v17729_v7  ;;  %v16749_v20 = vpack.c.bf16 %v533_v1, %v532_v63  ;;  %v16750_v21 = vpack.c.bf16 %v535_v9, %v534_v8  ;;  %v1379_v22 = vrot.slane %v16747_v10, %v17729_v7  ;;  %v460_v23 = vld [vmem:[%s17721_s18 + $0x28] sm:$0x3]  ;;  %v461_v24 = vld [vmem:[%s17721_s18 + $0x2a] sm:$0x3]  ;;  %v462_v25 = vld [vmem:[%s17721_s18 + $0x2c] sm:$0x3] }
  0x1f   : > { %17206 = vmatprep.mubr.msk.bf16.mxu0 %vm1614_vm1, %v878_v12  ;;  %v912_v26 = vcombine.low %v903_v6, %v910_v13  ;;  %v919_v27 = vrot.slane %v911_v14, %v17729_v7  ;;  %v1386_v28 = vrot.slane %v16748_v15, %v17729_v7  ;;  %v463_v29 = vld [vmem:[%s17721_s18 + $0x2e] sm:$0x3]  ;;  %v16711_v30 = vpack.c.bf16 %v457_v16, %v456_v11  ;;  %v536_v31 = vld [vmem:[%s17721_s18 + $0xc0] sm:$0x3]  ;;  %v537_v32 = vld [vmem:[%s17721_s18 + $0xc2] sm:$0x3] }
  0x20   : > { %v1368_v33 = vcombine.low %v1360_v4, %v1367_v19  ;;  %v1393_v34 = vrot.slane %v16749_v20, %v17729_v7  ;;  %v1400_v35 = vrot.slane %v16750_v21, %v17729_v7  ;;  %v16712_v36 = vpack.c.bf16 %v459_v18, %v458_v17  ;;  %v538_v37 = vld [vmem:[%s17721_s18 + $0xc4] sm:$0x3]  ;;  %v539_v38 = vld [vmem:[%s17721_s18 + $0xc6] sm:$0x3]  ;;  %v540_v43 = vld [vmem:[%s17721_s18 + $0xc8] sm:$0x3] }
  0x21   : > { %v926_v39 = vrot.slane %v912_v26, %v17729_v7  ;;  %v1401_v40 = vcombine.low %v1379_v22, %v1386_v28  ;;  %v16713_v41 = vpack.c.bf16 %v461_v24, %v460_v23  ;;  %v16714_v42 = vpack.c.bf16 %v463_v29, %v462_v25  ;;  %v541_v44 = vld [vmem:[%s17721_s18 + $0xca] sm:$0x3]  ;;  %v542_v45 = vld [vmem:[%s17721_s18 + $0xcc] sm:$0x3]  ;;  %v543_v49 = vld [vmem:[%s17721_s18 + $0xce] sm:$0x3] }
  0x22   : > { %17226 = vmatprep.mubr.msk.bf16.mxu1 %vm1614_vm1, %v1368_v33  ;;  %v1402_v46 = vcombine.low %v1393_v34, %v1400_v35  ;;  %v938_v47 = vrot.slane %v16711_v30, %v17729_v7  ;;  %v945_v48 = vrot.slane %v16712_v36, %v17729_v7  ;;  %v16751_v50 = vpack.c.bf16 %v537_v32, %v536_v31  ;;  %v464_v51 = vld [vmem:[%s17721_s18 + $0x30] sm:$0x3]  ;;  %v465_v52 = vld [vmem:[%s17721_s18 + $0x32] sm:$0x3]  ;;  %v466_v57 = vld [vmem:[%s17721_s18 + $0x34] sm:$0x3] }
  0x23   : > { %v927_v53 = vcombine.low %v919_v27, %v926_v39  ;;  %v1409_v54 = vrot.slane %v1401_v40, %v17729_v7  ;;  %v952_v55 = vrot.slane %v16713_v41, %v17729_v7  ;;  %v959_v56 = vrot.slane %v16714_v42, %v17729_v7  ;;  %v467_v58 = vld [vmem:[%s17721_s18 + $0x36] sm:$0x3]  ;;  %v468_v63 = vld [vmem:[%s17721_s18 + $0x38] sm:$0x3]  ;;  %v469_v1 = vld [vmem:[%s17721_s18 + $0x3a] sm:$0x3] }
  0x24   : > { %v1416_v59 = vrot.slane %v1402_v46, %v17729_v7  ;;  %v960_v60 = vcombine.low %v938_v47, %v945_v48  ;;  %v16752_v61 = vpack.c.bf16 %v539_v38, %v538_v37  ;;  %v16753_v62 = vpack.c.bf16 %v541_v44, %v540_v43  ;;  %v470_v3 = vld [vmem:[%s17721_s18 + $0x3c] sm:$0x3]  ;;  %v471_v9 = vld [vmem:[%s17721_s18 + $0x3e] sm:$0x3]  ;;  %v544_v11 = vld [vmem:[%s17721_s18 + $0xd0] sm:$0x3] }
  0x25   : > { %17207 = vmatmul.mubr.msk.bf16.vlgmr.msra.gmra.mxu0 %vm1614_vm1, %v927_v53  ;;  %v961_v4 = vcombine.low %v952_v55, %v959_v56  ;;  %v16754_v6 = vpack.c.bf16 %v543_v49, %v542_v45  ;;  %v1428_v8 = vrot.slane %v16751_v50, %v17729_v7  ;;  %v16715_v10 = vpack.c.bf16 %v465_v52, %v464_v51  ;;  %v545_v12 = vld [vmem:[%s17721_s18 + $0xd2] sm:$0x3]  ;;  %v546_v17 = vld [vmem:[%s17721_s18 + $0xd4] sm:$0x3]  ;;  %v547_v22 = vld [vmem:[%s17721_s18 + $0xd6] sm:$0x3] }
  0x26   : > { %v1417_v13 = vcombine.low %v1409_v54, %v1416_v59  ;;  %v968_v14 = vrot.slane %v960_v60, %v17729_v7  ;;  %v1435_v15 = vrot.slane %v16752_v61, %v17729_v7  ;;  %v1442_v16 = vrot.slane %v16753_v62, %v17729_v7  ;;  %v548_v23 = vld [vmem:[%s17721_s18 + $0xd8] sm:$0x3]  ;;  %v549_v24 = vld [vmem:[%s17721_s18 + $0xda] sm:$0x3]  ;;  %v550_v28 = vld [vmem:[%s17721_s18 + $0xdc] sm:$0x3] }
  0x27   : > { %v975_v18 = vrot.slane %v961_v4, %v17729_v7  ;;  %v1449_v19 = vrot.slane %v16754_v6, %v17729_v7  ;;  %v16716_v20 = vpack.c.bf16 %v467_v58, %v466_v57  ;;  %v16717_v21 = vpack.c.bf16 %v469_v1, %v468_v63  ;;  %v551_v29 = vld [vmem:[%s17721_s18 + $0xde] sm:$0x3]  ;;  %v472_v35 = vld [vmem:[%s17721_s18 + $0x40] sm:$0x3]  ;;  %v473_v36 = vld [vmem:[%s17721_s18 + $0x42] sm:$0x3] }
  0x28   : > { %17227 = vmatmul.mubr.msk.bf16.vlgmr.msra.gmra.mxu1 %vm1614_vm1, %v1417_v13  ;;  %v1450_v25 = vcombine.low %v1428_v8, %v1435_v15  ;;  %v16718_v26 = vpack.c.bf16 %v471_v9, %v470_v3  ;;  %v987_v27 = vrot.slane %v16715_v10, %v17729_v7  ;;  %v16755_v30 = vpack.c.bf16 %v545_v12, %v544_v11  ;;  %v474_v41 = vld [vmem:[%s17721_s18 + $0x44] sm:$0x3]  ;;  %v475_v42 = vld [vmem:[%s17721_s18 + $0x46] sm:$0x3]  ;;  %v476_v43 = vld [vmem:[%s17721_s18 + $0x48] sm:$0x3] }
  0x29   : > { %17239 = vmatpush3.bf16.msra.mxu1 %v17708_v2  ;;  %v976_v31 = vcombine.low %v968_v14, %v975_v18  ;;  %v1451_v32 = vcombine.low %v1442_v16, %v1449_v19  ;;  %v994_v33 = vrot.slane %v16716_v20, %v17729_v7  ;;  %v1001_v34 = vrot.slane %v16717_v21, %v17729_v7  ;;  %v477_v48 = vld [vmem:[%s17721_s18 + $0x4a] sm:$0x3]  ;;  %v478_v49 = vld [vmem:[%s17721_s18 + $0x4c] sm:$0x3]  ;;  %v479_v50 = vld [vmem:[%s17721_s18 + $0x4e] sm:$0x3] }
  0x2a   : > { %v1458_v37 = vrot.slane %v1450_v25, %v17729_v7  ;;  %v1008_v38 = vrot.slane %v16718_v26, %v17729_v7  ;;  %v16756_v39 = vpack.c.bf16 %v547_v22, %v546_v17  ;;  %v16757_v40 = vpack.c.bf16 %v549_v24, %v548_v23  ;;  %17595 = vmatprep.subr.msk.bf16.mxu1 %vm1663_vm0, %v17697_v0  ;;  %v552_v54 = vld [vmem:[%s17721_s18 + $0xe0] sm:$0x3]  ;;  %v553_v55 = vld [vmem:[%s17721_s18 + $0xe2] sm:$0x3]  ;;  %v554_v60 = vld [vmem:[%s17721_s18 + $0xe4] sm:$0x3] }
  0x2b   : > { %17210 = vmatprep.mubr.msk.bf16.mxu0 %vm1614_vm1, %v976_v31  ;;  %v1465_v44 = vrot.slane %v1451_v32, %v17729_v7  ;;  %v1009_v45 = vcombine.low %v987_v27, %v994_v33  ;;  %v16758_v46 = vpack.c.bf16 %v551_v29, %v550_v28  ;;  %v1477_v47 = vrot.slane %v16755_v30, %v17729_v7  ;;  %v555_v61 = vld [vmem:[%s17721_s18 + $0xe6] sm:$0x3]  ;;  %v556_v4 = vld [vmem:[%s17721_s18 + $0xe8] sm:$0x3]  ;;  %v557_v6 = vld [vmem:[%s17721_s18 + $0xea] sm:$0x3] }
  0x2c   : > { %v1010_v51 = vcombine.low %v1001_v34, %v1008_v38  ;;  %v1484_v52 = vrot.slane %v16756_v39, %v17729_v7  ;;  %v1491_v53 = vrot.slane %v16757_v40, %v17729_v7  ;;  %v16719_v0 = vpack.c.bf16 %v473_v36, %v472_v35  ;;  %v558_v8 = vld [vmem:[%s17721_s18 + $0xec] sm:$0x3]  ;;  %v559_v12 = vld [vmem:[%s17721_s18 + $0xee] sm:$0x3]  ;;  %v480_v14 = vld [vmem:[%s17721_s18 + $0x50] sm:$0x3] }
  0x2d   : > { %v1466_v56 = vcombine.low %v1458_v37, %v1465_v44  ;;  %v1017_v57 = vrot.slane %v1009_v45, %v17729_v7  ;;  %v1498_v58 = vrot.slane %v16758_v46, %v17729_v7  ;;  %v16720_v59 = vpack.c.bf16 %v475_v42, %v474_v41  ;;  %v481_v15 = vld [vmem:[%s17721_s18 + $0x52] sm:$0x3]  ;;  %v482_v20 = vld [vmem:[%s17721_s18 + $0x54] sm:$0x3]  ;;  %v483_v21 = vld [vmem:[%s17721_s18 + $0x56] sm:$0x3] }
  0x2e   : > { %v1024_v62 = vrot.slane %v1010_v51, %v17729_v7  ;;  %v1499_v63 = vcombine.low %v1477_v47, %v1484_v52  ;;  %v16721_v1 = vpack.c.bf16 %v477_v48, %v476_v43  ;;  %v16722_v3 = vpack.c.bf16 %v479_v50, %v478_v49  ;;  %v484_v26 = vld [vmem:[%s17721_s18 + $0x58] sm:$0x3]  ;;  %v485_v27 = vld [vmem:[%s17721_s18 + $0x5a] sm:$0x3]  ;;  %v486_v28 = vld [vmem:[%s17721_s18 + $0x5c] sm:$0x3] }
  0x2f   : > { %17230 = vmatprep.mubr.msk.bf16.mxu1 %vm1614_vm1, %v1466_v56  ;;  %v1500_v9 = vcombine.low %v1491_v53, %v1498_v58  ;;  %v1036_v10 = vrot.slane %v16719_v0, %v17729_v7  ;;  %v1043_v11 = vrot.slane %v16720_v59, %v17729_v7  ;;  %v16759_v13 = vpack.c.bf16 %v553_v55, %v552_v54  ;;  %v487_v32 = vld [vmem:[%s17721_s18 + $0x5e] sm:$0x3]  ;;  %v560_v34 = vld [vmem:[%s17721_s18 + $0xf0] sm:$0x3]  ;;  %v561_v35 = vld [vmem:[%s17721_s18 + $0xf2] sm:$0x3] }
  0x30   : > { %v1025_v16 = vcombine.low %v1017_v57, %v1024_v62  ;;  %v1507_v17 = vrot.slane %v1499_v63, %v17729_v7  ;;  %v1050_v18 = vrot.slane %v16721_v1, %v17729_v7  ;;  %v1057_v19 = vrot.slane %v16722_v3, %v17729_v7  ;;  %v562_v40 = vld [vmem:[%s17721_s18 + $0xf4] sm:$0x3]  ;;  %v563_v41 = vld [vmem:[%s17721_s18 + $0xf6] sm:$0x3]  ;;  %v564_v46 = vld [vmem:[%s17721_s18 + $0xf8] sm:$0x3] }
  0x31   : > { %v1514_v22 = vrot.slane %v1500_v9, %v17729_v7  ;;  %v1058_v23 = vcombine.low %v1036_v10, %v1043_v11  ;;  %v16760_v24 = vpack.c.bf16 %v555_v61, %v554_v60  ;;  %v16761_v25 = vpack.c.bf16 %v557_v6, %v556_v4  ;;  %v565_v47 = vld [vmem:[%s17721_s18 + $0xfa] sm:$0x3]  ;;  %s21271_s23 = smov (!%p16686_p5, %s407_s23), 15  ;;  %v566_v51 = vld [vmem:[%s17721_s18 + $0xfc] sm:$0x3]  ;;  %p17948_p6 = scmp.lt.s32.totalorder %s17008_s28, 15 }
  0x32   : > { %17211 = vmatmul.mubr.msk.bf16.gmra.mxu0 %vm1614_vm1, %v1025_v16  ;;  %v1059_v29 = vcombine.low %v1050_v18, %v1057_v19  ;;  %v16762_v30 = vpack.c.bf16 %v559_v12, %v558_v8  ;;  %v1526_v31 = vrot.slane %v16759_v13, %v17729_v7  ;;  %v16723_v33 = vpack.c.bf16 %v481_v15, %v480_v14  ;;  %v567_v52 = vld [vmem:[%s17721_s18 + $0xfe] sm:$0x3]  ;;  %v488_v57 = vld [vmem:[%s17721_s18 + $0x60] sm:$0x3]  ;;  %v489_v58 = vld [vmem:[%s17721_s18 + $0x62] sm:$0x3] }
  0x33   : > { %v1515_v36 = vcombine.low %v1507_v17, %v1514_v22  ;;  %v1066_v37 = vrot.slane %v1058_v23, %v17729_v7  ;;  %v1533_v38 = vrot.slane %v16760_v24, %v17729_v7  ;;  %v1540_v39 = vrot.slane %v16761_v25, %v17729_v7  ;;  %s17006_s24 = sshll.u32 %s21271_s23, 5  ;;  %v490_v63 = vld [vmem:[%s17721_s18 + $0x64] sm:$0x3]  ;;  %v491_v1 = vld [vmem:[%s17721_s18 + $0x66] sm:$0x3]  ;;  %s21273_s28 = smov (!%p17948_p6, %s17008_s28), 15 }
  0x34   : > { %v1073_v42 = vrot.slane %v1059_v29, %v17729_v7  ;;  %v1547_v43 = vrot.slane %v16762_v30, %v17729_v7  ;;  %v16724_v44 = vpack.c.bf16 %v483_v21, %v482_v20  ;;  %v16725_v45 = vpack.c.bf16 %v485_v27, %v484_v26  ;;  %v492_v3 = vld [vmem:[%s17721_s18 + $0x68] sm:$0x3]  ;;  %s17919_s27 = scalar_lea.vmem %s20981_s1, %s17006_s24  ;;  %v493_v10 = vld [vmem:[%s17721_s18 + $0x6a] sm:$0x3]  ;;  %v494_v11 = vld [vmem:[%s17721_s18 + $0x6c] sm:$0x3] }
  0x35   : > { %17231 = vmatmul.mubr.msk.bf16.gmra.mxu1 %vm1614_vm1, %v1515_v36  ;;  %v1548_v48 = vcombine.low %v1526_v31, %v1533_v38  ;;  %v16726_v49 = vpack.c.bf16 %v487_v32, %v486_v28  ;;  %v1085_v50 = vrot.slane %v16723_v33, %v17729_v7  ;;  %v16763_v53 = vpack.c.bf16 %v561_v35, %v560_v34  ;;  %v495_v12 = vld [vmem:[%s17721_s18 + $0x6e] sm:$0x3]  ;;  %v2934_v17 = vld [vmem:[%s17919_s27] sm:$0x3]  ;;  %v2935_v18 = vld [vmem:[%s17919_s27 + $0x2] sm:$0x3] }
  0x36   : > { %v1074_v0 = vcombine.low %v1066_v37, %v1073_v42  ;;  %v1549_v54 = vcombine.low %v1540_v39, %v1547_v43  ;;  %v1092_v55 = vrot.slane %v16724_v44, %v17729_v7  ;;  %v1099_v56 = vrot.slane %v16725_v45, %v17729_v7  ;;  %v2936_v23 = vld [vmem:[%s17919_s27 + $0x4] sm:$0x3]  ;;  %v496_v24 = vld [vmem:[%s17721_s18 + $0x70] sm:$0x3]  ;;  %v497_v25 = vld [vmem:[%s17721_s18 + $0x72] sm:$0x3] }
  0x37   : > { %v1556_v59 = vrot.slane %v1548_v48, %v17729_v7  ;;  %v1106_v60 = vrot.slane %v16726_v49, %v17729_v7  ;;  %v16764_v61 = vpack.c.bf16 %v563_v41, %v562_v40  ;;  %v16765_v62 = vpack.c.bf16 %v565_v47, %v564_v46  ;;  %v2937_v30 = vld [vmem:[%s17919_s27 + $0x6] sm:$0x3]  ;;  %v2938_v31 = vld [vmem:[%s17919_s27 + $0x8] sm:$0x3]  ;;  %v2939_v32 = vld [vmem:[%s17919_s27 + $0xa] sm:$0x3] }
  0x38   : > { %17214 = vmatprep.mubr.msk.bf16.mxu0 %vm1614_vm1, %v1074_v0  ;;  %v1563_v4 = vrot.slane %v1549_v54, %v17729_v7  ;;  %v1107_v6 = vcombine.low %v1085_v50, %v1092_v55  ;;  %v16766_v8 = vpack.c.bf16 %v567_v52, %v566_v51  ;;  %v1575_v9 = vrot.slane %v16763_v53, %v17729_v7  ;;  %v2940_v36 = vld [vmem:[%s17919_s27 + $0xc] sm:$0x3]  ;;  %v2941_v37 = vld [vmem:[%s17919_s27 + $0xe] sm:$0x3]  ;;  %v498_v43 = vld [vmem:[%s17721_s18 + $0x74] sm:$0x3] }
  0x39   : > { %v1108_v13 = vcombine.low %v1099_v56, %v1106_v60  ;;  %v1582_v14 = vrot.slane %v16764_v61, %v17729_v7  ;;  %v1589_v15 = vrot.slane %v16765_v62, %v17729_v7  ;;  %v16727_v16 = vpack.c.bf16 %v489_v58, %v488_v57  ;;  %v499_v44 = vld [vmem:[%s17721_s18 + $0x76] sm:$0x3]  ;;  %v500_v49 = vld [vmem:[%s17721_s18 + $0x78] sm:$0x3]  ;;  %v501_v50 = vld [vmem:[%s17721_s18 + $0x7a] sm:$0x3] }
  0x3a   : > { %v1564_v19 = vcombine.low %v1556_v59, %v1563_v4  ;;  %v1115_v20 = vrot.slane %v1107_v6, %v17729_v7  ;;  %v1596_v21 = vrot.slane %v16766_v8, %v17729_v7  ;;  %v16728_v22 = vpack.c.bf16 %v491_v1, %v490_v63  ;;  %v502_v51 = vld [vmem:[%s17721_s18 + $0x7c] sm:$0x3]  ;;  %v503_v54 = vld [vmem:[%s17721_s18 + $0x7e] sm:$0x3]  ;;  %v2942_v56 = vld [vmem:[%s17919_s27 + $0x10] sm:$0x3] }
  0x3b   : > { %v1122_v26 = vrot.slane %v1108_v13, %v17729_v7  ;;  %v1597_v27 = vcombine.low %v1575_v9, %v1582_v14  ;;  %v16729_v28 = vpack.c.bf16 %v493_v10, %v492_v3  ;;  %v16730_v29 = vpack.c.bf16 %v495_v12, %v494_v11  ;;  %v2943_v57 = vld [vmem:[%s17919_s27 + $0x12] sm:$0x3]  ;;  %v2944_v62 = vld [vmem:[%s17919_s27 + $0x14] sm:$0x3]  ;;  %v2945_v6 = vld [vmem:[%s17919_s27 + $0x16] sm:$0x3] }
  0x3c   : > { %17234 = vmatprep.mubr.msk.bf16.mxu1 %vm1614_vm1, %v1564_v19  ;;  %v1598_v33 = vcombine.low %v1589_v15, %v1596_v21  ;;  %v1134_v34 = vrot.slane %v16727_v16, %v17729_v7  ;;  %v1141_v35 = vrot.slane %v16728_v22, %v17729_v7  ;;  %v16799_v38 = vpack.c.bf16 %v2935_v18, %v2934_v17  ;;  %v2946_v8 = vld [vmem:[%s17919_s27 + $0x18] sm:$0x3]  ;;  %v2947_v9 = vld [vmem:[%s17919_s27 + $0x1a] sm:$0x3]  ;;  %v2948_v13 = vld [vmem:[%s17919_s27 + $0x1c] sm:$0x3] }
  0x3d   : > { %v1123_v39 = vcombine.low %v1115_v20, %v1122_v26  ;;  %v1605_v40 = vrot.slane %v1597_v27, %v17729_v7  ;;  %v1148_v41 = vrot.slane %v16729_v28, %v17729_v7  ;;  %v1155_v42 = vrot.slane %v16730_v29, %v17729_v7  ;;  %v2949_v14 = vld [vmem:[%s17919_s27 + $0x1e] sm:$0x3]  ;;  %s21275_s28 = smov (!%p17948_p6, %s21273_s28), 15  ;;  %v504_v20 = vld [vmem:[%s17721_s18 + $0x80] sm:$0x3]  ;;  %p16823_p7 = scmp.ne.s32.totalorder %s17690_s10, 0 }
  0x3e   : > { %v1612_v45 = vrot.slane %v1598_v33, %v17729_v7  ;;  %v1156_v46 = vcombine.low %v1134_v34, %v1141_v35  ;;  %v16800_v47 = vpack.c.bf16 %v2937_v30, %v2936_v23  ;;  %v16801_v48 = vpack.c.bf16 %v2939_v32, %v2938_v31  ;;  %v505_v21 = vld [vmem:[%s17721_s18 + $0x82] sm:$0x3]  ;;  %v506_v22 = vld [vmem:[%s17721_s18 + $0x84] sm:$0x3]  ;;  %v507_v27 = vld [vmem:[%s17721_s18 + $0x86] sm:$0x3] }
  0x3f   : > { %17215 = vmatmul.mubr.msk.bf16.gmra.mxu0 %vm1614_vm1, %v1123_v39  ;;  %v1157_v52 = vcombine.low %v1148_v41, %v1155_v42  ;;  %v16802_v53 = vpack.c.bf16 %v2941_v37, %v2940_v36  ;;  %v2992_v0 = vrot.slane %v16799_v38, %v17729_v7  ;;  %v16731_v55 = vpack.c.bf16 %v497_v25, %v496_v24  ;;  %v508_v28 = vld [vmem:[%s17721_s18 + $0x88] sm:$0x3]  ;;  %s17009_s11 = sshll.u32 %s21275_s28, 5  ;;  %v509_v33 = vld [vmem:[%s17721_s18 + $0x8a] sm:$0x3] }
  0x40   : > { %v1613_v58 = vcombine.low %v1605_v40, %v1612_v45  ;;  %v1164_v59 = vrot.slane %v1156_v46, %v17729_v7  ;;  %v2999_v60 = vrot.slane %v16800_v47, %v17729_v7  ;;  %v3006_v61 = vrot.slane %v16801_v48, %v17729_v7  ;;  %v510_v34 = vld [vmem:[%s17721_s18 + $0x8c] sm:$0x3]  ;;  %v511_v35 = vld [vmem:[%s17721_s18 + $0x8e] sm:$0x3]  ;;  %s18006_s14 = scalar_lea.vmem %s20982_s2, %s17009_s11  ;;  %v512_v47 = vld [vmem:[%s17721_s18 + $0x90] sm:$0x3] }
  0x41   : > { %v1171_v63 = vrot.slane %v1157_v52, %v17729_v7  ;;  %v3013_v1 = vrot.slane %v16802_v53, %v17729_v7  ;;  %v16732_v3 = vpack.c.bf16 %v499_v44, %v498_v43  ;;  %v16733_v4 = vpack.c.bf16 %v501_v50, %v500_v49  ;;  %v3274_v40 = vld [vmem:[%s18006_s14] sm:$0x3]  ;;  %v3275_v41 = vld [vmem:[%s18006_s14 + $0x2] sm:$0x3]  ;;  %v3276_v46 = vld [vmem:[%s18006_s14 + $0x4] sm:$0x3] }
  0x42   : > { %17235 = vmatmul.mubr.msk.bf16.gmra.mxu1 %vm1614_vm1, %v1613_v58  ;;  %v3014_v10 = vcombine.low %v2992_v0, %v2999_v60  ;;  %v16734_v11 = vpack.c.bf16 %v503_v54, %v502_v51  ;;  %v1183_v12 = vrot.slane %v16731_v55, %v17729_v7  ;;  %v16803_v15 = vpack.c.bf16 %v2943_v57, %v2942_v56  ;;  %v3277_v52 = vld [vmem:[%s18006_s14 + $0x6] sm:$0x3]  ;;  %v3278_v53 = vld [vmem:[%s18006_s14 + $0x8] sm:$0x3]  ;;  %v3279_v0 = vld [vmem:[%s18006_s14 + $0xa] sm:$0x3] }
  0x43   : > { %v1172_v16 = vcombine.low %v1164_v59, %v1171_v63  ;;  %v3015_v17 = vcombine.low %v3006_v61, %v3013_v1  ;;  %v1190_v18 = vrot.slane %v16732_v3, %v17729_v7  ;;  %v1197_v19 = vrot.slane %v16733_v4, %v17729_v7  ;;  %v3280_v57 = vld [vmem:[%s18006_s14 + $0xc] sm:$0x3]  ;;  %v3281_v58 = vld [vmem:[%s18006_s14 + $0xe] sm:$0x3]  ;;  %v513_v60 = vld [vmem:[%s17721_s18 + $0x92] sm:$0x3] }
  0x44   : > { %v3022_v23 = vrot.slane %v3014_v10, %v17729_v7  ;;  %v1204_v24 = vrot.slane %v16734_v11, %v17729_v7  ;;  %v16804_v25 = vpack.c.bf16 %v2945_v6, %v2944_v62  ;;  %v16805_v26 = vpack.c.bf16 %v2947_v9, %v2946_v8  ;;  %v514_v3 = vld [vmem:[%s17721_s18 + $0x94] sm:$0x3]  ;;  %v515_v4 = vld [vmem:[%s17721_s18 + $0x96] sm:$0x3]  ;;  %v516_v11 = vld [vmem:[%s17721_s18 + $0x98] sm:$0x3] }
  0x45   : > { %17218 = vmatprep.mubr.msk.bf16.mxu0 %vm1614_vm1, %v1172_v16  ;;  %v3029_v29 = vrot.slane %v3015_v17, %v17729_v7  ;;  %v1205_v30 = vcombine.low %v1183_v12, %v1190_v18  ;;  %v16806_v31 = vpack.c.bf16 %v2949_v14, %v2948_v13  ;;  %v3041_v32 = vrot.slane %v16803_v15, %v17729_v7  ;;  %v517_v12 = vld [vmem:[%s17721_s18 + $0x9a] sm:$0x3]  ;;  %v518_v13 = vld [vmem:[%s17721_s18 + $0x9c] sm:$0x3]  ;;  %v519_v17 = vld [vmem:[%s17721_s18 + $0x9e] sm:$0x3] }
  0x46   : > { %v1206_v36 = vcombine.low %v1197_v19, %v1204_v24  ;;  %v3048_v37 = vrot.slane %v16804_v25, %v17729_v7  ;;  %v3055_v38 = vrot.slane %v16805_v26, %v17729_v7  ;;  %v16735_v39 = vpack.c.bf16 %v505_v21, %v504_v20  ;;  %v3282_v19 = vld [vmem:[%s18006_s14 + $0x10] sm:$0x3]  ;;  %v3283_v20 = vld [vmem:[%s18006_s14 + $0x12] sm:$0x3]  ;;  %v3284_v25 = vld [vmem:[%s18006_s14 + $0x14] sm:$0x3] }
  0x47   : > { %v3030_v42 = vcombine.low %v3022_v23, %v3029_v29  ;;  %v1213_v43 = vrot.slane %v1205_v30, %v17729_v7  ;;  %v3062_v44 = vrot.slane %v16806_v31, %v17729_v7  ;;  %v16736_v45 = vpack.c.bf16 %v507_v27, %v506_v22  ;;  %v3285_v30 = vld [vmem:[%s18006_s14 + $0x16] sm:$0x3]  ;;  %v3286_v31 = vld [vmem:[%s18006_s14 + $0x18] sm:$0x3] }
  0x48   : > { %v1220_v48 = vrot.slane %v1206_v36, %v17729_v7  ;;  %v3063_v49 = vcombine.low %v3041_v32, %v3048_v37  ;;  %v16737_v50 = vpack.c.bf16 %v509_v33, %v508_v28  ;;  %v16738_v51 = vpack.c.bf16 %v511_v35, %v510_v34  ;;  %v3287_v32 = vld [vmem:[%s18006_s14 + $0x1a] sm:$0x3]  ;;  %v3288_v36 = vld [vmem:[%s18006_s14 + $0x1c] sm:$0x3]  ;;  %v3289_v37 = vld [vmem:[%s18006_s14 + $0x1e] sm:$0x3] }
  0x49   : > { %17240 = vmatprep.mubr.msk.bf16.mxu1 %vm1614_vm1, %v3030_v42  ;;  %v3064_v54 = vcombine.low %v3055_v38, %v3062_v44  ;;  %v1232_v55 = vrot.slane %v16735_v39, %v17729_v7  ;;  %v1239_v56 = vrot.slane %v16736_v45, %v17729_v7  ;;  %v16811_v59 = vpack.c.bf16 %v3275_v41, %v3274_v40 }
  0x4a   : > { %v1221_v61 = vcombine.low %v1213_v43, %v1220_v48  ;;  %v3071_v62 = vrot.slane %v3063_v49, %v17729_v7  ;;  %v1246_v63 = vrot.slane %v16737_v50, %v17729_v7  ;;  %v1253_v1 = vrot.slane %v16738_v51, %v17729_v7 }
  0x4b   : > { %v3078_v6 = vrot.slane %v3064_v54, %v17729_v7  ;;  %v1254_v8 = vcombine.low %v1232_v55, %v1239_v56  ;;  %v16812_v9 = vpack.c.bf16 %v3277_v52, %v3276_v46  ;;  %v16813_v10 = vpack.c.bf16 %v3279_v0, %v3278_v53 }
  0x4c   : > { %17219 = vmatmul.mubr.msk.bf16.gmra.mxu0 %vm1614_vm1, %v1221_v61  ;;  %v1255_v14 = vcombine.low %v1246_v63, %v1253_v1  ;;  %v16814_v15 = vpack.c.bf16 %v3281_v58, %v3280_v57  ;;  %v3332_v16 = vrot.slane %v16811_v59, %v17729_v7  ;;  %v16739_v18 = vpack.c.bf16 %v513_v60, %v512_v47  ;;  %v18074_v63 = vld [vmem:[%s20984_s4] ss:$0 sm:$0xff] }
  0x4d   : > { %v3079_v21 = vcombine.low %v3071_v62, %v3078_v6  ;;  %v1262_v22 = vrot.slane %v1254_v8, %v17729_v7  ;;  %v3339_v23 = vrot.slane %v16812_v9, %v17729_v7  ;;  %v3346_v24 = vrot.slane %v16813_v10, %v17729_v7 }
  0x4e   : > { %v1269_v26 = vrot.slane %v1255_v14, %v17729_v7  ;;  %v3353_v27 = vrot.slane %v16814_v15, %v17729_v7  ;;  %v16740_v28 = vpack.c.bf16 %v515_v4, %v514_v3  ;;  %v16741_v29 = vpack.c.bf16 %v517_v12, %v516_v11 }
  0x4f   : > { %17241 = vmatmul.mubr.msk.bf16.vlgmr.msra.gmra.mxu1 %vm1614_vm1, %v3079_v21  ;;  %v3354_v33 = vcombine.low %v3332_v16, %v3339_v23  ;;  %v16742_v34 = vpack.c.bf16 %v519_v17, %v518_v13  ;;  %v1281_v35 = vrot.slane %v16739_v18, %v17729_v7  ;;  %v16815_v38 = vpack.c.bf16 %v3283_v20, %v3282_v19 }
  0x50   : > { %17245 = vmatpush3.bf16.msra.mxu1 %v17708_v2  ;;  %v1270_v39 = vcombine.low %v1262_v22, %v1269_v26  ;;  %v3355_v40 = vcombine.low %v3346_v24, %v3353_v27  ;;  %v1288_v41 = vrot.slane %v16740_v28, %v17729_v7  ;;  %v1295_v42 = vrot.slane %v16741_v29, %v17729_v7 }
  0x51   : > { %v3362_v43 = vrot.slane %v3354_v33, %v17729_v7  ;;  %v1302_v44 = vrot.slane %v16742_v34, %v17729_v7  ;;  %v16816_v45 = vpack.c.bf16 %v3285_v30, %v3284_v25  ;;  %v16817_v46 = vpack.c.bf16 %v3287_v32, %v3286_v31 }
  0x52   : > { %17222 = vmatprep.mubr.msk.bf16.mxu0 %vm1614_vm1, %v1270_v39  ;;  %v3369_v47 = vrot.slane %v3355_v40, %v17729_v7  ;;  %v1303_v48 = vcombine.low %v1281_v35, %v1288_v41  ;;  %v16818_v49 = vpack.c.bf16 %v3289_v37, %v3288_v36  ;;  %v3381_v2 = vrot.slane %v16815_v38, %v17729_v7 }
  0x53   : > { %v1304_v50 = vcombine.low %v1295_v42, %v1302_v44  ;;  %v3388_v51 = vrot.slane %v16816_v45, %v17729_v7  ;;  %v3395_v52 = vrot.slane %v16817_v46, %v17729_v7 }
  0x54   : > { %v3370_v53 = vcombine.low %v3362_v43, %v3369_v47  ;;  %v1311_v0 = vrot.slane %v1303_v48, %v17729_v7  ;;  %v3402_v54 = vrot.slane %v16818_v49, %v17729_v7 }
  0x55   : > { %v1318_v55 = vrot.slane %v1304_v50, %v17729_v7  ;;  %v3403_v56 = vcombine.low %v3381_v2, %v3388_v51 }
  0x56   : > { %17246 = vmatprep.mubr.msk.bf16.mxu1 %vm1614_vm1, %v3370_v53  ;;  %v3404_v57 = vcombine.low %v3395_v52, %v3402_v54 }
  0x57   : > { %v1319_v58 = vcombine.low %v1311_v0, %v1318_v55  ;;  %v3411_v59 = vrot.slane %v3403_v56, %v17729_v7 }
  0x58   : > { %v3418_v60 = vrot.slane %v3404_v57, %v17729_v7 }
  0x59   : > { %17223 = vmatmul.mubr.msk.bf16.gmra.mxu0 %vm1614_vm1, %v1319_v58 }
  0x5a   : > { %v3419_v61 = vcombine.low %v3411_v59, %v3418_v60 }
  0x5c   : > { %17247 = vmatmul.mubr.msk.bf16.vlgmr.msra.gmra.mxu1 %vm1614_vm1, %v3419_v61 }
  0xe5   : > { %v17208_v62 = vpop.f32.mrf.mxu0 }
  0xe6   : > { %v1710_v3 = vadd.f32 %v17208_v62, %v18074_v63 }
  0xe7   : > { %v1701_v1 = vpop.f32.mrf.mxu0 }
  0xe8   : > { %v17228_v4 = vpop.f32.mrf.mxu1  ;;  %v1702_v8 = vadd.f32 %v18074_v63, %v1701_v1  ;;  %v1830_v13 = vmax.f32 %v1710_v3, 0.0 }
  0xe9   : > { %v17209_v6 = vpop.f32.mrf.mxu0  ;;  %v1790_v11 = vadd.f32 %v17228_v4, %v18074_v63 }
  0xea   : > { %v1781_v9 = vpop.f32.mrf.mxu1  ;;  %v1713_v10 = vadd.f32 %v17209_v6, %v18074_v63  ;;  %v1828_v19 = vmax.f32 %v1702_v8, 0.0 }
  0xeb   : > { %v1704_v12 = vpop.f32.mrf.mxu0  ;;  %v18082_v17 = vadd.f32 %v18074_v63, %v1781_v9  ;;  %v1850_v24 = vmax.f32 %v1790_v11, 0.0 }
  0xec   : > { %v1831_v14 = vmax.f32 %v1713_v10, 0.0  ;;  %v17229_v15 = vpop.f32.mrf.mxu1  ;;  %v1705_v16 = vadd.f32 %v18074_v63, %v1704_v12 }
  0xed   : > { %v1793_v18 = vadd.f32 %v17229_v15, %v18074_v63  ;;  %v1848_v31 = vmax.f32 %v18082_v17, 0.0 }
  0xee   : > { %v1861_v20 = vpack.c.bf16 %v1831_v14, %v1830_v13  ;;  %v16784_v21 = vpack.c.bf16 %v1831_v14, %v1831_v14  ;;  %v1829_v22 = vmax.f32 %v1705_v16, 0.0  ;;  %v1784_v23 = vpop.f32.mrf.mxu1 }
  0xef   : > { %v1851_v25 = vmax.f32 %v1793_v18, 0.0  ;;  %v1785_v26 = vadd.f32 %v18074_v63, %v1784_v23 }
  0xf0   : > { %v1948_v27 = vrot.slane %v1861_v20, %v17729_v7  ;;  %v1955_v28 = vrot.slane %v16784_v21, %v17729_v7  ;;  %v1860_v29 = vpack.c.bf16 %v1829_v22, %v1828_v19  ;;  %v16783_v30 = vpack.c.bf16 %v1829_v22, %v1829_v22 }
  0xf1   : > { %v1871_v32 = vpack.c.bf16 %v1851_v25, %v1850_v24  ;;  %v16794_v33 = vpack.c.bf16 %v1851_v25, %v1851_v25  ;;  %v18089_v34 = vmax.f32 %v1785_v26, 0.0 }
  0xf2   : > { %v1956_v35 = vcombine.high %v1948_v27, %v1948_v27  ;;  %v1957_v36 = vcombine.high %v1955_v28, %v1955_v28  ;;  %v1964_v37 = vrot.slane %v1948_v27, %v17729_v7  ;;  %v1971_v38 = vrot.slane %v1955_v28, %v17729_v7  ;;  %v17212_v39 = vpop.f32.mrf.mxu0 }
  0xf3   : > { %v2438_v40 = vrot.slane %v1871_v32, %v17729_v7  ;;  %v2445_v41 = vrot.slane %v16794_v33, %v17729_v7  ;;  %v1899_v42 = vrot.slane %v1860_v29, %v17729_v7  ;;  %v1906_v43 = vrot.slane %v16783_v30, %v17729_v7 }
  0xf4   : > { %v1978_v44 = vrot.slane %v1956_v35, %v17729_v7  ;;  %v1985_v45 = vrot.slane %v1957_v36, %v17729_v7  ;;  %v1986_v46 = vcombine.high %v1964_v37, %v1964_v37  ;;  %v1987_v47 = vcombine.high %v1971_v38, %v1971_v38  ;;  %2814 = vst.msk [vmem:[#allocation2 + $0x1b] sm:$0x1] %vm2805_vm2, %v1964_v37  ;;  %v1717_v48 = vpop.f32.mrf.mxu0 }
  0xf5   : > { %2818 = vst.msk [vmem:[#allocation2 + $0x1f] sm:$0x1] %vm2805_vm2, %v1971_v38  ;;  %v2446_v49 = vcombine.high %v2438_v40, %v2438_v40  ;;  %v2447_v2 = vcombine.high %v2445_v41, %v2445_v41  ;;  %v2454_v50 = vrot.slane %v2438_v40, %v17729_v7  ;;  %v2461_v51 = vrot.slane %v2445_v41, %v17729_v7  ;;  %v17232_v52 = vpop.f32.mrf.mxu1 }
  0xf6   : > { %v1988_v53 = vcombine.high %v1978_v44, %v1978_v44  ;;  %v1989_v0 = vcombine.high %v1985_v45, %v1985_v45  ;;  %2815 = vst.msk [vmem:[#allocation2 + $0x1c] sm:$0x1] %vm2805_vm2, %v1978_v44  ;;  %2816 = vst.msk [vmem:[#allocation2 + $0x1d] sm:$0x1] %vm2805_vm2, %v1986_v46  ;;  %v1907_v54 = vcombine.high %v1899_v42, %v1899_v42  ;;  %v17213_v61 = vpop.f32.mrf.mxu0 }
  0xf7   : > { %2819 = vst.msk [vmem:[#allocation2 + $0x20] sm:$0x1] %vm2805_vm2, %v1985_v45  ;;  %2820 = vst.msk [vmem:[#allocation2 + $0x21] sm:$0x1] %vm2805_vm2, %v1987_v47  ;;  %v1908_v55 = vcombine.high %v1906_v43, %v1906_v43  ;;  %v2468_v56 = vrot.slane %v2446_v49, %v17729_v7  ;;  %v2475_v57 = vrot.slane %v2447_v2, %v17729_v7  ;;  %v1797_v60 = vpop.f32.mrf.mxu1 }
  0xf8   : > { %v2476_v58 = vcombine.high %v2454_v50, %v2454_v50  ;;  %v2477_v59 = vcombine.high %v2461_v51, %v2461_v51  ;;  %2894 = vst.msk [vmem:[#allocation2 + $0x75] sm:$0x1] %vm2805_vm2, %v2454_v50  ;;  %2898 = vst.msk [vmem:[#allocation2 + $0x79] sm:$0x1] %vm2805_vm2, %v2461_v51  ;;  %v1915_v62 = vrot.slane %v1899_v42, %v17729_v7  ;;  %v1720_v20 = vpop.f32.mrf.mxu0 }
  0xf9   : > { %2817 = vst.msk [vmem:[#allocation2 + $0x1e] sm:$0x1] %vm2805_vm2, %v1988_v53  ;;  %2821 = vst.msk [vmem:[#allocation2 + $0x22] sm:$0x1] %vm2805_vm2, %v1989_v0  ;;  %v1922_v1 = vrot.slane %v1906_v43, %v17729_v7  ;;  %v1929_v3 = vrot.slane %v1907_v54, %v17729_v7  ;;  %v1936_v4 = vrot.slane %v1908_v55, %v17729_v7  ;;  %v17233_v11 = vpop.f32.mrf.mxu1 }
  0xfa   : > { %v2478_v6 = vcombine.high %v2468_v56, %v2468_v56  ;;  %v2479_v8 = vcombine.high %v2475_v57, %v2475_v57  ;;  %2895 = vst.msk [vmem:[#allocation2 + $0x76] sm:$0x1] %vm2805_vm2, %v2468_v56  ;;  %2896 = vst.msk [vmem:[#allocation2 + $0x77] sm:$0x1] %vm2805_vm2, %v2476_v58  ;;  %v1870_v9 = vpack.c.bf16 %v18089_v34, %v1848_v31 }
  0xfb   : > { %2899 = vst.msk [vmem:[#allocation2 + $0x7a] sm:$0x1] %vm2805_vm2, %v2475_v57  ;;  %2900 = vst.msk [vmem:[#allocation2 + $0x7b] sm:$0x1] %vm2805_vm2, %v2477_v59  ;;  %v16793_v10 = vpack.c.bf16 %v18089_v34, %v18089_v34  ;;  %v1937_v12 = vcombine.high %v1915_v62, %v1915_v62  ;;  %v1938_v13 = vcombine.high %v1922_v1, %v1922_v1  ;;  %v1800_v29 = vpop.f32.mrf.mxu1 }
  0xfc   : > { %v1939_v14 = vcombine.high %v1929_v3, %v1929_v3  ;;  %v1940_v15 = vcombine.high %v1936_v4, %v1936_v4  ;;  %2806 = vst.msk [vmem:[#allocation2 + $0x13] sm:$0x1] %vm2805_vm2, %v1915_v62  ;;  %2807 = vst.msk [vmem:[#allocation2 + $0x14] sm:$0x1] %vm2805_vm2, %v1929_v3  ;;  %v2389_v16 = vrot.slane %v1870_v9, %v17729_v7 }
  0xfd   : > { %2810 = vst.msk [vmem:[#allocation2 + $0x17] sm:$0x1] %vm2805_vm2, %v1922_v1  ;;  %2811 = vst.msk [vmem:[#allocation2 + $0x18] sm:$0x1] %vm2805_vm2, %v1936_v4  ;;  %v2396_v17 = vrot.slane %v16793_v10, %v17729_v7  ;;  %v1726_v18 = vadd.f32 %v17212_v39, %v18074_v63  ;;  %v1806_v19 = vadd.f32 %v17232_v52, %v18074_v63 }
  0xfe   : > { %2897 = vst.msk [vmem:[#allocation2 + $0x78] sm:$0x1] %vm2805_vm2, %v2478_v6  ;;  %2901 = vst.msk [vmem:[#allocation2 + $0x7c] sm:$0x1] %vm2805_vm2, %v2479_v8  ;;  %v1718_v21 = vadd.f32 %v18074_v63, %v1717_v48  ;;  %v1798_v22 = vadd.f32 %v18074_v63, %v1797_v60  ;;  %v1729_v23 = vadd.f32 %v17213_v61, %v18074_v63 }
  0xff   : > { %2808 = vst.msk [vmem:[#allocation2 + $0x15] sm:$0x1] %vm2805_vm2, %v1937_v12  ;;  %2809 = vst.msk [vmem:[#allocation2 + $0x16] sm:$0x1] %vm2805_vm2, %v1939_v14  ;;  %v1809_v24 = vadd.f32 %v17233_v11, %v18074_v63  ;;  %v2397_v25 = vcombine.high %v2389_v16, %v2389_v16  ;;  %v2398_v26 = vcombine.high %v2396_v17, %v2396_v17  ;;  %v1834_v30 = vmax.f32 %v1726_v18, 0.0  ;;  %v17216_v37 = vpop.f32.mrf.mxu0 }
 0x100   : > { %2812 = vst.msk [vmem:[#allocation2 + $0x19] sm:$0x1] %vm2805_vm2, %v1938_v13  ;;  %2813 = vst.msk [vmem:[#allocation2 + $0x1a] sm:$0x1] %vm2805_vm2, %v1940_v15  ;;  %v2405_v27 = vrot.slane %v2389_v16, %v17729_v7  ;;  %v2412_v28 = vrot.slane %v2396_v17, %v17729_v7  ;;  %v1854_v31 = vmax.f32 %v1806_v19, 0.0  ;;  %v1832_v32 = vmax.f32 %v1718_v21, 0.0 }
 0x101   : > { %v2419_v33 = vrot.slane %v2397_v25, %v17729_v7  ;;  %v2426_v34 = vrot.slane %v2398_v26, %v17729_v7  ;;  %v1835_v38 = vmax.f32 %v1729_v23, 0.0  ;;  %v1855_v39 = vmax.f32 %v1809_v24, 0.0  ;;  %v18157_v46 = vpop.f32.mrf.mxu0 }
 0x102   : > { %v2427_v35 = vcombine.high %v2405_v27, %v2405_v27  ;;  %v2428_v36 = vcombine.high %v2412_v28, %v2412_v28  ;;  %2886 = vst.msk [vmem:[#allocation2 + $0x6d] sm:$0x1] %vm2805_vm2, %v2405_v27  ;;  %2890 = vst.msk [vmem:[#allocation2 + $0x71] sm:$0x1] %vm2805_vm2, %v2412_v28  ;;  %v1721_v40 = vadd.f32 %v18074_v63, %v1720_v20  ;;  %v1852_v44 = vmax.f32 %v1798_v22, 0.0  ;;  %v17236_v50 = vpop.f32.mrf.mxu1 }
 0x103   : > { %v1801_v41 = vadd.f32 %v18074_v63, %v1800_v29  ;;  %v2429_v42 = vcombine.high %v2419_v33, %v2419_v33  ;;  %v2430_v43 = vcombine.high %v2426_v34, %v2426_v34  ;;  %2887 = vst.msk [vmem:[#allocation2 + $0x6e] sm:$0x1] %vm2805_vm2, %v2419_v33  ;;  %2891 = vst.msk [vmem:[#allocation2 + $0x72] sm:$0x1] %vm2805_vm2, %v2426_v34  ;;  %v18171_v1 = vpop.f32.mrf.mxu0 }
 0x104   : > { %2888 = vst.msk [vmem:[#allocation2 + $0x6f] sm:$0x1] %vm2805_vm2, %v2427_v35  ;;  %2892 = vst.msk [vmem:[#allocation2 + $0x73] sm:$0x1] %vm2805_vm2, %v2428_v36  ;;  %v18155_v45 = vadd.f32 %v17216_v37, %v18074_v63  ;;  %v1863_v47 = vpack.c.bf16 %v1835_v38, %v1834_v30  ;;  %v16786_v48 = vpack.c.bf16 %v1835_v38, %v1835_v38  ;;  %v1833_v51 = vmax.f32 %v1721_v40, 0.0  ;;  %v18169_v58 = vpop.f32.mrf.mxu1 }
 0x105   : > { %v1873_v49 = vpack.c.bf16 %v1855_v39, %v1854_v31  ;;  %v16796_v2 = vpack.c.bf16 %v1855_v39, %v1855_v39  ;;  %2889 = vst.msk [vmem:[#allocation2 + $0x70] sm:$0x1] %vm2805_vm2, %v2429_v42  ;;  %2893 = vst.msk [vmem:[#allocation2 + $0x74] sm:$0x1] %vm2805_vm2, %v2430_v43  ;;  %v1853_v52 = vmax.f32 %v1801_v41, 0.0  ;;  %v18163_v0 = vadd.f32 %v17236_v50, %v18074_v63  ;;  %v18187_v22 = vpop.f32.mrf.mxu0 }
 0x106   : > { %v1838_v53 = vmax.f32 %v18155_v45, 0.0  ;;  %v2046_v54 = vrot.slane %v1863_v47, %v17729_v7  ;;  %v2053_v55 = vrot.slane %v16786_v48, %v17729_v7  ;;  %v1862_v59 = vpack.c.bf16 %v1833_v51, %v1832_v32  ;;  %v18181_v17 = vpop.f32.mrf.mxu1 }
 0x107   : > { %v2536_v56 = vrot.slane %v1873_v49, %v17729_v7  ;;  %v2543_v57 = vrot.slane %v16796_v2, %v17729_v7  ;;  %v16785_v60 = vpack.c.bf16 %v1833_v51, %v1833_v51  ;;  %v1872_v61 = vpack.c.bf16 %v1853_v52, %v1852_v44 }
 0x108   : > { %v16795_v62 = vpack.c.bf16 %v1853_v52, %v1853_v52  ;;  %v2054_v3 = vcombine.high %v2046_v54, %v2046_v54  ;;  %v2055_v4 = vcombine.high %v2053_v55, %v2053_v55  ;;  %v2062_v6 = vrot.slane %v2046_v54, %v17729_v7  ;;  %v1816_v35 = vpop.f32.mrf.mxu1 }
 0x109   : > { %v2069_v8 = vrot.slane %v2053_v55, %v17729_v7  ;;  %v2544_v9 = vcombine.high %v2536_v56, %v2536_v56  ;;  %v2545_v10 = vcombine.high %v2543_v57, %v2543_v57  ;;  %v2552_v11 = vrot.slane %v2536_v56, %v17729_v7 }
 0x10a   : > { %v2559_v12 = vrot.slane %v2543_v57, %v17729_v7  ;;  %v2076_v13 = vrot.slane %v2054_v3, %v17729_v7  ;;  %v2083_v14 = vrot.slane %v2055_v4, %v17729_v7  ;;  %v2084_v15 = vcombine.high %v2062_v6, %v2062_v6  ;;  %2830 = vst.msk [vmem:[#allocation2 + $0x2d] sm:$0x1] %vm2805_vm2, %v2062_v6 }
 0x10b   : > { %v2085_v16 = vcombine.high %v2069_v8, %v2069_v8  ;;  %2834 = vst.msk [vmem:[#allocation2 + $0x31] sm:$0x1] %vm2805_vm2, %v2069_v8  ;;  %v2566_v18 = vrot.slane %v2544_v9, %v17729_v7  ;;  %v2573_v19 = vrot.slane %v2545_v10, %v17729_v7  ;;  %v2574_v20 = vcombine.high %v2552_v11, %v2552_v11 }
 0x10c   : > { %v2575_v21 = vcombine.high %v2559_v12, %v2559_v12  ;;  %2910 = vst.msk [vmem:[#allocation2 + $0x87] sm:$0x1] %vm2805_vm2, %v2552_v11  ;;  %2914 = vst.msk [vmem:[#allocation2 + $0x8b] sm:$0x1] %vm2805_vm2, %v2559_v12  ;;  %v2086_v23 = vcombine.high %v2076_v13, %v2076_v13  ;;  %v2087_v24 = vcombine.high %v2083_v14, %v2083_v14  ;;  %v17220_v40 = vpop.f32.mrf.mxu0  ;;  %v1858_v52 = vmax.f32 %v18163_v0, 0.0 }
 0x10d   : > { %2831 = vst.msk [vmem:[#allocation2 + $0x2e] sm:$0x1] %vm2805_vm2, %v2076_v13  ;;  %2832 = vst.msk [vmem:[#allocation2 + $0x2f] sm:$0x1] %vm2805_vm2, %v2084_v15  ;;  %v1997_v25 = vrot.slane %v1862_v59, %v17729_v7  ;;  %v2004_v26 = vrot.slane %v16785_v60, %v17729_v7  ;;  %v2576_v27 = vcombine.high %v2566_v18, %v2566_v18 }
 0x10e   : > { %2835 = vst.msk [vmem:[#allocation2 + $0x32] sm:$0x1] %vm2805_vm2, %v2083_v14  ;;  %2836 = vst.msk [vmem:[#allocation2 + $0x33] sm:$0x1] %vm2805_vm2, %v2085_v16  ;;  %v2577_v28 = vcombine.high %v2573_v19, %v2573_v19  ;;  %v2487_v29 = vrot.slane %v1872_v61, %v17729_v7  ;;  %v2494_v30 = vrot.slane %v16795_v62, %v17729_v7  ;;  %v1749_v60 = vpop.f32.mrf.mxu0 }
 0x10f   : > { %2911 = vst.msk [vmem:[#allocation2 + $0x88] sm:$0x1] %vm2805_vm2, %v2566_v18  ;;  %2912 = vst.msk [vmem:[#allocation2 + $0x89] sm:$0x1] %vm2805_vm2, %v2574_v20  ;;  %v2005_v31 = vcombine.high %v1997_v25, %v1997_v25  ;;  %v2006_v32 = vcombine.high %v2004_v26, %v2004_v26  ;;  %v2013_v33 = vrot.slane %v1997_v25, %v17729_v7  ;;  %v17242_v55 = vpop.f32.mrf.mxu1 }
 0x110   : > { %2915 = vst.msk [vmem:[#allocation2 + $0x8c] sm:$0x1] %vm2805_vm2, %v2573_v19  ;;  %2916 = vst.msk [vmem:[#allocation2 + $0x8d] sm:$0x1] %vm2805_vm2, %v2575_v21  ;;  %v2020_v34 = vrot.slane %v2004_v26, %v17729_v7  ;;  %v2495_v36 = vcombine.high %v2487_v29, %v2487_v29  ;;  %v2496_v37 = vcombine.high %v2494_v30, %v2494_v30 }
 0x111   : > { %2833 = vst.msk [vmem:[#allocation2 + $0x30] sm:$0x1] %vm2805_vm2, %v2086_v23  ;;  %2837 = vst.msk [vmem:[#allocation2 + $0x34] sm:$0x1] %vm2805_vm2, %v2087_v24  ;;  %v2503_v38 = vrot.slane %v2487_v29, %v17729_v7  ;;  %v2510_v39 = vrot.slane %v2494_v30, %v17729_v7  ;;  %v2027_v41 = vrot.slane %v2005_v31, %v17729_v7  ;;  %v3120_v30 = vpop.f32.mrf.mxu1 }
 0x112   : > { %2913 = vst.msk [vmem:[#allocation2 + $0x8a] sm:$0x1] %vm2805_vm2, %v2576_v27  ;;  %2917 = vst.msk [vmem:[#allocation2 + $0x8e] sm:$0x1] %vm2805_vm2, %v2577_v28  ;;  %v2034_v42 = vrot.slane %v2006_v32, %v17729_v7  ;;  %v2035_v43 = vcombine.high %v2013_v33, %v2013_v33  ;;  %v2036_v44 = vcombine.high %v2020_v34, %v2020_v34 }
 0x113   : > { %2822 = vst.msk [vmem:[#allocation2 + $0x25] sm:$0x1] %vm2805_vm2, %v2013_v33  ;;  %2826 = vst.msk [vmem:[#allocation2 + $0x29] sm:$0x1] %vm2805_vm2, %v2020_v34  ;;  %v2517_v47 = vrot.slane %v2495_v36, %v17729_v7  ;;  %v2524_v48 = vrot.slane %v2496_v37, %v17729_v7  ;;  %v2525_v49 = vcombine.high %v2503_v38, %v2503_v38 }
 0x114   : > { %v2526_v2 = vcombine.high %v2510_v39, %v2510_v39  ;;  %2902 = vst.msk [vmem:[#allocation2 + $0x7f] sm:$0x1] %vm2805_vm2, %v2503_v38  ;;  %2906 = vst.msk [vmem:[#allocation2 + $0x83] sm:$0x1] %vm2805_vm2, %v2510_v39  ;;  %v2037_v50 = vcombine.high %v2027_v41, %v2027_v41  ;;  %v2038_v51 = vcombine.high %v2034_v42, %v2034_v42  ;;  %v17221_v39 = vpop.f32.mrf.mxu0 }
 0x115   : > { %2823 = vst.msk [vmem:[#allocation2 + $0x26] sm:$0x1] %vm2805_vm2, %v2027_v41  ;;  %2824 = vst.msk [vmem:[#allocation2 + $0x27] sm:$0x1] %vm2805_vm2, %v2035_v43  ;;  %v1734_v54 = vadd.f32 %v18074_v63, %v18157_v46  ;;  %v2527_v56 = vcombine.high %v2517_v47, %v2517_v47  ;;  %v2528_v57 = vcombine.high %v2524_v48, %v2524_v48 }
 0x116   : > { %2827 = vst.msk [vmem:[#allocation2 + $0x2a] sm:$0x1] %vm2805_vm2, %v2034_v42  ;;  %2828 = vst.msk [vmem:[#allocation2 + $0x2b] sm:$0x1] %vm2805_vm2, %v2036_v44  ;;  %v1814_v59 = vadd.f32 %v18074_v63, %v18169_v58  ;;  %v1745_v0 = vadd.f32 %v18171_v1, %v18074_v63  ;;  %v1825_v61 = vadd.f32 %v18181_v17, %v18074_v63 }
 0x117   : > { %2903 = vst.msk [vmem:[#allocation2 + $0x80] sm:$0x1] %vm2805_vm2, %v2517_v47  ;;  %2904 = vst.msk [vmem:[#allocation2 + $0x81] sm:$0x1] %vm2805_vm2, %v2525_v49  ;;  %v1836_v46 = vmax.f32 %v1734_v54, 0.0  ;;  %v1737_v62 = vadd.f32 %v18074_v63, %v18187_v22  ;;  %v1817_v3 = vadd.f32 %v18074_v63, %v1816_v35  ;;  %v18242_v4 = vadd.f32 %v17220_v40, %v18074_v63 }
 0x118   : > { %2907 = vst.msk [vmem:[#allocation2 + $0x84] sm:$0x1] %vm2805_vm2, %v2524_v48  ;;  %2908 = vst.msk [vmem:[#allocation2 + $0x85] sm:$0x1] %vm2805_vm2, %v2526_v2  ;;  %v1856_v58 = vmax.f32 %v1814_v59, 0.0  ;;  %v1839_v1 = vmax.f32 %v1745_v0, 0.0  ;;  %v18245_v6 = vadd.f32 %v17242_v55, %v18074_v63  ;;  %v18250_v11 = vadd.f32 %v18074_v63, %v1749_v60  ;;  %v17243_v2 = vpop.f32.mrf.mxu1  ;;  %v1752_v0 = vpop.f32.mrf.mxu0 }
 0x119   : > { %2825 = vst.msk [vmem:[#allocation2 + $0x28] sm:$0x1] %vm2805_vm2, %v2037_v50  ;;  %2829 = vst.msk [vmem:[#allocation2 + $0x2c] sm:$0x1] %vm2805_vm2, %v2038_v51  ;;  %v1859_v8 = vmax.f32 %v1825_v61, 0.0  ;;  %v1837_v9 = vmax.f32 %v1737_v62, 0.0  ;;  %v3121_v62 = vadd.f32 %v18074_v63, %v3120_v30 }
 0x11a   : > { %2905 = vst.msk [vmem:[#allocation2 + $0x82] sm:$0x1] %vm2805_vm2, %v2527_v56  ;;  %2909 = vst.msk [vmem:[#allocation2 + $0x86] sm:$0x1] %vm2805_vm2, %v2528_v57  ;;  %v18247_v10 = vmax.f32 %v1817_v3, 0.0  ;;  %v1865_v12 = vpack.c.bf16 %v1839_v1, %v1838_v53  ;;  %v16788_v13 = vpack.c.bf16 %v1839_v1, %v1839_v1  ;;  %v1842_v14 = vmax.f32 %v18242_v4, 0.0 }
 0x11b   : > { %v3137_v15 = vmax.f32 %v18245_v6, 0.0  ;;  %v1875_v16 = vpack.c.bf16 %v1859_v8, %v1858_v52  ;;  %v16798_v17 = vpack.c.bf16 %v1859_v8, %v1859_v8  ;;  %v1864_v18 = vpack.c.bf16 %v1837_v9, %v1836_v46 }
 0x11c   : > { %v16787_v19 = vpack.c.bf16 %v1837_v9, %v1837_v9  ;;  %v2144_v20 = vrot.slane %v1865_v12, %v17729_v7  ;;  %v2151_v21 = vrot.slane %v16788_v13, %v17729_v7  ;;  %v1874_v22 = vpack.c.bf16 %v18247_v10, %v1856_v58  ;;  %v3123_v9 = vpop.f32.mrf.mxu1 }
 0x11d   : > { %v16797_v23 = vpack.c.bf16 %v18247_v10, %v18247_v10  ;;  %v2634_v45 = vrot.slane %v1875_v16, %v17729_v7  ;;  %v2641_v53 = vrot.slane %v16798_v17, %v17729_v7  ;;  %v2095_v24 = vrot.slane %v1864_v18, %v17729_v7 }
 0x11e   : > { %v2102_v25 = vrot.slane %v16787_v19, %v17729_v7  ;;  %v2152_v26 = vcombine.high %v2144_v20, %v2144_v20  ;;  %v2153_v27 = vcombine.high %v2151_v21, %v2151_v21  ;;  %v2160_v28 = vrot.slane %v2144_v20, %v17729_v7  ;;  %v17224_v20 = vpop.f32.mrf.mxu0 }
 0x11f   : > { %v2167_v29 = vrot.slane %v2151_v21, %v17729_v7  ;;  %v2642_v31 = vcombine.high %v2634_v45, %v2634_v45  ;;  %v2643_v32 = vcombine.high %v2641_v53, %v2641_v53  ;;  %v2650_v33 = vrot.slane %v2634_v45, %v17729_v7 }
 0x120   : > { %v2657_v34 = vrot.slane %v2641_v53, %v17729_v7  ;;  %v2174_v35 = vrot.slane %v2152_v26, %v17729_v7  ;;  %v2181_v36 = vrot.slane %v2153_v27, %v17729_v7  ;;  %v2182_v37 = vcombine.high %v2160_v28, %v2160_v28  ;;  %2846 = vst.msk [vmem:[#allocation2 + $0x3f] sm:$0x1] %vm2805_vm2, %v2160_v28 }
 0x121   : > { %v2183_v38 = vcombine.high %v2167_v29, %v2167_v29  ;;  %2850 = vst.msk [vmem:[#allocation2 + $0x43] sm:$0x1] %vm2805_vm2, %v2167_v29  ;;  %v2664_v40 = vrot.slane %v2642_v31, %v17729_v7  ;;  %v2671_v41 = vrot.slane %v2643_v32, %v17729_v7  ;;  %v2672_v42 = vcombine.high %v2650_v33, %v2650_v33 }
 0x122   : > { %v2673_v43 = vcombine.high %v2657_v34, %v2657_v34  ;;  %2926 = vst.msk [vmem:[#allocation2 + $0x99] sm:$0x1] %vm2805_vm2, %v2650_v33  ;;  %2930 = vst.msk [vmem:[#allocation2 + $0x9d] sm:$0x1] %vm2805_vm2, %v2657_v34  ;;  %v2184_v44 = vcombine.high %v2174_v35, %v2174_v35  ;;  %v2185_v47 = vcombine.high %v2181_v36, %v2181_v36  ;;  %v1840_v61 = vmax.f32 %v18250_v11, 0.0 }
 0x123   : > { %2847 = vst.msk [vmem:[#allocation2 + $0x40] sm:$0x1] %vm2805_vm2, %v2174_v35  ;;  %2848 = vst.msk [vmem:[#allocation2 + $0x41] sm:$0x1] %vm2805_vm2, %v2182_v37  ;;  %v2103_v48 = vcombine.high %v2095_v24, %v2095_v24  ;;  %v2104_v49 = vcombine.high %v2102_v25, %v2102_v25  ;;  %v2674_v50 = vcombine.high %v2664_v40, %v2664_v40  ;;  %v3135_v11 = vmax.f32 %v3121_v62, 0.0  ;;  %v18330_v37 = vpop.f32.mrf.mxu1 }
 0x124   : > { %2851 = vst.msk [vmem:[#allocation2 + $0x44] sm:$0x1] %vm2805_vm2, %v2181_v36  ;;  %2852 = vst.msk [vmem:[#allocation2 + $0x45] sm:$0x1] %vm2805_vm2, %v2183_v38  ;;  %v2675_v51 = vcombine.high %v2671_v41, %v2671_v41  ;;  %v2111_v52 = vrot.slane %v2095_v24, %v17729_v7  ;;  %v2118_v54 = vrot.slane %v2102_v25, %v17729_v7 }
 0x125   : > { %2927 = vst.msk [vmem:[#allocation2 + $0x9a] sm:$0x1] %vm2805_vm2, %v2664_v40  ;;  %2928 = vst.msk [vmem:[#allocation2 + $0x9b] sm:$0x1] %vm2805_vm2, %v2672_v42  ;;  %v2125_v55 = vrot.slane %v2103_v48, %v17729_v7  ;;  %v2132_v56 = vrot.slane %v2104_v49, %v17729_v7  ;;  %v2585_v57 = vrot.slane %v1874_v22, %v17729_v7 }
 0x126   : > { %2931 = vst.msk [vmem:[#allocation2 + $0x9e] sm:$0x1] %vm2805_vm2, %v2671_v41  ;;  %2932 = vst.msk [vmem:[#allocation2 + $0x9f] sm:$0x1] %vm2805_vm2, %v2673_v43  ;;  %v2592_v59 = vrot.slane %v16797_v23, %v17729_v7  ;;  %v2133_v60 = vcombine.high %v2111_v52, %v2111_v52  ;;  %v2134_v46 = vcombine.high %v2118_v54, %v2118_v54 }
 0x127   : > { %2849 = vst.msk [vmem:[#allocation2 + $0x42] sm:$0x1] %vm2805_vm2, %v2184_v44  ;;  %2853 = vst.msk [vmem:[#allocation2 + $0x46] sm:$0x1] %vm2805_vm2, %v2185_v47  ;;  %v2135_v3 = vcombine.high %v2125_v55, %v2125_v55  ;;  %v2136_v58 = vcombine.high %v2132_v56, %v2132_v56  ;;  %v2593_v1 = vcombine.high %v2585_v57, %v2585_v57 }
 0x128   : > { %2929 = vst.msk [vmem:[#allocation2 + $0x9c] sm:$0x1] %vm2805_vm2, %v2674_v50  ;;  %2933 = vst.msk [vmem:[#allocation2 + $0xa0] sm:$0x1] %vm2805_vm2, %v2675_v51  ;;  %v2594_v8 = vcombine.high %v2592_v59, %v2592_v59  ;;  %v2601_v10 = vrot.slane %v2585_v57, %v17729_v7  ;;  %v2608_v12 = vrot.slane %v2592_v59, %v17729_v7 }
 0x129   : > { %2838 = vst.msk [vmem:[#allocation2 + $0x37] sm:$0x1] %vm2805_vm2, %v2111_v52  ;;  %2842 = vst.msk [vmem:[#allocation2 + $0x3b] sm:$0x1] %vm2805_vm2, %v2118_v54  ;;  %v1761_v13 = vadd.f32 %v17221_v39, %v18074_v63  ;;  %v2615_v16 = vrot.slane %v2593_v1, %v17729_v7  ;;  %v3132_v18 = vadd.f32 %v17243_v2, %v18074_v63  ;;  %v1765_v54 = vpop.f32.mrf.mxu0 }
 0x12a   : > { %2839 = vst.msk [vmem:[#allocation2 + $0x38] sm:$0x1] %vm2805_vm2, %v2125_v55  ;;  %2843 = vst.msk [vmem:[#allocation2 + $0x3c] sm:$0x1] %vm2805_vm2, %v2132_v56  ;;  %v2622_v17 = vrot.slane %v2594_v8, %v17729_v7  ;;  %v1753_v19 = vadd.f32 %v18074_v63, %v1752_v0  ;;  %v2623_v21 = vcombine.high %v2601_v10, %v2601_v10  ;;  %v18344_v55 = vpop.f32.mrf.mxu1 }
 0x12b   : > { %2840 = vst.msk [vmem:[#allocation2 + $0x39] sm:$0x1] %vm2805_vm2, %v2133_v60  ;;  %2844 = vst.msk [vmem:[#allocation2 + $0x3d] sm:$0x1] %vm2805_vm2, %v2134_v46  ;;  %v2624_v22 = vcombine.high %v2608_v12, %v2608_v12  ;;  %v1843_v23 = vmax.f32 %v1761_v13, 0.0  ;;  %v3124_v45 = vadd.f32 %v18074_v63, %v3123_v9  ;;  %v2625_v53 = vcombine.high %v2615_v16, %v2615_v16  ;;  %v17225_v13 = vpop.f32.mrf.mxu0 }
 0x12c   : > { %2841 = vst.msk [vmem:[#allocation2 + $0x3a] sm:$0x1] %vm2805_vm2, %v2135_v3  ;;  %2845 = vst.msk [vmem:[#allocation2 + $0x3e] sm:$0x1] %vm2805_vm2, %v2136_v58  ;;  %v2626_v24 = vcombine.high %v2622_v17, %v2622_v17  ;;  %v3138_v25 = vmax.f32 %v3132_v18, 0.0  ;;  %v1841_v26 = vmax.f32 %v1753_v19, 0.0  ;;  %v18322_v30 = vadd.f32 %v17224_v20, %v18074_v63 }
 0x12d   : > { %2918 = vst.msk [vmem:[#allocation2 + $0x91] sm:$0x1] %vm2805_vm2, %v2601_v10  ;;  %2922 = vst.msk [vmem:[#allocation2 + $0x95] sm:$0x1] %vm2805_vm2, %v2608_v12  ;;  %v1867_v27 = vpack.c.bf16 %v1843_v23, %v1842_v14  ;;  %v16790_v28 = vpack.c.bf16 %v1843_v23, %v1843_v23  ;;  %v3136_v29 = vmax.f32 %v3124_v45, 0.0 }
 0x12e   : > { %2919 = vst.msk [vmem:[#allocation2 + $0x92] sm:$0x1] %vm2805_vm2, %v2615_v16  ;;  %2923 = vst.msk [vmem:[#allocation2 + $0x96] sm:$0x1] %vm2805_vm2, %v2622_v17  ;;  %v3140_v31 = vpack.c.bf16 %v3138_v25, %v3137_v15  ;;  %v16810_v32 = vpack.c.bf16 %v3138_v25, %v3138_v25  ;;  %v1866_v33 = vpack.c.bf16 %v1841_v26, %v1840_v61  ;;  %v17249_v16 = vpop.f32.mrf.mxu1 }
 0x12f   : > { %2920 = vst.msk [vmem:[#allocation2 + $0x93] sm:$0x1] %vm2805_vm2, %v2623_v21  ;;  %2924 = vst.msk [vmem:[#allocation2 + $0x97] sm:$0x1] %vm2805_vm2, %v2624_v22  ;;  %v16789_v34 = vpack.c.bf16 %v1841_v26, %v1841_v26  ;;  %v2242_v35 = vrot.slane %v1867_v27, %v17729_v7  ;;  %v2249_v4 = vrot.slane %v16790_v28, %v17729_v7  ;;  %v1846_v26 = vmax.f32 %v18322_v30, 0.0  ;;  %v1768_v28 = vpop.f32.mrf.mxu0 }
 0x130   : > { %2921 = vst.msk [vmem:[#allocation2 + $0x94] sm:$0x1] %vm2805_vm2, %v2625_v53  ;;  %2925 = vst.msk [vmem:[#allocation2 + $0x98] sm:$0x1] %vm2805_vm2, %v2626_v24  ;;  %v3139_v14 = vpack.c.bf16 %v3136_v29, %v3135_v11  ;;  %v16809_v36 = vpack.c.bf16 %v3136_v29, %v3136_v29  ;;  %v3199_v38 = vrot.slane %v3140_v31, %v17729_v7  ;;  %v3463_v29 = vpop.f32.mrf.mxu1 }
 0x131   : > { %v3206_v39 = vrot.slane %v16810_v32, %v17729_v7  ;;  %v2193_v40 = vrot.slane %v1866_v33, %v17729_v7  ;;  %v2200_v6 = vrot.slane %v16789_v34, %v17729_v7  ;;  %v2250_v15 = vcombine.high %v2242_v35, %v2242_v35 }
 0x132   : > { %v2251_v41 = vcombine.high %v2249_v4, %v2249_v4  ;;  %v2258_v42 = vrot.slane %v2242_v35, %v17729_v7  ;;  %v2265_v43 = vrot.slane %v2249_v4, %v17729_v7  ;;  %v3207_v44 = vcombine.high %v3199_v38, %v3199_v38 }
 0x133   : > { %v3208_v47 = vcombine.high %v3206_v39, %v3206_v39  ;;  %v3215_v48 = vrot.slane %v3199_v38, %v17729_v7  ;;  %v3222_v49 = vrot.slane %v3206_v39, %v17729_v7  ;;  %v2272_v2 = vrot.slane %v2250_v15, %v17729_v7 }
 0x134   : > { %v2279_v50 = vrot.slane %v2251_v41, %v17729_v7  ;;  %v2280_v51 = vcombine.high %v2258_v42, %v2258_v42  ;;  %v2281_v52 = vcombine.high %v2265_v43, %v2265_v43  ;;  %2862 = vst.msk [vmem:[#allocation2 + $0x51] sm:$0x1] %vm2805_vm2, %v2258_v42  ;;  %2866 = vst.msk [vmem:[#allocation2 + $0x55] sm:$0x1] %vm2805_vm2, %v2265_v43 }
 0x135   : > { %v3229_v56 = vrot.slane %v3207_v44, %v17729_v7  ;;  %v3236_v57 = vrot.slane %v3208_v47, %v17729_v7  ;;  %v3237_v59 = vcombine.high %v3215_v48, %v3215_v48  ;;  %v3238_v0 = vcombine.high %v3222_v49, %v3222_v49  ;;  %3266 = vst.msk [vmem:[#allocation2 + $0x9] sm:$0x1] %vm2805_vm2, %v3215_v48 }
 0x136   : > { %3270 = vst.msk [vmem:[#allocation2 + $0xd] sm:$0x1] %vm2805_vm2, %v3222_v49  ;;  %v2282_v60 = vcombine.high %v2272_v2, %v2272_v2  ;;  %v2283_v46 = vcombine.high %v2279_v50, %v2279_v50  ;;  %2863 = vst.msk [vmem:[#allocation2 + $0x52] sm:$0x1] %vm2805_vm2, %v2272_v2  ;;  %v2201_v61 = vcombine.high %v2193_v40, %v2193_v40 }
 0x137   : > { %2864 = vst.msk [vmem:[#allocation2 + $0x53] sm:$0x1] %vm2805_vm2, %v2280_v51  ;;  %2867 = vst.msk [vmem:[#allocation2 + $0x56] sm:$0x1] %vm2805_vm2, %v2279_v50  ;;  %v2202_v62 = vcombine.high %v2200_v6, %v2200_v6  ;;  %v3239_v3 = vcombine.high %v3229_v56, %v3229_v56  ;;  %v3240_v58 = vcombine.high %v3236_v57, %v3236_v57 }
 0x138   : > { %2868 = vst.msk [vmem:[#allocation2 + $0x57] sm:$0x1] %vm2805_vm2, %v2281_v52  ;;  %3267 = vst.msk [vmem:[#allocation2 + $0xa] sm:$0x1] %vm2805_vm2, %v3229_v56  ;;  %v2209_v1 = vrot.slane %v2193_v40, %v17729_v7  ;;  %v2216_v8 = vrot.slane %v2200_v6, %v17729_v7  ;;  %v2223_v9 = vrot.slane %v2201_v61, %v17729_v7 }
 0x139   : > { %3268 = vst.msk [vmem:[#allocation2 + $0xb] sm:$0x1] %vm2805_vm2, %v3237_v59  ;;  %3271 = vst.msk [vmem:[#allocation2 + $0xe] sm:$0x1] %vm2805_vm2, %v3236_v57  ;;  %v2230_v10 = vrot.slane %v2202_v62, %v17729_v7  ;;  %v3150_v12 = vrot.slane %v3139_v14, %v17729_v7  ;;  %v3157_v11 = vrot.slane %v16809_v36, %v17729_v7 }
 0x13a   : > { %3272 = vst.msk [vmem:[#allocation2 + $0xf] sm:$0x1] %vm2805_vm2, %v3238_v0  ;;  %2865 = vst.msk [vmem:[#allocation2 + $0x54] sm:$0x1] %vm2805_vm2, %v2282_v60  ;;  %v2231_v17 = vcombine.high %v2209_v1, %v2209_v1  ;;  %v2232_v18 = vcombine.high %v2216_v8, %v2216_v8  ;;  %v2233_v19 = vcombine.high %v2223_v9, %v2223_v9 }
 0x13b   : > { %2869 = vst.msk [vmem:[#allocation2 + $0x58] sm:$0x1] %vm2805_vm2, %v2283_v46  ;;  %3269 = vst.msk [vmem:[#allocation2 + $0xc] sm:$0x1] %vm2805_vm2, %v3239_v3  ;;  %v2234_v20 = vcombine.high %v2230_v10, %v2230_v10  ;;  %v3158_v21 = vcombine.high %v3150_v12, %v3150_v12  ;;  %v3159_v22 = vcombine.high %v3157_v11, %v3157_v11 }
 0x13c   : > { %3273 = vst.msk [vmem:[#allocation2 + $0x10] sm:$0x1] %vm2805_vm2, %v3240_v58  ;;  %2854 = vst.msk [vmem:[#allocation2 + $0x49] sm:$0x1] %vm2805_vm2, %v2209_v1  ;;  %v3166_v23 = vrot.slane %v3150_v12, %v17729_v7  ;;  %v3173_v45 = vrot.slane %v3157_v11, %v17729_v7  ;;  %v3469_v53 = vadd.f32 %v18330_v37, %v18074_v63 }
 0x13d   : > { %2858 = vst.msk [vmem:[#allocation2 + $0x4d] sm:$0x1] %vm2805_vm2, %v2216_v8  ;;  %2855 = vst.msk [vmem:[#allocation2 + $0x4a] sm:$0x1] %vm2805_vm2, %v2223_v9  ;;  %v3180_v24 = vrot.slane %v3158_v21, %v17729_v7  ;;  %v3187_v25 = vrot.slane %v3159_v22, %v17729_v7  ;;  %v1777_v27 = vadd.f32 %v17225_v13, %v18074_v63 }
 0x13e   : > { %2859 = vst.msk [vmem:[#allocation2 + $0x4e] sm:$0x1] %vm2805_vm2, %v2230_v10  ;;  %2856 = vst.msk [vmem:[#allocation2 + $0x4b] sm:$0x1] %vm2805_vm2, %v2231_v17  ;;  %v3188_v31 = vcombine.high %v3166_v23, %v3166_v23  ;;  %v3189_v32 = vcombine.high %v3173_v45, %v3173_v45  ;;  %v1766_v33 = vadd.f32 %v18074_v63, %v1765_v54  ;;  %v3477_v36 = vmax.f32 %v3469_v53, 0.0 }
 0x13f   : > { %2860 = vst.msk [vmem:[#allocation2 + $0x4f] sm:$0x1] %vm2805_vm2, %v2232_v18  ;;  %2857 = vst.msk [vmem:[#allocation2 + $0x4c] sm:$0x1] %vm2805_vm2, %v2233_v19  ;;  %v3472_v34 = vadd.f32 %v17249_v16, %v18074_v63  ;;  %v3190_v35 = vcombine.high %v3180_v24, %v3180_v24  ;;  %v3191_v4 = vcombine.high %v3187_v25, %v3187_v25  ;;  %v1847_v14 = vmax.f32 %v1777_v27, 0.0 }
 0x140   : > { %2861 = vst.msk [vmem:[#allocation2 + $0x50] sm:$0x1] %vm2805_vm2, %v2234_v20  ;;  %3258 = vst.msk [vmem:[#allocation2 + $0x1] sm:$0x1] %vm2805_vm2, %v3166_v23  ;;  %v3461_v30 = vadd.f32 %v18074_v63, %v18344_v55  ;;  %v1769_v38 = vadd.f32 %v18074_v63, %v1768_v28  ;;  %v3464_v39 = vadd.f32 %v18074_v63, %v3463_v29  ;;  %v1844_v15 = vmax.f32 %v1766_v33, 0.0 }
 0x141   : > { %3262 = vst.msk [vmem:[#allocation2 + $0x5] sm:$0x1] %vm2805_vm2, %v3173_v45  ;;  %3259 = vst.msk [vmem:[#allocation2 + $0x2] sm:$0x1] %vm2805_vm2, %v3180_v24  ;;  %v3478_v37 = vmax.f32 %v3472_v34, 0.0  ;;  %v1869_v40 = vpack.c.bf16 %v1847_v14, %v1846_v26  ;;  %v16792_v6 = vpack.c.bf16 %v1847_v14, %v1847_v14 }
 0x142   : > { %3263 = vst.msk [vmem:[#allocation2 + $0x6] sm:$0x1] %vm2805_vm2, %v3187_v25  ;;  %3260 = vst.msk [vmem:[#allocation2 + $0x3] sm:$0x1] %vm2805_vm2, %v3188_v31  ;;  %v1845_v43 = vmax.f32 %v1769_v38, 0.0  ;;  %v3475_v44 = vmax.f32 %v3461_v30, 0.0 }
 0x143   : > { %3264 = vst.msk [vmem:[#allocation2 + $0x7] sm:$0x1] %vm2805_vm2, %v3189_v32  ;;  %3261 = vst.msk [vmem:[#allocation2 + $0x4] sm:$0x1] %vm2805_vm2, %v3190_v35  ;;  %v3480_v41 = vpack.c.bf16 %v3478_v37, %v3477_v36  ;;  %v16822_v42 = vpack.c.bf16 %v3478_v37, %v3478_v37  ;;  %v2340_v47 = vrot.slane %v1869_v40, %v17729_v7  ;;  %v3476_v49 = vmax.f32 %v3464_v39, 0.0 }
 0x144   : > { %3265 = vst.msk [vmem:[#allocation2 + $0x8] sm:$0x1] %vm2805_vm2, %v3191_v4  ;;  %v2347_v48 = vrot.slane %v16792_v6, %v17729_v7  ;;  %v1868_v50 = vpack.c.bf16 %v1845_v43, %v1844_v15  ;;  %v16791_v51 = vpack.c.bf16 %v1845_v43, %v1845_v43 }
 0x145   : > { %v3539_v2 = vrot.slane %v3480_v41, %v17729_v7  ;;  %v3546_v63 = vrot.slane %v16822_v42, %v17729_v7  ;;  %v2348_v52 = vcombine.high %v2340_v47, %v2340_v47  ;;  %v2356_v55 = vrot.slane %v2340_v47, %v17729_v7 }
 0x146   : > { %v2349_v54 = vcombine.high %v2347_v48, %v2347_v48  ;;  %v2363_v56 = vrot.slane %v2347_v48, %v17729_v7  ;;  %v2291_v11 = vrot.slane %v1868_v50, %v17729_v7  ;;  %v2298_v13 = vrot.slane %v16791_v51, %v17729_v7 }
 0x147   : > { %v3547_v57 = vcombine.high %v3539_v2, %v3539_v2  ;;  %v3548_v59 = vcombine.high %v3546_v63, %v3546_v63  ;;  %v3555_v0 = vrot.slane %v3539_v2, %v17729_v7  ;;  %v3562_v60 = vrot.slane %v3546_v63, %v17729_v7  ;;  %2878 = vst.msk [vmem:[#allocation2 + $0x63] sm:$0x1] %vm2805_vm2, %v2356_v55 }
 0x148   : > { %v2370_v46 = vrot.slane %v2348_v52, %v17729_v7  ;;  %v2377_v61 = vrot.slane %v2349_v54, %v17729_v7  ;;  %v2378_v62 = vcombine.high %v2356_v55, %v2356_v55  ;;  %v2379_v3 = vcombine.high %v2363_v56, %v2363_v56  ;;  %2882 = vst.msk [vmem:[#allocation2 + $0x67] sm:$0x1] %vm2805_vm2, %v2363_v56 }
 0x149   : > { %v3569_v58 = vrot.slane %v3547_v57, %v17729_v7  ;;  %v3576_v1 = vrot.slane %v3548_v59, %v17729_v7  ;;  %v3577_v8 = vcombine.high %v3555_v0, %v3555_v0  ;;  %v3578_v9 = vcombine.high %v3562_v60, %v3562_v60  ;;  %3606 = vst.msk [vmem:[#allocation2 + $0xab] sm:$0x1] %vm2805_vm2, %v3555_v0 }
 0x14a   : > { %3610 = vst.msk [vmem:[#allocation2 + $0xaf] sm:$0x1] %vm2805_vm2, %v3562_v60  ;;  %v2380_v10 = vcombine.high %v2370_v46, %v2370_v46  ;;  %v2381_v12 = vcombine.high %v2377_v61, %v2377_v61  ;;  %2879 = vst.msk [vmem:[#allocation2 + $0x64] sm:$0x1] %vm2805_vm2, %v2370_v46  ;;  %v3479_v18 = vpack.c.bf16 %v3476_v49, %v3475_v44 }
 0x14b   : > { %2880 = vst.msk [vmem:[#allocation2 + $0x65] sm:$0x1] %vm2805_vm2, %v2378_v62  ;;  %2883 = vst.msk [vmem:[#allocation2 + $0x68] sm:$0x1] %vm2805_vm2, %v2377_v61  ;;  %v3579_v16 = vcombine.high %v3569_v58, %v3569_v58  ;;  %v3580_v17 = vcombine.high %v3576_v1, %v3576_v1  ;;  %v16821_v19 = vpack.c.bf16 %v3476_v49, %v3476_v49 }
 0x14c   : > { %2884 = vst.msk [vmem:[#allocation2 + $0x69] sm:$0x1] %vm2805_vm2, %v2379_v3  ;;  %3607 = vst.msk [vmem:[#allocation2 + $0xac] sm:$0x1] %vm2805_vm2, %v3569_v58  ;;  %v2299_v20 = vcombine.high %v2291_v11, %v2291_v11  ;;  %v2300_v21 = vcombine.high %v2298_v13, %v2298_v13  ;;  %v2307_v22 = vrot.slane %v2291_v11, %v17729_v7 }
 0x14d   : > { %3608 = vst.msk [vmem:[#allocation2 + $0xad] sm:$0x1] %vm2805_vm2, %v3577_v8  ;;  %3611 = vst.msk [vmem:[#allocation2 + $0xb0] sm:$0x1] %vm2805_vm2, %v3576_v1  ;;  %v2314_v23 = vrot.slane %v2298_v13, %v17729_v7  ;;  %v3490_v45 = vrot.slane %v3479_v18, %v17729_v7  ;;  %v3497_v53 = vrot.slane %v16821_v19, %v17729_v7 }
 0x14e   : > { %3612 = vst.msk [vmem:[#allocation2 + $0xb1] sm:$0x1] %vm2805_vm2, %v3578_v9  ;;  %2881 = vst.msk [vmem:[#allocation2 + $0x66] sm:$0x1] %vm2805_vm2, %v2380_v10  ;;  %v2321_v24 = vrot.slane %v2299_v20, %v17729_v7  ;;  %v2328_v25 = vrot.slane %v2300_v21, %v17729_v7  ;;  %v2329_v26 = vcombine.high %v2307_v22, %v2307_v22 }
 0x14f   : > { %2885 = vst.msk [vmem:[#allocation2 + $0x6a] sm:$0x1] %vm2805_vm2, %v2381_v12  ;;  %3609 = vst.msk [vmem:[#allocation2 + $0xae] sm:$0x1] %vm2805_vm2, %v3579_v16  ;;  %v2330_v27 = vcombine.high %v2314_v23, %v2314_v23  ;;  %v3498_v28 = vcombine.high %v3490_v45, %v3490_v45  ;;  %v3499_v29 = vcombine.high %v3497_v53, %v3497_v53 }
 0x150   : > { %3613 = vst.msk [vmem:[#allocation2 + $0xb2] sm:$0x1] %vm2805_vm2, %v3580_v17  ;;  %2870 = vst.msk [vmem:[#allocation2 + $0x5b] sm:$0x1] %vm2805_vm2, %v2307_v22  ;;  %v3506_v31 = vrot.slane %v3490_v45, %v17729_v7  ;;  %v3513_v32 = vrot.slane %v3497_v53, %v17729_v7  ;;  %v2331_v33 = vcombine.high %v2321_v24, %v2321_v24 }
 0x151   : > { %2874 = vst.msk [vmem:[#allocation2 + $0x5f] sm:$0x1] %vm2805_vm2, %v2314_v23  ;;  %v2332_v34 = vcombine.high %v2328_v25, %v2328_v25  ;;  %2871 = vst.msk [vmem:[#allocation2 + $0x5c] sm:$0x1] %vm2805_vm2, %v2321_v24  ;;  %v3520_v35 = vrot.slane %v3498_v28, %v17729_v7  ;;  %v3527_v4 = vrot.slane %v3499_v29, %v17729_v7 }
 0x152   : > { %2872 = vst.msk [vmem:[#allocation2 + $0x5d] sm:$0x1] %vm2805_vm2, %v2329_v26  ;;  %2875 = vst.msk [vmem:[#allocation2 + $0x60] sm:$0x1] %vm2805_vm2, %v2328_v25  ;;  %v3528_v30 = vcombine.high %v3506_v31, %v3506_v31  ;;  %v3529_v14 = vcombine.high %v3513_v32, %v3513_v32 }
 0x153   : > { %2876 = vst.msk [vmem:[#allocation2 + $0x61] sm:$0x1] %vm2805_vm2, %v2330_v27  ;;  %3598 = vst.msk [vmem:[#allocation2 + $0xa3] sm:$0x1] %vm2805_vm2, %v3506_v31  ;;  %v3530_v36 = vcombine.high %v3520_v35, %v3520_v35  ;;  %v3531_v37 = vcombine.high %v3527_v4, %v3527_v4 }
 0x154   : > { %3602 = vst.msk [vmem:[#allocation2 + $0xa7] sm:$0x1] %vm2805_vm2, %v3513_v32  ;;  %2873 = vst.msk [vmem:[#allocation2 + $0x5e] sm:$0x1] %vm2805_vm2, %v2331_v33  ;;  %3617 = sbr.rel (%p16823_p7) target bundleno = 354 (0x162), region = 60 }
 0x155   : > { %2877 = vst.msk [vmem:[#allocation2 + $0x62] sm:$0x1] %vm2805_vm2, %v2332_v34  ;;  %3599 = vst.msk [vmem:[#allocation2 + $0xa4] sm:$0x1] %vm2805_vm2, %v3520_v35 }
 0x156   : > { %3600 = vst.msk [vmem:[#allocation2 + $0xa5] sm:$0x1] %vm2805_vm2, %v3528_v30  ;;  %3603 = vst.msk [vmem:[#allocation2 + $0xa8] sm:$0x1] %vm2805_vm2, %v3527_v4 }
 0x157   : > { %3604 = vst.msk [vmem:[#allocation2 + $0xa9] sm:$0x1] %vm2805_vm2, %v3529_v14  ;;  %3601 = vst.msk [vmem:[#allocation2 + $0xa6] sm:$0x1] %vm2805_vm2, %v3530_v36 }
 0x158   : > { %3605 = vst.msk [vmem:[#allocation2 + $0xaa] sm:$0x1] %vm2805_vm2, %v3531_v37 }
 0x159   : > { %v17630_v38 = vmov 0  }
 0x15a   : > { %3618 = vst.msk [vmem:[#allocation2 + $0x1] sm:$0x1] %vm2805_vm2, %v17630_v38  ;;  %3619 = vst.msk [vmem:[#allocation2 + $0x2] sm:$0x1] %vm2805_vm2, %v17630_v38 }
 0x15b   : > { %3620 = vst.msk [vmem:[#allocation2 + $0x3] sm:$0x1] %vm2805_vm2, %v17630_v38  ;;  %3621 = vst.msk [vmem:[#allocation2 + $0x4] sm:$0x1] %vm2805_vm2, %v17630_v38 }
 0x15c   : > { %3622 = vst.msk [vmem:[#allocation2 + $0x5] sm:$0x1] %vm2805_vm2, %v17630_v38  ;;  %3623 = vst.msk [vmem:[#allocation2 + $0x6] sm:$0x1] %vm2805_vm2, %v17630_v38 }
 0x15d   : > { %3624 = vst.msk [vmem:[#allocation2 + $0x7] sm:$0x1] %vm2805_vm2, %v17630_v38  ;;  %3625 = vst.msk [vmem:[#allocation2 + $0x8] sm:$0x1] %vm2805_vm2, %v17630_v38 }
 0x15e   : > { %3626 = vst.msk [vmem:[#allocation2 + $0x9] sm:$0x1] %vm2805_vm2, %v17630_v38  ;;  %3627 = vst.msk [vmem:[#allocation2 + $0xa] sm:$0x1] %vm2805_vm2, %v17630_v38 }
 0x15f   : > { %3628 = vst.msk [vmem:[#allocation2 + $0xb] sm:$0x1] %vm2805_vm2, %v17630_v38  ;;  %3629 = vst.msk [vmem:[#allocation2 + $0xc] sm:$0x1] %vm2805_vm2, %v17630_v38 }
 0x160   : > { %3630 = vst.msk [vmem:[#allocation2 + $0xd] sm:$0x1] %vm2805_vm2, %v17630_v38  ;;  %3631 = vst.msk [vmem:[#allocation2 + $0xe] sm:$0x1] %vm2805_vm2, %v17630_v38 }
 0x161   : > { %3632 = vst.msk [vmem:[#allocation2 + $0xf] sm:$0x1] %vm2805_vm2, %v17630_v38  ;;  %3633 = vst.msk [vmem:[#allocation2 + $0x10] sm:$0x1] %vm2805_vm2, %v17630_v38 }
 0x162 PF: > { %p16824_p8 = scmp.ne.s32.totalorder %s17690_s10, 1 }
 0x164   : > { %3637 = sbr.rel (%p16824_p8) target bundleno = 370 (0x172), region = 64 }
 0x169   : > { %v17631_v39 = vmov 0  }
 0x16a   : > { %3638 = vst.msk [vmem:[#allocation2 + $0xa3] sm:$0x1] %vm2805_vm2, %v17631_v39  ;;  %3639 = vst.msk [vmem:[#allocation2 + $0xa4] sm:$0x1] %vm2805_vm2, %v17631_v39 }
 0x16b   : > { %3640 = vst.msk [vmem:[#allocation2 + $0xa5] sm:$0x1] %vm2805_vm2, %v17631_v39  ;;  %3641 = vst.msk [vmem:[#allocation2 + $0xa6] sm:$0x1] %vm2805_vm2, %v17631_v39 }
 0x16c   : > { %3642 = vst.msk [vmem:[#allocation2 + $0xa7] sm:$0x1] %vm2805_vm2, %v17631_v39  ;;  %3643 = vst.msk [vmem:[#allocation2 + $0xa8] sm:$0x1] %vm2805_vm2, %v17631_v39 }
 0x16d   : > { %3644 = vst.msk [vmem:[#allocation2 + $0xa9] sm:$0x1] %vm2805_vm2, %v17631_v39  ;;  %3645 = vst.msk [vmem:[#allocation2 + $0xaa] sm:$0x1] %vm2805_vm2, %v17631_v39 }
 0x16e   : > { %3646 = vst.msk [vmem:[#allocation2 + $0xab] sm:$0x1] %vm2805_vm2, %v17631_v39  ;;  %3647 = vst.msk [vmem:[#allocation2 + $0xac] sm:$0x1] %vm2805_vm2, %v17631_v39 }
 0x16f   : > { %3648 = vst.msk [vmem:[#allocation2 + $0xad] sm:$0x1] %vm2805_vm2, %v17631_v39  ;;  %3649 = vst.msk [vmem:[#allocation2 + $0xae] sm:$0x1] %vm2805_vm2, %v17631_v39 }
 0x170   : > { %3650 = vst.msk [vmem:[#allocation2 + $0xaf] sm:$0x1] %vm2805_vm2, %v17631_v39  ;;  %3651 = vst.msk [vmem:[#allocation2 + $0xb0] sm:$0x1] %vm2805_vm2, %v17631_v39 }
 0x171   : > { %3652 = vst.msk [vmem:[#allocation2 + $0xb1] sm:$0x1] %vm2805_vm2, %v17631_v39  ;;  %3653 = vst.msk [vmem:[#allocation2 + $0xb2] sm:$0x1] %vm2805_vm2, %v17631_v39 }
 0x172 PF: > { %v16825_v40 = vld [vmem:[%s20985_s5 + $0x1] sm:$0x1]  ;;  %vm4895_vm3 = vcmask 1040384   ;;  %v3805_v41 = vld [vmem:[#allocation2 + $0x2] sm:$0x1]  ;;  %v17632_v49 = vmov 0  }
 0x173   : > { %v3804_v6 = vld [vmem:[#allocation2 + $0x1] sm:$0x1]  ;;  %17596 = vmatprep.subr.msk.bf16.mxu1 %vm4895_vm3, %v16825_v40  ;;  %v4897_v15 = vsel %vm4895_vm3, %v16825_v40, 0  ;;  %v3806_v42 = vld [vmem:[#allocation2 + $0x3] sm:$0x1]  ;;  %vm4846_vm4 = vcmask 15360  }
 0x174   : > { %17251 = vmatpush3.bf16.msra.mxu1 %v4897_v15  ;;  %v3807_v43 = vld [vmem:[#allocation2 + $0x4] sm:$0x1]  ;;  %v3808_v44 = vld [vmem:[#allocation2 + $0x5] sm:$0x1]  ;;  %v3809_v47 = vld [vmem:[#allocation2 + $0x6] sm:$0x1]  ;;  %v4062_v48 = vcombine.low %v3804_v6, %v3805_v41 }
 0x175   : > { %3654 = vst.msk [vmem:[#allocation2] sm:$0x1] %vm2805_vm2, %v17632_v49  ;;  %3655 = vst.msk [vmem:[#allocation2 + $0x12] sm:$0x1] %vm2805_vm2, %v17632_v49  ;;  %v3810_v2 = vld [vmem:[#allocation2 + $0x7] sm:$0x1]  ;;  %v4063_v50 = vcombine.low %v3806_v42, %v3807_v43  ;;  %v4064_v51 = vcombine.low %v3808_v44, %v3809_v47 }
 0x176   : > { %3656 = vst.msk [vmem:[#allocation2 + $0x24] sm:$0x1] %vm2805_vm2, %v17632_v49  ;;  %3657 = vst.msk [vmem:[#allocation2 + $0x36] sm:$0x1] %vm2805_vm2, %v17632_v49  ;;  %v3811_v63 = vld [vmem:[#allocation2 + $0x8] sm:$0x1]  ;;  %v4072_v55 = vrot.slane %v4062_v48, %v17729_v7 }
 0x177   : > { %3658 = vst.msk [vmem:[#allocation2 + $0x48] sm:$0x1] %vm2805_vm2, %v17632_v49  ;;  %3659 = vst.msk [vmem:[#allocation2 + $0x5a] sm:$0x1] %vm2805_vm2, %v17632_v49  ;;  %v16858_v52 = vld [vmem:[%s20985_s5 + $0x2] sm:$0x1]  ;;  %v4065_v54 = vcombine.low %v3810_v2, %v3811_v63  ;;  %v4079_v0 = vrot.slane %v4063_v50, %v17729_v7  ;;  %v4086_v60 = vrot.slane %v4064_v51, %v17729_v7 }
 0x178   : > { %3660 = vst.msk [vmem:[#allocation2 + $0x6c] sm:$0x1] %vm2805_vm2, %v17632_v49  ;;  %3661 = vst.msk [vmem:[#allocation2 + $0x7e] sm:$0x1] %vm2805_vm2, %v17632_v49  ;;  %17598 = vmatprep.subr.msk.bf16.mxu1 %vm4895_vm3, %v16858_v52  ;;  %v3812_v56 = vld [vmem:[#allocation2 + $0x9] sm:$0x1] }
 0x179   : > { %3662 = vst.msk [vmem:[#allocation2 + $0x90] sm:$0x1] %vm2805_vm2, %v17632_v49  ;;  %3663 = vst.msk [vmem:[#allocation2 + $0xa2] sm:$0x1] %vm2805_vm2, %v17632_v49  ;;  %v3813_v57 = vld [vmem:[#allocation2 + $0xa] sm:$0x1]  ;;  %v4093_v58 = vrot.slane %v4065_v54, %v17729_v7  ;;  %v4094_v11 = vcombine.low %v4072_v55, %v4079_v0 }
 0x17a   : > { %3665 = vst.msk [vmem:[#allocation2 + $0x11] sm:$0x1] %vm2805_vm2, %v17632_v49  ;;  %3666 = vst.msk [vmem:[#allocation2 + $0x23] sm:$0x1] %vm2805_vm2, %v17632_v49  ;;  %v3814_v59 = vld [vmem:[#allocation2 + $0xb] sm:$0x1]  ;;  %v4111_v3 = vcombine.low %v3812_v56, %v3813_v57 }
 0x17b   : > { %3667 = vst.msk [vmem:[#allocation2 + $0x35] sm:$0x1] %vm2805_vm2, %v17632_v49  ;;  %3668 = vst.msk [vmem:[#allocation2 + $0x47] sm:$0x1] %vm2805_vm2, %v17632_v49  ;;  %v3815_v46 = vld [vmem:[#allocation2 + $0xc] sm:$0x1]  ;;  %v4095_v20 = vcombine.low %v4086_v60, %v4093_v58  ;;  %v4102_v24 = vrot.slane %v4094_v11, %v17729_v7 }
 0x17c   : > { %3669 = vst.msk [vmem:[#allocation2 + $0x59] sm:$0x1] %vm2805_vm2, %v17632_v49  ;;  %3670 = vst.msk [vmem:[#allocation2 + $0x6b] sm:$0x1] %vm2805_vm2, %v17632_v49  ;;  %v3816_v61 = vld [vmem:[#allocation2 + $0xd] sm:$0x1]  ;;  %v4112_v9 = vcombine.low %v3814_v59, %v3815_v46  ;;  %v4121_v16 = vrot.slane %v4111_v3, %v17729_v7 }
 0x17d   : > { %3671 = vst.msk [vmem:[#allocation2 + $0x7d] sm:$0x1] %vm2805_vm2, %v17632_v49  ;;  %3672 = vst.msk [vmem:[#allocation2 + $0x8f] sm:$0x1] %vm2805_vm2, %v17632_v49  ;;  %v3817_v62 = vld [vmem:[#allocation2 + $0xe] sm:$0x1]  ;;  %v4109_v32 = vrot.slane %v4095_v20, %v17729_v7 }
 0x17e   : > { %3673 = vst.msk [vmem:[#allocation2 + $0xa1] sm:$0x1] %vm2805_vm2, %v17632_v49  ;;  %3674 = vst.msk [vmem:[#allocation2 + $0xb3] sm:$0x1] %vm2805_vm2, %v17632_v49  ;;  %v3818_v1 = vld [vmem:[#allocation2 + $0xf] sm:$0x1]  ;;  %v4113_v10 = vcombine.low %v3816_v61, %v3817_v62  ;;  %v4128_v21 = vrot.slane %v4112_v9, %v17729_v7 }
 0x17f   : > { %v3819_v8 = vld [vmem:[#allocation2 + $0x10] sm:$0x1]  ;;  %v18522_v12 = vsel %vm4895_vm3, %v16858_v52, 0  ;;  %v3803_v17 = vld [vmem:[%s20985_s5] sm:$0x1]  ;;  %v4110_v15 = vcombine.low %v4102_v24, %v4109_v32  ;;  %vm16459_vm5 = vcmask 25600  }
 0x180   : > { %v4114_v13 = vcombine.low %v3818_v1, %v3819_v8  ;;  %v3820_v18 = vld [vmem:[#allocation2 + $0x13] sm:$0x1]  ;;  %v3821_v19 = vld [vmem:[#allocation2 + $0x14] sm:$0x1]  ;;  %v4135_v22 = vrot.slane %v4113_v10, %v17729_v7  ;;  %17597 = vmatprep.subr.msk.bf16.mxu0 %vm4895_vm3, %v3803_v17  ;;  %v6021_v23 = vsel %vm4895_vm3, %v3803_v17, 0  ;;  %v4143_v33 = vcombine.low %v4121_v16, %v4128_v21 }
 0x181   : > { %v3822_v45 = vld [vmem:[#allocation2 + $0x15] sm:$0x1]  ;;  %v3823_v53 = vld [vmem:[#allocation2 + $0x16] sm:$0x1]  ;;  %17285 = vmatpush3.bf16.msra.mxu0 %v6021_v23  ;;  %v3824_v26 = vld [vmem:[#allocation2 + $0x17] sm:$0x1]  ;;  %v4160_v29 = vcombine.low %v3820_v18, %v3821_v19  ;;  %17252 = vmatprep.mubr.msk.bf16.mxu1 %vm4846_vm4, %v4110_v15 }
 0x182   : > { %v4142_v25 = vrot.slane %v4114_v13, %v17729_v7  ;;  %v3825_v27 = vld [vmem:[#allocation2 + $0x18] sm:$0x1]  ;;  %v3826_v28 = vld [vmem:[#allocation2 + $0x19] sm:$0x1]  ;;  %v4161_v31 = vcombine.low %v3822_v45, %v3823_v53  ;;  %v3827_v34 = vld [vmem:[#allocation2 + $0x1a] sm:$0x1]  ;;  %v4151_v41 = vrot.slane %v4143_v33, %v17729_v7 }
 0x183   : > { %v4162_v35 = vcombine.low %v3824_v26, %v3825_v27  ;;  %v3675_v4 = vld [vmem:[#allocation2] sm:$0x1]  ;;  %v3676_v30 = vld [vmem:[#allocation2 + $0x1] sm:$0x1]  ;;  %v4163_v36 = vcombine.low %v3826_v28, %v3827_v34  ;;  %v4170_v37 = vrot.slane %v4160_v29, %v17729_v7  ;;  %v3677_v39 = vld [vmem:[#allocation2 + $0x2] sm:$0x1] }
 0x184   : > { %v4144_v14 = vcombine.low %v4135_v22, %v4142_v25  ;;  %v4177_v38 = vrot.slane %v4161_v31, %v17729_v7  ;;  %v3678_v40 = vld [vmem:[#allocation2 + $0x3] sm:$0x1]  ;;  %v3679_v6 = vld [vmem:[#allocation2 + $0x4] sm:$0x1]  ;;  %v3680_v43 = vld [vmem:[#allocation2 + $0x5] sm:$0x1]  ;;  %v5188_v48 = vcombine.low %v3675_v4, %v3676_v30 }
 0x185   : > { %v4184_v42 = vrot.slane %v4162_v35, %v17729_v7  ;;  %v3681_v44 = vld [vmem:[#allocation2 + $0x6] sm:$0x1]  ;;  %v3682_v47 = vld [vmem:[#allocation2 + $0x7] sm:$0x1]  ;;  %v4191_v2 = vrot.slane %v4163_v36, %v17729_v7  ;;  %v5189_v50 = vcombine.low %v3677_v39, %v3678_v40  ;;  %v3828_v51 = vld [vmem:[#allocation2 + $0x1b] sm:$0x1]  ;;  %v5190_v55 = vcombine.low %v3679_v6, %v3680_v43 }
 0x186   : > { %v4158_v49 = vrot.slane %v4144_v14, %v17729_v7  ;;  %v4192_v63 = vcombine.low %v4170_v37, %v4177_v38  ;;  %v3829_v52 = vld [vmem:[#allocation2 + $0x1c] sm:$0x1]  ;;  %v3830_v54 = vld [vmem:[#allocation2 + $0x1d] sm:$0x1]  ;;  %v5191_v56 = vcombine.low %v3681_v44, %v3682_v47  ;;  %v5198_v57 = vrot.slane %v5188_v48, %v17729_v7  ;;  %v3831_v59 = vld [vmem:[#allocation2 + $0x1e] sm:$0x1] }
 0x187   : > { %v3832_v0 = vld [vmem:[#allocation2 + $0x1f] sm:$0x1]  ;;  %v3833_v60 = vld [vmem:[#allocation2 + $0x20] sm:$0x1]  ;;  %v4209_v46 = vcombine.low %v3828_v51, %v3829_v52  ;;  %v4193_v62 = vcombine.low %v4184_v42, %v4191_v2  ;;  %v5205_v58 = vrot.slane %v5189_v50, %v17729_v7  ;;  %v3834_v1 = vld [vmem:[#allocation2 + $0x21] sm:$0x1]  ;;  %v5212_v10 = vrot.slane %v5190_v55, %v17729_v7 }
 0x188   : > { %v4159_v61 = vcombine.low %v4151_v41, %v4158_v49  ;;  %v4200_v3 = vrot.slane %v4192_v63, %v17729_v7  ;;  %v3835_v8 = vld [vmem:[#allocation2 + $0x22] sm:$0x1]  ;;  %v3683_v9 = vld [vmem:[#allocation2 + $0x8] sm:$0x1]  ;;  %v5219_v11 = vrot.slane %v5191_v56, %v17729_v7  ;;  %v4210_v13 = vcombine.low %v3830_v54, %v3831_v59  ;;  %v3684_v17 = vld [vmem:[#allocation2 + $0x9] sm:$0x1] }
 0x189   : > { %v4211_v16 = vcombine.low %v3832_v0, %v3833_v60  ;;  %v3685_v18 = vld [vmem:[#allocation2 + $0xa] sm:$0x1]  ;;  %v3686_v19 = vld [vmem:[#allocation2 + $0xb] sm:$0x1]  ;;  %v4207_v20 = vrot.slane %v4193_v62, %v17729_v7  ;;  %v5220_v21 = vcombine.low %v5198_v57, %v5205_v58  ;;  %v4212_v22 = vcombine.low %v3834_v1, %v3835_v8  ;;  %v3687_v45 = vld [vmem:[#allocation2 + $0xc] sm:$0x1] }
 0x18a   : > { %17253 = vmatmul.mubr.msk.bf16.vlgmr.msra.gmra.mxu1 %vm4846_vm4, %v4159_v61  ;;  %v4219_v23 = vrot.slane %v4209_v46, %v17729_v7  ;;  %v3688_v53 = vld [vmem:[#allocation2 + $0xd] sm:$0x1]  ;;  %v3689_v24 = vld [vmem:[#allocation2 + $0xe] sm:$0x1]  ;;  %v5221_v25 = vcombine.low %v5212_v10, %v5219_v11  ;;  %v4226_v26 = vrot.slane %v4210_v13, %v17729_v7  ;;  %v3690_v28 = vld [vmem:[#allocation2 + $0xf] sm:$0x1]  ;;  %v5237_v29 = vcombine.low %v3683_v9, %v3684_v17 }
 0x18b   : > { %17319 = vmatpush3.bf16.msra.mxu1 %v18522_v12  ;;  %v4233_v27 = vrot.slane %v4211_v16, %v17729_v7  ;;  %v3836_v31 = vld [vmem:[#allocation2 + $0x25] sm:$0x1]  ;;  %v3837_v32 = vld [vmem:[#allocation2 + $0x26] sm:$0x1]  ;;  %v4208_v33 = vcombine.low %v4200_v3, %v4207_v20  ;;  %v5228_v34 = vrot.slane %v5220_v21, %v17729_v7  ;;  %v4240_v35 = vrot.slane %v4212_v22, %v17729_v7  ;;  %v3838_v30 = vld [vmem:[#allocation2 + $0x27] sm:$0x1] }
 0x18c   : > { %v5238_v4 = vcombine.low %v3685_v18, %v3686_v19  ;;  %v3839_v14 = vld [vmem:[#allocation2 + $0x28] sm:$0x1]  ;;  %v5235_v36 = vrot.slane %v5221_v25, %v17729_v7  ;;  %v4241_v12 = vcombine.low %v4219_v23, %v4226_v26  ;;  %v5239_v37 = vcombine.low %v3687_v45, %v3688_v53  ;;  %v3840_v39 = vld [vmem:[#allocation2 + $0x29] sm:$0x1]  ;;  %v3841_v40 = vld [vmem:[#allocation2 + $0x2a] sm:$0x1] }
 0x18d   : > { %v5240_v38 = vcombine.low %v3689_v24, %v3690_v28  ;;  %v3842_v6 = vld [vmem:[#allocation2 + $0x2b] sm:$0x1]  ;;  %17256 = vmatprep.mubr.msk.bf16.mxu1 %vm4846_vm4, %v4208_v33  ;;  %v4242_v15 = vcombine.low %v4233_v27, %v4240_v35  ;;  %v5247_v41 = vrot.slane %v5237_v29, %v17729_v7  ;;  %v3843_v43 = vld [vmem:[#allocation2 + $0x2c] sm:$0x1]  ;;  %v4258_v44 = vcombine.low %v3836_v31, %v3837_v32  ;;  %v3691_v47 = vld [vmem:[#allocation2 + $0x12] sm:$0x1] }
 0x18e   : > { %v5254_v42 = vrot.slane %v5238_v4, %v17729_v7  ;;  %v3692_v48 = vld [vmem:[#allocation2 + $0x13] sm:$0x1]  ;;  %v5236_v49 = vcombine.low %v5228_v34, %v5235_v36  ;;  %v4249_v2 = vrot.slane %v4241_v12, %v17729_v7  ;;  %v5261_v63 = vrot.slane %v5239_v37, %v17729_v7  ;;  %v3693_v51 = vld [vmem:[#allocation2 + $0x14] sm:$0x1]  ;;  %v3694_v52 = vld [vmem:[#allocation2 + $0x15] sm:$0x1] }
 0x18f   : > { %v5268_v50 = vrot.slane %v5240_v38, %v17729_v7  ;;  %v4256_v54 = vrot.slane %v4242_v15, %v17729_v7  ;;  %v4259_v56 = vcombine.low %v3838_v30, %v3839_v14  ;;  %v4260_v57 = vcombine.low %v3840_v39, %v3841_v40  ;;  %v3695_v59 = vld [vmem:[#allocation2 + $0x16] sm:$0x1]  ;;  %v3696_v0 = vld [vmem:[#allocation2 + $0x17] sm:$0x1]  ;;  %v3697_v60 = vld [vmem:[#allocation2 + $0x18] sm:$0x1] }
 0x190   : > { %v5269_v55 = vcombine.low %v5247_v41, %v5254_v42  ;;  %17286 = vmatprep.mubr.msk.bf16.mxu0 %vm4846_vm4, %v5236_v49  ;;  %v4261_v61 = vcombine.low %v3842_v6, %v3843_v43  ;;  %v4268_v62 = vrot.slane %v4258_v44, %v17729_v7  ;;  %v3698_v3 = vld [vmem:[#allocation2 + $0x19] sm:$0x1]  ;;  %v5286_v58 = vcombine.low %v3691_v47, %v3692_v48  ;;  %v3844_v1 = vld [vmem:[#allocation2 + $0x2d] sm:$0x1]  ;;  %v3845_v8 = vld [vmem:[#allocation2 + $0x2e] sm:$0x1] }
 0x191   : > { %v5270_v46 = vcombine.low %v5261_v63, %v5268_v50  ;;  %v4257_v9 = vcombine.low %v4249_v2, %v4256_v54  ;;  %v4275_v11 = vrot.slane %v4259_v56, %v17729_v7  ;;  %v4282_v13 = vrot.slane %v4260_v57, %v17729_v7  ;;  %v3846_v16 = vld [vmem:[#allocation2 + $0x2f] sm:$0x1]  ;;  %v3847_v21 = vld [vmem:[#allocation2 + $0x30] sm:$0x1]  ;;  %v3848_v22 = vld [vmem:[#allocation2 + $0x31] sm:$0x1] }
 0x192   : > { %v5277_v10 = vrot.slane %v5269_v55, %v17729_v7  ;;  %v4289_v18 = vrot.slane %v4261_v61, %v17729_v7  ;;  %v5287_v19 = vcombine.low %v3693_v51, %v3694_v52  ;;  %v5288_v20 = vcombine.low %v3695_v59, %v3696_v0  ;;  %v3849_v23 = vld [vmem:[#allocation2 + $0x32] sm:$0x1]  ;;  %v3850_v25 = vld [vmem:[#allocation2 + $0x33] sm:$0x1]  ;;  %v3851_v26 = vld [vmem:[#allocation2 + $0x34] sm:$0x1] }
 0x193   : > { %v5284_v17 = vrot.slane %v5270_v46, %v17729_v7  ;;  %17257 = vmatmul.mubr.msk.bf16.gmra.mxu1 %vm4846_vm4, %v4257_v9  ;;  %v4290_v45 = vcombine.low %v4268_v62, %v4275_v11  ;;  %v5289_v53 = vcombine.low %v3697_v60, %v3698_v3  ;;  %v5296_v24 = vrot.slane %v5286_v58, %v17729_v7  ;;  %v3699_v33 = vld [vmem:[#allocation2 + $0x1a] sm:$0x1]  ;;  %v3700_v34 = vld [vmem:[#allocation2 + $0x1b] sm:$0x1]  ;;  %v3701_v36 = vld [vmem:[#allocation2 + $0x1c] sm:$0x1] }
 0x194   : > { %v4307_v27 = vcombine.low %v3844_v1, %v3845_v8  ;;  %v4291_v29 = vcombine.low %v4282_v13, %v4289_v18  ;;  %v5303_v31 = vrot.slane %v5287_v19, %v17729_v7  ;;  %v5310_v32 = vrot.slane %v5288_v20, %v17729_v7  ;;  %v3702_v12 = vld [vmem:[#allocation2 + $0x1d] sm:$0x1]  ;;  %v3703_v37 = vld [vmem:[#allocation2 + $0x1e] sm:$0x1]  ;;  %v3704_v15 = vld [vmem:[#allocation2 + $0x1f] sm:$0x1] }
 0x195   : > { %v5285_v28 = vcombine.low %v5277_v10, %v5284_v17  ;;  %v4298_v35 = vrot.slane %v4290_v45, %v17729_v7  ;;  %v5317_v4 = vrot.slane %v5289_v53, %v17729_v7  ;;  %v4308_v30 = vcombine.low %v3846_v16, %v3847_v21  ;;  %v3705_v41 = vld [vmem:[#allocation2 + $0x20] sm:$0x1]  ;;  %v3706_v42 = vld [vmem:[#allocation2 + $0x21] sm:$0x1]  ;;  %v3852_v49 = vld [vmem:[#allocation2 + $0x37] sm:$0x1] }
 0x196   : > { %v4309_v14 = vcombine.low %v3848_v22, %v3849_v23  ;;  %v4305_v38 = vrot.slane %v4291_v29, %v17729_v7  ;;  %v5318_v39 = vcombine.low %v5296_v24, %v5303_v31  ;;  %v4310_v40 = vcombine.low %v3850_v25, %v3851_v26  ;;  %v3853_v2 = vld [vmem:[#allocation2 + $0x38] sm:$0x1]  ;;  %v3854_v54 = vld [vmem:[#allocation2 + $0x39] sm:$0x1]  ;;  %v3855_v55 = vld [vmem:[#allocation2 + $0x3a] sm:$0x1] }
 0x197   : > { %17287 = vmatmul.mubr.msk.bf16.vlgmr.msra.gmra.mxu0 %vm4846_vm4, %v5285_v28  ;;  %v4317_v6 = vrot.slane %v4307_v27, %v17729_v7  ;;  %v5319_v43 = vcombine.low %v5310_v32, %v5317_v4  ;;  %v4324_v44 = vrot.slane %v4308_v30, %v17729_v7  ;;  %v5335_v48 = vcombine.low %v3699_v33, %v3700_v34  ;;  %v3856_v60 = vld [vmem:[#allocation2 + $0x3b] sm:$0x1]  ;;  %v3857_v46 = vld [vmem:[#allocation2 + $0x3c] sm:$0x1]  ;;  %v3858_v61 = vld [vmem:[#allocation2 + $0x3d] sm:$0x1] }
 0x198   : > { %v4331_v47 = vrot.slane %v4309_v14, %v17729_v7  ;;  %v4306_v63 = vcombine.low %v4298_v35, %v4305_v38  ;;  %v5326_v50 = vrot.slane %v5318_v39, %v17729_v7  ;;  %v4338_v51 = vrot.slane %v4310_v40, %v17729_v7  ;;  %v3859_v1 = vld [vmem:[#allocation2 + $0x3e] sm:$0x1]  ;;  %v3707_v9 = vld [vmem:[#allocation2 + $0x24] sm:$0x1]  ;;  %v3708_v10 = vld [vmem:[#allocation2 + $0x25] sm:$0x1] }
 0x199   : > { %v5336_v52 = vcombine.low %v3701_v36, %v3702_v12  ;;  %v5333_v56 = vrot.slane %v5319_v43, %v17729_v7  ;;  %v4339_v57 = vcombine.low %v4317_v6, %v4324_v44  ;;  %v5337_v59 = vcombine.low %v3703_v37, %v3704_v15  ;;  %v3709_v18 = vld [vmem:[#allocation2 + $0x26] sm:$0x1]  ;;  %v3710_v19 = vld [vmem:[#allocation2 + $0x27] sm:$0x1]  ;;  %v3711_v45 = vld [vmem:[#allocation2 + $0x28] sm:$0x1] }
 0x19a   : > { %v5338_v0 = vcombine.low %v3705_v41, %v3706_v42  ;;  %17260 = vmatprep.mubr.msk.bf16.mxu1 %vm4846_vm4, %v4306_v63  ;;  %v4340_v62 = vcombine.low %v4331_v47, %v4338_v51  ;;  %v5345_v3 = vrot.slane %v5335_v48, %v17729_v7  ;;  %v4356_v8 = vcombine.low %v3852_v49, %v3853_v2  ;;  %v3712_v53 = vld [vmem:[#allocation2 + $0x29] sm:$0x1]  ;;  %v3713_v24 = vld [vmem:[#allocation2 + $0x2a] sm:$0x1]  ;;  %v3714_v28 = vld [vmem:[#allocation2 + $0x2b] sm:$0x1] }
 0x19b   : > { %v5352_v58 = vrot.slane %v5336_v52, %v17729_v7  ;;  %v5334_v11 = vcombine.low %v5326_v50, %v5333_v56  ;;  %v4347_v13 = vrot.slane %v4339_v57, %v17729_v7  ;;  %v5359_v16 = vrot.slane %v5337_v59, %v17729_v7  ;;  %v3860_v31 = vld [vmem:[#allocation2 + $0x3f] sm:$0x1]  ;;  %v3861_v32 = vld [vmem:[#allocation2 + $0x40] sm:$0x1]  ;;  %v3862_v30 = vld [vmem:[#allocation2 + $0x41] sm:$0x1] }
 0x19c   : > { %v5366_v17 = vrot.slane %v5338_v0, %v17729_v7  ;;  %v4354_v20 = vrot.slane %v4340_v62, %v17729_v7  ;;  %v4357_v22 = vcombine.low %v3854_v54, %v3855_v55  ;;  %v4358_v23 = vcombine.low %v3856_v60, %v3857_v46  ;;  %v3863_v38 = vld [vmem:[#allocation2 + $0x42] sm:$0x1]  ;;  %v3864_v39 = vld [vmem:[#allocation2 + $0x43] sm:$0x1]  ;;  %v3865_v40 = vld [vmem:[#allocation2 + $0x44] sm:$0x1] }
 0x19d   : > { %v5367_v21 = vcombine.low %v5345_v3, %v5352_v58  ;;  %17290 = vmatprep.mubr.msk.bf16.mxu0 %vm4846_vm4, %v5334_v11  ;;  %v4359_v26 = vcombine.low %v3858_v61, %v3859_v1  ;;  %v4366_v27 = vrot.slane %v4356_v8, %v17729_v7  ;;  %v5384_v29 = vcombine.low %v3707_v9, %v3708_v10  ;;  %v3866_v42 = vld [vmem:[#allocation2 + $0x45] sm:$0x1]  ;;  %v3867_v43 = vld [vmem:[#allocation2 + $0x46] sm:$0x1]  ;;  %v3715_v63 = vld [vmem:[#allocation2 + $0x2c] sm:$0x1] }
 0x19e   : > { %v5368_v25 = vcombine.low %v5359_v16, %v5366_v17  ;;  %v4355_v33 = vcombine.low %v4347_v13, %v4354_v20  ;;  %v4373_v35 = vrot.slane %v4357_v22, %v17729_v7  ;;  %v4380_v4 = vrot.slane %v4358_v23, %v17729_v7  ;;  %v3716_v50 = vld [vmem:[#allocation2 + $0x2d] sm:$0x1]  ;;  %v3717_v56 = vld [vmem:[#allocation2 + $0x2e] sm:$0x1]  ;;  %v3718_v57 = vld [vmem:[#allocation2 + $0x2f] sm:$0x1] }
 0x19f   : > { %v5375_v34 = vrot.slane %v5367_v21, %v17729_v7  ;;  %v4387_v36 = vrot.slane %v4359_v26, %v17729_v7  ;;  %v5385_v12 = vcombine.low %v3709_v18, %v3710_v19  ;;  %v5386_v37 = vcombine.low %v3711_v45, %v3712_v53  ;;  %v3719_v59 = vld [vmem:[#allocation2 + $0x30] sm:$0x1]  ;;  %v3720_v62 = vld [vmem:[#allocation2 + $0x31] sm:$0x1]  ;;  %v3721_v3 = vld [vmem:[#allocation2 + $0x32] sm:$0x1] }
 0x1a0   : > { %v5382_v14 = vrot.slane %v5368_v25, %v17729_v7  ;;  %17261 = vmatmul.mubr.msk.bf16.gmra.mxu1 %vm4846_vm4, %v4355_v33  ;;  %v4388_v6 = vcombine.low %v4366_v27, %v4373_v35  ;;  %v5387_v15 = vcombine.low %v3713_v24, %v3714_v28  ;;  %v5394_v41 = vrot.slane %v5384_v29, %v17729_v7  ;;  %v3722_v58 = vld [vmem:[#allocation2 + $0x33] sm:$0x1]  ;;  %v3868_v11 = vld [vmem:[#allocation2 + $0x49] sm:$0x1]  ;;  %v3869_v13 = vld [vmem:[#allocation2 + $0x4a] sm:$0x1] }
 0x1a1   : > { %v4405_v44 = vcombine.low %v3860_v31, %v3861_v32  ;;  %v4389_v48 = vcombine.low %v4380_v4, %v4387_v36  ;;  %v5401_v49 = vrot.slane %v5385_v12, %v17729_v7  ;;  %v5408_v2 = vrot.slane %v5386_v37, %v17729_v7  ;;  %v3870_v20 = vld [vmem:[#allocation2 + $0x4b] sm:$0x1]  ;;  %v3871_v21 = vld [vmem:[#allocation2 + $0x4c] sm:$0x1]  ;;  %v3872_v24 = vld [vmem:[#allocation2 + $0x4d] sm:$0x1] }
 0x1a2   : > { %v5383_v47 = vcombine.low %v5375_v34, %v5382_v14  ;;  %v4396_v51 = vrot.slane %v4388_v6, %v17729_v7  ;;  %v5415_v52 = vrot.slane %v5387_v15, %v17729_v7  ;;  %v4406_v54 = vcombine.low %v3862_v30, %v3863_v38  ;;  %v3873_v25 = vld [vmem:[#allocation2 + $0x4e] sm:$0x1]  ;;  %v3874_v26 = vld [vmem:[#allocation2 + $0x4f] sm:$0x1]  ;;  %v3875_v31 = vld [vmem:[#allocation2 + $0x50] sm:$0x1] }
 0x1a3   : > { %v4407_v55 = vcombine.low %v3864_v39, %v3865_v40  ;;  %v4403_v0 = vrot.slane %v4389_v48, %v17729_v7  ;;  %v5416_v60 = vcombine.low %v5394_v41, %v5401_v49  ;;  %v4408_v46 = vcombine.low %v3866_v42, %v3867_v43  ;;  %v3723_v33 = vld [vmem:[#allocation2 + $0x36] sm:$0x1]  ;;  %v3724_v34 = vld [vmem:[#allocation2 + $0x37] sm:$0x1]  ;;  %v3725_v36 = vld [vmem:[#allocation2 + $0x38] sm:$0x1] }
 0x1a4   : > { %17291 = vmatmul.mubr.msk.bf16.gmra.mxu0 %vm4846_vm4, %v5383_v47  ;;  %v4415_v61 = vrot.slane %v4405_v44, %v17729_v7  ;;  %v5417_v1 = vcombine.low %v5408_v2, %v5415_v52  ;;  %v4422_v8 = vrot.slane %v4406_v54, %v17729_v7  ;;  %v5433_v10 = vcombine.low %v3715_v63, %v3716_v50  ;;  %v3726_v12 = vld [vmem:[#allocation2 + $0x39] sm:$0x1]  ;;  %v3727_v6 = vld [vmem:[#allocation2 + $0x3a] sm:$0x1]  ;;  %v3728_v15 = vld [vmem:[#allocation2 + $0x3b] sm:$0x1] }
 0x1a5   : > { %v4429_v9 = vrot.slane %v4407_v55, %v17729_v7  ;;  %v4404_v16 = vcombine.low %v4396_v51, %v4403_v0  ;;  %v5424_v17 = vrot.slane %v5416_v60, %v17729_v7  ;;  %v4436_v18 = vrot.slane %v4408_v46, %v17729_v7  ;;  %v3729_v41 = vld [vmem:[#allocation2 + $0x3c] sm:$0x1]  ;;  %v3730_v47 = vld [vmem:[#allocation2 + $0x3d] sm:$0x1]  ;;  %v3876_v49 = vld [vmem:[#allocation2 + $0x51] sm:$0x1] }
 0x1a6   : > { %v5434_v19 = vcombine.low %v3717_v56, %v3718_v57  ;;  %v5431_v22 = vrot.slane %v5417_v1, %v17729_v7  ;;  %v4437_v23 = vcombine.low %v4415_v61, %v4422_v8  ;;  %v5435_v45 = vcombine.low %v3719_v59, %v3720_v62  ;;  %v3877_v2 = vld [vmem:[#allocation2 + $0x52] sm:$0x1]  ;;  %v3878_v54 = vld [vmem:[#allocation2 + $0x53] sm:$0x1]  ;;  %v3879_v0 = vld [vmem:[#allocation2 + $0x54] sm:$0x1] }
 0x1a7   : > { %v5436_v53 = vcombine.low %v3721_v3, %v3722_v58  ;;  %17264 = vmatprep.mubr.msk.bf16.mxu1 %vm4846_vm4, %v4404_v16  ;;  %v4438_v27 = vcombine.low %v4429_v9, %v4436_v18  ;;  %v5443_v28 = vrot.slane %v5433_v10, %v17729_v7  ;;  %v4454_v32 = vcombine.low %v3868_v11, %v3869_v13  ;;  %v3880_v60 = vld [vmem:[#allocation2 + $0x55] sm:$0x1]  ;;  %v3881_v46 = vld [vmem:[#allocation2 + $0x56] sm:$0x1]  ;;  %v3882_v58 = vld [vmem:[#allocation2 + $0x57] sm:$0x1] }
 0x1a8   : > { %v5450_v29 = vrot.slane %v5434_v19, %v17729_v7  ;;  %v5432_v35 = vcombine.low %v5424_v17, %v5431_v22  ;;  %v4445_v4 = vrot.slane %v4437_v23, %v17729_v7  ;;  %v5457_v30 = vrot.slane %v5435_v45, %v17729_v7  ;;  %v3883_v1 = vld [vmem:[#allocation2 + $0x58] sm:$0x1]  ;;  %v3731_v16 = vld [vmem:[#allocation2 + $0x3e] sm:$0x1]  ;;  %v3732_v17 = vld [vmem:[#allocation2 + $0x3f] sm:$0x1] }
 0x1a9   : > { %v5464_v14 = vrot.slane %v5436_v53, %v17729_v7  ;;  %v4452_v37 = vrot.slane %v4438_v27, %v17729_v7  ;;  %v4455_v39 = vcombine.low %v3870_v20, %v3871_v21  ;;  %v4456_v40 = vcombine.low %v3872_v24, %v3873_v25  ;;  %v3733_v22 = vld [vmem:[#allocation2 + $0x40] sm:$0x1]  ;;  %v3734_v23 = vld [vmem:[#allocation2 + $0x41] sm:$0x1]  ;;  %v3735_v45 = vld [vmem:[#allocation2 + $0x42] sm:$0x1] }
 0x1aa   : > { %v5465_v38 = vcombine.low %v5443_v28, %v5450_v29  ;;  %17294 = vmatprep.mubr.msk.bf16.mxu0 %vm4846_vm4, %v5432_v35  ;;  %v4457_v43 = vcombine.low %v3874_v26, %v3875_v31  ;;  %v4464_v44 = vrot.slane %v4454_v32, %v17729_v7  ;;  %v5482_v48 = vcombine.low %v3723_v33, %v3724_v34  ;;  %v3736_v27 = vld [vmem:[#allocation2 + $0x43] sm:$0x1]  ;;  %v3737_v28 = vld [vmem:[#allocation2 + $0x44] sm:$0x1]  ;;  %v3738_v29 = vld [vmem:[#allocation2 + $0x45] sm:$0x1] }
 0x1ab   : > { %v5466_v42 = vcombine.low %v5457_v30, %v5464_v14  ;;  %v4453_v63 = vcombine.low %v4445_v4, %v4452_v37  ;;  %v4471_v51 = vrot.slane %v4455_v39, %v17729_v7  ;;  %v4478_v52 = vrot.slane %v4456_v40, %v17729_v7  ;;  %v3884_v35 = vld [vmem:[#allocation2 + $0x5b] sm:$0x1]  ;;  %v3885_v4 = vld [vmem:[#allocation2 + $0x5c] sm:$0x1]  ;;  %v3886_v37 = vld [vmem:[#allocation2 + $0x5d] sm:$0x1] }
 0x1ac   : > { %v5473_v50 = vrot.slane %v5465_v38, %v17729_v7  ;;  %v4485_v56 = vrot.slane %v4457_v43, %v17729_v7  ;;  %v5483_v57 = vcombine.low %v3725_v36, %v3726_v12  ;;  %v5484_v59 = vcombine.low %v3727_v6, %v3728_v15  ;;  %v3887_v38 = vld [vmem:[#allocation2 + $0x5e] sm:$0x1]  ;;  %v3890_v43 = vld [vmem:[#allocation2 + $0x61] sm:$0x1] }
 0x1ad   : > { %v5480_v55 = vrot.slane %v5466_v42, %v17729_v7  ;;  %17265 = vmatmul.mubr.msk.bf16.gmra.mxu1 %vm4846_vm4, %v4453_v63  ;;  %v4486_v61 = vcombine.low %v4464_v44, %v4471_v51  ;;  %v5485_v62 = vcombine.low %v3729_v41, %v3730_v47  ;;  %v5492_v3 = vrot.slane %v5482_v48, %v17729_v7  ;;  %v3888_v41 = vld [vmem:[#allocation2 + $0x5f] sm:$0x1]  ;;  %v3889_v42 = vld [vmem:[#allocation2 + $0x60] sm:$0x1]  ;;  %v3739_v63 = vld [vmem:[#allocation2 + $0x48] sm:$0x1] }
 0x1ae   : > { %v4503_v8 = vcombine.low %v3876_v49, %v3877_v2  ;;  %v4487_v10 = vcombine.low %v4478_v52, %v4485_v56  ;;  %v5499_v11 = vrot.slane %v5483_v57, %v17729_v7  ;;  %v5506_v13 = vrot.slane %v5484_v59, %v17729_v7  ;;  %v3891_v49 = vld [vmem:[#allocation2 + $0x62] sm:$0x1]  ;;  %v3741_v56 = vld [vmem:[#allocation2 + $0x4a] sm:$0x1]  ;;  %v3742_v57 = vld [vmem:[#allocation2 + $0x4b] sm:$0x1] }
 0x1af   : > { %v5481_v9 = vcombine.low %v5473_v50, %v5480_v55  ;;  %v4494_v18 = vrot.slane %v4486_v61, %v17729_v7  ;;  %v5513_v19 = vrot.slane %v5485_v62, %v17729_v7  ;;  %v4504_v20 = vcombine.low %v3878_v54, %v3879_v0  ;;  %v3740_v50 = vld [vmem:[#allocation2 + $0x49] sm:$0x1]  ;;  %v3743_v61 = vld [vmem:[#allocation2 + $0x4c] sm:$0x1]  ;;  %v3744_v62 = vld [vmem:[#allocation2 + $0x4d] sm:$0x1] }
 0x1b0   : > { %v4505_v21 = vcombine.low %v3880_v60, %v3881_v46  ;;  %v4501_v53 = vrot.slane %v4487_v10, %v17729_v7  ;;  %v5514_v24 = vcombine.low %v5492_v3, %v5499_v11  ;;  %v4506_v25 = vcombine.low %v3882_v58, %v3883_v1  ;;  %v3745_v3 = vld [vmem:[#allocation2 + $0x4e] sm:$0x1]  ;;  %v3892_v11 = vld [vmem:[#allocation2 + $0x63] sm:$0x1] }
 0x1b1   : > { %17295 = vmatmul.mubr.msk.bf16.gmra.mxu0 %vm4846_vm4, %v5481_v9  ;;  %v4513_v26 = vrot.slane %v4503_v8, %v17729_v7  ;;  %v5515_v31 = vcombine.low %v5506_v13, %v5513_v19  ;;  %v4520_v32 = vrot.slane %v4504_v20, %v17729_v7  ;;  %v5531_v34 = vcombine.low %v3731_v16, %v3732_v17  ;;  %v3746_v9 = vld [vmem:[#allocation2 + $0x4f] sm:$0x1]  ;;  %v3893_v13 = vld [vmem:[#allocation2 + $0x64] sm:$0x1]  ;;  %v3894_v20 = vld [vmem:[#allocation2 + $0x65] sm:$0x1] }
 0x1b2   : > { %v4527_v33 = vrot.slane %v4505_v21, %v17729_v7  ;;  %v4502_v30 = vcombine.low %v4494_v18, %v4501_v53  ;;  %v5522_v14 = vrot.slane %v5514_v24, %v17729_v7  ;;  %v4534_v36 = vrot.slane %v4506_v25, %v17729_v7  ;;  %v3895_v53 = vld [vmem:[#allocation2 + $0x66] sm:$0x1]  ;;  %v3896_v24 = vld [vmem:[#allocation2 + $0x67] sm:$0x1]  ;;  %v3897_v25 = vld [vmem:[#allocation2 + $0x68] sm:$0x1] }
 0x1b3   : > { %v5532_v12 = vcombine.low %v3733_v22, %v3734_v23  ;;  %v5529_v39 = vrot.slane %v5515_v31, %v17729_v7  ;;  %v4535_v40 = vcombine.low %v4513_v26, %v4520_v32  ;;  %v5533_v6 = vcombine.low %v3735_v45, %v3736_v27  ;;  %v3899_v31 = vld [vmem:[#allocation2 + $0x6a] sm:$0x1] }
 0x1b4   : > { %v5534_v15 = vcombine.low %v3737_v28, %v3738_v29  ;;  %17268 = vmatprep.mubr.msk.bf16.mxu1 %vm4846_vm4, %v4502_v30  ;;  %v4536_v44 = vcombine.low %v4527_v33, %v4534_v36  ;;  %v5541_v47 = vrot.slane %v5531_v34, %v17729_v7  ;;  %v4552_v2 = vcombine.low %v3884_v35, %v3885_v4  ;;  %v3898_v29 = vld [vmem:[#allocation2 + $0x69] sm:$0x1]  ;;  %v3747_v30 = vld [vmem:[#allocation2 + $0x50] sm:$0x1] }
 0x1b5   : > { %v5548_v48 = vrot.slane %v5532_v12, %v17729_v7  ;;  %v5530_v51 = vcombine.low %v5522_v14, %v5529_v39  ;;  %v4543_v52 = vrot.slane %v4535_v40, %v17729_v7  ;;  %v5555_v54 = vrot.slane %v5533_v6, %v17729_v7  ;;  %v3748_v14 = vld [vmem:[#allocation2 + $0x51] sm:$0x1]  ;;  %v3749_v39 = vld [vmem:[#allocation2 + $0x52] sm:$0x1]  ;;  %v3750_v40 = vld [vmem:[#allocation2 + $0x53] sm:$0x1] }
 0x1b6   : > { %v5562_v55 = vrot.slane %v5534_v15, %v17729_v7  ;;  %v4550_v59 = vrot.slane %v4536_v44, %v17729_v7  ;;  %v4553_v60 = vcombine.low %v3886_v37, %v3887_v38  ;;  %v4554_v46 = vcombine.low %v3888_v41, %v3889_v42  ;;  %v3751_v6 = vld [vmem:[#allocation2 + $0x54] sm:$0x1]  ;;  %v3752_v44 = vld [vmem:[#allocation2 + $0x55] sm:$0x1] }
 0x1b7   : > { %v5563_v0 = vcombine.low %v5541_v47, %v5548_v48  ;;  %17298 = vmatprep.mubr.msk.bf16.mxu0 %vm4846_vm4, %v5530_v51  ;;  %v4555_v1 = vcombine.low %v3890_v43, %v3891_v49  ;;  %v4562_v8 = vrot.slane %v4552_v2, %v17729_v7  ;;  %v5580_v10 = vcombine.low %v3739_v63, %v3740_v50  ;;  %v3753_v47 = vld [vmem:[#allocation2 + $0x56] sm:$0x1]  ;;  %v3754_v48 = vld [vmem:[#allocation2 + $0x57] sm:$0x1]  ;;  %v3900_v51 = vld [vmem:[#allocation2 + $0x6d] sm:$0x1] }
 0x1b8   : > { %v5564_v58 = vcombine.low %v5555_v54, %v5562_v55  ;;  %v4551_v16 = vcombine.low %v4543_v52, %v4550_v59  ;;  %v4569_v18 = vrot.slane %v4553_v60, %v17729_v7  ;;  %v4576_v19 = vrot.slane %v4554_v46, %v17729_v7  ;;  %v3901_v52 = vld [vmem:[#allocation2 + $0x6e] sm:$0x1]  ;;  %v3902_v59 = vld [vmem:[#allocation2 + $0x6f] sm:$0x1] }
 0x1b9   : > { %v5571_v17 = vrot.slane %v5563_v0, %v17729_v7  ;;  %v4583_v22 = vrot.slane %v4555_v1, %v17729_v7  ;;  %v5581_v23 = vcombine.low %v3741_v56, %v3742_v57  ;;  %v5582_v45 = vcombine.low %v3743_v61, %v3744_v62  ;;  %v3903_v0 = vld [vmem:[#allocation2 + $0x70] sm:$0x1]  ;;  %v3906_v1 = vld [vmem:[#allocation2 + $0x73] sm:$0x1] }
 0x1ba   : > { %v5578_v21 = vrot.slane %v5564_v58, %v17729_v7  ;;  %17269 = vmatmul.mubr.msk.bf16.gmra.mxu1 %vm4846_vm4, %v4551_v16  ;;  %v4584_v26 = vcombine.low %v4562_v8, %v4569_v18  ;;  %v5583_v27 = vcombine.low %v3745_v3, %v3746_v9  ;;  %v5590_v28 = vrot.slane %v5580_v10, %v17729_v7  ;;  %v3904_v3 = vld [vmem:[#allocation2 + $0x71] sm:$0x1]  ;;  %v3905_v58 = vld [vmem:[#allocation2 + $0x72] sm:$0x1]  ;;  %v3755_v16 = vld [vmem:[#allocation2 + $0x5a] sm:$0x1] }
 0x1bb   : > { %v4601_v32 = vcombine.low %v3892_v11, %v3893_v13  ;;  %v4585_v34 = vcombine.low %v4576_v19, %v4583_v22  ;;  %v5597_v35 = vrot.slane %v5581_v23, %v17729_v7  ;;  %v5604_v4 = vrot.slane %v5582_v45, %v17729_v7  ;;  %v3907_v11 = vld [vmem:[#allocation2 + $0x74] sm:$0x1]  ;;  %v3757_v22 = vld [vmem:[#allocation2 + $0x5c] sm:$0x1]  ;;  %v3758_v23 = vld [vmem:[#allocation2 + $0x5d] sm:$0x1] }
 0x1bc   : > { %v5579_v33 = vcombine.low %v5571_v17, %v5578_v21  ;;  %v4592_v36 = vrot.slane %v4584_v26, %v17729_v7  ;;  %v5611_v12 = vrot.slane %v5583_v27, %v17729_v7  ;;  %v4602_v37 = vcombine.low %v3894_v20, %v3895_v53  ;;  %v3756_v17 = vld [vmem:[#allocation2 + $0x5b] sm:$0x1]  ;;  %v3759_v26 = vld [vmem:[#allocation2 + $0x5e] sm:$0x1]  ;;  %v3760_v27 = vld [vmem:[#allocation2 + $0x5f] sm:$0x1] }
 0x1bd   : > { %v4603_v38 = vcombine.low %v3896_v24, %v3897_v25  ;;  %v4599_v15 = vrot.slane %v4585_v34, %v17729_v7  ;;  %v5612_v41 = vcombine.low %v5590_v28, %v5597_v35  ;;  %v4604_v42 = vcombine.low %v3898_v29, %v3899_v31  ;;  %v3761_v28 = vld [vmem:[#allocation2 + $0x60] sm:$0x1]  ;;  %v3908_v35 = vld [vmem:[#allocation2 + $0x75] sm:$0x1] }
 0x1be   : > { %17299 = vmatmul.mubr.msk.bf16.gmra.mxu0 %vm4846_vm4, %v5579_v33  ;;  %v4611_v43 = vrot.slane %v4601_v32, %v17729_v7  ;;  %v5613_v49 = vcombine.low %v5604_v4, %v5611_v12  ;;  %v4618_v2 = vrot.slane %v4602_v37, %v17729_v7  ;;  %v5629_v50 = vcombine.low %v3747_v30, %v3748_v14  ;;  %v3762_v33 = vld [vmem:[#allocation2 + $0x61] sm:$0x1]  ;;  %v3909_v4 = vld [vmem:[#allocation2 + $0x76] sm:$0x1]  ;;  %v3910_v37 = vld [vmem:[#allocation2 + $0x77] sm:$0x1] }
 0x1bf   : > { %v4625_v63 = vrot.slane %v4603_v38, %v17729_v7  ;;  %v4600_v54 = vcombine.low %v4592_v36, %v4599_v15  ;;  %v5620_v55 = vrot.slane %v5612_v41, %v17729_v7  ;;  %v4632_v56 = vrot.slane %v4604_v42, %v17729_v7  ;;  %v3911_v15 = vld [vmem:[#allocation2 + $0x78] sm:$0x1]  ;;  %v3912_v41 = vld [vmem:[#allocation2 + $0x79] sm:$0x1]  ;;  %v3913_v42 = vld [vmem:[#allocation2 + $0x7a] sm:$0x1] }
 0x1c0   : > { %v5630_v57 = vcombine.low %v3749_v39, %v3750_v40  ;;  %v5627_v60 = vrot.slane %v5613_v49, %v17729_v7  ;;  %v4633_v46 = vcombine.low %v4611_v43, %v4618_v2  ;;  %v5631_v61 = vcombine.low %v3751_v6, %v3752_v44  ;;  %v3915_v49 = vld [vmem:[#allocation2 + $0x7c] sm:$0x1] }
 0x1c1   : > { %v5632_v62 = vcombine.low %v3753_v47, %v3754_v48  ;;  %17272 = vmatprep.mubr.msk.bf16.mxu1 %vm4846_vm4, %v4600_v54  ;;  %v4634_v8 = vcombine.low %v4625_v63, %v4632_v56  ;;  %v5639_v9 = vrot.slane %v5629_v50, %v17729_v7  ;;  %v4650_v13 = vcombine.low %v3900_v51, %v3901_v52  ;;  %v3914_v48 = vld [vmem:[#allocation2 + $0x7b] sm:$0x1]  ;;  %v3763_v54 = vld [vmem:[#allocation2 + $0x62] sm:$0x1]  ;;  %v3765_v56 = vld [vmem:[#allocation2 + $0x64] sm:$0x1] }
 0x1c2   : > { %v5646_v10 = vrot.slane %v5630_v57, %v17729_v7  ;;  %v5628_v18 = vcombine.low %v5620_v55, %v5627_v60  ;;  %v4641_v19 = vrot.slane %v4633_v46, %v17729_v7  ;;  %v5653_v20 = vrot.slane %v5631_v61, %v17729_v7  ;;  %v3764_v55 = vld [vmem:[#allocation2 + $0x63] sm:$0x1]  ;;  %v3766_v46 = vld [vmem:[#allocation2 + $0x65] sm:$0x1]  ;;  %v3767_v61 = vld [vmem:[#allocation2 + $0x66] sm:$0x1] }
 0x1c3   : > { %v5660_v21 = vrot.slane %v5632_v62, %v17729_v7  ;;  %v4648_v45 = vrot.slane %v4634_v8, %v17729_v7  ;;  %v4651_v24 = vcombine.low %v3902_v59, %v3903_v0  ;;  %v4652_v25 = vcombine.low %v3904_v3, %v3905_v58  ;;  %v3768_v62 = vld [vmem:[#allocation2 + $0x67] sm:$0x1] }
 0x1c4   : > { %v5661_v53 = vcombine.low %v5639_v9, %v5646_v10  ;;  %17302 = vmatprep.mubr.msk.bf16.mxu0 %vm4846_vm4, %v5628_v18  ;;  %v4653_v31 = vcombine.low %v3906_v1, %v3907_v11  ;;  %v4660_v32 = vrot.slane %v4650_v13, %v17729_v7  ;;  %v5678_v34 = vcombine.low %v3755_v16, %v3756_v17  ;;  %v3769_v9 = vld [vmem:[#allocation2 + $0x68] sm:$0x1]  ;;  %v3770_v10 = vld [vmem:[#allocation2 + $0x69] sm:$0x1]  ;;  %v18694_v11 = vld [vmem:[%s20985_s5 + $0x3] sm:$0x1] }
 0x1c5   : > { %v5662_v29 = vcombine.low %v5653_v20, %v5660_v21  ;;  %v4649_v30 = vcombine.low %v4641_v19, %v4648_v45  ;;  %v4667_v36 = vrot.slane %v4651_v24, %v17729_v7  ;;  %v4674_v12 = vrot.slane %v4652_v25, %v17729_v7  ;;  %v3916_v19 = vld [vmem:[#allocation2 + $0x7f] sm:$0x1]  ;;  %v3917_v20 = vld [vmem:[#allocation2 + $0x80] sm:$0x1]  ;;  %17599 = vmatprep.subr.msk.bf16.mxu0 %vm4895_vm3, %v18694_v11  ;;  %v3919_v24 = vld [vmem:[#allocation2 + $0x82] sm:$0x1] }
 0x1c6   : > { %v5669_v14 = vrot.slane %v5661_v53, %v17729_v7  ;;  %v4681_v39 = vrot.slane %v4653_v31, %v17729_v7  ;;  %v5679_v40 = vcombine.low %v3757_v22, %v3758_v23  ;;  %v5680_v6 = vcombine.low %v3759_v26, %v3760_v27  ;;  %v3918_v53 = vld [vmem:[#allocation2 + $0x81] sm:$0x1]  ;;  %v3921_v31 = vld [vmem:[#allocation2 + $0x84] sm:$0x1] }
 0x1c7   : > { %v5676_v38 = vrot.slane %v5662_v29, %v17729_v7  ;;  %17273 = vmatmul.mubr.msk.bf16.gmra.mxu1 %vm4846_vm4, %v4649_v30  ;;  %v4682_v43 = vcombine.low %v4660_v32, %v4667_v36  ;;  %v5681_v44 = vcombine.low %v3761_v28, %v3762_v33  ;;  %v5688_v47 = vrot.slane %v5678_v34, %v17729_v7  ;;  %v3920_v29 = vld [vmem:[#allocation2 + $0x83] sm:$0x1]  ;;  %v3922_v32 = vld [vmem:[#allocation2 + $0x85] sm:$0x1]  ;;  %v3772_v36 = vld [vmem:[#allocation2 + $0x6d] sm:$0x1] }
 0x1c8   : > { %v4699_v2 = vcombine.low %v3908_v35, %v3909_v4  ;;  %v4683_v50 = vcombine.low %v4674_v12, %v4681_v39  ;;  %v5695_v51 = vrot.slane %v5679_v40, %v17729_v7  ;;  %v5702_v52 = vrot.slane %v5680_v6, %v17729_v7  ;;  %v3923_v4 = vld [vmem:[#allocation2 + $0x86] sm:$0x1]  ;;  %v3773_v40 = vld [vmem:[#allocation2 + $0x6e] sm:$0x1]  ;;  %v3774_v6 = vld [vmem:[#allocation2 + $0x6f] sm:$0x1] }
 0x1c9   : > { %v5677_v63 = vcombine.low %v5669_v14, %v5676_v38  ;;  %v4690_v57 = vrot.slane %v4682_v43, %v17729_v7  ;;  %v5709_v59 = vrot.slane %v5681_v44, %v17729_v7  ;;  %v4700_v0 = vcombine.low %v3910_v37, %v3911_v15  ;;  %v3771_v14 = vld [vmem:[#allocation2 + $0x6c] sm:$0x1]  ;;  %v3775_v15 = vld [vmem:[#allocation2 + $0x70] sm:$0x1] }
 0x1ca   : > { %v4701_v60 = vcombine.low %v3912_v41, %v3913_v42  ;;  %v4697_v3 = vrot.slane %v4683_v50, %v17729_v7  ;;  %v5710_v58 = vcombine.low %v5688_v47, %v5695_v51  ;;  %v4702_v1 = vcombine.low %v3914_v48, %v3915_v49  ;;  %v3776_v47 = vld [vmem:[#allocation2 + $0x71] sm:$0x1]  ;;  %v3777_v48 = vld [vmem:[#allocation2 + $0x72] sm:$0x1]  ;;  %v18713_v49 = vld [vmem:[%s20985_s5 + $0x4] sm:$0x1] }
 0x1cb   : > { %17303 = vmatmul.mubr.msk.bf16.gmra.mxu0 %vm4846_vm4, %v5677_v63  ;;  %v4709_v8 = vrot.slane %v4699_v2, %v17729_v7  ;;  %v5711_v13 = vcombine.low %v5702_v52, %v5709_v59  ;;  %v4716_v16 = vrot.slane %v4700_v0, %v17729_v7  ;;  %v5727_v18 = vcombine.low %v3763_v54, %v3764_v55  ;;  %v3778_v51 = vld [vmem:[#allocation2 + $0x73] sm:$0x1]  ;;  %v3924_v54 = vld [vmem:[#allocation2 + $0x87] sm:$0x1]  ;;  %v3925_v55 = vld [vmem:[#allocation2 + $0x88] sm:$0x1] }
 0x1cc   : > { %v4723_v17 = vrot.slane %v4701_v60, %v17729_v7  ;;  %v4698_v21 = vcombine.low %v4690_v57, %v4697_v3  ;;  %v5718_v22 = vrot.slane %v5710_v58, %v17729_v7  ;;  %v4730_v23 = vrot.slane %v4702_v1, %v17729_v7  ;;  %v3926_v60 = vld [vmem:[#allocation2 + $0x89] sm:$0x1]  ;;  %17600 = vmatprep.subr.msk.bf16.mxu1 %vm4895_vm3, %v18713_v49  ;;  %v3927_v58 = vld [vmem:[#allocation2 + $0x8a] sm:$0x1]  ;;  %v3928_v1 = vld [vmem:[#allocation2 + $0x8b] sm:$0x1] }
 0x1cd   : > { %v5728_v45 = vcombine.low %v3765_v56, %v3766_v46  ;;  %v5725_v25 = vrot.slane %v5711_v13, %v17729_v7  ;;  %v4731_v26 = vcombine.low %v4709_v8, %v4716_v16  ;;  %v5729_v27 = vcombine.low %v3767_v61, %v3768_v62  ;;  %v3929_v8 = vld [vmem:[#allocation2 + $0x8c] sm:$0x1]  ;;  %v3930_v16 = vld [vmem:[#allocation2 + $0x8d] sm:$0x1] }
 0x1ce   : > { %v5730_v28 = vcombine.low %v3769_v9, %v3770_v10  ;;  %17276 = vmatprep.mubr.msk.bf16.mxu1 %vm4846_vm4, %v4698_v21  ;;  %v4732_v33 = vcombine.low %v4723_v17, %v4730_v23  ;;  %v5737_v34 = vrot.slane %v5727_v18, %v17729_v7  ;;  %v4748_v30 = vcombine.low %v3916_v19, %v3917_v20  ;;  %v3931_v17 = vld [vmem:[#allocation2 + $0x8e] sm:$0x1]  ;;  %v3779_v23 = vld [vmem:[#allocation2 + $0x74] sm:$0x1] }
 0x1cf   : > { %v5744_v35 = vrot.slane %v5728_v45, %v17729_v7  ;;  %v5726_v12 = vcombine.low %v5718_v22, %v5725_v25  ;;  %v4739_v37 = vrot.slane %v4731_v26, %v17729_v7  ;;  %v5751_v38 = vrot.slane %v5729_v27, %v17729_v7  ;;  %v3780_v45 = vld [vmem:[#allocation2 + $0x75] sm:$0x1]  ;;  %v3781_v27 = vld [vmem:[#allocation2 + $0x76] sm:$0x1] }
 0x1d0   : > { %v5758_v39 = vrot.slane %v5730_v28, %v17729_v7  ;;  %v4746_v41 = vrot.slane %v4732_v33, %v17729_v7  ;;  %v4749_v43 = vcombine.low %v3918_v53, %v3919_v24  ;;  %v4750_v44 = vcombine.low %v3920_v29, %v3921_v31  ;;  %v3782_v28 = vld [vmem:[#allocation2 + $0x77] sm:$0x1]  ;;  %v3783_v29 = vld [vmem:[#allocation2 + $0x78] sm:$0x1] }
 0x1d1   : > { %v5759_v42 = vcombine.low %v5737_v34, %v5744_v35  ;;  %17306 = vmatprep.mubr.msk.bf16.mxu0 %vm4846_vm4, %v5726_v12  ;;  %v4751_v63 = vcombine.low %v3922_v32, %v3923_v4  ;;  %v4758_v50 = vrot.slane %v4748_v30, %v17729_v7  ;;  %v5776_v52 = vcombine.low %v3771_v14, %v3772_v36  ;;  %v3784_v35 = vld [vmem:[#allocation2 + $0x79] sm:$0x1]  ;;  %v3785_v4 = vld [vmem:[#allocation2 + $0x7a] sm:$0x1]  ;;  %v3786_v30 = vld [vmem:[#allocation2 + $0x7b] sm:$0x1] }
 0x1d2   : > { %v5760_v2 = vcombine.low %v5751_v38, %v5758_v39  ;;  %v4747_v56 = vcombine.low %v4739_v37, %v4746_v41  ;;  %v4765_v59 = vrot.slane %v4749_v43, %v17729_v7  ;;  %v4772_v0 = vrot.slane %v4750_v44, %v17729_v7  ;;  %v3787_v38 = vld [vmem:[#allocation2 + $0x7e] sm:$0x1]  ;;  %v3788_v39 = vld [vmem:[#allocation2 + $0x7f] sm:$0x1]  ;;  %v3790_v43 = vld [vmem:[#allocation2 + $0x81] sm:$0x1] }
 0x1d3   : > { %v5767_v57 = vrot.slane %v5759_v42, %v17729_v7  ;;  %v4779_v61 = vrot.slane %v4751_v63, %v17729_v7  ;;  %v5777_v62 = vcombine.low %v3773_v40, %v3774_v6  ;;  %v5778_v3 = vcombine.low %v3775_v15, %v3776_v47  ;;  %v3789_v42 = vld [vmem:[#allocation2 + $0x80] sm:$0x1]  ;;  %v3791_v44 = vld [vmem:[#allocation2 + $0x82] sm:$0x1] }
 0x1d4   : > { %v5774_v46 = vrot.slane %v5760_v2, %v17729_v7  ;;  %17277 = vmatmul.mubr.msk.bf16.gmra.mxu1 %vm4846_vm4, %v4747_v56  ;;  %v4780_v9 = vcombine.low %v4758_v50, %v4765_v59  ;;  %v5779_v10 = vcombine.low %v3777_v48, %v3778_v51  ;;  %v5786_v13 = vrot.slane %v5776_v52, %v17729_v7  ;;  %v3792_v50 = vld [vmem:[#allocation2 + $0x83] sm:$0x1]  ;;  %v3793_v51 = vld [vmem:[#allocation2 + $0x84] sm:$0x1]  ;;  %v3794_v52 = vld [vmem:[#allocation2 + $0x85] sm:$0x1] }
 0x1d5   : > { %v4797_v18 = vcombine.low %v3924_v54, %v3925_v55  ;;  %v4781_v20 = vcombine.low %v4772_v0, %v4779_v61  ;;  %v5793_v21 = vrot.slane %v5777_v62, %v17729_v7  ;;  %v5800_v22 = vrot.slane %v5778_v3, %v17729_v7  ;;  %v6185_v59 = vld [vmem:[#allocation2 + $0x2] sm:$0x1]  ;;  %v6186_v0 = vld [vmem:[#allocation2 + $0x3] sm:$0x1] }
 0x1d6   : > { %v5775_v19 = vcombine.low %v5767_v57, %v5774_v46  ;;  %v4788_v53 = vrot.slane %v4780_v9, %v17729_v7  ;;  %v5807_v24 = vrot.slane %v5779_v10, %v17729_v7  ;;  %v4798_v25 = vcombine.low %v3926_v60, %v3927_v58  ;;  %v6187_v9 = vld [vmem:[#allocation2 + $0x4] sm:$0x1]  ;;  %v6188_v10 = vld [vmem:[#allocation2 + $0x5] sm:$0x1] }
 0x1d7   : > { %v4799_v26 = vcombine.low %v3928_v1, %v3929_v8  ;;  %v4795_v31 = vrot.slane %v4781_v20, %v17729_v7  ;;  %v5808_v32 = vcombine.low %v5786_v13, %v5793_v21  ;;  %v4800_v33 = vcombine.low %v3930_v16, %v3931_v17  ;;  %v6189_v13 = vld [vmem:[#allocation2 + $0x6] sm:$0x1]  ;;  %v6192_v20 = vld [vmem:[#allocation2 + $0x9] sm:$0x1] }
 0x1d8   : > { %17307 = vmatmul.mubr.msk.bf16.gmra.mxu0 %vm4846_vm4, %v5775_v19  ;;  %v4807_v34 = vrot.slane %v4797_v18, %v17729_v7  ;;  %v5809_v14 = vcombine.low %v5800_v22, %v5807_v24  ;;  %v4814_v36 = vrot.slane %v4798_v25, %v17729_v7  ;;  %v5825_v37 = vcombine.low %v3779_v23, %v3780_v45  ;;  %v6190_v18 = vld [vmem:[#allocation2 + $0x7] sm:$0x1]  ;;  %v6191_v19 = vld [vmem:[#allocation2 + $0x8] sm:$0x1]  ;;  %v3795_v24 = vld [vmem:[#allocation2 + $0x86] sm:$0x1] }
 0x1d9   : > { %v4821_v12 = vrot.slane %v4799_v26, %v17729_v7  ;;  %v4796_v40 = vcombine.low %v4788_v53, %v4795_v31  ;;  %v5816_v6 = vrot.slane %v5808_v32, %v17729_v7  ;;  %v4828_v15 = vrot.slane %v4800_v33, %v17729_v7  ;;  %v3796_v25 = vld [vmem:[#allocation2 + $0x87] sm:$0x1]  ;;  %v3797_v31 = vld [vmem:[#allocation2 + $0x88] sm:$0x1]  ;;  %v3798_v32 = vld [vmem:[#allocation2 + $0x89] sm:$0x1] }
 0x1da   : > { %v5826_v41 = vcombine.low %v3781_v27, %v3782_v28  ;;  %v5823_v47 = vrot.slane %v5809_v14, %v17729_v7  ;;  %v4829_v48 = vcombine.low %v4807_v34, %v4814_v36  ;;  %v5827_v2 = vcombine.low %v3783_v29, %v3784_v35  ;;  %v3799_v33 = vld [vmem:[#allocation2 + $0x8a] sm:$0x1]  ;;  %v3800_v14 = vld [vmem:[#allocation2 + $0x8b] sm:$0x1]  ;;  %v3801_v36 = vld [vmem:[#allocation2 + $0x8c] sm:$0x1] }
 0x1db   : > { %v5828_v63 = vcombine.low %v3785_v4, %v3786_v30  ;;  %17280 = vmatprep.mubr.msk.bf16.mxu1 %vm4846_vm4, %v4796_v40  ;;  %v4830_v54 = vcombine.low %v4821_v12, %v4828_v15  ;;  %v5835_v55 = vrot.slane %v5825_v37, %v17729_v7  ;;  %v8563_v57 = vsel %vm4895_vm3, %v18694_v11, 0  ;;  %v3802_v12 = vld [vmem:[#allocation2 + $0x8d] sm:$0x1]  ;;  %v6194_v15 = vld [vmem:[#allocation2 + $0xb] sm:$0x1] }
 0x1dc   : > { %v5842_v56 = vrot.slane %v5826_v41, %v17729_v7  ;;  %v5824_v60 = vcombine.low %v5816_v6, %v5823_v47  ;;  %v4837_v46 = vrot.slane %v4829_v48, %v17729_v7  ;;  %v5849_v61 = vrot.slane %v5827_v2, %v17729_v7  ;;  %17353 = vmatpush3.bf16.msra.mxu0 %v8563_v57  ;;  %v6193_v6 = vld [vmem:[#allocation2 + $0xa] sm:$0x1]  ;;  %v6195_v47 = vld [vmem:[#allocation2 + $0xc] sm:$0x1]  ;;  %v6196_v48 = vld [vmem:[#allocation2 + $0xd] sm:$0x1] }
 0x1dd   : > { %v5856_v62 = vrot.slane %v5828_v63, %v17729_v7  ;;  %v4844_v3 = vrot.slane %v4830_v54, %v17729_v7  ;;  %v5874_v1 = vcombine.low %v3787_v38, %v3788_v39  ;;  %v5875_v8 = vcombine.low %v3789_v42, %v3790_v43  ;;  %v6198_v54 = vld [vmem:[#allocation2 + $0xf] sm:$0x1] }
 0x1de   : > { %v5857_v58 = vcombine.low %v5835_v55, %v5842_v56  ;;  %17310 = vmatprep.mubr.msk.bf16.mxu0 %vm4846_vm4, %v5824_v60  ;;  %v5876_v16 = vcombine.low %v3791_v44, %v3792_v50  ;;  %v5877_v17 = vcombine.low %v3793_v51, %v3794_v52  ;;  %v6443_v21 = vcombine.low %v6185_v59, %v6186_v0  ;;  %v6197_v52 = vld [vmem:[#allocation2 + $0xe] sm:$0x1]  ;;  %v6199_v55 = vld [vmem:[#allocation2 + $0x10] sm:$0x1]  ;;  %v6200_v0 = vld [vmem:[#allocation2 + $0x11] sm:$0x1] }
 0x1df   : > { %v5858_v11 = vcombine.low %v5849_v61, %v5856_v62  ;;  %v4845_v22 = vcombine.low %v4837_v46, %v4844_v3  ;;  %v5884_v45 = vrot.slane %v5874_v1, %v17729_v7  ;;  %v5891_v53 = vrot.slane %v5875_v8, %v17729_v7  ;;  %v6201_v46 = vld [vmem:[#allocation2 + $0x14] sm:$0x1]  ;;  %v6202_v61 = vld [vmem:[#allocation2 + $0x15] sm:$0x1]  ;;  %v6203_v8 = vld [vmem:[#allocation2 + $0x16] sm:$0x1] }
 0x1e0   : > { %v5865_v23 = vrot.slane %v5857_v58, %v17729_v7  ;;  %v5898_v27 = vrot.slane %v5876_v16, %v17729_v7  ;;  %v5905_v28 = vrot.slane %v5877_v17, %v17729_v7  ;;  %v6444_v29 = vcombine.low %v6187_v9, %v6188_v10  ;;  %v6204_v9 = vld [vmem:[#allocation2 + $0x17] sm:$0x1]  ;;  %v6205_v10 = vld [vmem:[#allocation2 + $0x18] sm:$0x1] }
 0x1e1   : > { %v5872_v26 = vrot.slane %v5858_v11, %v17729_v7  ;;  %17281 = vmatmul.mubr.msk.bf16.gmra.mxu1 %vm4846_vm4, %v4845_v22  ;;  %v5906_v34 = vcombine.low %v5884_v45, %v5891_v53  ;;  %v6445_v35 = vcombine.low %v6189_v13, %v6190_v18  ;;  %v6446_v4 = vcombine.low %v6191_v19, %v6192_v20  ;;  %v6206_v18 = vld [vmem:[#allocation2 + $0x19] sm:$0x1]  ;;  %v6207_v19 = vld [vmem:[#allocation2 + $0x1a] sm:$0x1]  ;;  %v6208_v20 = vld [vmem:[#allocation2 + $0x1b] sm:$0x1] }
 0x1e2   : > { %v6453_v30 = vrot.slane %v6443_v21, %v17729_v7  ;;  %v5907_v38 = vcombine.low %v5898_v27, %v5905_v28  ;;  %v6460_v39 = vrot.slane %v6444_v29, %v17729_v7  ;;  %v5923_v40 = vcombine.low %v3795_v24, %v3796_v25  ;;  %v7472_v53 = vld [vmem:[#allocation2 + $0x12] sm:$0x1]  ;;  %v7473_v24 = vld [vmem:[#allocation2 + $0x13] sm:$0x1] }
 0x1e3   : > { %v5873_v37 = vcombine.low %v5865_v23, %v5872_v26  ;;  %v5914_v41 = vrot.slane %v5906_v34, %v17729_v7  ;;  %v6467_v42 = vrot.slane %v6445_v35, %v17729_v7  ;;  %v6474_v43 = vrot.slane %v6446_v4, %v17729_v7  ;;  %v7474_v34 = vld [vmem:[#allocation2 + $0x14] sm:$0x1]  ;;  %v7475_v35 = vld [vmem:[#allocation2 + $0x15] sm:$0x1]  ;;  %v7476_v4 = vld [vmem:[#allocation2 + $0x16] sm:$0x1] }
 0x1e4   : > { %v5924_v44 = vcombine.low %v3797_v31, %v3798_v32  ;;  %v5921_v2 = vrot.slane %v5907_v38, %v17729_v7  ;;  %v6475_v63 = vcombine.low %v6453_v30, %v6460_v39  ;;  %v5925_v50 = vcombine.low %v3799_v33, %v3800_v14 }
 0x1e5   : > { %17311 = vmatmul.mubr.msk.bf16.gmra.mxu0 %vm4846_vm4, %v5873_v37  ;;  %v5926_v51 = vcombine.low %v3801_v36, %v3802_v12  ;;  %v6476_v56 = vcombine.low %v6467_v42, %v6474_v43  ;;  %v5933_v57 = vrot.slane %v5923_v40, %v17729_v7  ;;  %v6492_v60 = vcombine.low %v6193_v6, %v6194_v15  ;;  %v7477_v36 = vld [vmem:[#allocation2 + $0x17] sm:$0x1]  ;;  %v7478_v12 = vld [vmem:[#allocation2 + $0x18] sm:$0x1]  ;;  %v7479_v37 = vld [vmem:[#allocation2 + $0x19] sm:$0x1] }
 0x1e6   : > { %v5940_v59 = vrot.slane %v5924_v44, %v17729_v7  ;;  %v5922_v62 = vcombine.low %v5914_v41, %v5921_v2  ;;  %v6483_v3 = vrot.slane %v6475_v63, %v17729_v7  ;;  %v5947_v58 = vrot.slane %v5925_v50, %v17729_v7  ;;  %v6209_v41 = vld [vmem:[#allocation2 + $0x1c] sm:$0x1]  ;;  %v6210_v42 = vld [vmem:[#allocation2 + $0x1d] sm:$0x1]  ;;  %v6211_v2 = vld [vmem:[#allocation2 + $0x1e] sm:$0x1] }
 0x1e7   : > { %v5954_v1 = vrot.slane %v5926_v51, %v17729_v7  ;;  %v6490_v13 = vrot.slane %v6476_v56, %v17729_v7  ;;  %v6493_v16 = vcombine.low %v6195_v47, %v6196_v48  ;;  %v6494_v17 = vcombine.low %v6197_v52, %v6198_v54  ;;  %v6212_v63 = vld [vmem:[#allocation2 + $0x1f] sm:$0x1]  ;;  %v6214_v56 = vld [vmem:[#allocation2 + $0x21] sm:$0x1] }
 0x1e8   : > { %v5955_v11 = vcombine.low %v5933_v57, %v5940_v59  ;;  %17314 = vmatprep.mubr.msk.bf16.mxu0 %vm4846_vm4, %v5922_v62  ;;  %v6495_v22 = vcombine.low %v6199_v55, %v6200_v0  ;;  %v6502_v23 = vrot.slane %v6492_v60, %v17729_v7  ;;  %v18772_v45 = vsel %vm4895_vm3, %v18713_v49, 0  ;;  %v6213_v55 = vld [vmem:[#allocation2 + $0x20] sm:$0x1]  ;;  %v6215_v57 = vld [vmem:[#allocation2 + $0x22] sm:$0x1] }
 0x1e9   : > { %v5956_v21 = vcombine.low %v5947_v58, %v5954_v1  ;;  %v6491_v25 = vcombine.low %v6483_v3, %v6490_v13  ;;  %v6509_v27 = vrot.slane %v6493_v16, %v17729_v7  ;;  %v6516_v28 = vrot.slane %v6494_v17, %v17729_v7  ;;  %v7480_v62 = vld [vmem:[#allocation2 + $0x1a] sm:$0x1]  ;;  %v7481_v3 = vld [vmem:[#allocation2 + $0x1b] sm:$0x1]  ;;  %v7483_v13 = vld [vmem:[#allocation2 + $0x1d] sm:$0x1] }
 0x1ea   : > { %v5963_v26 = vrot.slane %v5955_v11, %v17729_v7  ;;  %v6523_v31 = vrot.slane %v6495_v22, %v17729_v7  ;;  %v6541_v32 = vcombine.low %v6201_v46, %v6202_v61  ;;  %v6542_v33 = vcombine.low %v6203_v8, %v6204_v9  ;;  %v6216_v46 = vld [vmem:[#allocation2 + $0x23] sm:$0x1] }
 0x1eb   : > { %v5970_v29 = vrot.slane %v5956_v21, %v17729_v7  ;;  %17320 = vmatprep.mubr.msk.bf16.mxu1 %vm4846_vm4, %v6491_v25  ;;  %v6524_v49 = vcombine.low %v6502_v23, %v6509_v27  ;;  %v6543_v30 = vcombine.low %v6205_v10, %v6206_v18  ;;  %v6544_v14 = vcombine.low %v6207_v19, %v6208_v20  ;;  %v7482_v10 = vld [vmem:[#allocation2 + $0x1c] sm:$0x1]  ;;  %v7484_v19 = vld [vmem:[#allocation2 + $0x1e] sm:$0x1]  ;;  %v7485_v20 = vld [vmem:[#allocation2 + $0x1f] sm:$0x1] }
 0x1ec   : > { %v7730_v38 = vcombine.low %v7472_v53, %v7473_v24  ;;  %v6525_v40 = vcombine.low %v6516_v28, %v6523_v31  ;;  %v6551_v6 = vrot.slane %v6541_v32, %v17729_v7  ;;  %v6558_v15 = vrot.slane %v6542_v33, %v17729_v7  ;;  %v7486_v21 = vld [vmem:[#allocation2 + $0x20] sm:$0x1]  ;;  %v7487_v24 = vld [vmem:[#allocation2 + $0x21] sm:$0x1]  ;;  %v6218_v27 = vld [vmem:[#allocation2 + $0x27] sm:$0x1] }
 0x1ed   : > { %v5971_v39 = vcombine.low %v5963_v26, %v5970_v29  ;;  %v6532_v43 = vrot.slane %v6524_v49, %v17729_v7  ;;  %v6565_v44 = vrot.slane %v6543_v30, %v17729_v7  ;;  %v6572_v47 = vrot.slane %v6544_v14, %v17729_v7  ;;  %v6217_v26 = vld [vmem:[#allocation2 + $0x26] sm:$0x1]  ;;  %v6219_v33 = vld [vmem:[#allocation2 + $0x28] sm:$0x1]  ;;  %v6220_v30 = vld [vmem:[#allocation2 + $0x29] sm:$0x1] }
 0x1ee   : > { %v7731_v48 = vcombine.low %v7474_v34, %v7475_v35  ;;  %v6539_v50 = vrot.slane %v6525_v40, %v17729_v7  ;;  %v6573_v51 = vcombine.low %v6551_v6, %v6558_v15  ;;  %v7732_v52 = vcombine.low %v7476_v4, %v7477_v36  ;;  %v6221_v14 = vld [vmem:[#allocation2 + $0x2a] sm:$0x1]  ;;  %v6222_v36 = vld [vmem:[#allocation2 + $0x2b] sm:$0x1] }
 0x1ef   : > { %17315 = vmatmul.mubr.msk.bf16.gmra.mxu0 %vm4846_vm4, %v5971_v39  ;;  %v7733_v54 = vcombine.low %v7478_v12, %v7479_v37  ;;  %v6574_v59 = vcombine.low %v6565_v44, %v6572_v47  ;;  %v7740_v0 = vrot.slane %v7730_v38, %v17729_v7  ;;  %v6590_v61 = vcombine.low %v6209_v41, %v6210_v42  ;;  %v6223_v38 = vld [vmem:[#allocation2 + $0x2c] sm:$0x1]  ;;  %v6224_v39 = vld [vmem:[#allocation2 + $0x2d] sm:$0x1]  ;;  %v7489_v44 = vld [vmem:[#allocation2 + $0x25] sm:$0x1] }
 0x1f0   : > { %v7747_v60 = vrot.slane %v7731_v48, %v17729_v7  ;;  %v6540_v58 = vcombine.low %v6532_v43, %v6539_v50  ;;  %v6581_v1 = vrot.slane %v6573_v51, %v17729_v7  ;;  %v7754_v8 = vrot.slane %v7732_v52, %v17729_v7  ;;  %v7488_v43 = vld [vmem:[#allocation2 + $0x24] sm:$0x1]  ;;  %v7490_v50 = vld [vmem:[#allocation2 + $0x26] sm:$0x1]  ;;  %v7491_v51 = vld [vmem:[#allocation2 + $0x27] sm:$0x1] }
 0x1f1   : > { %v7761_v9 = vrot.slane %v7733_v54, %v17729_v7  ;;  %v6588_v11 = vrot.slane %v6574_v59, %v17729_v7  ;;  %v6591_v17 = vcombine.low %v6211_v2, %v6212_v63  ;;  %v6592_v18 = vcombine.low %v6213_v55, %v6214_v56  ;;  %v7492_v52 = vld [vmem:[#allocation2 + $0x28] sm:$0x1]  ;;  %v7493_v59 = vld [vmem:[#allocation2 + $0x29] sm:$0x1] }
 0x1f2   : > { %v7762_v16 = vcombine.low %v7740_v0, %v7747_v60  ;;  %17321 = vmatmul.mubr.msk.bf16.vlgmr.msra.gmra.mxu1 %vm4846_vm4, %v6540_v58  ;;  %v6593_v23 = vcombine.low %v6215_v57, %v6216_v46  ;;  %v6600_v53 = vrot.slane %v6590_v61, %v17729_v7  ;;  %v7779_v25 = vcombine.low %v7480_v62, %v7481_v3  ;;  %v7494_v0 = vld [vmem:[#allocation2 + $0x2a] sm:$0x1]  ;;  %v7495_v60 = vld [vmem:[#allocation2 + $0x2b] sm:$0x1]  ;;  %v6225_v58 = vld [vmem:[#allocation2 + $0x2e] sm:$0x1] }
 0x1f3   : > { %v7763_v22 = vcombine.low %v7754_v8, %v7761_v9  ;;  %17387 = vmatpush3.bf16.msra.mxu1 %v18772_v45  ;;  %v6589_v28 = vcombine.low %v6581_v1, %v6588_v11  ;;  %v6607_v31 = vrot.slane %v6591_v17, %v17729_v7  ;;  %v6614_v32 = vrot.slane %v6592_v18, %v17729_v7  ;;  %v6226_v1 = vld [vmem:[#allocation2 + $0x2f] sm:$0x1]  ;;  %v6227_v11 = vld [vmem:[#allocation2 + $0x30] sm:$0x1] }
 0x1f4   : > { %v7770_v29 = vrot.slane %v7762_v16, %v17729_v7  ;;  %v6621_v35 = vrot.slane %v6593_v23, %v17729_v7  ;;  %v7780_v4 = vcombine.low %v7482_v10, %v7483_v13  ;;  %v7781_v49 = vcombine.low %v7484_v19, %v7485_v20  ;;  %v6228_v16 = vld [vmem:[#allocation2 + $0x31] sm:$0x1]  ;;  %v6231_v23 = vld [vmem:[#allocation2 + $0x34] sm:$0x1] }
 0x1f5   : > { %v7777_v34 = vrot.slane %v7763_v22, %v17729_v7  ;;  %17324 = vmatprep.mubr.msk.bf16.mxu1 %vm4846_vm4, %v6589_v28  ;;  %v6622_v45 = vcombine.low %v6600_v53, %v6607_v31  ;;  %v7782_v12 = vcombine.low %v7486_v21, %v7487_v24  ;;  %v7789_v37 = vrot.slane %v7779_v25, %v17729_v7  ;;  %v6229_v21 = vld [vmem:[#allocation2 + $0x32] sm:$0x1]  ;;  %v6230_v22 = vld [vmem:[#allocation2 + $0x33] sm:$0x1]  ;;  %v7496_v28 = vld [vmem:[#allocation2 + $0x2c] sm:$0x1] }
 0x1f6   : > { %v6639_v40 = vcombine.low %v6217_v26, %v6218_v27  ;;  %v6623_v15 = vcombine.low %v6614_v32, %v6621_v35  ;;  %v7796_v41 = vrot.slane %v7780_v4, %v17729_v7  ;;  %v7803_v42 = vrot.slane %v7781_v49, %v17729_v7  ;;  %v6232_v26 = vld [vmem:[#allocation2 + $0x35] sm:$0x1]  ;;  %v7498_v35 = vld [vmem:[#allocation2 + $0x2e] sm:$0x1]  ;;  %v7499_v4 = vld [vmem:[#allocation2 + $0x2f] sm:$0x1] }
 0x1f7   : > { %v7778_v6 = vcombine.low %v7770_v29, %v7777_v34  ;;  %v6630_v47 = vrot.slane %v6622_v45, %v17729_v7  ;;  %v7810_v48 = vrot.slane %v7782_v12, %v17729_v7  ;;  %v6640_v2 = vcombine.low %v6219_v33, %v6220_v30  ;;  %v7497_v29 = vld [vmem:[#allocation2 + $0x2d] sm:$0x1]  ;;  %v7500_v45 = vld [vmem:[#allocation2 + $0x30] sm:$0x1]  ;;  %v7501_v12 = vld [vmem:[#allocation2 + $0x31] sm:$0x1] }
 0x1f8   : > { %v6641_v63 = vcombine.low %v6221_v14, %v6222_v36  ;;  %v6637_v54 = vrot.slane %v6623_v15, %v17729_v7  ;;  %v7811_v55 = vcombine.low %v7789_v37, %v7796_v41  ;;  %v6642_v56 = vcombine.low %v6223_v38, %v6224_v39  ;;  %v7502_v37 = vld [vmem:[#allocation2 + $0x32] sm:$0x1]  ;;  %v6233_v41 = vld [vmem:[#allocation2 + $0x38] sm:$0x1] }
 0x1f9   : > { %17354 = vmatprep.mubr.msk.bf16.mxu0 %vm4846_vm4, %v7778_v6  ;;  %v6649_v57 = vrot.slane %v6639_v40, %v17729_v7  ;;  %v7812_v46 = vcombine.low %v7803_v42, %v7810_v48  ;;  %v6656_v61 = vrot.slane %v6640_v2, %v17729_v7  ;;  %v7828_v3 = vcombine.low %v7488_v43, %v7489_v44  ;;  %v7503_v6 = vld [vmem:[#allocation2 + $0x33] sm:$0x1]  ;;  %v6234_v42 = vld [vmem:[#allocation2 + $0x39] sm:$0x1]  ;;  %v6235_v2 = vld [vmem:[#allocation2 + $0x3a] sm:$0x1] }
 0x1fa   : > { %v6663_v62 = vrot.slane %v6641_v63, %v17729_v7  ;;  %v6638_v8 = vcombine.low %v6630_v47, %v6637_v54  ;;  %v7819_v9 = vrot.slane %v7811_v55, %v17729_v7  ;;  %v6670_v10 = vrot.slane %v6642_v56, %v17729_v7  ;;  %v6236_v54 = vld [vmem:[#allocation2 + $0x3b] sm:$0x1]  ;;  %v6237_v55 = vld [vmem:[#allocation2 + $0x3c] sm:$0x1]  ;;  %v6238_v56 = vld [vmem:[#allocation2 + $0x3d] sm:$0x1] }
 0x1fb   : > { %v7829_v13 = vcombine.low %v7490_v50, %v7491_v51  ;;  %v7826_v17 = vrot.slane %v7812_v46, %v17729_v7  ;;  %v6671_v18 = vcombine.low %v6649_v57, %v6656_v61  ;;  %v7830_v19 = vcombine.low %v7492_v52, %v7493_v59  ;;  %v6240_v46 = vld [vmem:[#allocation2 + $0x3f] sm:$0x1] }
 0x1fc   : > { %v7831_v20 = vcombine.low %v7494_v0, %v7495_v60  ;;  %17325 = vmatmul.mubr.msk.bf16.gmra.mxu1 %vm4846_vm4, %v6638_v8  ;;  %v6672_v53 = vcombine.low %v6663_v62, %v6670_v10  ;;  %v7838_v24 = vrot.slane %v7828_v3, %v17729_v7  ;;  %v6688_v27 = vcombine.low %v6225_v58, %v6226_v1  ;;  %v6239_v60 = vld [vmem:[#allocation2 + $0x3e] sm:$0x1]  ;;  %v7504_v8 = vld [vmem:[#allocation2 + $0x36] sm:$0x1] }
 0x1fd   : > { %v7845_v25 = vrot.slane %v7829_v13, %v17729_v7  ;;  %v7827_v31 = vcombine.low %v7819_v9, %v7826_v17  ;;  %v6679_v32 = vrot.slane %v6671_v18, %v17729_v7  ;;  %v7852_v33 = vrot.slane %v7830_v19, %v17729_v7  ;;  %v7505_v9 = vld [vmem:[#allocation2 + $0x37] sm:$0x1]  ;;  %v7506_v17 = vld [vmem:[#allocation2 + $0x38] sm:$0x1]  ;;  %v7507_v18 = vld [vmem:[#allocation2 + $0x39] sm:$0x1] }
 0x1fe   : > { %v7859_v34 = vrot.slane %v7831_v20, %v17729_v7  ;;  %v6686_v49 = vrot.slane %v6672_v53, %v17729_v7  ;;  %v6689_v14 = vcombine.low %v6227_v11, %v6228_v16  ;;  %v6690_v36 = vcombine.low %v6229_v21, %v6230_v22  ;;  %v7508_v19 = vld [vmem:[#allocation2 + $0x3a] sm:$0x1]  ;;  %v7509_v53 = vld [vmem:[#allocation2 + $0x3b] sm:$0x1] }
 0x1ff   : > { %v7860_v30 = vcombine.low %v7838_v24, %v7845_v25  ;;  %17355 = vmatmul.mubr.msk.bf16.vlgmr.msra.gmra.mxu0 %vm4846_vm4, %v7827_v31  ;;  %v6691_v39 = vcombine.low %v6231_v23, %v6232_v26  ;;  %v6698_v40 = vrot.slane %v6688_v27, %v17729_v7  ;;  %v7877_v15 = vcombine.low %v7496_v28, %v7497_v29  ;;  %v7510_v24 = vld [vmem:[#allocation2 + $0x3c] sm:$0x1]  ;;  %v7511_v25 = vld [vmem:[#allocation2 + $0x3d] sm:$0x1]  ;;  %v6241_v31 = vld [vmem:[#allocation2 + $0x40] sm:$0x1] }
 0x200   : > { %v7861_v38 = vcombine.low %v7852_v33, %v7859_v34  ;;  %v6687_v43 = vcombine.low %v6679_v32, %v6686_v49  ;;  %v6705_v47 = vrot.slane %v6689_v14, %v17729_v7  ;;  %v6712_v48 = vrot.slane %v6690_v36, %v17729_v7  ;;  %v6242_v32 = vld [vmem:[#allocation2 + $0x41] sm:$0x1]  ;;  %v6243_v49 = vld [vmem:[#allocation2 + $0x42] sm:$0x1] }
 0x201   : > { %v7868_v44 = vrot.slane %v7860_v30, %v17729_v7  ;;  %v6719_v50 = vrot.slane %v6691_v39, %v17729_v7  ;;  %v7878_v51 = vcombine.low %v7498_v35, %v7499_v4  ;;  %v7879_v52 = vcombine.low %v7500_v45, %v7501_v12  ;;  %v6244_v30 = vld [vmem:[#allocation2 + $0x43] sm:$0x1]  ;;  %v6247_v39 = vld [vmem:[#allocation2 + $0x46] sm:$0x1] }
 0x202   : > { %v7875_v63 = vrot.slane %v7861_v38, %v17729_v7  ;;  %17328 = vmatprep.mubr.msk.bf16.mxu1 %vm4846_vm4, %v6687_v43  ;;  %v6720_v57 = vcombine.low %v6698_v40, %v6705_v47  ;;  %v7880_v59 = vcombine.low %v7502_v37, %v7503_v6  ;;  %v7887_v0 = vrot.slane %v7877_v15, %v17729_v7  ;;  %v6245_v37 = vld [vmem:[#allocation2 + $0x44] sm:$0x1]  ;;  %v6246_v38 = vld [vmem:[#allocation2 + $0x45] sm:$0x1]  ;;  %v7512_v43 = vld [vmem:[#allocation2 + $0x3e] sm:$0x1] }
 0x203   : > { %v6737_v61 = vcombine.low %v6233_v41, %v6234_v42  ;;  %v6721_v3 = vcombine.low %v6712_v48, %v6719_v50  ;;  %v7894_v58 = vrot.slane %v7878_v51, %v17729_v7  ;;  %v7901_v1 = vrot.slane %v7879_v52, %v17729_v7  ;;  %v6248_v41 = vld [vmem:[#allocation2 + $0x47] sm:$0x1]  ;;  %v7514_v50 = vld [vmem:[#allocation2 + $0x40] sm:$0x1]  ;;  %v7515_v51 = vld [vmem:[#allocation2 + $0x41] sm:$0x1] }
 0x204   : > { %v7876_v62 = vcombine.low %v7868_v44, %v7875_v63  ;;  %v6728_v10 = vrot.slane %v6720_v57, %v17729_v7  ;;  %v7908_v13 = vrot.slane %v7880_v59, %v17729_v7  ;;  %v6738_v11 = vcombine.low %v6235_v2, %v6236_v54  ;;  %v7513_v44 = vld [vmem:[#allocation2 + $0x3f] sm:$0x1]  ;;  %v7516_v57 = vld [vmem:[#allocation2 + $0x42] sm:$0x1]  ;;  %v7517_v59 = vld [vmem:[#allocation2 + $0x43] sm:$0x1] }
 0x205   : > { %v6739_v16 = vcombine.low %v6237_v55, %v6238_v56  ;;  %v6735_v20 = vrot.slane %v6721_v3, %v17729_v7  ;;  %v7909_v21 = vcombine.low %v7887_v0, %v7894_v58  ;;  %v6740_v22 = vcombine.low %v6239_v60, %v6240_v46  ;;  %v7518_v0 = vld [vmem:[#allocation2 + $0x44] sm:$0x1]  ;;  %v6249_v58 = vld [vmem:[#allocation2 + $0x4a] sm:$0x1] }
 0x206   : > { %17358 = vmatprep.mubr.msk.bf16.mxu0 %vm4846_vm4, %v7876_v62  ;;  %v6747_v23 = vrot.slane %v6737_v61, %v17729_v7  ;;  %v7910_v26 = vcombine.low %v7901_v1, %v7908_v13  ;;  %v6754_v27 = vrot.slane %v6738_v11, %v17729_v7  ;;  %v7926_v29 = vcombine.low %v7504_v8, %v7505_v9  ;;  %v7519_v62 = vld [vmem:[#allocation2 + $0x45] sm:$0x1]  ;;  %v6250_v1 = vld [vmem:[#allocation2 + $0x4b] sm:$0x1]  ;;  %v6251_v11 = vld [vmem:[#allocation2 + $0x4c] sm:$0x1] }
 0x207   : > { %v6761_v28 = vrot.slane %v6739_v16, %v17729_v7  ;;  %v6736_v33 = vcombine.low %v6728_v10, %v6735_v20  ;;  %v7917_v34 = vrot.slane %v7909_v21, %v17729_v7  ;;  %v6768_v35 = vrot.slane %v6740_v22, %v17729_v7  ;;  %v6252_v20 = vld [vmem:[#allocation2 + $0x4d] sm:$0x1]  ;;  %v6253_v21 = vld [vmem:[#allocation2 + $0x4e] sm:$0x1]  ;;  %v6254_v22 = vld [vmem:[#allocation2 + $0x4f] sm:$0x1] }
 0x208   : > { %v7927_v4 = vcombine.low %v7506_v17, %v7507_v18  ;;  %v7924_v14 = vrot.slane %v7910_v26, %v17729_v7  ;;  %v6769_v36 = vcombine.low %v6747_v23, %v6754_v27  ;;  %v7928_v45 = vcombine.low %v7508_v19, %v7509_v53  ;;  %v6256_v26 = vld [vmem:[#allocation2 + $0x51] sm:$0x1] }
 0x209   : > { %v7929_v12 = vcombine.low %v7510_v24, %v7511_v25  ;;  %17329 = vmatmul.mubr.msk.bf16.gmra.mxu1 %vm4846_vm4, %v6736_v33  ;;  %v6770_v40 = vcombine.low %v6761_v28, %v6768_v35  ;;  %v7936_v6 = vrot.slane %v7926_v29, %v17729_v7  ;;  %v6786_v42 = vcombine.low %v6241_v31, %v6242_v32  ;;  %v6255_v25 = vld [vmem:[#allocation2 + $0x50] sm:$0x1]  ;;  %v7520_v33 = vld [vmem:[#allocation2 + $0x48] sm:$0x1] }
 0x20a   : > { %v7943_v15 = vrot.slane %v7927_v4, %v17729_v7  ;;  %v7925_v47 = vcombine.low %v7917_v34, %v7924_v14  ;;  %v6777_v48 = vrot.slane %v6769_v36, %v17729_v7  ;;  %v7950_v2 = vrot.slane %v7928_v45, %v17729_v7  ;;  %v7521_v34 = vld [vmem:[#allocation2 + $0x49] sm:$0x1]  ;;  %v7522_v14 = vld [vmem:[#allocation2 + $0x4a] sm:$0x1]  ;;  %v7523_v36 = vld [vmem:[#allocation2 + $0x4b] sm:$0x1] }
 0x20b   : > { %v7957_v63 = vrot.slane %v7929_v12, %v17729_v7  ;;  %v6784_v52 = vrot.slane %v6770_v40, %v17729_v7  ;;  %v6787_v55 = vcombine.low %v6243_v49, %v6244_v30  ;;  %v6788_v56 = vcombine.low %v6245_v37, %v6246_v38  ;;  %v7524_v45 = vld [vmem:[#allocation2 + $0x4c] sm:$0x1]  ;;  %v7525_v40 = vld [vmem:[#allocation2 + $0x4d] sm:$0x1] }
 0x20c   : > { %v7958_v54 = vcombine.low %v7936_v6, %v7943_v15  ;;  %17359 = vmatmul.mubr.msk.bf16.gmra.mxu0 %vm4846_vm4, %v7925_v47  ;;  %v6789_v46 = vcombine.low %v6247_v39, %v6248_v41  ;;  %v6796_v61 = vrot.slane %v6786_v42, %v17729_v7  ;;  %v7975_v3 = vcombine.low %v7512_v43, %v7513_v44  ;;  %v7526_v6 = vld [vmem:[#allocation2 + $0x4e] sm:$0x1]  ;;  %v7527_v15 = vld [vmem:[#allocation2 + $0x4f] sm:$0x1]  ;;  %v6257_v47 = vld [vmem:[#allocation2 + $0x52] sm:$0x1] }
 0x20d   : > { %v7959_v60 = vcombine.low %v7950_v2, %v7957_v63  ;;  %v6785_v8 = vcombine.low %v6777_v48, %v6784_v52  ;;  %v6803_v10 = vrot.slane %v6787_v55, %v17729_v7  ;;  %v6810_v13 = vrot.slane %v6788_v56, %v17729_v7  ;;  %v6258_v48 = vld [vmem:[#allocation2 + $0x53] sm:$0x1]  ;;  %v6259_v52 = vld [vmem:[#allocation2 + $0x54] sm:$0x1] }
 0x20e   : > { %v7966_v9 = vrot.slane %v7958_v54, %v17729_v7  ;;  %v6817_v17 = vrot.slane %v6789_v46, %v17729_v7  ;;  %v7976_v18 = vcombine.low %v7514_v50, %v7515_v51  ;;  %v7977_v19 = vcombine.low %v7516_v57, %v7517_v59  ;;  %v6260_v54 = vld [vmem:[#allocation2 + $0x55] sm:$0x1]  ;;  %v6263_v46 = vld [vmem:[#allocation2 + $0x58] sm:$0x1] }
 0x20f   : > { %v7973_v16 = vrot.slane %v7959_v60, %v17729_v7  ;;  %17332 = vmatprep.mubr.msk.bf16.mxu1 %vm4846_vm4, %v6785_v8  ;;  %v6818_v23 = vcombine.low %v6796_v61, %v6803_v10  ;;  %v7978_v53 = vcombine.low %v7518_v0, %v7519_v62  ;;  %v7985_v24 = vrot.slane %v7975_v3, %v17729_v7  ;;  %v6261_v0 = vld [vmem:[#allocation2 + $0x56] sm:$0x1]  ;;  %v6262_v60 = vld [vmem:[#allocation2 + $0x57] sm:$0x1]  ;;  %v7528_v8 = vld [vmem:[#allocation2 + $0x50] sm:$0x1] }
 0x210   : > { %v6835_v27 = vcombine.low %v6249_v58, %v6250_v1  ;;  %v6819_v29 = vcombine.low %v6810_v13, %v6817_v17  ;;  %v7992_v31 = vrot.slane %v7976_v18, %v17729_v7  ;;  %v7999_v32 = vrot.slane %v7977_v19, %v17729_v7  ;;  %v6264_v58 = vld [vmem:[#allocation2 + $0x59] sm:$0x1]  ;;  %v7530_v17 = vld [vmem:[#allocation2 + $0x52] sm:$0x1]  ;;  %v7531_v18 = vld [vmem:[#allocation2 + $0x53] sm:$0x1] }
 0x211   : > { %v7974_v28 = vcombine.low %v7966_v9, %v7973_v16  ;;  %v6826_v35 = vrot.slane %v6818_v23, %v17729_v7  ;;  %v8006_v4 = vrot.slane %v7978_v53, %v17729_v7  ;;  %v6836_v49 = vcombine.low %v6251_v11, %v6252_v20  ;;  %v7529_v9 = vld [vmem:[#allocation2 + $0x51] sm:$0x1]  ;;  %v7532_v23 = vld [vmem:[#allocation2 + $0x54] sm:$0x1]  ;;  %v7533_v53 = vld [vmem:[#allocation2 + $0x55] sm:$0x1] }
 0x212   : > { %v6837_v30 = vcombine.low %v6253_v21, %v6254_v22  ;;  %v6833_v12 = vrot.slane %v6819_v29, %v17729_v7  ;;  %v8007_v37 = vcombine.low %v7985_v24, %v7992_v31  ;;  %v6838_v38 = vcombine.low %v6255_v25, %v6256_v26  ;;  %v7534_v24 = vld [vmem:[#allocation2 + $0x56] sm:$0x1]  ;;  %v6265_v31 = vld [vmem:[#allocation2 + $0x5c] sm:$0x1] }
 0x213   : > { %17362 = vmatprep.mubr.msk.bf16.mxu0 %vm4846_vm4, %v7974_v28  ;;  %v6845_v39 = vrot.slane %v6835_v27, %v17729_v7  ;;  %v8008_v41 = vcombine.low %v7999_v32, %v8006_v4  ;;  %v6852_v42 = vrot.slane %v6836_v49, %v17729_v7  ;;  %v8024_v44 = vcombine.low %v7520_v33, %v7521_v34  ;;  %v7535_v28 = vld [vmem:[#allocation2 + $0x57] sm:$0x1]  ;;  %v6266_v32 = vld [vmem:[#allocation2 + $0x5d] sm:$0x1]  ;;  %v6267_v49 = vld [vmem:[#allocation2 + $0x5e] sm:$0x1] }
 0x214   : > { %v6859_v43 = vrot.slane %v6837_v30, %v17729_v7  ;;  %v6834_v2 = vcombine.low %v6826_v35, %v6833_v12  ;;  %v8015_v63 = vrot.slane %v8007_v37, %v17729_v7  ;;  %v6866_v50 = vrot.slane %v6838_v38, %v17729_v7  ;;  %v6268_v12 = vld [vmem:[#allocation2 + $0x5f] sm:$0x1]  ;;  %v6269_v37 = vld [vmem:[#allocation2 + $0x60] sm:$0x1]  ;;  %v6270_v38 = vld [vmem:[#allocation2 + $0x61] sm:$0x1] }
 0x215   : > { %v8025_v51 = vcombine.low %v7522_v14, %v7523_v36  ;;  %v8022_v55 = vrot.slane %v8008_v41, %v17729_v7  ;;  %v6867_v56 = vcombine.low %v6845_v39, %v6852_v42  ;;  %v8026_v57 = vcombine.low %v7524_v45, %v7525_v40  ;;  %v6272_v41 = vld [vmem:[#allocation2 + $0x63] sm:$0x1] }
 0x216   : > { %v8027_v59 = vcombine.low %v7526_v6, %v7527_v15  ;;  %17333 = vmatmul.mubr.msk.bf16.gmra.mxu1 %vm4846_vm4, %v6834_v2  ;;  %v6868_v61 = vcombine.low %v6859_v43, %v6866_v50  ;;  %v8034_v62 = vrot.slane %v8024_v44, %v17729_v7  ;;  %v6884_v1 = vcombine.low %v6257_v47, %v6258_v48  ;;  %v6271_v15 = vld [vmem:[#allocation2 + $0x62] sm:$0x1]  ;;  %v7536_v2 = vld [vmem:[#allocation2 + $0x5a] sm:$0x1] }
 0x217   : > { %v8041_v3 = vrot.slane %v8025_v51, %v17729_v7  ;;  %v8023_v10 = vcombine.low %v8015_v63, %v8022_v55  ;;  %v6875_v13 = vrot.slane %v6867_v56, %v17729_v7  ;;  %v8048_v11 = vrot.slane %v8026_v57, %v17729_v7  ;;  %v7537_v63 = vld [vmem:[#allocation2 + $0x5b] sm:$0x1]  ;;  %v7538_v55 = vld [vmem:[#allocation2 + $0x5c] sm:$0x1]  ;;  %v7539_v56 = vld [vmem:[#allocation2 + $0x5d] sm:$0x1] }
 0x218   : > { %v8055_v16 = vrot.slane %v8027_v59, %v17729_v7  ;;  %v6882_v19 = vrot.slane %v6868_v61, %v17729_v7  ;;  %v6885_v21 = vcombine.low %v6259_v52, %v6260_v54  ;;  %v6886_v22 = vcombine.low %v6261_v0, %v6262_v60  ;;  %v7540_v57 = vld [vmem:[#allocation2 + $0x5e] sm:$0x1]  ;;  %v7541_v61 = vld [vmem:[#allocation2 + $0x5f] sm:$0x1] }
 0x219   : > { %v8056_v20 = vcombine.low %v8034_v62, %v8041_v3  ;;  %17363 = vmatmul.mubr.msk.bf16.gmra.mxu0 %vm4846_vm4, %v8023_v10  ;;  %v6887_v26 = vcombine.low %v6263_v46, %v6264_v58  ;;  %v6894_v27 = vrot.slane %v6884_v1, %v17729_v7  ;;  %v8073_v29 = vcombine.low %v7528_v8, %v7529_v9  ;;  %v7542_v62 = vld [vmem:[#allocation2 + $0x60] sm:$0x1]  ;;  %v7543_v3 = vld [vmem:[#allocation2 + $0x61] sm:$0x1]  ;;  %v6273_v10 = vld [vmem:[#allocation2 + $0x64] sm:$0x1] }
 0x21a   : > { %v8057_v25 = vcombine.low %v8048_v11, %v8055_v16  ;;  %v6883_v33 = vcombine.low %v6875_v13, %v6882_v19  ;;  %v6901_v35 = vrot.slane %v6885_v21, %v17729_v7  ;;  %v6908_v4 = vrot.slane %v6886_v22, %v17729_v7  ;;  %v6274_v13 = vld [vmem:[#allocation2 + $0x65] sm:$0x1]  ;;  %v6275_v19 = vld [vmem:[#allocation2 + $0x66] sm:$0x1] }
 0x21b   : > { %v8064_v34 = vrot.slane %v8056_v20, %v17729_v7  ;;  %v6915_v14 = vrot.slane %v6887_v26, %v17729_v7  ;;  %v8074_v36 = vcombine.low %v7530_v17, %v7531_v18  ;;  %v8075_v45 = vcombine.low %v7532_v23, %v7533_v53  ;;  %v6276_v20 = vld [vmem:[#allocation2 + $0x67] sm:$0x1]  ;;  %v18901_v21 = vld [vmem:[%s20985_s5 + $0x5] sm:$0x1]  ;;  %v6278_v26 = vld [vmem:[#allocation2 + $0x69] sm:$0x1] }
 0x21c   : > { %v8071_v30 = vrot.slane %v8057_v25, %v17729_v7  ;;  %17336 = vmatprep.mubr.msk.bf16.mxu1 %vm4846_vm4, %v6883_v33  ;;  %v6916_v39 = vcombine.low %v6894_v27, %v6901_v35  ;;  %v8076_v40 = vcombine.low %v7534_v24, %v7535_v28  ;;  %v8083_v6 = vrot.slane %v8073_v29, %v17729_v7  ;;  %v6277_v25 = vld [vmem:[#allocation2 + $0x68] sm:$0x1]  ;;  %v6279_v27 = vld [vmem:[#allocation2 + $0x6a] sm:$0x1]  ;;  %v7545_v35 = vld [vmem:[#allocation2 + $0x63] sm:$0x1] }
 0x21d   : > { %v6933_v42 = vcombine.low %v6265_v31, %v6266_v32  ;;  %v6917_v44 = vcombine.low %v6908_v4, %v6915_v14  ;;  %v8090_v47 = vrot.slane %v8074_v36, %v17729_v7  ;;  %v8097_v48 = vrot.slane %v8075_v45, %v17729_v7  ;;  %17601 = vmatprep.subr.msk.bf16.mxu0 %vm4895_vm3, %v18901_v21  ;;  %v6280_v32 = vld [vmem:[#allocation2 + $0x6b] sm:$0x1]  ;;  %v7546_v36 = vld [vmem:[#allocation2 + $0x64] sm:$0x1]  ;;  %v7547_v45 = vld [vmem:[#allocation2 + $0x65] sm:$0x1] }
 0x21e   : > { %v8072_v43 = vcombine.low %v8064_v34, %v8071_v30  ;;  %v6924_v50 = vrot.slane %v6916_v39, %v17729_v7  ;;  %v8104_v51 = vrot.slane %v8076_v40, %v17729_v7  ;;  %v6934_v52 = vcombine.low %v6267_v49, %v6268_v12  ;;  %v7544_v34 = vld [vmem:[#allocation2 + $0x62] sm:$0x1]  ;;  %v7548_v12 = vld [vmem:[#allocation2 + $0x66] sm:$0x1] }
 0x21f   : > { %v6935_v54 = vcombine.low %v6269_v37, %v6270_v38  ;;  %v6931_v59 = vrot.slane %v6917_v44, %v17729_v7  ;;  %v8105_v0 = vcombine.low %v8083_v6, %v8090_v47  ;;  %v6936_v60 = vcombine.low %v6271_v15, %v6272_v41  ;;  %v7549_v6 = vld [vmem:[#allocation2 + $0x67] sm:$0x1]  ;;  %v7550_v15 = vld [vmem:[#allocation2 + $0x68] sm:$0x1]  ;;  %v7551_v41 = vld [vmem:[#allocation2 + $0x69] sm:$0x1] }
 0x220   : > { %17366 = vmatprep.mubr.msk.bf16.mxu0 %vm4846_vm4, %v8072_v43  ;;  %v6943_v46 = vrot.slane %v6933_v42, %v17729_v7  ;;  %v8106_v58 = vcombine.low %v8097_v48, %v8104_v51  ;;  %v6950_v1 = vrot.slane %v6934_v52, %v17729_v7  ;;  %v8122_v9 = vcombine.low %v7536_v2, %v7537_v63  ;;  %v6281_v48 = vld [vmem:[#allocation2 + $0x6e] sm:$0x1]  ;;  %v6282_v2 = vld [vmem:[#allocation2 + $0x6f] sm:$0x1]  ;;  %v18918_v63 = vld [vmem:[%s20985_s5 + $0x6] sm:$0x1] }
 0x221   : > { %v6957_v8 = vrot.slane %v6935_v54, %v17729_v7  ;;  %v6932_v11 = vcombine.low %v6924_v50, %v6931_v59  ;;  %v8113_v16 = vrot.slane %v8105_v0, %v17729_v7  ;;  %v6964_v17 = vrot.slane %v6936_v60, %v17729_v7  ;;  %17602 = vmatprep.subr.msk.bf16.mxu1 %vm4895_vm3, %v18918_v63  ;;  %v6284_v60 = vld [vmem:[#allocation2 + $0x71] sm:$0x1] }
 0x222   : > { %v8123_v18 = vcombine.low %v7538_v55, %v7539_v56  ;;  %v8120_v22 = vrot.slane %v8106_v58, %v17729_v7  ;;  %v6965_v23 = vcombine.low %v6943_v46, %v6950_v1  ;;  %v8124_v53 = vcombine.low %v7540_v57, %v7541_v61  ;;  %v6283_v55 = vld [vmem:[#allocation2 + $0x70] sm:$0x1]  ;;  %v6285_v46 = vld [vmem:[#allocation2 + $0x72] sm:$0x1]  ;;  %v6286_v61 = vld [vmem:[#allocation2 + $0x73] sm:$0x1] }
 0x223   : > { %v8125_v24 = vcombine.low %v7542_v62, %v7543_v3  ;;  %17337 = vmatmul.mubr.msk.bf16.gmra.mxu1 %vm4846_vm4, %v6932_v11  ;;  %v6966_v28 = vcombine.low %v6957_v8, %v6964_v17  ;;  %v8132_v29 = vrot.slane %v8122_v9, %v17729_v7  ;;  %v6982_v33 = vcombine.low %v6273_v10, %v6274_v13  ;;  %v6287_v1 = vld [vmem:[#allocation2 + $0x74] sm:$0x1]  ;;  %v6288_v8 = vld [vmem:[#allocation2 + $0x75] sm:$0x1]  ;;  %v7552_v17 = vld [vmem:[#allocation2 + $0x6c] sm:$0x1] }
 0x224   : > { %v8139_v31 = vrot.slane %v8123_v18, %v17729_v7  ;;  %v8121_v4 = vcombine.low %v8113_v16, %v8120_v22  ;;  %v6973_v49 = vrot.slane %v6965_v23, %v17729_v7  ;;  %v8146_v30 = vrot.slane %v8124_v53, %v17729_v7  ;;  %v7553_v18 = vld [vmem:[#allocation2 + $0x6d] sm:$0x1]  ;;  %v7554_v53 = vld [vmem:[#allocation2 + $0x6e] sm:$0x1] }
 0x225   : > { %v8153_v14 = vrot.slane %v8125_v24, %v17729_v7  ;;  %v6980_v37 = vrot.slane %v6966_v28, %v17729_v7  ;;  %v6983_v39 = vcombine.low %v6275_v19, %v6276_v20  ;;  %v6984_v40 = vcombine.low %v6277_v25, %v6278_v26  ;;  %v7555_v24 = vld [vmem:[#allocation2 + $0x6f] sm:$0x1]  ;;  %v7556_v25 = vld [vmem:[#allocation2 + $0x70] sm:$0x1] }
 0x226   : > { %v8154_v38 = vcombine.low %v8132_v29, %v8139_v31  ;;  %17367 = vmatmul.mubr.msk.bf16.gmra.mxu0 %vm4846_vm4, %v8121_v4  ;;  %v6985_v43 = vcombine.low %v6279_v27, %v6280_v32  ;;  %v6992_v44 = vrot.slane %v6982_v33, %v17729_v7  ;;  %v8171_v47 = vcombine.low %v7544_v34, %v7545_v35  ;;  %v7557_v31 = vld [vmem:[#allocation2 + $0x71] sm:$0x1]  ;;  %v7558_v32 = vld [vmem:[#allocation2 + $0x72] sm:$0x1]  ;;  %v7559_v33 = vld [vmem:[#allocation2 + $0x73] sm:$0x1] }
 0x227   : > { %v8155_v42 = vcombine.low %v8146_v30, %v8153_v14  ;;  %v6981_v50 = vcombine.low %v6973_v49, %v6980_v37  ;;  %v6999_v52 = vrot.slane %v6983_v39, %v17729_v7  ;;  %v7006_v54 = vrot.slane %v6984_v40, %v17729_v7  ;;  %v6289_v30 = vld [vmem:[#allocation2 + $0x76] sm:$0x1]  ;;  %v6290_v14 = vld [vmem:[#allocation2 + $0x77] sm:$0x1]  ;;  %v6292_v39 = vld [vmem:[#allocation2 + $0x79] sm:$0x1] }
 0x228   : > { %v8162_v51 = vrot.slane %v8154_v38, %v17729_v7  ;;  %v7013_v57 = vrot.slane %v6985_v43, %v17729_v7  ;;  %v8172_v59 = vcombine.low %v7546_v36, %v7547_v45  ;;  %v8173_v0 = vcombine.low %v7548_v12, %v7549_v6  ;;  %v6291_v38 = vld [vmem:[#allocation2 + $0x78] sm:$0x1]  ;;  %v6294_v43 = vld [vmem:[#allocation2 + $0x7b] sm:$0x1] }
 0x229   : > { %v8169_v56 = vrot.slane %v8155_v42, %v17729_v7  ;;  %17340 = vmatprep.mubr.msk.bf16.mxu1 %vm4846_vm4, %v6981_v50  ;;  %v7014_v62 = vcombine.low %v6992_v44, %v6999_v52  ;;  %v8174_v3 = vcombine.low %v7550_v15, %v7551_v41  ;;  %v8181_v58 = vrot.slane %v8171_v47, %v17729_v7  ;;  %v6293_v42 = vld [vmem:[#allocation2 + $0x7a] sm:$0x1]  ;;  %v6295_v44 = vld [vmem:[#allocation2 + $0x7c] sm:$0x1]  ;;  %v6296_v50 = vld [vmem:[#allocation2 + $0x7d] sm:$0x1] }
 0x22a   : > { %v7031_v9 = vcombine.low %v6281_v48, %v6282_v2  ;;  %v7015_v13 = vcombine.low %v7006_v54, %v7013_v57  ;;  %v8188_v11 = vrot.slane %v8172_v59, %v17729_v7  ;;  %v8195_v16 = vrot.slane %v8173_v0, %v17729_v7  ;;  %v7560_v52 = vld [vmem:[#allocation2 + $0x74] sm:$0x1]  ;;  %v7561_v54 = vld [vmem:[#allocation2 + $0x75] sm:$0x1]  ;;  %v7562_v0 = vld [vmem:[#allocation2 + $0x76] sm:$0x1] }
 0x22b   : > { %v8170_v10 = vcombine.low %v8162_v51, %v8169_v56  ;;  %v7022_v19 = vrot.slane %v7014_v62, %v17729_v7  ;;  %v8202_v20 = vrot.slane %v8174_v3, %v17729_v7  ;;  %v7032_v22 = vcombine.low %v6283_v55, %v6284_v60  ;;  %v7563_v60 = vld [vmem:[#allocation2 + $0x77] sm:$0x1] }
 0x22c   : > { %v7033_v23 = vcombine.low %v6285_v46, %v6286_v61  ;;  %v7029_v26 = vrot.slane %v7015_v13, %v17729_v7  ;;  %v8203_v27 = vcombine.low %v8181_v58, %v8188_v11  ;;  %v7034_v28 = vcombine.low %v6287_v1, %v6288_v8  ;;  %v7564_v58 = vld [vmem:[#allocation2 + $0x78] sm:$0x1]  ;;  %v7565_v1 = vld [vmem:[#allocation2 + $0x79] sm:$0x1]  ;;  %v7566_v8 = vld [vmem:[#allocation2 + $0x7a] sm:$0x1] }
 0x22d   : > { %17370 = vmatprep.mubr.msk.bf16.mxu0 %vm4846_vm4, %v8170_v10  ;;  %v7041_v29 = vrot.slane %v7031_v9, %v17729_v7  ;;  %v8204_v34 = vcombine.low %v8195_v16, %v8202_v20  ;;  %v7048_v35 = vrot.slane %v7032_v22, %v17729_v7  ;;  %v8220_v49 = vcombine.low %v7552_v17, %v7553_v18  ;;  %v7567_v11 = vld [vmem:[#allocation2 + $0x7b] sm:$0x1]  ;;  %v6297_v17 = vld [vmem:[#allocation2 + $0x80] sm:$0x1]  ;;  %v6298_v18 = vld [vmem:[#allocation2 + $0x81] sm:$0x1] }
 0x22e   : > { %v7055_v4 = vrot.slane %v7033_v23, %v17729_v7  ;;  %v7030_v36 = vcombine.low %v7022_v19, %v7029_v26  ;;  %v8211_v45 = vrot.slane %v8203_v27, %v17729_v7  ;;  %v7062_v12 = vrot.slane %v7034_v28, %v17729_v7  ;;  %v6300_v28 = vld [vmem:[#allocation2 + $0x83] sm:$0x1] }
 0x22f   : > { %v8221_v37 = vcombine.low %v7554_v53, %v7555_v24  ;;  %v8218_v40 = vrot.slane %v8204_v34, %v17729_v7  ;;  %v7063_v6 = vcombine.low %v7041_v29, %v7048_v35  ;;  %v8222_v15 = vcombine.low %v7556_v25, %v7557_v31  ;;  %v6299_v53 = vld [vmem:[#allocation2 + $0x82] sm:$0x1]  ;;  %v6301_v29 = vld [vmem:[#allocation2 + $0x84] sm:$0x1]  ;;  %v6302_v31 = vld [vmem:[#allocation2 + $0x85] sm:$0x1] }
 0x230   : > { %v8223_v41 = vcombine.low %v7558_v32, %v7559_v33  ;;  %17341 = vmatmul.mubr.msk.bf16.gmra.mxu1 %vm4846_vm4, %v7030_v36  ;;  %v7064_v47 = vcombine.low %v7055_v4, %v7062_v12  ;;  %v8230_v48 = vrot.slane %v8220_v49, %v17729_v7  ;;  %v7080_v51 = vcombine.low %v6289_v30, %v6290_v14  ;;  %v6303_v35 = vld [vmem:[#allocation2 + $0x86] sm:$0x1]  ;;  %v6304_v4 = vld [vmem:[#allocation2 + $0x87] sm:$0x1]  ;;  %v7568_v12 = vld [vmem:[#allocation2 + $0x7e] sm:$0x1] }
 0x231   : > { %v8237_v2 = vrot.slane %v8221_v37, %v17729_v7  ;;  %v8219_v55 = vcombine.low %v8211_v45, %v8218_v40  ;;  %v7071_v56 = vrot.slane %v7063_v6, %v17729_v7  ;;  %v8244_v57 = vrot.slane %v8222_v15, %v17729_v7  ;;  %v7569_v37 = vld [vmem:[#allocation2 + $0x7f] sm:$0x1]  ;;  %v7570_v15 = vld [vmem:[#allocation2 + $0x80] sm:$0x1] }
 0x232   : > { %v8251_v59 = vrot.slane %v8223_v41, %v17729_v7  ;;  %v7078_v46 = vrot.slane %v7064_v47, %v17729_v7  ;;  %v7081_v62 = vcombine.low %v6291_v38, %v6292_v39  ;;  %v7082_v3 = vcombine.low %v6293_v42, %v6294_v43  ;;  %v7571_v41 = vld [vmem:[#allocation2 + $0x81] sm:$0x1]  ;;  %v7572_v42 = vld [vmem:[#allocation2 + $0x82] sm:$0x1] }
 0x233   : > { %v8252_v61 = vcombine.low %v8230_v48, %v8237_v2  ;;  %17371 = vmatmul.mubr.msk.bf16.gmra.mxu0 %vm4846_vm4, %v8219_v55  ;;  %v7083_v10 = vcombine.low %v6295_v44, %v6296_v50  ;;  %v7090_v13 = vrot.slane %v7080_v51, %v17729_v7  ;;  %v8269_v16 = vcombine.low %v7560_v52, %v7561_v54  ;;  %v7573_v2 = vld [vmem:[#allocation2 + $0x83] sm:$0x1]  ;;  %v7574_v50 = vld [vmem:[#allocation2 + $0x84] sm:$0x1]  ;;  %v7575_v51 = vld [vmem:[#allocation2 + $0x85] sm:$0x1] }
 0x234   : > { %v8253_v9 = vcombine.low %v8244_v57, %v8251_v59  ;;  %v7079_v19 = vcombine.low %v7071_v56, %v7078_v46  ;;  %v7097_v22 = vrot.slane %v7081_v62, %v17729_v7  ;;  %v7104_v23 = vrot.slane %v7082_v3, %v17729_v7  ;;  %v6305_v57 = vld [vmem:[#allocation2 + $0x88] sm:$0x1]  ;;  %v6306_v59 = vld [vmem:[#allocation2 + $0x89] sm:$0x1]  ;;  %v6307_v62 = vld [vmem:[#allocation2 + $0x8a] sm:$0x1] }
 0x235   : > { %v8260_v20 = vrot.slane %v8252_v61, %v17729_v7  ;;  %v7111_v25 = vrot.slane %v7083_v10, %v17729_v7  ;;  %v8270_v26 = vcombine.low %v7562_v0, %v7563_v60  ;;  %v8271_v27 = vcombine.low %v7564_v58, %v7565_v1  ;;  %v6308_v3 = vld [vmem:[#allocation2 + $0x8b] sm:$0x1]  ;;  %v6309_v10 = vld [vmem:[#allocation2 + $0x8c] sm:$0x1] }
 0x236   : > { %v8267_v24 = vrot.slane %v8253_v9, %v17729_v7  ;;  %17344 = vmatprep.mubr.msk.bf16.mxu1 %vm4846_vm4, %v7079_v19  ;;  %v7112_v32 = vcombine.low %v7090_v13, %v7097_v22  ;;  %v8272_v33 = vcombine.low %v7566_v8, %v7567_v11  ;;  %v8279_v34 = vrot.slane %v8269_v16, %v17729_v7  ;;  %v6310_v13 = vld [vmem:[#allocation2 + $0x8d] sm:$0x1]  ;;  %v6311_v11 = vld [vmem:[#allocation2 + $0x8e] sm:$0x1]  ;;  %v6312_v19 = vld [vmem:[#allocation2 + $0x8f] sm:$0x1] }
 0x237   : > { %v7129_v49 = vcombine.low %v6297_v17, %v6298_v18  ;;  %v7113_v14 = vcombine.low %v7104_v23, %v7111_v25  ;;  %v8286_v36 = vrot.slane %v8270_v26, %v17729_v7  ;;  %v8293_v45 = vrot.slane %v8271_v27, %v17729_v7  ;;  %v7576_v22 = vld [vmem:[#allocation2 + $0x86] sm:$0x1]  ;;  %v7577_v23 = vld [vmem:[#allocation2 + $0x87] sm:$0x1]  ;;  %v7578_v27 = vld [vmem:[#allocation2 + $0x88] sm:$0x1] }
 0x238   : > { %v8268_v30 = vcombine.low %v8260_v20, %v8267_v24  ;;  %v7120_v38 = vrot.slane %v7112_v32, %v17729_v7  ;;  %v8300_v39 = vrot.slane %v8272_v33, %v17729_v7  ;;  %v7130_v40 = vcombine.low %v6299_v53, %v6300_v28  ;;  %v7579_v33 = vld [vmem:[#allocation2 + $0x89] sm:$0x1] }
 0x239   : > { %v7131_v6 = vcombine.low %v6301_v29, %v6302_v31  ;;  %v7127_v43 = vrot.slane %v7113_v14, %v17729_v7  ;;  %v8301_v44 = vcombine.low %v8279_v34, %v8286_v36  ;;  %v7132_v47 = vcombine.low %v6303_v35, %v6304_v4  ;;  %v7580_v34 = vld [vmem:[#allocation2 + $0x8a] sm:$0x1]  ;;  %v7581_v35 = vld [vmem:[#allocation2 + $0x8b] sm:$0x1]  ;;  %v7582_v14 = vld [vmem:[#allocation2 + $0x8c] sm:$0x1] }
 0x23a   : > { %17374 = vmatprep.mubr.msk.bf16.mxu0 %vm4846_vm4, %v8268_v30  ;;  %v7139_v48 = vrot.slane %v7129_v49, %v17729_v7  ;;  %v8302_v52 = vcombine.low %v8293_v45, %v8300_v39  ;;  %v7146_v54 = vrot.slane %v7130_v40, %v17729_v7  ;;  %v8318_v56 = vcombine.low %v7568_v12, %v7569_v37  ;;  %v7583_v36 = vld [vmem:[#allocation2 + $0x8d] sm:$0x1]  ;;  %v7584_v40 = vld [vmem:[#allocation2 + $0x90] sm:$0x1] }
 0x23b   : > { %v7153_v55 = vrot.slane %v7131_v6, %v17729_v7  ;;  %v7128_v0 = vcombine.low %v7120_v38, %v7127_v43  ;;  %v8309_v60 = vrot.slane %v8301_v44, %v17729_v7  ;;  %v7160_v46 = vrot.slane %v7132_v47, %v17729_v7  ;;  %v7585_v6 = vld [vmem:[#allocation2 + $0x91] sm:$0x1]  ;;  %v7587_v47 = vld [vmem:[#allocation2 + $0x93] sm:$0x1] }
 0x23c   : > { %v8319_v61 = vcombine.low %v7570_v15, %v7571_v41  ;;  %v8316_v58 = vrot.slane %v8302_v52, %v17729_v7  ;;  %v7161_v1 = vcombine.low %v7139_v48, %v7146_v54  ;;  %v8320_v8 = vcombine.low %v7572_v42, %v7573_v2  ;;  %v7586_v15 = vld [vmem:[#allocation2 + $0x92] sm:$0x1]  ;;  %v7588_v48 = vld [vmem:[#allocation2 + $0x94] sm:$0x1]  ;;  %v7589_v2 = vld [vmem:[#allocation2 + $0x95] sm:$0x1] }
 0x23d   : > { %v8321_v9 = vcombine.low %v7574_v50, %v7575_v51  ;;  %17345 = vmatmul.mubr.msk.bf16.gmra.mxu1 %vm4846_vm4, %v7128_v0  ;;  %v7162_v16 = vcombine.low %v7153_v55, %v7160_v46  ;;  %v8328_v17 = vrot.slane %v8318_v56, %v17729_v7  ;;  %v7178_v20 = vcombine.low %v6305_v57, %v6306_v59  ;;  %v7590_v55 = vld [vmem:[#allocation2 + $0x96] sm:$0x1]  ;;  %v7591_v56 = vld [vmem:[#allocation2 + $0x97] sm:$0x1]  ;;  %v8758_v46 = vld [vmem:[#allocation2 + $0x13] sm:$0x1] }
 0x23e   : > { %v8335_v18 = vrot.slane %v8319_v61, %v17729_v7  ;;  %v8317_v53 = vcombine.low %v8309_v60, %v8316_v58  ;;  %v7169_v24 = vrot.slane %v7161_v1, %v17729_v7  ;;  %v8342_v25 = vrot.slane %v8320_v8, %v17729_v7  ;;  %v8759_v61 = vld [vmem:[#allocation2 + $0x14] sm:$0x1]  ;;  %v8760_v8 = vld [vmem:[#allocation2 + $0x15] sm:$0x1] }
 0x23f   : > { %v8349_v26 = vrot.slane %v8321_v9, %v17729_v7  ;;  %v7176_v28 = vrot.slane %v7162_v16, %v17729_v7  ;;  %v7179_v31 = vcombine.low %v6307_v62, %v6308_v3  ;;  %v7180_v32 = vcombine.low %v6309_v10, %v6310_v13  ;;  %v8761_v9 = vld [vmem:[#allocation2 + $0x16] sm:$0x1]  ;;  %v8762_v16 = vld [vmem:[#allocation2 + $0x17] sm:$0x1] }
 0x240   : > { %v8350_v29 = vcombine.low %v8328_v17, %v8335_v18  ;;  %17375 = vmatmul.mubr.msk.bf16.gmra.mxu0 %vm4846_vm4, %v8317_v53  ;;  %v7181_v49 = vcombine.low %v6311_v11, %v6312_v19  ;;  %v7188_v30 = vrot.slane %v7178_v20, %v17729_v7  ;;  %v8367_v45 = vcombine.low %v7576_v22, %v7577_v23  ;;  %v8763_v17 = vld [vmem:[#allocation2 + $0x18] sm:$0x1]  ;;  %v8764_v18 = vld [vmem:[#allocation2 + $0x19] sm:$0x1]  ;;  %v8765_v23 = vld [vmem:[#allocation2 + $0x1a] sm:$0x1] }
 0x241   : > { %v8351_v4 = vcombine.low %v8342_v25, %v8349_v26  ;;  %v7177_v12 = vcombine.low %v7169_v24, %v7176_v28  ;;  %v7195_v38 = vrot.slane %v7179_v31, %v17729_v7  ;;  %v7202_v39 = vrot.slane %v7180_v32, %v17729_v7  ;;  %v7592_v24 = vld [vmem:[#allocation2 + $0x98] sm:$0x1]  ;;  %v7593_v25 = vld [vmem:[#allocation2 + $0x99] sm:$0x1]  ;;  %v7594_v31 = vld [vmem:[#allocation2 + $0x9a] sm:$0x1] }
 0x242   : > { %v8358_v37 = vrot.slane %v8350_v29, %v17729_v7  ;;  %v7209_v42 = vrot.slane %v7181_v49, %v17729_v7  ;;  %v8368_v43 = vcombine.low %v7578_v27, %v7579_v33  ;;  %v8369_v44 = vcombine.low %v7580_v34, %v7581_v35  ;;  %v7595_v32 = vld [vmem:[#allocation2 + $0x9b] sm:$0x1]  ;;  %v7596_v49 = vld [vmem:[#allocation2 + $0x9c] sm:$0x1] }
 0x243   : > { %v8365_v41 = vrot.slane %v8351_v4, %v17729_v7  ;;  %17348 = vmatprep.mubr.msk.bf16.mxu1 %vm4846_vm4, %v7177_v12  ;;  %v7210_v50 = vcombine.low %v7188_v30, %v7195_v38  ;;  %v8370_v51 = vcombine.low %v7582_v14, %v7583_v36  ;;  %v8377_v52 = vrot.slane %v8367_v45, %v17729_v7  ;;  %v7597_v30 = vld [vmem:[#allocation2 + $0x9d] sm:$0x1]  ;;  %v7598_v14 = vld [vmem:[#allocation2 + $0x9e] sm:$0x1]  ;;  %v7599_v38 = vld [vmem:[#allocation2 + $0x9f] sm:$0x1] }
 0x244   : > { %v11136_v54 = vsel %vm4895_vm3, %v18901_v21, 0  ;;  %v7211_v59 = vcombine.low %v7202_v39, %v7209_v42  ;;  %v8384_v0 = vrot.slane %v8368_v43, %v17729_v7  ;;  %v8391_v60 = vrot.slane %v8369_v44, %v17729_v7  ;;  %v8768_v44 = vld [vmem:[#allocation2 + $0x1d] sm:$0x1] }
 0x245   : > { %v8366_v57 = vcombine.low %v8358_v37, %v8365_v41  ;;  %17421 = vmatpush3.bf16.msra.mxu0 %v11136_v54  ;;  %v7218_v62 = vrot.slane %v7210_v50, %v17729_v7  ;;  %v8398_v3 = vrot.slane %v8370_v51, %v17729_v7  ;;  %v8416_v58 = vcombine.low %v7584_v40, %v7585_v6  ;;  %v8766_v40 = vld [vmem:[#allocation2 + $0x1b] sm:$0x1]  ;;  %v8767_v6 = vld [vmem:[#allocation2 + $0x1c] sm:$0x1]  ;;  %v8770_v54 = vld [vmem:[#allocation2 + $0x1f] sm:$0x1] }
 0x246   : > { %v8417_v1 = vcombine.low %v7586_v15, %v7587_v47  ;;  %v7225_v21 = vrot.slane %v7211_v59, %v17729_v7  ;;  %v8399_v10 = vcombine.low %v8377_v52, %v8384_v0  ;;  %v8418_v13 = vcombine.low %v7588_v48, %v7589_v2  ;;  %v8769_v52 = vld [vmem:[#allocation2 + $0x1e] sm:$0x1]  ;;  %v8772_v0 = vld [vmem:[#allocation2 + $0x21] sm:$0x1] }
 0x247   : > { %17378 = vmatprep.mubr.msk.bf16.mxu0 %vm4846_vm4, %v8366_v57  ;;  %v8419_v11 = vcombine.low %v7590_v55, %v7591_v56  ;;  %v8400_v19 = vcombine.low %v8391_v60, %v8398_v3  ;;  %v8426_v20 = vrot.slane %v8416_v58, %v17729_v7  ;;  %v9016_v53 = vcombine.low %v8758_v46, %v8759_v61  ;;  %v8771_v55 = vld [vmem:[#allocation2 + $0x20] sm:$0x1]  ;;  %v8773_v60 = vld [vmem:[#allocation2 + $0x22] sm:$0x1] }
 0x248   : > { %v8433_v22 = vrot.slane %v8417_v1, %v17729_v7  ;;  %v7226_v26 = vcombine.low %v7218_v62, %v7225_v21  ;;  %v8407_v27 = vrot.slane %v8399_v10, %v17729_v7  ;;  %v8440_v28 = vrot.slane %v8418_v13, %v17729_v7 }
 0x249   : > { %v8447_v29 = vrot.slane %v8419_v11, %v17729_v7  ;;  %v8414_v33 = vrot.slane %v8400_v19, %v17729_v7  ;;  %v9017_v35 = vcombine.low %v8760_v8, %v8761_v9  ;;  %v9018_v4 = vcombine.low %v8762_v16, %v8763_v17  ;;  %v8774_v8 = vld [vmem:[#allocation2 + $0x25] sm:$0x1]  ;;  %v8775_v9 = vld [vmem:[#allocation2 + $0x26] sm:$0x1]  ;;  %v8776_v16 = vld [vmem:[#allocation2 + $0x27] sm:$0x1] }
 0x24a   : > { %v8448_v34 = vcombine.low %v8426_v20, %v8433_v22  ;;  %v18999_v36 = vpop.f32.mrf.mxu1  ;;  %17349 = vmatmul.mubr.msk.bf16.gmra.mxu1 %vm4846_vm4, %v7226_v26  ;;  %v9019_v12 = vcombine.low %v8764_v18, %v8765_v23  ;;  %v9026_v37 = vrot.slane %v9016_v53, %v17729_v7  ;;  %v8465_v39 = vcombine.low %v7592_v24, %v7593_v25  ;;  %v8777_v17 = vld [vmem:[#allocation2 + $0x28] sm:$0x1]  ;;  %v8778_v18 = vld [vmem:[#allocation2 + $0x29] sm:$0x1]  ;;  %v8779_v24 = vld [vmem:[#allocation2 + $0x2a] sm:$0x1] }
 0x24b   : > { %20993 = vst [vmem:[#allocation4_spill] sm:$0xff] %v18999_v36  ;;  %v8449_v45 = vcombine.low %v8440_v28, %v8447_v29  ;;  %v8415_v15 = vcombine.low %v8407_v27, %v8414_v33  ;;  %v9033_v42 = vrot.slane %v9017_v35, %v17729_v7  ;;  %v9040_v43 = vrot.slane %v9018_v4, %v17729_v7  ;;  %v8780_v25 = vld [vmem:[#allocation2 + $0x2b] sm:$0x1]  ;;  %v8781_v26 = vld [vmem:[#allocation2 + $0x2c] sm:$0x1] }
 0x24c   : > { %v8456_v41 = vrot.slane %v8448_v34, %v17729_v7  ;;  %v19006_v47 = vpop.f32.mrf.mxu1  ;;  %v9047_v2 = vrot.slane %v9019_v12, %v17729_v7  ;;  %v8466_v50 = vcombine.low %v7594_v31, %v7595_v32  ;;  %v8467_v51 = vcombine.low %v7596_v49, %v7597_v30  ;;  %v10045_v32 = vld [vmem:[#allocation2 + $0x14] sm:$0x1]  ;;  %v10046_v33 = vld [vmem:[#allocation2 + $0x15] sm:$0x1]  ;;  %v10047_v30 = vld [vmem:[#allocation2 + $0x16] sm:$0x1] }
 0x24d   : > { %20994 = vst [vmem:[#allocation5_spill] sm:$0xff] %v19006_v47  ;;  %v8463_v48 = vrot.slane %v8449_v45, %v17729_v7  ;;  %17379 = vmatmul.mubr.msk.bf16.gmra.mxu0 %vm4846_vm4, %v8415_v15  ;;  %v9048_v56 = vcombine.low %v9026_v37, %v9033_v42  ;;  %v8468_v57 = vcombine.low %v7598_v14, %v7599_v38  ;;  %v19027_v31 = vsel %vm4895_vm3, %v18918_v63, 0  ;;  %v10048_v14 = vld [vmem:[#allocation2 + $0x17] sm:$0x1]  ;;  %v10126_v36 = vld [vmem:[#allocation2 + $0x6f] sm:$0x1] }
 0x24e   : > { %v8475_v59 = vrot.slane %v8465_v39, %v17729_v7  ;;  %v9065_v46 = vcombine.low %v8766_v40, %v8767_v6  ;;  %v19012_v61 = vpop.f32.mrf.mxu1  ;;  %v9049_v3 = vcombine.low %v9040_v43, %v9047_v2  ;;  %v8482_v58 = vrot.slane %v8466_v50, %v17729_v7  ;;  %v10049_v39 = vld [vmem:[#allocation2 + $0x18] sm:$0x1]  ;;  %v10050_v40 = vld [vmem:[#allocation2 + $0x19] sm:$0x1]  ;;  %v10051_v6 = vld [vmem:[#allocation2 + $0x1a] sm:$0x1] }
 0x24f   : > { %20995 = vst [vmem:[#allocation6_spill] sm:$0xff] %v19012_v61  ;;  %v8464_v62 = vcombine.low %v8456_v41, %v8463_v48  ;;  %v8489_v1 = vrot.slane %v8467_v51, %v17729_v7  ;;  %v9056_v21 = vrot.slane %v9048_v56, %v17729_v7  ;;  %v8496_v10 = vrot.slane %v8468_v57, %v17729_v7  ;;  %v10052_v43 = vld [vmem:[#allocation2 + $0x1b] sm:$0x1]  ;;  %v8782_v48 = vld [vmem:[#allocation2 + $0x2d] sm:$0x1] }
 0x250   : > { %v9066_v13 = vcombine.low %v8768_v44, %v8769_v52  ;;  %v9067_v11 = vcombine.low %v8770_v54, %v8771_v55  ;;  %v19018_v19 = vpop.f32.mrf.mxu1  ;;  %v9063_v20 = vrot.slane %v9049_v3, %v17729_v7  ;;  %v8497_v22 = vcombine.low %v8475_v59, %v8482_v58  ;;  %v8783_v2 = vld [vmem:[#allocation2 + $0x2e] sm:$0x1]  ;;  %v8784_v55 = vld [vmem:[#allocation2 + $0x2f] sm:$0x1]  ;;  %v8787_v3 = vld [vmem:[#allocation2 + $0x32] sm:$0x1] }
 0x251   : > { %20996 = vst [vmem:[#allocation7_spill] sm:$0xff] %v19018_v19  ;;  %17382 = vmatprep.mubr.msk.bf16.mxu0 %vm4846_vm4, %v8464_v62  ;;  %v9068_v23 = vcombine.low %v8772_v0, %v8773_v60  ;;  %v9075_v53 = vrot.slane %v9065_v46, %v17729_v7  ;;  %v8498_v27 = vcombine.low %v8489_v1, %v8496_v10  ;;  %v8785_v46 = vld [vmem:[#allocation2 + $0x30] sm:$0x1]  ;;  %v8786_v62 = vld [vmem:[#allocation2 + $0x31] sm:$0x1] }
 0x252   : > { %v9082_v28 = vrot.slane %v9066_v13, %v17729_v7  ;;  %v9089_v29 = vrot.slane %v9067_v11, %v17729_v7  ;;  %v9064_v34 = vcombine.low %v9056_v21, %v9063_v20  ;;  %v8505_v35 = vrot.slane %v8497_v22, %v17729_v7  ;;  %v8788_v21 = vld [vmem:[#allocation2 + $0x33] sm:$0x1]  ;;  %v8789_v10 = vld [vmem:[#allocation2 + $0x34] sm:$0x1]  ;;  %v10053_v20 = vld [vmem:[#allocation2 + $0x1c] sm:$0x1] }
 0x253   : > { %v9096_v4 = vrot.slane %v9068_v23, %v17729_v7  ;;  %v9114_v49 = vcombine.low %v8774_v8, %v8775_v9  ;;  %v8512_v45 = vrot.slane %v8498_v27, %v17729_v7  ;;  %v9115_v37 = vcombine.low %v8776_v16, %v8777_v17  ;;  %v19032_v63 = vpop.f32.mrf.mxu1  ;;  %v10054_v22 = vld [vmem:[#allocation2 + $0x1d] sm:$0x1]  ;;  %v8879_v47 = vld [vmem:[#allocation2 + $0x9a] sm:$0x1] }
 0x254   : > { %v9097_v12 = vcombine.low %v9075_v53, %v9082_v28  ;;  %v9116_v38 = vcombine.low %v8778_v18, %v8779_v24  ;;  %20997 = vst [vmem:[#allocation8_spill] sm:$0xff] %v19032_v63  ;;  %17388 = vmatprep.mubr.msk.bf16.mxu1 %vm4846_vm4, %v9064_v34  ;;  %v9117_v41 = vcombine.low %v8780_v25, %v8781_v26  ;;  %v10055_v28 = vld [vmem:[#allocation2 + $0x1e] sm:$0x1]  ;;  %v10142_v63 = vld [vmem:[#allocation2 + $0x81] sm:$0x1] }
 0x255   : > { %v9098_v15 = vcombine.low %v9089_v29, %v9096_v4  ;;  %v9124_v42 = vrot.slane %v9114_v49, %v17729_v7  ;;  %v10303_v44 = vcombine.low %v10045_v32, %v10046_v33  ;;  %v8513_v50 = vcombine.low %v8505_v35, %v8512_v45  ;;  %v19039_v56 = vpop.f32.mrf.mxu1  ;;  %v10056_v29 = vld [vmem:[#allocation2 + $0x1f] sm:$0x1]  ;;  %v10057_v32 = vld [vmem:[#allocation2 + $0x20] sm:$0x1]  ;;  %v10058_v49 = vld [vmem:[#allocation2 + $0x21] sm:$0x1] }
 0x256   : > { %v9105_v51 = vrot.slane %v9097_v12, %v17729_v7  ;;  %v9131_v52 = vrot.slane %v9115_v37, %v17729_v7  ;;  %v9138_v54 = vrot.slane %v9116_v38, %v17729_v7  ;;  %20998 = vst [vmem:[#allocation9_spill] sm:$0xff] %v19039_v56  ;;  %v9145_v59 = vrot.slane %v9117_v41, %v17729_v7 }
 0x257   : > { %v9112_v57 = vrot.slane %v9098_v15, %v17729_v7  ;;  %v10304_v0 = vcombine.low %v10047_v30, %v10048_v14  ;;  %v10305_v60 = vcombine.low %v10049_v39, %v10050_v40  ;;  %v19043_v58 = vpop.f32.mrf.mxu0  ;;  %17383 = vmatmul.mubr.msk.bf16.gmra.mxu0 %vm4846_vm4, %v8513_v50  ;;  %v10306_v8 = vcombine.low %v10051_v6, %v10052_v43  ;;  %v19051_v53 = vpop.f32.mrf.mxu1  ;;  %v10059_v30 = vld [vmem:[#allocation2 + $0x22] sm:$0x1]  ;;  %v10060_v14 = vld [vmem:[#allocation2 + $0x23] sm:$0x1]  ;;  %v8790_v39 = vld [vmem:[#allocation2 + $0x37] sm:$0x1] }
 0x258   : > { %20999 = vst [vmem:[#allocation10_spill] sm:$0xff] %v19043_v58  ;;  %v9146_v1 = vcombine.low %v9124_v42, %v9131_v52  ;;  %v10313_v9 = vrot.slane %v10303_v44, %v17729_v7  ;;  %v9163_v13 = vcombine.low %v8782_v48, %v8783_v2  ;;  %v9147_v16 = vcombine.low %v9138_v54, %v9145_v59  ;;  %v8791_v40 = vld [vmem:[#allocation2 + $0x38] sm:$0x1]  ;;  %v8792_v44 = vld [vmem:[#allocation2 + $0x39] sm:$0x1] }
 0x259   : > { %v9113_v11 = vcombine.low %v9105_v51, %v9112_v57  ;;  %v10320_v17 = vrot.slane %v10304_v0, %v17729_v7  ;;  %v10327_v18 = vrot.slane %v10305_v60, %v17729_v7  ;;  %v19049_v23 = vpop.f32.mrf.mxu0  ;;  %21001 = vst [vmem:[#allocation12_spill] sm:$0xff] %v19051_v53  ;;  %v10334_v25 = vrot.slane %v10306_v8, %v17729_v7  ;;  %v8793_v48 = vld [vmem:[#allocation2 + $0x3a] sm:$0x1]  ;;  %v19065_v2 = vpop.f32.mrf.mxu1  ;;  %v8794_v54 = vld [vmem:[#allocation2 + $0x3b] sm:$0x1] }
 0x25a   : > { %21000 = vst [vmem:[#allocation11_spill] sm:$0xff] %v19049_v23  ;;  %v9154_v24 = vrot.slane %v9146_v1, %v17729_v7  ;;  %v9164_v26 = vcombine.low %v8784_v55, %v8785_v46  ;;  %v9165_v27 = vcombine.low %v8786_v62, %v8787_v3  ;;  %v9161_v33 = vrot.slane %v9147_v16, %v17729_v7  ;;  %v8795_v55 = vld [vmem:[#allocation2 + $0x3c] sm:$0x1]  ;;  %v8796_v57 = vld [vmem:[#allocation2 + $0x3d] sm:$0x1] }
 0x25b   : > { %17389 = vmatmul.mubr.msk.bf16.vlgmr.msra.gmra.mxu1 %vm4846_vm4, %v9113_v11  ;;  %v10335_v34 = vcombine.low %v10313_v9, %v10320_v17  ;;  %v9166_v35 = vcombine.low %v8788_v21, %v8789_v10  ;;  %v9173_v4 = vrot.slane %v9163_v13, %v17729_v7  ;;  %v10336_v45 = vcombine.low %v10327_v18, %v10334_v25  ;;  %v19061_v6 = vpop.f32.mrf.mxu0  ;;  %v8797_v46 = vld [vmem:[#allocation2 + $0x3e] sm:$0x1]  ;;  %v10061_v3 = vld [vmem:[#allocation2 + $0x26] sm:$0x1]  ;;  %v10062_v1 = vld [vmem:[#allocation2 + $0x27] sm:$0x1] }
 0x25c   : > { %17455 = vmatpush3.bf16.msra.mxu1 %v19027_v31  ;;  %v9180_v12 = vrot.slane %v9164_v26, %v17729_v7  ;;  %v9187_v37 = vrot.slane %v9165_v27, %v17729_v7  ;;  %v10352_v38 = vcombine.low %v10053_v20, %v10054_v22  ;;  %21002 = vst [vmem:[#allocation13_spill] sm:$0xff] %v19061_v6  ;;  %21003 = vst [vmem:[#allocation14_spill] sm:$0xff] %v19065_v2  ;;  %v10063_v13 = vld [vmem:[#allocation2 + $0x28] sm:$0x1]  ;;  %v10064_v11 = vld [vmem:[#allocation2 + $0x29] sm:$0x1] }
 0x25d   : > { %v9162_v15 = vcombine.low %v9154_v24, %v9161_v33  ;;  %v10343_v41 = vrot.slane %v10335_v34, %v17729_v7  ;;  %v9194_v42 = vrot.slane %v9166_v35, %v17729_v7  ;;  %v10353_v43 = vcombine.low %v10055_v28, %v10056_v29  ;;  %v19074_v16 = vpop.f32.mrf.mxu0  ;;  %v10065_v24 = vld [vmem:[#allocation2 + $0x2a] sm:$0x1]  ;;  %v10066_v25 = vld [vmem:[#allocation2 + $0x2b] sm:$0x1]  ;;  %v10067_v26 = vld [vmem:[#allocation2 + $0x2c] sm:$0x1] }
 0x25e   : > { %v10350_v31 = vrot.slane %v10336_v45, %v17729_v7  ;;  %v9195_v50 = vcombine.low %v9173_v4, %v9180_v12  ;;  %v10354_v51 = vcombine.low %v10057_v32, %v10058_v49  ;;  %v10355_v52 = vcombine.low %v10059_v30, %v10060_v14  ;;  %21004 = vst [vmem:[#allocation15_spill] sm:$0xff] %v19074_v16  ;;  %v10068_v33 = vld [vmem:[#allocation2 + $0x2d] sm:$0x1]  ;;  %v8798_v35 = vld [vmem:[#allocation2 + $0x3f] sm:$0x1] }
 0x25f   : > { %17392 = vmatprep.mubr.msk.bf16.mxu1 %vm4846_vm4, %v9162_v15  ;;  %v9196_v59 = vcombine.low %v9187_v37, %v9194_v42  ;;  %v10362_v0 = vrot.slane %v10352_v38, %v17729_v7  ;;  %v10369_v60 = vrot.slane %v10353_v43, %v17729_v7  ;;  %v9212_v62 = vcombine.low %v8790_v39, %v8791_v40  ;;  %v8799_v4 = vld [vmem:[#allocation2 + $0x40] sm:$0x1]  ;;  %v8800_v12 = vld [vmem:[#allocation2 + $0x41] sm:$0x1]  ;;  %v8802_v42 = vld [vmem:[#allocation2 + $0x43] sm:$0x1] }
 0x260   : > { %v10351_v8 = vcombine.low %v10343_v41, %v10350_v31  ;;  %v9203_v9 = vrot.slane %v9195_v50, %v17729_v7  ;;  %v10376_v21 = vrot.slane %v10354_v51, %v17729_v7  ;;  %v10383_v10 = vrot.slane %v10355_v52, %v17729_v7  ;;  %v19077_v27 = vpop.f32.mrf.mxu1  ;;  %v8801_v41 = vld [vmem:[#allocation2 + $0x42] sm:$0x1]  ;;  %v8803_v43 = vld [vmem:[#allocation2 + $0x44] sm:$0x1]  ;;  %v8804_v51 = vld [vmem:[#allocation2 + $0x45] sm:$0x1] }
 0x261   : > { %v9210_v17 = vrot.slane %v9196_v59, %v17729_v7  ;;  %v10384_v18 = vcombine.low %v10362_v0, %v10369_v60  ;;  %v9213_v20 = vcombine.low %v8792_v44, %v8793_v48  ;;  %v9214_v22 = vcombine.low %v8794_v54, %v8795_v55  ;;  %v8805_v52 = vld [vmem:[#allocation2 + $0x46] sm:$0x1]  ;;  %v10069_v60 = vld [vmem:[#allocation2 + $0x2e] sm:$0x1]  ;;  %v10110_v2 = vld [vmem:[#allocation2 + $0x5d] sm:$0x1] }
 0x262   : > { %17422 = vmatprep.mubr.msk.bf16.mxu0 %vm4846_vm4, %v10351_v8  ;;  %v10385_v28 = vcombine.low %v10376_v21, %v10383_v10  ;;  %v9215_v29 = vcombine.low %v8796_v57, %v8797_v46  ;;  %v9222_v32 = vrot.slane %v9212_v62, %v17729_v7  ;;  %v10401_v34 = vcombine.low %v10061_v3, %v10062_v1  ;;  %v19084_v37 = vpop.f32.mrf.mxu1  ;;  %v10070_v46 = vld [vmem:[#allocation2 + $0x2f] sm:$0x1]  ;;  %v10071_v10 = vld [vmem:[#allocation2 + $0x30] sm:$0x1]  ;;  %v8846_v16 = vld [vmem:[#allocation2 + $0x75] sm:$0x1] }
 0x263   : > { %v9211_v49 = vcombine.low %v9203_v9, %v9210_v17  ;;  %v10392_v30 = vrot.slane %v10384_v18, %v17729_v7  ;;  %v9229_v14 = vrot.slane %v9213_v20, %v17729_v7  ;;  %v9236_v45 = vrot.slane %v9214_v22, %v17729_v7  ;;  %v8860_v58 = vld [vmem:[#allocation2 + $0x85] sm:$0x1]  ;;  %v8878_v23 = vld [vmem:[#allocation2 + $0x99] sm:$0x1] }
 0x264   : > { %v10399_v38 = vrot.slane %v10385_v28, %v17729_v7  ;;  %v9243_v39 = vrot.slane %v9215_v29, %v17729_v7  ;;  %v10402_v40 = vcombine.low %v10063_v13, %v10064_v11  ;;  %v10403_v15 = vcombine.low %v10065_v24, %v10066_v25  ;;  %v19088_v44 = vpop.f32.mrf.mxu0  ;;  %v19096_v3 = vpop.f32.mrf.mxu1  ;;  %v10072_v13 = vld [vmem:[#allocation2 + $0x31] sm:$0x1]  ;;  %v10073_v11 = vld [vmem:[#allocation2 + $0x32] sm:$0x1]  ;;  %v10074_v24 = vld [vmem:[#allocation2 + $0x33] sm:$0x1] }
 0x265   : > { %21005 = vst [vmem:[#allocation16_spill] sm:$0xff] %v19088_v44  ;;  %17393 = vmatmul.mubr.msk.bf16.gmra.mxu1 %vm4846_vm4, %v9211_v49  ;;  %v9244_v48 = vcombine.low %v9222_v32, %v9229_v14  ;;  %v10404_v31 = vcombine.low %v10067_v26, %v10068_v33  ;;  %v10411_v50 = vrot.slane %v10401_v34, %v17729_v7  ;;  %v10075_v25 = vld [vmem:[#allocation2 + $0x34] sm:$0x1]  ;;  %v10076_v26 = vld [vmem:[#allocation2 + $0x35] sm:$0x1] }
 0x266   : > { %v9261_v54 = vcombine.low %v8798_v35, %v8799_v4  ;;  %v10400_v55 = vcombine.low %v10392_v30, %v10399_v38  ;;  %v9245_v57 = vcombine.low %v9236_v45, %v9243_v39  ;;  %v10418_v59 = vrot.slane %v10402_v40, %v17729_v7  ;;  %v19094_v62 = vpop.f32.mrf.mxu0  ;;  %v8806_v34 = vld [vmem:[#allocation2 + $0x49] sm:$0x1]  ;;  %v8807_v35 = vld [vmem:[#allocation2 + $0x4a] sm:$0x1]  ;;  %v8809_v38 = vld [vmem:[#allocation2 + $0x4c] sm:$0x1]  ;;  %v19109_v39 = vpop.f32.mrf.mxu1 }
 0x267   : > { %v10425_v0 = vrot.slane %v10403_v15, %v17729_v7  ;;  %21006 = vst [vmem:[#allocation17_spill] sm:$0xff] %v19094_v62  ;;  %v9252_v1 = vrot.slane %v9244_v48, %v17729_v7  ;;  %v10432_v8 = vrot.slane %v10404_v31, %v17729_v7  ;;  %v9262_v9 = vcombine.low %v8800_v12, %v8801_v41  ;;  %v8808_v12 = vld [vmem:[#allocation2 + $0x4b] sm:$0x1]  ;;  %v8811_v48 = vld [vmem:[#allocation2 + $0x4e] sm:$0x1] }
 0x268   : > { %v9263_v21 = vcombine.low %v8802_v42, %v8803_v43  ;;  %17423 = vmatmul.mubr.msk.bf16.vlgmr.msra.gmra.mxu0 %vm4846_vm4, %v10400_v55  ;;  %v9259_v17 = vrot.slane %v9245_v57, %v17729_v7  ;;  %v10433_v18 = vcombine.low %v10411_v50, %v10418_v59  ;;  %v9264_v20 = vcombine.low %v8804_v51, %v8805_v52  ;;  %v19105_v4 = vpop.f32.mrf.mxu0  ;;  %v8810_v43 = vld [vmem:[#allocation2 + $0x4d] sm:$0x1]  ;;  %v8812_v31 = vld [vmem:[#allocation2 + $0x4f] sm:$0x1]  ;;  %v10077_v57 = vld [vmem:[#allocation2 + $0x38] sm:$0x1] }
 0x269   : > { %v9271_v22 = vrot.slane %v9261_v54, %v17729_v7  ;;  %v10434_v28 = vcombine.low %v10425_v0, %v10432_v8  ;;  %v9278_v29 = vrot.slane %v9262_v9, %v17729_v7  ;;  %v10450_v33 = vcombine.low %v10069_v60, %v10070_v46  ;;  %21007 = vst [vmem:[#allocation18_spill] sm:$0xff] %v19105_v4  ;;  %v8813_v54 = vld [vmem:[#allocation2 + $0x50] sm:$0x1]  ;;  %v10078_v59 = vld [vmem:[#allocation2 + $0x39] sm:$0x1] }
 0x26a   : > { %v9285_v32 = vrot.slane %v9263_v21, %v17729_v7  ;;  %v9260_v49 = vcombine.low %v9252_v1, %v9259_v17  ;;  %v10441_v30 = vrot.slane %v10433_v18, %v17729_v7  ;;  %v9292_v14 = vrot.slane %v9264_v20, %v17729_v7  ;;  %21008 = vst [vmem:[#allocation19_spill] sm:$0xff] %v19109_v39  ;;  %v10079_v8 = vld [vmem:[#allocation2 + $0x3a] sm:$0x1]  ;;  %v10080_v9 = vld [vmem:[#allocation2 + $0x3b] sm:$0x1]  ;;  %v19118_v21 = vpop.f32.mrf.mxu0 }
 0x26b   : > { %v10451_v45 = vcombine.low %v10071_v10, %v10072_v13  ;;  %v10448_v40 = vrot.slane %v10434_v28, %v17729_v7  ;;  %v9293_v15 = vcombine.low %v9271_v22, %v9278_v29  ;;  %v10452_v41 = vcombine.low %v10073_v11, %v10074_v24  ;;  %21009 = vst [vmem:[#allocation20_spill] sm:$0xff] %v19118_v21  ;;  %v10081_v18 = vld [vmem:[#allocation2 + $0x3c] sm:$0x1]  ;;  %v10082_v20 = vld [vmem:[#allocation2 + $0x3d] sm:$0x1] }
 0x26c   : > { %v10453_v42 = vcombine.low %v10075_v25, %v10076_v26  ;;  %17396 = vmatprep.mubr.msk.bf16.mxu1 %vm4846_vm4, %v9260_v49  ;;  %v9294_v50 = vcombine.low %v9285_v32, %v9292_v14  ;;  %v10460_v51 = vrot.slane %v10450_v33, %v17729_v7  ;;  %v9310_v55 = vcombine.low %v8806_v34, %v8807_v35  ;;  %v10083_v22 = vld [vmem:[#allocation2 + $0x3e] sm:$0x1]  ;;  %v10084_v29 = vld [vmem:[#allocation2 + $0x3f] sm:$0x1]  ;;  %v8814_v33 = vld [vmem:[#allocation2 + $0x51] sm:$0x1] }
 0x26d   : > { %v10467_v52 = vrot.slane %v10451_v45, %v17729_v7  ;;  %v10449_v0 = vcombine.low %v10441_v30, %v10448_v40  ;;  %v9301_v60 = vrot.slane %v9293_v15, %v17729_v7  ;;  %v10474_v46 = vrot.slane %v10452_v41, %v17729_v7  ;;  %v19121_v24 = vpop.f32.mrf.mxu1  ;;  %v8815_v34 = vld [vmem:[#allocation2 + $0x52] sm:$0x1]  ;;  %v8816_v45 = vld [vmem:[#allocation2 + $0x53] sm:$0x1]  ;;  %v8862_v4 = vld [vmem:[#allocation2 + $0x87] sm:$0x1] }
 0x26e   : > { %v10481_v1 = vrot.slane %v10453_v42, %v17729_v7  ;;  %v9308_v10 = vrot.slane %v9294_v50, %v17729_v7  ;;  %v9311_v11 = vcombine.low %v8808_v12, %v8809_v38  ;;  %v9312_v17 = vcombine.low %v8810_v43, %v8811_v48  ;;  %v8817_v42 = vld [vmem:[#allocation2 + $0x54] sm:$0x1]  ;;  %v8818_v43 = vld [vmem:[#allocation2 + $0x55] sm:$0x1]  ;;  %v8819_v48 = vld [vmem:[#allocation2 + $0x56] sm:$0x1] }
 0x26f   : > { %v10482_v13 = vcombine.low %v10460_v51, %v10467_v52  ;;  %17426 = vmatprep.mubr.msk.bf16.mxu0 %vm4846_vm4, %v10449_v0  ;;  %v9313_v26 = vcombine.low %v8812_v31, %v8813_v54  ;;  %v9320_v28 = vrot.slane %v9310_v55, %v17729_v7  ;;  %v10499_v32 = vcombine.low %v10077_v57, %v10078_v59  ;;  %v19128_v12 = vpop.f32.mrf.mxu1  ;;  %v8820_v54 = vld [vmem:[#allocation2 + $0x57] sm:$0x1]  ;;  %v8821_v55 = vld [vmem:[#allocation2 + $0x58] sm:$0x1]  ;;  %v8844_v21 = vld [vmem:[#allocation2 + $0x73] sm:$0x1] }
 0x270   : > { %v10483_v25 = vcombine.low %v10474_v46, %v10481_v1  ;;  %v9309_v35 = vcombine.low %v9301_v60, %v9308_v10  ;;  %v9327_v30 = vrot.slane %v9311_v11, %v17729_v7  ;;  %v9334_v14 = vrot.slane %v9312_v17, %v17729_v7  ;;  %v10085_v1 = vld [vmem:[#allocation2 + $0x40] sm:$0x1]  ;;  %v8874_v44 = vld [vmem:[#allocation2 + $0x95] sm:$0x1] }
 0x271   : > { %v10490_v49 = vrot.slane %v10482_v13, %v17729_v7  ;;  %v9341_v40 = vrot.slane %v9313_v26, %v17729_v7  ;;  %v10500_v15 = vcombine.low %v10079_v8, %v10080_v9  ;;  %v10501_v41 = vcombine.low %v10081_v18, %v10082_v20  ;;  %v19132_v31 = vpop.f32.mrf.mxu0  ;;  %v10086_v8 = vld [vmem:[#allocation2 + $0x41] sm:$0x1]  ;;  %v19140_v10 = vpop.f32.mrf.mxu1  ;;  %v10087_v20 = vld [vmem:[#allocation2 + $0x42] sm:$0x1] }
 0x272   : > { %v10497_v38 = vrot.slane %v10483_v25, %v17729_v7  ;;  %17397 = vmatmul.mubr.msk.bf16.gmra.mxu1 %vm4846_vm4, %v9309_v35  ;;  %v9342_v50 = vcombine.low %v9320_v28, %v9327_v30  ;;  %v10502_v51 = vcombine.low %v10083_v22, %v10084_v29  ;;  %v10509_v52 = vrot.slane %v10499_v32, %v17729_v7  ;;  %v10088_v22 = vld [vmem:[#allocation2 + $0x43] sm:$0x1]  ;;  %v10089_v25 = vld [vmem:[#allocation2 + $0x44] sm:$0x1]  ;;  %v10092_v35 = vld [vmem:[#allocation2 + $0x47] sm:$0x1] }
 0x273   : > { %v9359_v57 = vcombine.low %v8814_v33, %v8815_v34  ;;  %v9343_v0 = vcombine.low %v9334_v14, %v9341_v40  ;;  %v10516_v60 = vrot.slane %v10500_v15, %v17729_v7  ;;  %v10523_v46 = vrot.slane %v10501_v41, %v17729_v7  ;;  %v19138_v9 = vpop.f32.mrf.mxu0  ;;  %v10090_v33 = vld [vmem:[#allocation2 + $0x45] sm:$0x1]  ;;  %v10091_v34 = vld [vmem:[#allocation2 + $0x46] sm:$0x1]  ;;  %v8823_v40 = vld [vmem:[#allocation2 + $0x5c] sm:$0x1] }
 0x274   : > { %v10498_v59 = vcombine.low %v10490_v49, %v10497_v38  ;;  %v9350_v13 = vrot.slane %v9342_v50, %v17729_v7  ;;  %v10530_v11 = vrot.slane %v10502_v51, %v17729_v7  ;;  %v9360_v17 = vcombine.low %v8816_v45, %v8817_v42  ;;  %v8822_v38 = vld [vmem:[#allocation2 + $0x5b] sm:$0x1]  ;;  %v8824_v50 = vld [vmem:[#allocation2 + $0x5d] sm:$0x1]  ;;  %v8825_v51 = vld [vmem:[#allocation2 + $0x5e] sm:$0x1] }
 0x275   : > { %v9361_v18 = vcombine.low %v8818_v43, %v8819_v48  ;;  %v9357_v26 = vrot.slane %v9343_v0, %v17729_v7  ;;  %v10531_v28 = vcombine.low %v10509_v52, %v10516_v60  ;;  %v9362_v29 = vcombine.low %v8820_v54, %v8821_v55  ;;  %v19149_v15 = vpop.f32.mrf.mxu0  ;;  %v8826_v52 = vld [vmem:[#allocation2 + $0x5f] sm:$0x1]  ;;  %v19153_v54 = vpop.f32.mrf.mxu1  ;;  %v8827_v60 = vld [vmem:[#allocation2 + $0x60] sm:$0x1] }
 0x276   : > { %17427 = vmatmul.mubr.msk.bf16.gmra.mxu0 %vm4846_vm4, %v10498_v59  ;;  %v9369_v32 = vrot.slane %v9359_v57, %v17729_v7  ;;  %v10532_v49 = vcombine.low %v10523_v46, %v10530_v11  ;;  %v9376_v30 = vrot.slane %v9360_v17, %v17729_v7  ;;  %v10548_v45 = vcombine.low %v10085_v1, %v10086_v8  ;;  %v8828_v46 = vld [vmem:[#allocation2 + $0x61] sm:$0x1]  ;;  %v19159_v1 = vld [vmem:[%s20985_s5 + $0x7] sm:$0x1]  ;;  %v8829_v17 = vld [vmem:[#allocation2 + $0x62] sm:$0x1] }
 0x277   : > { %v9383_v14 = vrot.slane %v9361_v18, %v17729_v7  ;;  %v9358_v41 = vcombine.low %v9350_v13, %v9357_v26  ;;  %v10539_v42 = vrot.slane %v10531_v28, %v17729_v7  ;;  %v9390_v43 = vrot.slane %v9362_v29, %v17729_v7  ;;  %21010 = vst [vmem:[#allocation21_spill] sm:$0xff] %v19153_v54 }
 0x278   : > { %v10549_v48 = vcombine.low %v10087_v20, %v10088_v22  ;;  %v10546_v55 = vrot.slane %v10532_v49, %v17729_v7  ;;  %v9391_v57 = vcombine.low %v9369_v32, %v9376_v30  ;;  %v10550_v59 = vcombine.low %v10089_v25, %v10090_v33  ;;  %v10093_v20 = vld [vmem:[#allocation2 + $0x4a] sm:$0x1]  ;;  %v10094_v22 = vld [vmem:[#allocation2 + $0x4b] sm:$0x1]  ;;  %v10095_v32 = vld [vmem:[#allocation2 + $0x4c] sm:$0x1]  ;;  %17603 = vmatprep.subr.msk.bf16.mxu0 %vm4895_vm3, %v19159_v1 }
 0x279   : > { %v10551_v0 = vcombine.low %v10091_v34, %v10092_v35  ;;  %17400 = vmatprep.mubr.msk.bf16.mxu1 %vm4846_vm4, %v9358_v41  ;;  %v9392_v8 = vcombine.low %v9383_v14, %v9390_v43  ;;  %v10558_v13 = vrot.slane %v10548_v45, %v17729_v7  ;;  %v9408_v18 = vcombine.low %v8822_v38, %v8823_v40  ;;  %v10096_v33 = vld [vmem:[#allocation2 + $0x4d] sm:$0x1]  ;;  %v19169_v34 = vpop.f32.mrf.mxu0  ;;  %v10097_v45 = vld [vmem:[#allocation2 + $0x4e] sm:$0x1]  ;;  %v10098_v38 = vld [vmem:[#allocation2 + $0x4f] sm:$0x1] }
 0x27a   : > { %v10565_v11 = vrot.slane %v10549_v48, %v17729_v7  ;;  %v10547_v25 = vcombine.low %v10539_v42, %v10546_v55  ;;  %v9399_v26 = vrot.slane %v9391_v57, %v17729_v7  ;;  %v10572_v28 = vrot.slane %v10550_v59, %v17729_v7  ;;  %21011 = vst [vmem:[#allocation22_spill] sm:$0xff] %v19169_v34  ;;  %v10099_v40 = vld [vmem:[#allocation2 + $0x50] sm:$0x1]  ;;  %v19172_v41 = vpop.f32.mrf.mxu1  ;;  %v10100_v55 = vld [vmem:[#allocation2 + $0x51] sm:$0x1] }
 0x27b   : > { %v10579_v29 = vrot.slane %v10551_v0, %v17729_v7  ;;  %v9406_v35 = vrot.slane %v9392_v8, %v17729_v7  ;;  %v9409_v30 = vcombine.low %v8824_v50, %v8825_v51  ;;  %v9410_v14 = vcombine.low %v8826_v52, %v8827_v60  ;;  %v8830_v59 = vld [vmem:[#allocation2 + $0x63] sm:$0x1]  ;;  %v8831_v0 = vld [vmem:[#allocation2 + $0x64] sm:$0x1]  ;;  %v8832_v52 = vld [vmem:[#allocation2 + $0x65] sm:$0x1] }
 0x27c   : > { %v10580_v49 = vcombine.low %v10558_v13, %v10565_v11  ;;  %17430 = vmatprep.mubr.msk.bf16.mxu0 %vm4846_vm4, %v10547_v25  ;;  %v9411_v43 = vcombine.low %v8828_v46, %v8829_v17  ;;  %v9418_v48 = vrot.slane %v9408_v18, %v17729_v7  ;;  %v10597_v57 = vcombine.low %v10093_v20, %v10094_v22  ;;  %v8833_v60 = vld [vmem:[#allocation2 + $0x66] sm:$0x1]  ;;  %v19179_v13 = vpop.f32.mrf.mxu1  ;;  %v8834_v20 = vld [vmem:[#allocation2 + $0x67] sm:$0x1]  ;;  %v8835_v22 = vld [vmem:[#allocation2 + $0x68] sm:$0x1] }
 0x27d   : > { %v10581_v42 = vcombine.low %v10572_v28, %v10579_v29  ;;  %v9407_v5 = vcombine.low %v9399_v26, %v9406_v35  ;;  %v9425_v50 = vrot.slane %v9409_v30, %v17729_v7  ;;  %v9432_v51 = vrot.slane %v9410_v14, %v17729_v7  ;;  %v19186_v25 = vld [vmem:[%s20985_s5 + $0x8] sm:$0x1]  ;;  %v8837_v30 = vld [vmem:[#allocation2 + $0x6a] sm:$0x1]  ;;  %v10108_v34 = vld [vmem:[#allocation2 + $0x59] sm:$0x1] }
 0x27e   : > { %v10588_v8 = vrot.slane %v10580_v49, %v17729_v7  ;;  %v9439_v46 = vrot.slane %v9411_v43, %v17729_v7  ;;  %v10598_v17 = vcombine.low %v10095_v32, %v10096_v33  ;;  %v10599_v18 = vcombine.low %v10097_v45, %v10098_v38  ;;  %v19188_v26 = vpop.f32.mrf.mxu0  ;;  %v8836_v49 = vld [vmem:[#allocation2 + $0x69] sm:$0x1]  ;;  %v10102_v43 = vld [vmem:[#allocation2 + $0x53] sm:$0x1]  ;;  %17604 = vmatprep.subr.msk.bf16.mxu1 %vm4895_vm3, %v19186_v25 }
 0x27f   : > { %v10595_v11 = vrot.slane %v10581_v42, %v17729_v7  ;;  %17401 = vmatmul.mubr.msk.bf16.gmra.mxu1 %vm4846_vm4, %v9407_v5  ;;  %v9440_v28 = vcombine.low %v9418_v48, %v9425_v50  ;;  %v10600_v29 = vcombine.low %v10099_v40, %v10100_v55  ;;  %v10607_v35 = vrot.slane %v10597_v57, %v17729_v7  ;;  %v10101_v42 = vld [vmem:[#allocation2 + $0x52] sm:$0x1]  ;;  %v19198_v5 = vpop.f32.mrf.mxu1 }
 0x280   : > { %v9457_v14 = vcombine.low %v8830_v59, %v8831_v0  ;;  %v9441_v33 = vcombine.low %v9432_v51, %v9439_v46  ;;  %v10614_v45 = vrot.slane %v10598_v17, %v17729_v7  ;;  %v10621_v38 = vrot.slane %v10599_v18, %v17729_v7  ;;  %v19196_v54 = vpop.f32.mrf.mxu0  ;;  %v10103_v59 = vld [vmem:[#allocation2 + $0x54] sm:$0x1]  ;;  %v10104_v0 = vld [vmem:[#allocation2 + $0x55] sm:$0x1]  ;;  %v10106_v17 = vld [vmem:[#allocation2 + $0x57] sm:$0x1] }
 0x281   : > { %v10596_v32 = vcombine.low %v10588_v8, %v10595_v11  ;;  %v9448_v40 = vrot.slane %v9440_v28, %v17729_v7  ;;  %v10628_v48 = vrot.slane %v10600_v29, %v17729_v7  ;;  %v9458_v55 = vcombine.low %v8832_v52, %v8833_v60  ;;  %v10105_v8 = vld [vmem:[#allocation2 + $0x56] sm:$0x1]  ;;  %v10107_v18 = vld [vmem:[#allocation2 + $0x58] sm:$0x1] }
 0x282   : > { %v9459_v57 = vcombine.low %v8834_v20, %v8835_v22  ;;  %v9455_v50 = vrot.slane %v9441_v33, %v17729_v7  ;;  %v10629_v51 = vcombine.low %v10607_v35, %v10614_v45  ;;  %v9460_v11 = vcombine.low %v8836_v49, %v8837_v30  ;;  %v8838_v20 = vld [vmem:[#allocation2 + $0x6d] sm:$0x1]  ;;  %v8839_v22 = vld [vmem:[#allocation2 + $0x6e] sm:$0x1]  ;;  %v19207_v29 = vpop.f32.mrf.mxu0  ;;  %v8840_v30 = vld [vmem:[#allocation2 + $0x6f] sm:$0x1]  ;;  %v19211_v45 = vpop.f32.mrf.mxu1 }
 0x283   : > { %17431 = vmatmul.mubr.msk.bf16.gmra.mxu0 %vm4846_vm4, %v10596_v32  ;;  %v9467_v46 = vrot.slane %v9457_v14, %v17729_v7  ;;  %v10630_v39 = vcombine.low %v10621_v38, %v10628_v48  ;;  %v9474_v28 = vrot.slane %v9458_v55, %v17729_v7  ;;  %v10646_v60 = vcombine.low %v10101_v42, %v10102_v43  ;;  %v8841_v14 = vld [vmem:[#allocation2 + $0x70] sm:$0x1]  ;;  %v8842_v42 = vld [vmem:[#allocation2 + $0x71] sm:$0x1]  ;;  %v8843_v43 = vld [vmem:[#allocation2 + $0x72] sm:$0x1] }
 0x284   : > { %v9481_v52 = vrot.slane %v9459_v57, %v17729_v7  ;;  %v9456_v32 = vcombine.low %v9448_v40, %v9455_v50  ;;  %v10637_v33 = vrot.slane %v10629_v51, %v17729_v7  ;;  %v9488_v35 = vrot.slane %v9460_v11, %v17729_v7  ;;  %21012 = vst [vmem:[#allocation23_spill] sm:$0xff] %v19211_v45  ;;  %v10109_v11 = vld [vmem:[#allocation2 + $0x5c] sm:$0x1] }
 0x285   : > { %v10647_v49 = vcombine.low %v10103_v59, %v10104_v0  ;;  %v10644_v38 = vrot.slane %v10630_v39, %v17729_v7  ;;  %v9489_v48 = vcombine.low %v9467_v46, %v9474_v28  ;;  %v10648_v55 = vcombine.low %v10105_v8, %v10106_v17  ;;  %v8845_v59 = vld [vmem:[#allocation2 + $0x74] sm:$0x1]  ;;  %v10111_v46 = vld [vmem:[#allocation2 + $0x5e] sm:$0x1]  ;;  %v10112_v17 = vld [vmem:[#allocation2 + $0x5f] sm:$0x1] }
 0x286   : > { %v10649_v57 = vcombine.low %v10107_v18, %v10108_v34  ;;  %17404 = vmatprep.mubr.msk.bf16.mxu1 %vm4846_vm4, %v9456_v32  ;;  %v9490_v40 = vcombine.low %v9481_v52, %v9488_v35  ;;  %v10656_v50 = vrot.slane %v10646_v60, %v17729_v7  ;;  %v9506_v0 = vcombine.low %v8838_v20, %v8839_v22  ;;  %v19220_v18 = vpop.f32.mrf.mxu0  ;;  %v10113_v35 = vld [vmem:[#allocation2 + $0x60] sm:$0x1]  ;;  %v10114_v20 = vld [vmem:[#allocation2 + $0x61] sm:$0x1]  ;;  %v10115_v22 = vld [vmem:[#allocation2 + $0x62] sm:$0x1] }
 0x287   : > { %v10663_v51 = vrot.slane %v10647_v49, %v17729_v7  ;;  %v10645_v45 = vcombine.low %v10637_v33, %v10644_v38  ;;  %v9497_v39 = vrot.slane %v9489_v48, %v17729_v7  ;;  %v10670_v8 = vrot.slane %v10648_v55, %v17729_v7  ;;  %21013 = vst [vmem:[#allocation24_spill] sm:$0xff] %v19220_v18  ;;  %v19223_v49 = vpop.f32.mrf.mxu1  ;;  %v10116_v55 = vld [vmem:[#allocation2 + $0x63] sm:$0x1]  ;;  %v8847_v18 = vld [vmem:[#allocation2 + $0x76] sm:$0x1] }
 0x288   : > { %v10677_v34 = vrot.slane %v10649_v57, %v17729_v7  ;;  %v9504_v28 = vrot.slane %v9490_v40, %v17729_v7  ;;  %v9507_v60 = vcombine.low %v8840_v30, %v8841_v14  ;;  %v9508_v32 = vcombine.low %v8842_v42, %v8843_v43  ;;  %v8848_v42 = vld [vmem:[#allocation2 + $0x77] sm:$0x1] }
 0x289   : > { %v10678_v52 = vcombine.low %v10656_v50, %v10663_v51  ;;  %17434 = vmatprep.mubr.msk.bf16.mxu0 %vm4846_vm4, %v10645_v45  ;;  %v9509_v38 = vcombine.low %v8844_v21, %v8845_v59  ;;  %v9516_v48 = vrot.slane %v9506_v0, %v17729_v7  ;;  %v10695_v57 = vcombine.low %v10109_v11, %v10110_v2  ;;  %v19230_v43 = vpop.f32.mrf.mxu1  ;;  %v8849_v59 = vld [vmem:[#allocation2 + $0x78] sm:$0x1]  ;;  %v8850_v2 = vld [vmem:[#allocation2 + $0x79] sm:$0x1]  ;;  %v8851_v0 = vld [vmem:[#allocation2 + $0x7a] sm:$0x1] }
 0x28a   : > { %v10679_v33 = vcombine.low %v10670_v8, %v10677_v34  ;;  %v9505_v19 = vcombine.low %v9497_v39, %v9504_v28  ;;  %v9523_v30 = vrot.slane %v9507_v60, %v17729_v7  ;;  %v9530_v14 = vrot.slane %v9508_v32, %v17729_v7  ;;  %v8852_v28 = vld [vmem:[#allocation2 + $0x7b] sm:$0x1] }
 0x28b   : > { %v10686_v40 = vrot.slane %v10678_v52, %v17729_v7  ;;  %v9537_v21 = vrot.slane %v9509_v38, %v17729_v7  ;;  %v10696_v50 = vcombine.low %v10111_v46, %v10112_v17  ;;  %v10697_v51 = vcombine.low %v10113_v35, %v10114_v20  ;;  %v19234_v11 = vpop.f32.mrf.mxu0  ;;  %v8853_v52 = vld [vmem:[#allocation2 + $0x7c] sm:$0x1]  ;;  %v10117_v17 = vld [vmem:[#allocation2 + $0x64] sm:$0x1]  ;;  %v10118_v35 = vld [vmem:[#allocation2 + $0x65] sm:$0x1]  ;;  %v19242_v6 = vpop.f32.mrf.mxu1 }
 0x28c   : > { %v10693_v45 = vrot.slane %v10679_v33, %v17729_v7  ;;  %17405 = vmatmul.mubr.msk.bf16.gmra.mxu1 %vm4846_vm4, %v9505_v19  ;;  %v9538_v39 = vcombine.low %v9516_v48, %v9523_v30  ;;  %v10698_v8 = vcombine.low %v10115_v22, %v10116_v55  ;;  %v10705_v34 = vrot.slane %v10695_v57, %v17729_v7  ;;  %v10119_v57 = vld [vmem:[#allocation2 + $0x66] sm:$0x1] }
 0x28d   : > { %v9555_v60 = vcombine.low %v8846_v16, %v8847_v18  ;;  %v9539_v33 = vcombine.low %v9530_v14, %v9537_v21  ;;  %v10712_v38 = vrot.slane %v10696_v50, %v17729_v7  ;;  %v10719_v46 = vrot.slane %v10697_v51, %v17729_v7  ;;  %v19240_v20 = vpop.f32.mrf.mxu0  ;;  %v10120_v16 = vld [vmem:[#allocation2 + $0x67] sm:$0x1]  ;;  %v10121_v18 = vld [vmem:[#allocation2 + $0x68] sm:$0x1]  ;;  %v10122_v21 = vld [vmem:[#allocation2 + $0x69] sm:$0x1] }
 0x28e   : > { %v10694_v32 = vcombine.low %v10686_v40, %v10693_v45  ;;  %v9546_v19 = vrot.slane %v9538_v39, %v17729_v7  ;;  %v10726_v22 = vrot.slane %v10698_v8, %v17729_v7  ;;  %v9556_v48 = vcombine.low %v8848_v42, %v8849_v59  ;;  %v10123_v50 = vld [vmem:[#allocation2 + $0x6a] sm:$0x1]  ;;  %v10124_v51 = vld [vmem:[#allocation2 + $0x6b] sm:$0x1] }
 0x28f   : > { %v9557_v55 = vcombine.low %v8850_v2, %v8851_v0  ;;  %v9553_v40 = vrot.slane %v9539_v33, %v17729_v7  ;;  %v10727_v30 = vcombine.low %v10705_v34, %v10712_v38  ;;  %v9558_v14 = vcombine.low %v8852_v28, %v8853_v52  ;;  %v8854_v2 = vld [vmem:[#allocation2 + $0x7f] sm:$0x1]  ;;  %v8855_v0 = vld [vmem:[#allocation2 + $0x80] sm:$0x1]  ;;  %v19251_v8 = vpop.f32.mrf.mxu0  ;;  %v8856_v52 = vld [vmem:[#allocation2 + $0x81] sm:$0x1]  ;;  %v19255_v38 = vpop.f32.mrf.mxu1 }
 0x290   : > { %17435 = vmatmul.mubr.msk.bf16.gmra.mxu0 %vm4846_vm4, %v10694_v32  ;;  %v9565_v45 = vrot.slane %v9555_v60, %v17729_v7  ;;  %v10728_v61 = vcombine.low %v10719_v46, %v10726_v22  ;;  %v9572_v39 = vrot.slane %v9556_v48, %v17729_v7  ;;  %v10744_v59 = vcombine.low %v10117_v17, %v10118_v35  ;;  %v8857_v60 = vld [vmem:[#allocation2 + $0x82] sm:$0x1]  ;;  %v8858_v17 = vld [vmem:[#allocation2 + $0x83] sm:$0x1]  ;;  %v8859_v35 = vld [vmem:[#allocation2 + $0x84] sm:$0x1] }
 0x291   : > { %v9579_v42 = vrot.slane %v9557_v55, %v17729_v7  ;;  %v9554_v32 = vcombine.low %v9546_v19, %v9553_v40  ;;  %v10735_v33 = vrot.slane %v10727_v30, %v17729_v7  ;;  %v9586_v34 = vrot.slane %v9558_v14, %v17729_v7  ;;  %21014 = vst [vmem:[#allocation25_spill] sm:$0xff] %v19255_v38  ;;  %v10125_v14 = vld [vmem:[#allocation2 + $0x6e] sm:$0x1] }
 0x292   : > { %v10745_v28 = vcombine.low %v10119_v57, %v10120_v16  ;;  %v10742_v46 = vrot.slane %v10728_v61, %v17729_v7  ;;  %v9587_v22 = vcombine.low %v9565_v45, %v9572_v39  ;;  %v10746_v48 = vcombine.low %v10121_v18, %v10122_v21  ;;  %v8861_v57 = vld [vmem:[#allocation2 + $0x86] sm:$0x1]  ;;  %v10127_v21 = vld [vmem:[#allocation2 + $0x70] sm:$0x1] }
 0x293   : > { %v10747_v55 = vcombine.low %v10123_v50, %v10124_v51  ;;  %17408 = vmatprep.mubr.msk.bf16.mxu1 %vm4846_vm4, %v9554_v32  ;;  %v9588_v19 = vcombine.low %v9579_v42, %v9586_v34  ;;  %v10754_v40 = vrot.slane %v10744_v59, %v17729_v7  ;;  %v9604_v16 = vcombine.low %v8854_v2, %v8855_v0  ;;  %v10128_v50 = vld [vmem:[#allocation2 + $0x71] sm:$0x1]  ;;  %v19264_v51 = vpop.f32.mrf.mxu0  ;;  %v10129_v34 = vld [vmem:[#allocation2 + $0x72] sm:$0x1]  ;;  %v10130_v2 = vld [vmem:[#allocation2 + $0x73] sm:$0x1] }
 0x294   : > { %v10761_v30 = vrot.slane %v10745_v28, %v17729_v7  ;;  %v10743_v38 = vcombine.low %v10735_v33, %v10742_v46  ;;  %v9595_v61 = vrot.slane %v9587_v22, %v17729_v7  ;;  %v10768_v18 = vrot.slane %v10746_v48, %v17729_v7  ;;  %21015 = vst [vmem:[#allocation26_spill] sm:$0xff] %v19264_v51  ;;  %v10131_v0 = vld [vmem:[#allocation2 + $0x74] sm:$0x1]  ;;  %v19267_v28 = vpop.f32.mrf.mxu1  ;;  %v10132_v48 = vld [vmem:[#allocation2 + $0x75] sm:$0x1] }
 0x295   : > { %v10775_v45 = vrot.slane %v10747_v55, %v17729_v7  ;;  %v9602_v39 = vrot.slane %v9588_v19, %v17729_v7  ;;  %v9605_v59 = vcombine.low %v8856_v52, %v8857_v60  ;;  %v9606_v32 = vcombine.low %v8858_v17, %v8859_v35  ;;  %v8863_v51 = vld [vmem:[#allocation2 + $0x88] sm:$0x1]  ;;  %v8864_v17 = vld [vmem:[#allocation2 + $0x89] sm:$0x1] }
 0x296   : > { %v10776_v42 = vcombine.low %v10754_v40, %v10761_v30  ;;  %17438 = vmatprep.mubr.msk.bf16.mxu0 %vm4846_vm4, %v10743_v38  ;;  %v9607_v46 = vcombine.low %v8860_v58, %v8861_v57  ;;  %v9614_v22 = vrot.slane %v9604_v16, %v17729_v7  ;;  %v10793_v55 = vcombine.low %v10125_v14, %v10126_v36  ;;  %v19274_v35 = vpop.f32.mrf.mxu1  ;;  %v8865_v57 = vld [vmem:[#allocation2 + $0x8a] sm:$0x1]  ;;  %v8866_v36 = vld [vmem:[#allocation2 + $0x8b] sm:$0x1]  ;;  %v8867_v16 = vld [vmem:[#allocation2 + $0x8c] sm:$0x1] }
 0x297   : > { %v10777_v33 = vcombine.low %v10768_v18, %v10775_v45  ;;  %v9603_v53 = vcombine.low %v9595_v61, %v9602_v39  ;;  %v9621_v52 = vrot.slane %v9605_v59, %v17729_v7  ;;  %v9628_v60 = vrot.slane %v9606_v32, %v17729_v7  ;;  %v8868_v39 = vld [vmem:[#allocation2 + $0x8d] sm:$0x1] }
 0x298   : > { %v10784_v19 = vrot.slane %v10776_v42, %v17729_v7  ;;  %v9635_v58 = vrot.slane %v9607_v46, %v17729_v7  ;;  %v10794_v40 = vcombine.low %v10127_v21, %v10128_v50  ;;  %v10795_v30 = vcombine.low %v10129_v34, %v10130_v2  ;;  %v19278_v14 = vpop.f32.mrf.mxu0  ;;  %v8869_v42 = vld [vmem:[#allocation2 + $0x8e] sm:$0x1]  ;;  %v10133_v50 = vld [vmem:[#allocation2 + $0x76] sm:$0x1]  ;;  %v10134_v34 = vld [vmem:[#allocation2 + $0x77] sm:$0x1] }
 0x299   : > { %v10791_v38 = vrot.slane %v10777_v33, %v17729_v7  ;;  %17409 = vmatmul.mubr.msk.bf16.gmra.mxu1 %vm4846_vm4, %v9603_v53  ;;  %v9636_v61 = vcombine.low %v9614_v22, %v9621_v52  ;;  %v10796_v18 = vcombine.low %v10131_v0, %v10132_v48  ;;  %v10803_v45 = vrot.slane %v10793_v55, %v17729_v7  ;;  %v10135_v48 = vld [vmem:[#allocation2 + $0x78] sm:$0x1]  ;;  %v10136_v55 = vld [vmem:[#allocation2 + $0x79] sm:$0x1]  ;;  %v10137_v52 = vld [vmem:[#allocation2 + $0x7a] sm:$0x1] }
 0x29a   : > { %v9653_v59 = vcombine.low %v8862_v4, %v8863_v51  ;;  %v9637_v33 = vcombine.low %v9628_v60, %v9635_v58  ;;  %v10810_v46 = vrot.slane %v10794_v40, %v17729_v7  ;;  %v10817_v21 = vrot.slane %v10795_v30, %v17729_v7  ;;  %v19284_v2 = vpop.f32.mrf.mxu0  ;;  %v19288_v4 = vpop.f32.mrf.mxu1  ;;  %v10138_v58 = vld [vmem:[#allocation2 + $0x7b] sm:$0x1]  ;;  %v10139_v40 = vld [vmem:[#allocation2 + $0x7c] sm:$0x1]  ;;  %v10140_v30 = vld [vmem:[#allocation2 + $0x7d] sm:$0x1] }
 0x29b   : > { %v10792_v32 = vcombine.low %v10784_v19, %v10791_v38  ;;  %v9644_v62 = vrot.slane %v9636_v61, %v17729_v7  ;;  %v10824_v53 = vrot.slane %v10796_v18, %v17729_v7  ;;  %v9654_v0 = vcombine.low %v8864_v17, %v8865_v57  ;;  %21016 = vst [vmem:[#allocation27_spill] sm:$0xff] %v19288_v4  ;;  %v8871_v18 = vld [vmem:[#allocation2 + $0x92] sm:$0x1] }
 0x29c   : > { %v9655_v22 = vcombine.low %v8866_v36, %v8867_v16  ;;  %v9651_v51 = vrot.slane %v9637_v33, %v17729_v7  ;;  %v10825_v19 = vcombine.low %v10803_v45, %v10810_v46  ;;  %v9656_v60 = vcombine.low %v8868_v39, %v8869_v42  ;;  %v8870_v16 = vld [vmem:[#allocation2 + $0x91] sm:$0x1]  ;;  %v19295_v56 = vpop.f32.mrf.mxu0  ;;  %v8872_v42 = vld [vmem:[#allocation2 + $0x93] sm:$0x1] }
 0x29d   : > { %17439 = vmatmul.mubr.msk.bf16.gmra.mxu0 %vm4846_vm4, %v10792_v32  ;;  %v9663_v38 = vrot.slane %v9653_v59, %v17729_v7  ;;  %v10826_v61 = vcombine.low %v10817_v21, %v10824_v53  ;;  %v9670_v17 = vrot.slane %v9654_v0, %v17729_v7  ;;  %v10842_v36 = vcombine.low %v10133_v50, %v10134_v34  ;;  %v8873_v59 = vld [vmem:[#allocation2 + $0x94] sm:$0x1]  ;;  %v8876_v50 = vld [vmem:[#allocation2 + $0x97] sm:$0x1]  ;;  %v19300_v34 = vpop.f32.mrf.mxu1 }
 0x29e   : > { %v9677_v57 = vrot.slane %v9655_v22, %v17729_v7  ;;  %v9652_v32 = vcombine.low %v9644_v62, %v9651_v51  ;;  %v10833_v33 = vrot.slane %v10825_v19, %v17729_v7  ;;  %v9684_v45 = vrot.slane %v9656_v60, %v17729_v7  ;;  %v8875_v22 = vld [vmem:[#allocation2 + $0x96] sm:$0x1]  ;;  %21017 = vst [vmem:[#allocation28_spill] sm:$0xff] %v19300_v34  ;;  %v10141_v60 = vld [vmem:[#allocation2 + $0x80] sm:$0x1] }
 0x29f   : > { %v10843_v39 = vcombine.low %v10135_v48, %v10136_v55  ;;  %v10840_v46 = vrot.slane %v10826_v61, %v17729_v7  ;;  %v9685_v21 = vcombine.low %v9663_v38, %v9670_v17  ;;  %v10844_v53 = vcombine.low %v10137_v52, %v10138_v58  ;;  %v8877_v48 = vld [vmem:[#allocation2 + $0x98] sm:$0x1]  ;;  %v19308_v17 = vpop.f32.mrf.mxu0 }
 0x2a0   : > { %v10845_v0 = vcombine.low %v10139_v40, %v10140_v30  ;;  %17412 = vmatprep.mubr.msk.bf16.mxu1 %vm4846_vm4, %v9652_v32  ;;  %v9686_v62 = vcombine.low %v9677_v57, %v9684_v45  ;;  %v10852_v51 = vrot.slane %v10842_v36, %v17729_v7  ;;  %v9702_v55 = vcombine.low %v8870_v16, %v8871_v18  ;;  %v10143_v40 = vld [vmem:[#allocation2 + $0x82] sm:$0x1]  ;;  %v10144_v30 = vld [vmem:[#allocation2 + $0x83] sm:$0x1]  ;;  %v10146_v16 = vld [vmem:[#allocation2 + $0x85] sm:$0x1] }
 0x2a1   : > { %v10859_v19 = vrot.slane %v10843_v39, %v17729_v7  ;;  %v10841_v61 = vcombine.low %v10833_v33, %v10840_v46  ;;  %v9693_v52 = vrot.slane %v9685_v21, %v17729_v7  ;;  %v10866_v38 = vrot.slane %v10844_v53, %v17729_v7  ;;  %21018 = vst [vmem:[#allocation29_spill] sm:$0xff] %v19308_v17  ;;  %v10145_v39 = vld [vmem:[#allocation2 + $0x84] sm:$0x1]  ;;  %v10147_v18 = vld [vmem:[#allocation2 + $0x86] sm:$0x1]  ;;  %v19313_v34 = vpop.f32.mrf.mxu1 }
 0x2a2   : > { %v10873_v58 = vrot.slane %v10845_v0, %v17729_v7  ;;  %v9700_v57 = vrot.slane %v9686_v62, %v17729_v7  ;;  %v9703_v32 = vcombine.low %v8872_v42, %v8873_v59  ;;  %v9704_v45 = vcombine.low %v8874_v44, %v8875_v22  ;;  %v10148_v53 = vld [vmem:[#allocation2 + $0x87] sm:$0x1]  ;;  %21019 = vst [vmem:[#allocation30_spill] sm:$0xff] %v19313_v34  ;;  %v8880_v59 = vld [vmem:[#allocation2 + $0x9b] sm:$0x1] }
 0x2a3   : > { %v10874_v36 = vcombine.low %v10852_v51, %v10859_v19  ;;  %17442 = vmatprep.mubr.msk.bf16.mxu0 %vm4846_vm4, %v10841_v61  ;;  %v9705_v46 = vcombine.low %v8876_v50, %v8877_v48  ;;  %v9712_v21 = vrot.slane %v9702_v55, %v17729_v7  ;;  %v10891_v0 = vcombine.low %v10141_v60, %v10142_v63  ;;  %v8881_v48 = vld [vmem:[#allocation2 + $0x9c] sm:$0x1]  ;;  %v8882_v63 = vld [vmem:[#allocation2 + $0x9d] sm:$0x1]  ;;  %v8883_v55 = vld [vmem:[#allocation2 + $0x9e] sm:$0x1] }
 0x2a4   : > { %v10875_v33 = vcombine.low %v10866_v38, %v10873_v58  ;;  %v9701_v17 = vcombine.low %v9693_v52, %v9700_v57  ;;  %v9719_v44 = vrot.slane %v9703_v32, %v17729_v7  ;;  %v9726_v42 = vrot.slane %v9704_v45, %v17729_v7  ;;  %v8884_v58 = vld [vmem:[#allocation2 + $0x9f] sm:$0x1]  ;;  %v8885_v57 = vld [vmem:[#allocation2 + $0xa0] sm:$0x1] }
 0x2a5   : > { %v10882_v62 = vrot.slane %v10874_v36, %v17729_v7  ;;  %v9733_v50 = vrot.slane %v9705_v46, %v17729_v7  ;;  %v10892_v51 = vcombine.low %v10143_v40, %v10144_v30  ;;  %v10893_v19 = vcombine.low %v10145_v39, %v10146_v16  ;;  %v19320_v60 = vpop.f32.mrf.mxu0  ;;  %v10149_v30 = vld [vmem:[#allocation2 + $0x88] sm:$0x1]  ;;  %v10150_v39 = vld [vmem:[#allocation2 + $0x89] sm:$0x1]  ;;  %v19326_v16 = vpop.f32.mrf.mxu1 }
 0x2a6   : > { %v10889_v22 = vrot.slane %v10875_v33, %v17729_v7  ;;  %17413 = vmatmul.mubr.msk.bf16.gmra.mxu1 %vm4846_vm4, %v9701_v17  ;;  %v9734_v61 = vcombine.low %v9712_v21, %v9719_v44  ;;  %v10894_v52 = vcombine.low %v10147_v18, %v10148_v53  ;;  %v10901_v38 = vrot.slane %v10891_v0, %v17729_v7  ;;  %v10151_v0 = vld [vmem:[#allocation2 + $0x8a] sm:$0x1] }
 0x2a7   : > { %v9751_v36 = vcombine.low %v8878_v23, %v8879_v47  ;;  %v9735_v45 = vcombine.low %v9726_v42, %v9733_v50  ;;  %v10908_v33 = vrot.slane %v10892_v51, %v17729_v7  ;;  %v10915_v40 = vrot.slane %v10893_v19, %v17729_v7  ;;  %21020 = vst [vmem:[#allocation31_spill] sm:$0xff] %v19326_v16  ;;  %v19328_v46 = vpop.f32.mrf.mxu0  ;;  %v10152_v47 = vld [vmem:[#allocation2 + $0x8b] sm:$0x1]  ;;  %v10153_v23 = vld [vmem:[#allocation2 + $0x8c] sm:$0x1]  ;;  %v19341_v34 = vpop.f32.mrf.mxu1 }
 0x2a8   : > { %v10890_v32 = vcombine.low %v10882_v62, %v10889_v22  ;;  %v9742_v17 = vrot.slane %v9734_v61, %v17729_v7  ;;  %v10922_v18 = vrot.slane %v10894_v52, %v17729_v7  ;;  %v9752_v21 = vcombine.low %v8880_v59, %v8881_v48  ;;  %v10154_v50 = vld [vmem:[#allocation2 + $0x8d] sm:$0x1]  ;;  %v10155_v51 = vld [vmem:[#allocation2 + $0x8e] sm:$0x1]  ;;  %v10156_v19 = vld [vmem:[#allocation2 + $0x8f] sm:$0x1] }
 0x2a9   : > { %v9753_v53 = vcombine.low %v8882_v63, %v8883_v55  ;;  %v9749_v62 = vrot.slane %v9735_v45, %v17729_v7  ;;  %v10923_v44 = vcombine.low %v10901_v38, %v10908_v33  ;;  %v9754_v42 = vcombine.low %v8884_v58, %v8885_v57  ;;  %v19335_v16 = vpop.f32.mrf.mxu0  ;;  %v10157_v55 = vld [vmem:[#allocation2 + $0x92] sm:$0x1]  ;;  %v10158_v52 = vld [vmem:[#allocation2 + $0x93] sm:$0x1]  ;;  %v10159_v57 = vld [vmem:[#allocation2 + $0x94] sm:$0x1] }
 0x2aa   : > { %17443 = vmatmul.mubr.msk.bf16.gmra.mxu0 %vm4846_vm4, %v10890_v32  ;;  %v9761_v22 = vrot.slane %v9751_v36, %v17729_v7  ;;  %21021 = vst [vmem:[#allocation32_spill] sm:$0xff] %v19335_v16  ;;  %v10924_v61 = vcombine.low %v10915_v40, %v10922_v18  ;;  %v9768_v59 = vrot.slane %v9752_v21, %v17729_v7  ;;  %v10160_v36 = vld [vmem:[#allocation2 + $0x95] sm:$0x1]  ;;  %v10161_v33 = vld [vmem:[#allocation2 + $0x96] sm:$0x1]  ;;  %21022 = vst [vmem:[#allocation33_spill] sm:$0xff] %v19341_v34 }
 0x2ab   : > { %v9775_v48 = vrot.slane %v9753_v53, %v17729_v7  ;;  %v10940_v63 = vcombine.low %v10149_v30, %v10150_v39  ;;  %v9750_v32 = vcombine.low %v9742_v17, %v9749_v62  ;;  %v10931_v45 = vrot.slane %v10923_v44, %v17729_v7  ;;  %v10162_v53 = vld [vmem:[#allocation2 + $0x97] sm:$0x1]  ;;  %v10163_v30 = vld [vmem:[#allocation2 + $0x98] sm:$0x1]  ;;  %v10164_v39 = vld [vmem:[#allocation2 + $0x99] sm:$0x1]  ;;  %v19344_v4 = vpop.f32.mrf.mxu0 }
 0x2ac   : > { %v9782_v38 = vrot.slane %v9754_v42, %v17729_v7  ;;  %v10941_v58 = vcombine.low %v10151_v0, %v10152_v47  ;;  %v10938_v40 = vrot.slane %v10924_v61, %v17729_v7  ;;  %v9783_v18 = vcombine.low %v9761_v22, %v9768_v59  ;;  %v11332_v44 = vld [vmem:[#allocation2 + $0x24] sm:$0x1]  ;;  %v11333_v42 = vld [vmem:[#allocation2 + $0x25] sm:$0x1]  ;;  %v11339_v34 = vld [vmem:[#allocation2 + $0x2b] sm:$0x1] }
 0x2ad   : > { %v10942_v21 = vcombine.low %v10153_v23, %v10154_v50  ;;  %v10943_v16 = vcombine.low %v10155_v51, %v10156_v19  ;;  %17416 = vmatprep.mubr.msk.bf16.mxu1 %vm4846_vm4, %v9750_v32  ;;  %v10950_v0 = vrot.slane %v10940_v63, %v17729_v7  ;;  %v13710_v62 = vsel %vm4895_vm3, %v19159_v1, 0  ;;  %v11334_v63 = vld [vmem:[#allocation2 + $0x26] sm:$0x1]  ;;  %v11335_v32 = vld [vmem:[#allocation2 + $0x27] sm:$0x1] }
 0x2ae   : > { %v9784_v17 = vcombine.low %v9775_v48, %v9782_v38  ;;  %v10957_v47 = vrot.slane %v10941_v58, %v17729_v7  ;;  %v10939_v22 = vcombine.low %v10931_v45, %v10938_v40  ;;  %v9791_v23 = vrot.slane %v9783_v18, %v17729_v7  ;;  %17489 = vmatpush3.bf16.msra.mxu0 %v13710_v62  ;;  %v11336_v38 = vld [vmem:[#allocation2 + $0x28] sm:$0x1]  ;;  %v19355_v58 = vpop.f32.mrf.mxu1  ;;  %v11337_v18 = vld [vmem:[#allocation2 + $0x29] sm:$0x1] }
 0x2af   : > { %v10964_v50 = vrot.slane %v10942_v21, %v17729_v7  ;;  %v10971_v51 = vrot.slane %v10943_v16, %v17729_v7  ;;  %v10989_v59 = vcombine.low %v10157_v55, %v10158_v52  ;;  %v10990_v48 = vcombine.low %v10159_v57, %v10160_v36  ;;  %21023 = vst [vmem:[#allocation34_spill] sm:$0xff] %v19355_v58  ;;  %v11338_v21 = vld [vmem:[#allocation2 + $0x2a] sm:$0x1]  ;;  %v19358_v62 = vpop.f32.mrf.mxu0  ;;  %v10165_v36 = vld [vmem:[#allocation2 + $0x9a] sm:$0x1] }
 0x2b0   : > { %v9798_v19 = vrot.slane %v9784_v17, %v17729_v7  ;;  %v10972_v61 = vcombine.low %v10950_v0, %v10957_v47  ;;  %17446 = vmatprep.mubr.msk.bf16.mxu0 %vm4846_vm4, %v10939_v22  ;;  %v10991_v45 = vcombine.low %v10161_v33, %v10162_v53  ;;  %v10992_v40 = vcombine.low %v10163_v30, %v10164_v39  ;;  %v10166_v0 = vld [vmem:[#allocation2 + $0x9b] sm:$0x1]  ;;  %v10167_v39 = vld [vmem:[#allocation2 + $0x9c] sm:$0x1]  ;;  %v11341_v58 = vld [vmem:[#allocation2 + $0x2d] sm:$0x1] }
 0x2b1   : > { %v10973_v1 = vcombine.low %v10964_v50, %v10971_v51  ;;  %v11590_v16 = vcombine.low %v11332_v44, %v11333_v42  ;;  %21024 = vst [vmem:[#allocation35_spill] sm:$0xff] %v19358_v62  ;;  %v10999_v52 = vrot.slane %v10989_v59, %v17729_v7  ;;  %v11006_v57 = vrot.slane %v10990_v48, %v17729_v7  ;;  %v10168_v44 = vld [vmem:[#allocation2 + $0x9d] sm:$0x1]  ;;  %v10169_v42 = vld [vmem:[#allocation2 + $0x9e] sm:$0x1]  ;;  %v19371_v62 = vpop.f32.mrf.mxu0 }
 0x2b2   : > { %v9799_v17 = vcombine.low %v9791_v23, %v9798_v19  ;;  %v10980_v55 = vrot.slane %v10972_v61, %v17729_v7  ;;  %v11013_v33 = vrot.slane %v10991_v45, %v17729_v7  ;;  %v11020_v53 = vrot.slane %v10992_v40, %v17729_v7  ;;  %v10170_v19 = vld [vmem:[#allocation2 + $0x9f] sm:$0x1]  ;;  %v10171_v61 = vld [vmem:[#allocation2 + $0xa0] sm:$0x1]  ;;  %v10172_v59 = vld [vmem:[#allocation2 + $0xa1] sm:$0x1]  ;;  %v19368_v48 = vpop.f32.mrf.mxu1 }
 0x2b3   : > { %v10987_v47 = vrot.slane %v10973_v1, %v17729_v7  ;;  %v11591_v30 = vcombine.low %v11334_v63, %v11335_v32  ;;  %v11021_v22 = vcombine.low %v10999_v52, %v11006_v57  ;;  %v11592_v23 = vcombine.low %v11336_v38, %v11337_v18  ;;  %21025 = vst [vmem:[#allocation36_spill] sm:$0xff] %v19368_v48  ;;  %v11340_v32 = vld [vmem:[#allocation2 + $0x2c] sm:$0x1] }
 0x2b4   : > { %17417 = vmatmul.mubr.msk.bf16.gmra.mxu1 %vm4846_vm4, %v9799_v17  ;;  %v11593_v50 = vcombine.low %v11338_v21, %v11339_v34  ;;  %v11600_v51 = vrot.slane %v11590_v16, %v17729_v7  ;;  %v11022_v45 = vcombine.low %v11013_v33, %v11020_v53  ;;  %v11038_v63 = vcombine.low %v10165_v36, %v10166_v0  ;;  %v11342_v21 = vld [vmem:[#allocation2 + $0x2e] sm:$0x1]  ;;  %v19376_v16 = vpop.f32.mrf.mxu1  ;;  %v11343_v0 = vld [vmem:[#allocation2 + $0x2f] sm:$0x1]  ;;  %v11345_v33 = vld [vmem:[#allocation2 + $0x31] sm:$0x1] }
 0x2b5   : > { %v10988_v1 = vcombine.low %v10980_v55, %v10987_v47  ;;  %v11607_v40 = vrot.slane %v11591_v30, %v17729_v7  ;;  %21026 = vst [vmem:[#allocation37_spill] sm:$0xff] %v19371_v62  ;;  %v11029_v17 = vrot.slane %v11021_v22, %v17729_v7  ;;  %v11614_v34 = vrot.slane %v11592_v23, %v17729_v7  ;;  %v11344_v47 = vld [vmem:[#allocation2 + $0x30] sm:$0x1]  ;;  %v11346_v23 = vld [vmem:[#allocation2 + $0x32] sm:$0x1] }
 0x2b6   : > { %v11621_v38 = vrot.slane %v11593_v50, %v17729_v7  ;;  %v11039_v18 = vcombine.low %v10167_v39, %v10168_v44  ;;  %21027 = vst [vmem:[#allocation38_spill] sm:$0xff] %v19376_v16  ;;  %v11036_v55 = vrot.slane %v11022_v45, %v17729_v7  ;;  %v11040_v57 = vcombine.low %v10169_v42, %v10170_v19  ;;  %v11347_v39 = vld [vmem:[#allocation2 + $0x33] sm:$0x1]  ;;  %v11348_v50 = vld [vmem:[#allocation2 + $0x36] sm:$0x1]  ;;  %v19382_v48 = vpop.f32.mrf.mxu1 }
 0x2b7   : > { %17447 = vmatmul.mubr.msk.bf16.gmra.mxu0 %vm4846_vm4, %v10988_v1  ;;  %v11622_v52 = vcombine.low %v11600_v51, %v11607_v40  ;;  %v11041_v36 = vcombine.low %v10171_v61, %v10172_v59  ;;  %v11048_v30 = vrot.slane %v11038_v63, %v17729_v7  ;;  %v11639_v44 = vcombine.low %v11340_v32, %v11341_v58  ;;  %v11349_v19 = vld [vmem:[#allocation2 + $0x37] sm:$0x1]  ;;  %v11350_v61 = vld [vmem:[#allocation2 + $0x38] sm:$0x1]  ;;  %v11351_v59 = vld [vmem:[#allocation2 + $0x39] sm:$0x1]  ;;  %v19387_v40 = vpop.f32.mrf.mxu0 }
 0x2b8   : > { %v11623_v53 = vcombine.low %v11614_v34, %v11621_v38  ;;  %v11055_v22 = vrot.slane %v11039_v18, %v17729_v7  ;;  %21028 = vst [vmem:[#allocation39_spill] sm:$0xff] %v19382_v48  ;;  %v11037_v1 = vcombine.low %v11029_v17, %v11036_v55  ;;  %v11062_v42 = vrot.slane %v11040_v57, %v17729_v7  ;;  %v11352_v32 = vld [vmem:[#allocation2 + $0x3a] sm:$0x1]  ;;  %v11353_v18 = vld [vmem:[#allocation2 + $0x3b] sm:$0x1]  ;;  %v19390_v17 = vpop.f32.mrf.mxu1 }
 0x2b9   : > { %v11630_v45 = vrot.slane %v11622_v52, %v17729_v7  ;;  %v11069_v51 = vrot.slane %v11041_v36, %v17729_v7  ;;  %21029 = vst [vmem:[#allocation40_spill] sm:$0xff] %v19387_v40  ;;  %v11640_v38 = vcombine.low %v11342_v21, %v11343_v0  ;;  %v11641_v58 = vcombine.low %v11344_v47, %v11345_v33  ;;  %v11354_v48 = vld [vmem:[#allocation2 + $0x3c] sm:$0x1]  ;;  %v11355_v36 = vld [vmem:[#allocation2 + $0x3d] sm:$0x1] }
 0x2ba   : > { %v11637_v63 = vrot.slane %v11623_v53, %v17729_v7  ;;  %v11070_v34 = vcombine.low %v11048_v30, %v11055_v22  ;;  %21030 = vst [vmem:[#allocation41_spill] sm:$0xff] %v19390_v17  ;;  %17450 = vmatprep.mubr.msk.bf16.mxu0 %vm4846_vm4, %v11037_v1  ;;  %v11642_v52 = vcombine.low %v11346_v23, %v11347_v39  ;;  %v12619_v16 = vld [vmem:[#allocation2 + $0x25] sm:$0x1]  ;;  %v12620_v62 = vld [vmem:[#allocation2 + $0x26] sm:$0x1] }
 0x2bb   : > { %v11071_v55 = vcombine.low %v11062_v42, %v11069_v51  ;;  %v11649_v57 = vrot.slane %v11639_v44, %v17729_v7  ;;  %v11656_v21 = vrot.slane %v11640_v38, %v17729_v7  ;;  %v11663_v0 = vrot.slane %v11641_v58, %v17729_v7  ;;  %v12621_v1 = vld [vmem:[#allocation2 + $0x27] sm:$0x1]  ;;  %v12622_v23 = vld [vmem:[#allocation2 + $0x28] sm:$0x1]  ;;  %v12623_v39 = vld [vmem:[#allocation2 + $0x29] sm:$0x1]  ;;  %v19399_v44 = vpop.f32.mrf.mxu0 }
 0x2bc   : > { %v11638_v40 = vcombine.low %v11630_v45, %v11637_v63  ;;  %v11078_v53 = vrot.slane %v11070_v34, %v17729_v7  ;;  %v11670_v33 = vrot.slane %v11642_v52, %v17729_v7  ;;  %v11688_v30 = vcombine.low %v11348_v50, %v11349_v19  ;;  %21031 = vst [vmem:[#allocation42_spill] sm:$0xff] %v19399_v44  ;;  %v12624_v63 = vld [vmem:[#allocation2 + $0x2a] sm:$0x1]  ;;  %v12625_v34 = vld [vmem:[#allocation2 + $0x2b] sm:$0x1]  ;;  %v19402_v17 = vpop.f32.mrf.mxu1 }
 0x2bd   : > { %v11085_v47 = vrot.slane %v11071_v55, %v17729_v7  ;;  %v11689_v22 = vcombine.low %v11350_v61, %v11351_v59  ;;  %v11671_v45 = vcombine.low %v11649_v57, %v11656_v21  ;;  %v11690_v42 = vcombine.low %v11352_v32, %v11353_v18  ;;  %v12626_v38 = vld [vmem:[#allocation2 + $0x2c] sm:$0x1]  ;;  %21032 = vst [vmem:[#allocation43_spill] sm:$0xff] %v19402_v17  ;;  %v11356_v61 = vld [vmem:[#allocation2 + $0x3e] sm:$0x1] }
 0x2be   : > { %17456 = vmatprep.mubr.msk.bf16.mxu1 %vm4846_vm4, %v11638_v40  ;;  %v11691_v51 = vcombine.low %v11354_v48, %v11355_v36  ;;  %v12877_v58 = vcombine.low %v12619_v16, %v12620_v62  ;;  %v11672_v52 = vcombine.low %v11663_v0, %v11670_v33  ;;  %v11698_v50 = vrot.slane %v11688_v30, %v17729_v7  ;;  %v11357_v59 = vld [vmem:[#allocation2 + $0x3f] sm:$0x1]  ;;  %v11358_v18 = vld [vmem:[#allocation2 + $0x40] sm:$0x1]  ;;  %v11359_v57 = vld [vmem:[#allocation2 + $0x41] sm:$0x1]  ;;  %v19409_v16 = vpop.f32.mrf.mxu1 }
 0x2bf   : > { %v11086_v55 = vcombine.low %v11078_v53, %v11085_v47  ;;  %v11705_v19 = vrot.slane %v11689_v22, %v17729_v7  ;;  %v11679_v44 = vrot.slane %v11671_v45, %v17729_v7  ;;  %v11712_v40 = vrot.slane %v11690_v42, %v17729_v7  ;;  %v11360_v62 = vld [vmem:[#allocation2 + $0x42] sm:$0x1]  ;;  %21033 = vst [vmem:[#allocation44_spill] sm:$0xff] %v19409_v16  ;;  %v11361_v47 = vld [vmem:[#allocation2 + $0x43] sm:$0x1]  ;;  %v19413_v22 = vpop.f32.mrf.mxu0 }
 0x2c0   : > { %v11719_v48 = vrot.slane %v11691_v51, %v17729_v7  ;;  %v12878_v32 = vcombine.low %v12621_v1, %v12622_v23  ;;  %v11686_v36 = vrot.slane %v11672_v52, %v17729_v7  ;;  %v12879_v21 = vcombine.low %v12623_v39, %v12624_v63  ;;  %v11362_v33 = vld [vmem:[#allocation2 + $0x44] sm:$0x1]  ;;  %v11363_v30 = vld [vmem:[#allocation2 + $0x45] sm:$0x1]  ;;  %21034 = vst [vmem:[#allocation45_spill] sm:$0xff] %v19413_v22 }
 0x2c1   : > { %17451 = vmatmul.mubr.msk.bf16.gmra.mxu0 %vm4846_vm4, %v11086_v55  ;;  %v11720_v53 = vcombine.low %v11698_v50, %v11705_v19  ;;  %v12880_v0 = vcombine.low %v12625_v34, %v12626_v38  ;;  %v14997_v1 = vsel %vm4895_vm3, %v19186_v25, 0  ;;  %v12887_v45 = vrot.slane %v12877_v58, %v17729_v7  ;;  %v12627_v51 = vld [vmem:[#allocation2 + $0x2d] sm:$0x1]  ;;  %v12628_v55 = vld [vmem:[#allocation2 + $0x2e] sm:$0x1]  ;;  %v19422_v34 = vpop.f32.mrf.mxu0  ;;  %v19424_v38 = vpop.f32.mrf.mxu1 }
 0x2c2   : > { %v11721_v23 = vcombine.low %v11712_v40, %v11719_v48  ;;  %v12894_v42 = vrot.slane %v12878_v32, %v17729_v7  ;;  %v11687_v16 = vcombine.low %v11679_v44, %v11686_v36  ;;  %v12901_v39 = vrot.slane %v12879_v21, %v17729_v7  ;;  %21035 = vst [vmem:[#allocation46_spill] sm:$0xff] %v19422_v34  ;;  %v12629_v40 = vld [vmem:[#allocation2 + $0x2f] sm:$0x1]  ;;  %v12630_v48 = vld [vmem:[#allocation2 + $0x30] sm:$0x1] }
 0x2c3   : > { %v11728_v52 = vrot.slane %v11720_v53, %v17729_v7  ;;  %v12908_v63 = vrot.slane %v12880_v0, %v17729_v7  ;;  %21036 = vst [vmem:[#allocation47_spill] sm:$0xff] %v19424_v38  ;;  %v11737_v19 = vcombine.low %v11356_v61, %v11357_v59  ;;  %v11738_v58 = vcombine.low %v11358_v18, %v11359_v57  ;;  %v12631_v32 = vld [vmem:[#allocation2 + $0x31] sm:$0x1]  ;;  %v12632_v21 = vld [vmem:[#allocation2 + $0x32] sm:$0x1]  ;;  %v19431_v59 = vpop.f32.mrf.mxu0 }
 0x2c4   : > { %v11735_v25 = vrot.slane %v11721_v23, %v17729_v7  ;;  %v12909_v50 = vcombine.low %v12887_v45, %v12894_v42  ;;  %17457 = vmatmul.mubr.msk.bf16.vlgmr.msra.gmra.mxu1 %vm4846_vm4, %v11687_v16  ;;  %v11739_v36 = vcombine.low %v11360_v62, %v11361_v47  ;;  %v11740_v53 = vcombine.low %v11362_v33, %v11363_v30  ;;  %v12633_v22 = vld [vmem:[#allocation2 + $0x33] sm:$0x1]  ;;  %v12634_v0 = vld [vmem:[#allocation2 + $0x34] sm:$0x1]  ;;  %v11364_v47 = vld [vmem:[#allocation2 + $0x48] sm:$0x1]  ;;  %v19436_v30 = vpop.f32.mrf.mxu1 }
 0x2c5   : > { %v12910_v44 = vcombine.low %v12901_v39, %v12908_v63  ;;  %v12926_v17 = vcombine.low %v12627_v51, %v12628_v55  ;;  %17523 = vmatpush3.bf16.msra.mxu1 %v14997_v1  ;;  %v11747_v23 = vrot.slane %v11737_v19, %v17729_v7  ;;  %v11754_v61 = vrot.slane %v11738_v58, %v17729_v7  ;;  %v11365_v33 = vld [vmem:[#allocation2 + $0x49] sm:$0x1]  ;;  %v11366_v55 = vld [vmem:[#allocation2 + $0x4a] sm:$0x1]  ;;  %v11368_v39 = vld [vmem:[#allocation2 + $0x4c] sm:$0x1] }
 0x2c6   : > { %v11736_v34 = vcombine.low %v11728_v52, %v11735_v25  ;;  %v12917_v38 = vrot.slane %v12909_v50, %v17729_v7  ;;  %21037 = vst [vmem:[#allocation48_spill] sm:$0xff] %v19431_v59  ;;  %v11761_v57 = vrot.slane %v11739_v36, %v17729_v7  ;;  %v11768_v62 = vrot.slane %v11740_v53, %v17729_v7  ;;  %v11367_v52 = vld [vmem:[#allocation2 + $0x4b] sm:$0x1]  ;;  %v11369_v19 = vld [vmem:[#allocation2 + $0x4d] sm:$0x1]  ;;  %v19444_v36 = vpop.f32.mrf.mxu0 }
 0x2c7   : > { %v12924_v18 = vrot.slane %v12910_v44, %v17729_v7  ;;  %v12927_v16 = vcombine.low %v12629_v40, %v12630_v48  ;;  %21038 = vst [vmem:[#allocation49_spill] sm:$0xff] %v19436_v30  ;;  %v11769_v1 = vcombine.low %v11747_v23, %v11754_v61  ;;  %v12928_v45 = vcombine.low %v12631_v32, %v12632_v21  ;;  %v11370_v58 = vld [vmem:[#allocation2 + $0x4e] sm:$0x1]  ;;  %v11371_v40 = vld [vmem:[#allocation2 + $0x4f] sm:$0x1] }
 0x2c8   : > { %17460 = vmatprep.mubr.msk.bf16.mxu1 %vm4846_vm4, %v11736_v34  ;;  %v12929_v42 = vcombine.low %v12633_v22, %v12634_v0  ;;  %v12936_v51 = vrot.slane %v12926_v17, %v17729_v7  ;;  %v11770_v25 = vcombine.low %v11761_v57, %v11768_v62  ;;  %v12635_v32 = vld [vmem:[#allocation2 + $0x37] sm:$0x1]  ;;  %v12636_v22 = vld [vmem:[#allocation2 + $0x38] sm:$0x1]  ;;  %21039 = vst [vmem:[#allocation50_spill] sm:$0xff] %v19444_v36 }
 0x2c9   : > { %v12925_v63 = vcombine.low %v12917_v38, %v12924_v18  ;;  %v12943_v50 = vrot.slane %v12927_v16, %v17729_v7  ;;  %v11777_v48 = vrot.slane %v11769_v1, %v17729_v7  ;;  %v12950_v44 = vrot.slane %v12928_v45, %v17729_v7  ;;  %v12637_v21 = vld [vmem:[#allocation2 + $0x39] sm:$0x1]  ;;  %v12638_v0 = vld [vmem:[#allocation2 + $0x3a] sm:$0x1]  ;;  %v12639_v23 = vld [vmem:[#allocation2 + $0x3b] sm:$0x1]  ;;  %v19448_v61 = vpop.f32.mrf.mxu1 }
 0x2ca   : > { %v12957_v34 = vrot.slane %v12929_v42, %v17729_v7  ;;  %v11784_v17 = vrot.slane %v11770_v25, %v17729_v7  ;;  %v11786_v53 = vcombine.low %v11364_v47, %v11365_v33  ;;  %v11787_v57 = vcombine.low %v11366_v55, %v11367_v52  ;;  %v12640_v1 = vld [vmem:[#allocation2 + $0x3c] sm:$0x1]  ;;  %v12641_v45 = vld [vmem:[#allocation2 + $0x3d] sm:$0x1]  ;;  %v12642_v42 = vld [vmem:[#allocation2 + $0x3e] sm:$0x1] }
 0x2cb   : > { %17490 = vmatprep.mubr.msk.bf16.mxu0 %vm4846_vm4, %v12925_v63  ;;  %v12958_v38 = vcombine.low %v12936_v51, %v12943_v50  ;;  %v11788_v62 = vcombine.low %v11368_v39, %v11369_v19  ;;  %v11789_v16 = vcombine.low %v11370_v58, %v11371_v40  ;;  %v12975_v25 = vcombine.low %v12635_v32, %v12636_v22  ;;  %v19452_v51 = vpop.f32.mrf.mxu1  ;;  %v11372_v52 = vld [vmem:[#allocation2 + $0x50] sm:$0x1]  ;;  %v11373_v39 = vld [vmem:[#allocation2 + $0x51] sm:$0x1]  ;;  %v11374_v19 = vld [vmem:[#allocation2 + $0x52] sm:$0x1] }
 0x2cc   : > { %v12959_v18 = vcombine.low %v12950_v44, %v12957_v34  ;;  %v11785_v30 = vcombine.low %v11777_v48, %v11784_v17  ;;  %v11796_v63 = vrot.slane %v11786_v53, %v17729_v7  ;;  %21040 = vst [vmem:[#allocation51_spill] sm:$0xff] %v19452_v51  ;;  %v11803_v33 = vrot.slane %v11787_v57, %v17729_v7  ;;  %v19458_v58 = vpop.f32.mrf.mxu0  ;;  %v11375_v32 = vld [vmem:[#allocation2 + $0x53] sm:$0x1]  ;;  %v11376_v22 = vld [vmem:[#allocation2 + $0x54] sm:$0x1] }
 0x2cd   : > { %v12966_v36 = vrot.slane %v12958_v38, %v17729_v7  ;;  %v11810_v50 = vrot.slane %v11788_v62, %v17729_v7  ;;  %v11817_v55 = vrot.slane %v11789_v16, %v17729_v7  ;;  %21041 = vst [vmem:[#allocation52_spill] sm:$0xff] %v19458_v58  ;;  %v12976_v40 = vcombine.low %v12637_v21, %v12638_v0  ;;  %v11377_v17 = vld [vmem:[#allocation2 + $0x55] sm:$0x1]  ;;  %v11378_v57 = vld [vmem:[#allocation2 + $0x56] sm:$0x1]  ;;  %v19464_v59 = vpop.f32.mrf.mxu1 }
 0x2ce   : > { %v12973_v47 = vrot.slane %v12959_v18, %v17729_v7  ;;  %17461 = vmatmul.mubr.msk.bf16.gmra.mxu1 %vm4846_vm4, %v11785_v30  ;;  %v12977_v48 = vcombine.low %v12639_v23, %v12640_v1  ;;  %v12978_v44 = vcombine.low %v12641_v45, %v12642_v42  ;;  %v12985_v34 = vrot.slane %v12975_v25, %v17729_v7  ;;  %v11379_v62 = vld [vmem:[#allocation2 + $0x57] sm:$0x1]  ;;  %v19462_v16 = vpop.f32.mrf.mxu0  ;;  %v12643_v23 = vld [vmem:[#allocation2 + $0x3f] sm:$0x1]  ;;  %v12644_v1 = vld [vmem:[#allocation2 + $0x40] sm:$0x1] }
 0x2cf   : > { %v11818_v53 = vcombine.low %v11796_v63, %v11803_v33  ;;  %v11819_v18 = vcombine.low %v11810_v50, %v11817_v55  ;;  %21042 = vst [vmem:[#allocation53_spill] sm:$0xff] %v19462_v16  ;;  %21043 = vst [vmem:[#allocation54_spill] sm:$0xff] %v19464_v59  ;;  %v12992_v58 = vrot.slane %v12976_v40, %v17729_v7  ;;  %v12645_v25 = vld [vmem:[#allocation2 + $0x41] sm:$0x1]  ;;  %v12647_v33 = vld [vmem:[#allocation2 + $0x43] sm:$0x1] }
 0x2d0   : > { %v12974_v38 = vcombine.low %v12966_v36, %v12973_v47  ;;  %v12999_v30 = vrot.slane %v12977_v48, %v17729_v7  ;;  %v13006_v21 = vrot.slane %v12978_v44, %v17729_v7  ;;  %v11835_v0 = vcombine.low %v11372_v52, %v11373_v39  ;;  %v12646_v47 = vld [vmem:[#allocation2 + $0x42] sm:$0x1]  ;;  %v12648_v44 = vld [vmem:[#allocation2 + $0x44] sm:$0x1]  ;;  %v12649_v52 = vld [vmem:[#allocation2 + $0x45] sm:$0x1]  ;;  %v19473_v16 = vpop.f32.mrf.mxu0 }
 0x2d1   : > { %v11826_v36 = vrot.slane %v11818_v53, %v17729_v7  ;;  %v11833_v45 = vrot.slane %v11819_v18, %v17729_v7  ;;  %v11836_v42 = vcombine.low %v11374_v19, %v11375_v32  ;;  %v11837_v63 = vcombine.low %v11376_v22, %v11377_v17  ;;  %v12650_v39 = vld [vmem:[#allocation2 + $0x46] sm:$0x1]  ;;  %21044 = vst [vmem:[#allocation55_spill] sm:$0xff] %v19473_v16  ;;  %v19477_v32 = vpop.f32.mrf.mxu1  ;;  %v12657_v16 = vld [vmem:[#allocation2 + $0x4f] sm:$0x1] }
 0x2d2   : > { %17491 = vmatmul.mubr.msk.bf16.vlgmr.msra.gmra.mxu0 %vm4846_vm4, %v12974_v38  ;;  %v13007_v50 = vcombine.low %v12985_v34, %v12992_v58  ;;  %v13008_v55 = vcombine.low %v12999_v30, %v13006_v21  ;;  %v11838_v40 = vcombine.low %v11378_v57, %v11379_v62  ;;  %v11845_v48 = vrot.slane %v11835_v0, %v17729_v7  ;;  %v11380_v57 = vld [vmem:[#allocation2 + $0x5a] sm:$0x1]  ;;  %v11381_v62 = vld [vmem:[#allocation2 + $0x5b] sm:$0x1] }
 0x2d3   : > { %v11834_v38 = vcombine.low %v11826_v36, %v11833_v45  ;;  %v11852_v53 = vrot.slane %v11836_v42, %v17729_v7  ;;  %v11859_v18 = vrot.slane %v11837_v63, %v17729_v7  ;;  %v13024_v19 = vcombine.low %v12643_v23, %v12644_v1  ;;  %21045 = vst [vmem:[#allocation56_spill] sm:$0xff] %v19477_v32  ;;  %v11382_v45 = vld [vmem:[#allocation2 + $0x5c] sm:$0x1]  ;;  %v11383_v23 = vld [vmem:[#allocation2 + $0x5d] sm:$0x1] }
 0x2d4   : > { %v13015_v22 = vrot.slane %v13007_v50, %v17729_v7  ;;  %v13022_v58 = vrot.slane %v13008_v55, %v17729_v7  ;;  %v11866_v34 = vrot.slane %v11838_v40, %v17729_v7  ;;  %v13025_v17 = vcombine.low %v12645_v25, %v12646_v47  ;;  %v11384_v1 = vld [vmem:[#allocation2 + $0x5e] sm:$0x1]  ;;  %v11385_v55 = vld [vmem:[#allocation2 + $0x5f] sm:$0x1]  ;;  %v11386_v32 = vld [vmem:[#allocation2 + $0x60] sm:$0x1]  ;;  %v19485_v25 = vpop.f32.mrf.mxu0 }
 0x2d5   : > { %17464 = vmatprep.mubr.msk.bf16.mxu1 %vm4846_vm4, %v11834_v38  ;;  %v11867_v30 = vcombine.low %v11845_v48, %v11852_v53  ;;  %v13026_v21 = vcombine.low %v12647_v33, %v12648_v44  ;;  %v13027_v0 = vcombine.low %v12649_v52, %v12650_v39  ;;  %v13034_v36 = vrot.slane %v13024_v19, %v17729_v7  ;;  %v11387_v40 = vld [vmem:[#allocation2 + $0x61] sm:$0x1]  ;;  %v12651_v44 = vld [vmem:[#allocation2 + $0x49] sm:$0x1]  ;;  %v12652_v52 = vld [vmem:[#allocation2 + $0x4a] sm:$0x1] }
 0x2d6   : > { %v13023_v42 = vcombine.low %v13015_v22, %v13022_v58  ;;  %v11868_v63 = vcombine.low %v11859_v18, %v11866_v34  ;;  %v13041_v50 = vrot.slane %v13025_v17, %v17729_v7  ;;  %21046 = vst [vmem:[#allocation57_spill] sm:$0xff] %v19485_v25  ;;  %v19490_v39 = vpop.f32.mrf.mxu1  ;;  %v11884_v18 = vcombine.low %v11380_v57, %v11381_v62  ;;  %v12653_v19 = vld [vmem:[#allocation2 + $0x4b] sm:$0x1]  ;;  %v12654_v22 = vld [vmem:[#allocation2 + $0x4c] sm:$0x1] }
 0x2d7   : > { %v11875_v47 = vrot.slane %v11867_v30, %v17729_v7  ;;  %v13048_v48 = vrot.slane %v13026_v21, %v17729_v7  ;;  %v13055_v33 = vrot.slane %v13027_v0, %v17729_v7  ;;  %21047 = vst [vmem:[#allocation58_spill] sm:$0xff] %v19490_v39  ;;  %v12655_v58 = vld [vmem:[#allocation2 + $0x4d] sm:$0x1]  ;;  %v11885_v17 = vcombine.low %v11382_v45, %v11383_v23  ;;  %v12656_v21 = vld [vmem:[#allocation2 + $0x4e] sm:$0x1] }
 0x2d8   : > { %17494 = vmatprep.mubr.msk.bf16.mxu0 %vm4846_vm4, %v13023_v42  ;;  %v11882_v38 = vrot.slane %v11868_v63, %v17729_v7  ;;  %v13056_v53 = vcombine.low %v13034_v36, %v13041_v50  ;;  %v11886_v30 = vcombine.low %v11384_v1, %v11385_v55  ;;  %v11887_v25 = vcombine.low %v11386_v32, %v11387_v40  ;;  %v12658_v0 = vld [vmem:[#allocation2 + $0x50] sm:$0x1]  ;;  %v19494_v59 = vpop.f32.mrf.mxu1  ;;  %v11388_v23 = vld [vmem:[#allocation2 + $0x62] sm:$0x1]  ;;  %v11389_v1 = vld [vmem:[#allocation2 + $0x63] sm:$0x1] }
 0x2d9   : > { %v13057_v34 = vcombine.low %v13048_v48, %v13055_v33  ;;  %21048 = vst [vmem:[#allocation59_spill] sm:$0xff] %v19494_v59  ;;  %v11894_v42 = vrot.slane %v11884_v18, %v17729_v7  ;;  %v13073_v63 = vcombine.low %v12651_v44, %v12652_v52  ;;  %v19498_v36 = vpop.f32.mrf.mxu0  ;;  %v11901_v62 = vrot.slane %v11885_v17, %v17729_v7  ;;  %v11390_v50 = vld [vmem:[#allocation2 + $0x64] sm:$0x1]  ;;  %v11391_v33 = vld [vmem:[#allocation2 + $0x65] sm:$0x1] }
 0x2da   : > { %v11883_v51 = vcombine.low %v11875_v47, %v11882_v38  ;;  %v13064_v39 = vrot.slane %v13056_v53, %v17729_v7  ;;  %21049 = vst [vmem:[#allocation60_spill] sm:$0xff] %v19498_v36  ;;  %v11908_v45 = vrot.slane %v11886_v30, %v17729_v7  ;;  %v11915_v32 = vrot.slane %v11887_v25, %v17729_v7  ;;  %v11392_v44 = vld [vmem:[#allocation2 + $0x66] sm:$0x1]  ;;  %v11393_v52 = vld [vmem:[#allocation2 + $0x67] sm:$0x1]  ;;  %v19508_v53 = vpop.f32.mrf.mxu1 }
 0x2db   : > { %v13071_v57 = vrot.slane %v13057_v34, %v17729_v7  ;;  %v13074_v55 = vcombine.low %v12653_v19, %v12654_v22  ;;  %v13075_v40 = vcombine.low %v12655_v58, %v12656_v21  ;;  %v13076_v47 = vcombine.low %v12657_v16, %v12658_v0  ;;  %v19506_v38 = vpop.f32.mrf.mxu0  ;;  %21051 = vst [vmem:[#allocation62_spill] sm:$0xff] %v19508_v53  ;;  %v11394_v17 = vld [vmem:[#allocation2 + $0x68] sm:$0x1]  ;;  %v11395_v30 = vld [vmem:[#allocation2 + $0x69] sm:$0x1] }
 0x2dc   : > { %17465 = vmatmul.mubr.msk.bf16.gmra.mxu1 %vm4846_vm4, %v11883_v51  ;;  %v13083_v48 = vrot.slane %v13073_v63, %v17729_v7  ;;  %21050 = vst [vmem:[#allocation61_spill] sm:$0xff] %v19506_v38  ;;  %v11916_v34 = vcombine.low %v11894_v42, %v11901_v62  ;;  %v11917_v25 = vcombine.low %v11908_v45, %v11915_v32  ;;  %v12659_v22 = vld [vmem:[#allocation2 + $0x51] sm:$0x1]  ;;  %v12660_v58 = vld [vmem:[#allocation2 + $0x52] sm:$0x1] }
 0x2dd   : > { %v13072_v18 = vcombine.low %v13064_v39, %v13071_v57  ;;  %v13090_v59 = vrot.slane %v13074_v55, %v17729_v7  ;;  %v13097_v51 = vrot.slane %v13075_v40, %v17729_v7  ;;  %v13104_v16 = vrot.slane %v13076_v47, %v17729_v7  ;;  %v12661_v63 = vld [vmem:[#allocation2 + $0x53] sm:$0x1]  ;;  %v12662_v57 = vld [vmem:[#allocation2 + $0x54] sm:$0x1]  ;;  %v12663_v62 = vld [vmem:[#allocation2 + $0x55] sm:$0x1]  ;;  %v19516_v45 = vpop.f32.mrf.mxu0 }
 0x2de   : > { %v11933_v19 = vcombine.low %v11388_v23, %v11389_v1  ;;  %v11924_v21 = vrot.slane %v11916_v34, %v17729_v7  ;;  %v11931_v0 = vrot.slane %v11917_v25, %v17729_v7  ;;  %v11934_v39 = vcombine.low %v11390_v50, %v11391_v33  ;;  %21052 = vst [vmem:[#allocation63_spill] sm:$0xff] %v19516_v45  ;;  %v12664_v1 = vld [vmem:[#allocation2 + $0x56] sm:$0x1]  ;;  %v12665_v47 = vld [vmem:[#allocation2 + $0x57] sm:$0x1] }
 0x2df   : > { %17495 = vmatmul.mubr.msk.bf16.gmra.mxu0 %vm4846_vm4, %v13072_v18  ;;  %v11935_v42 = vcombine.low %v11392_v44, %v11393_v52  ;;  %v13105_v32 = vcombine.low %v13083_v48, %v13090_v59  ;;  %v13106_v55 = vcombine.low %v13097_v51, %v13104_v16  ;;  %v11936_v40 = vcombine.low %v11394_v17, %v11395_v30  ;;  %v12666_v53 = vld [vmem:[#allocation2 + $0x58] sm:$0x1]  ;;  %v19519_v18 = vpop.f32.mrf.mxu1  ;;  %v11396_v17 = vld [vmem:[#allocation2 + $0x6c] sm:$0x1]  ;;  %v11397_v30 = vld [vmem:[#allocation2 + $0x6d] sm:$0x1] }
 0x2e0   : > { %v11943_v23 = vrot.slane %v11933_v19, %v17729_v7  ;;  %21053 = vst [vmem:[#allocation64_spill] sm:$0xff] %v19519_v18  ;;  %v11932_v34 = vcombine.low %v11924_v21, %v11931_v0  ;;  %v11950_v25 = vrot.slane %v11934_v39, %v17729_v7  ;;  %v13122_v33 = vcombine.low %v12659_v22, %v12660_v58  ;;  %v11398_v0 = vld [vmem:[#allocation2 + $0x6e] sm:$0x1]  ;;  %v11399_v39 = vld [vmem:[#allocation2 + $0x6f] sm:$0x1]  ;;  %v19528_v22 = vpop.f32.mrf.mxu0 }
 0x2e1   : > { %v11957_v50 = vrot.slane %v11935_v42, %v17729_v7  ;;  %v13113_v44 = vrot.slane %v13105_v32, %v17729_v7  ;;  %v13120_v52 = vrot.slane %v13106_v55, %v17729_v7  ;;  %v11964_v59 = vrot.slane %v11936_v40, %v17729_v7  ;;  %v11400_v42 = vld [vmem:[#allocation2 + $0x70] sm:$0x1]  ;;  %21054 = vst [vmem:[#allocation65_spill] sm:$0xff] %v19528_v22  ;;  %v11401_v40 = vld [vmem:[#allocation2 + $0x71] sm:$0x1] }
 0x2e2   : > { %v13123_v48 = vcombine.low %v12661_v63, %v12662_v57  ;;  %17468 = vmatprep.mubr.msk.bf16.mxu1 %vm4846_vm4, %v11932_v34  ;;  %v11965_v51 = vcombine.low %v11943_v23, %v11950_v25  ;;  %v13124_v16 = vcombine.low %v12663_v62, %v12664_v1  ;;  %v13125_v19 = vcombine.low %v12665_v47, %v12666_v53  ;;  %v11402_v63 = vld [vmem:[#allocation2 + $0x72] sm:$0x1]  ;;  %v11403_v57 = vld [vmem:[#allocation2 + $0x73] sm:$0x1]  ;;  %v12667_v1 = vld [vmem:[#allocation2 + $0x5b] sm:$0x1] }
 0x2e3   : > { %v13132_v21 = vrot.slane %v13122_v33, %v17729_v7  ;;  %v13121_v58 = vcombine.low %v13113_v44, %v13120_v52  ;;  %v11966_v32 = vcombine.low %v11957_v50, %v11964_v59  ;;  %v19531_v18 = vpop.f32.mrf.mxu1  ;;  %v12668_v47 = vld [vmem:[#allocation2 + $0x5c] sm:$0x1]  ;;  %v11982_v50 = vcombine.low %v11396_v17, %v11397_v30  ;;  %v12669_v33 = vld [vmem:[#allocation2 + $0x5d] sm:$0x1]  ;;  %v12670_v44 = vld [vmem:[#allocation2 + $0x5e] sm:$0x1] }
 0x2e4   : > { %v13139_v55 = vrot.slane %v13123_v48, %v17729_v7  ;;  %21055 = vst [vmem:[#allocation66_spill] sm:$0xff] %v19531_v18  ;;  %v11973_v23 = vrot.slane %v11965_v51, %v17729_v7  ;;  %v13146_v53 = vrot.slane %v13124_v16, %v17729_v7  ;;  %v13153_v62 = vrot.slane %v13125_v19, %v17729_v7  ;;  %v12671_v52 = vld [vmem:[#allocation2 + $0x5f] sm:$0x1]  ;;  %v12672_v16 = vld [vmem:[#allocation2 + $0x60] sm:$0x1] }
 0x2e5   : > { %17498 = vmatprep.mubr.msk.bf16.mxu0 %vm4846_vm4, %v13121_v58  ;;  %v11980_v34 = vrot.slane %v11966_v32, %v17729_v7  ;;  %v19538_v59 = vpop.f32.mrf.mxu1  ;;  %v11983_v22 = vcombine.low %v11398_v0, %v11399_v39  ;;  %v11984_v51 = vcombine.low %v11400_v42, %v11401_v40  ;;  %v11985_v18 = vcombine.low %v11402_v63, %v11403_v57  ;;  %v12673_v45 = vld [vmem:[#allocation2 + $0x61] sm:$0x1]  ;;  %v12674_v19 = vld [vmem:[#allocation2 + $0x62] sm:$0x1]  ;;  %v11404_v39 = vld [vmem:[#allocation2 + $0x74] sm:$0x1] }
 0x2e6   : > { %v13154_v25 = vcombine.low %v13132_v21, %v13139_v55  ;;  %21056 = vst [vmem:[#allocation67_spill] sm:$0xff] %v19538_v59  ;;  %v13155_v48 = vcombine.low %v13146_v53, %v13153_v62  ;;  %v19540_v38 = vpop.f32.mrf.mxu0  ;;  %v11992_v21 = vrot.slane %v11982_v50, %v17729_v7  ;;  %v13171_v17 = vcombine.low %v12667_v1, %v12668_v47  ;;  %v11405_v42 = vld [vmem:[#allocation2 + $0x75] sm:$0x1]  ;;  %v11406_v40 = vld [vmem:[#allocation2 + $0x76] sm:$0x1] }
 0x2e7   : > { %21057 = vst [vmem:[#allocation68_spill] sm:$0xff] %v19540_v38  ;;  %v11981_v36 = vcombine.low %v11973_v23, %v11980_v34  ;;  %v11999_v32 = vrot.slane %v11983_v22, %v17729_v7  ;;  %v12006_v55 = vrot.slane %v11984_v51, %v17729_v7  ;;  %v12013_v0 = vrot.slane %v11985_v18, %v17729_v7  ;;  %v19550_v57 = vpop.f32.mrf.mxu1  ;;  %v11407_v47 = vld [vmem:[#allocation2 + $0x77] sm:$0x1]  ;;  %v11408_v22 = vld [vmem:[#allocation2 + $0x78] sm:$0x1] }
 0x2e8   : > { %v13162_v58 = vrot.slane %v13154_v25, %v17729_v7  ;;  %v13169_v30 = vrot.slane %v13155_v48, %v17729_v7  ;;  %v19548_v63 = vpop.f32.mrf.mxu0  ;;  %21059 = vst [vmem:[#allocation70_spill] sm:$0xff] %v19550_v57  ;;  %v13172_v23 = vcombine.low %v12669_v33, %v12670_v44  ;;  %v13173_v53 = vcombine.low %v12671_v52, %v12672_v16  ;;  %v11409_v34 = vld [vmem:[#allocation2 + $0x79] sm:$0x1]  ;;  %v11410_v48 = vld [vmem:[#allocation2 + $0x7a] sm:$0x1] }
 0x2e9   : > { %21058 = vst [vmem:[#allocation69_spill] sm:$0xff] %v19548_v63  ;;  %17469 = vmatmul.mubr.msk.bf16.gmra.mxu1 %vm4846_vm4, %v11981_v36  ;;  %v13174_v62 = vcombine.low %v12673_v45, %v12674_v19  ;;  %v13181_v1 = vrot.slane %v13171_v17, %v17729_v7  ;;  %v12014_v50 = vcombine.low %v11992_v21, %v11999_v32  ;;  %v11411_v51 = vld [vmem:[#allocation2 + $0x7b] sm:$0x1]  ;;  %v12675_v33 = vld [vmem:[#allocation2 + $0x63] sm:$0x1]  ;;  %v19562_v32 = vpop.f32.mrf.mxu1 }
 0x2ea   : > { %v13170_v25 = vcombine.low %v13162_v58, %v13169_v30  ;;  %v12015_v18 = vcombine.low %v12006_v55, %v12013_v0  ;;  %v13188_v59 = vrot.slane %v13172_v23, %v17729_v7  ;;  %v13195_v63 = vrot.slane %v13173_v53, %v17729_v7  ;;  %v12676_v44 = vld [vmem:[#allocation2 + $0x64] sm:$0x1]  ;;  %v19557_v45 = vpop.f32.mrf.mxu0  ;;  %v12677_v21 = vld [vmem:[#allocation2 + $0x65] sm:$0x1]  ;;  %v12678_v17 = vld [vmem:[#allocation2 + $0x66] sm:$0x1] }
 0x2eb   : > { %v13202_v57 = vrot.slane %v13174_v62, %v17729_v7  ;;  %v12031_v36 = vcombine.low %v11404_v39, %v11405_v42  ;;  %21060 = vst [vmem:[#allocation71_spill] sm:$0xff] %v19557_v45  ;;  %v12022_v52 = vrot.slane %v12014_v50, %v17729_v7  ;;  %v12032_v19 = vcombine.low %v11406_v40, %v11407_v47  ;;  %v12679_v30 = vld [vmem:[#allocation2 + $0x67] sm:$0x1]  ;;  %v12680_v23 = vld [vmem:[#allocation2 + $0x68] sm:$0x1] }
 0x2ec   : > { %17499 = vmatmul.mubr.msk.bf16.gmra.mxu0 %vm4846_vm4, %v13170_v25  ;;  %v12029_v16 = vrot.slane %v12015_v18, %v17729_v7  ;;  %v12033_v58 = vcombine.low %v11408_v22, %v11409_v34  ;;  %21061 = vst [vmem:[#allocation72_spill] sm:$0xff] %v19562_v32  ;;  %v13203_v55 = vcombine.low %v13181_v1, %v13188_v59  ;;  %v12681_v53 = vld [vmem:[#allocation2 + $0x69] sm:$0x1]  ;;  %v12682_v62 = vld [vmem:[#allocation2 + $0x6a] sm:$0x1]  ;;  %v19570_v1 = vpop.f32.mrf.mxu0 }
 0x2ed   : > { %v13204_v0 = vcombine.low %v13195_v63, %v13202_v57  ;;  %v12034_v39 = vcombine.low %v11410_v48, %v11411_v51  ;;  %v12041_v42 = vrot.slane %v12031_v36, %v17729_v7  ;;  %v12048_v50 = vrot.slane %v12032_v19, %v17729_v7  ;;  %v11412_v63 = vld [vmem:[#allocation2 + $0x7e] sm:$0x1]  ;;  %v11413_v57 = vld [vmem:[#allocation2 + $0x7f] sm:$0x1]  ;;  %21062 = vst [vmem:[#allocation73_spill] sm:$0xff] %v19570_v1 }
 0x2ee   : > { %v12030_v25 = vcombine.low %v12022_v52, %v12029_v16  ;;  %v12055_v18 = vrot.slane %v12033_v58, %v17729_v7  ;;  %v13220_v40 = vcombine.low %v12675_v33, %v12676_v44  ;;  %v13211_v47 = vrot.slane %v13203_v55, %v17729_v7  ;;  %v11414_v16 = vld [vmem:[#allocation2 + $0x80] sm:$0x1]  ;;  %v11415_v33 = vld [vmem:[#allocation2 + $0x81] sm:$0x1]  ;;  %v11416_v44 = vld [vmem:[#allocation2 + $0x82] sm:$0x1] }
 0x2ef   : > { %v13218_v22 = vrot.slane %v13204_v0, %v17729_v7  ;;  %v12062_v34 = vrot.slane %v12034_v39, %v17729_v7  ;;  %v13221_v59 = vcombine.low %v12677_v21, %v12678_v17  ;;  %v12063_v48 = vcombine.low %v12041_v42, %v12048_v50  ;;  %v11417_v17 = vld [vmem:[#allocation2 + $0x83] sm:$0x1]  ;;  %v11418_v0 = vld [vmem:[#allocation2 + $0x84] sm:$0x1]  ;;  %v11419_v39 = vld [vmem:[#allocation2 + $0x85] sm:$0x1] }
 0x2f0   : > { %17472 = vmatprep.mubr.msk.bf16.mxu1 %vm4846_vm4, %v12030_v25  ;;  %v13222_v51 = vcombine.low %v12679_v30, %v12680_v23  ;;  %v13223_v36 = vcombine.low %v12681_v53, %v12682_v62  ;;  %v13230_v52 = vrot.slane %v13220_v40, %v17729_v7  ;;  %v19574_v19 = vpop.f32.mrf.mxu1  ;;  %v12683_v23 = vld [vmem:[#allocation2 + $0x6d] sm:$0x1]  ;;  %v12684_v53 = vld [vmem:[#allocation2 + $0x6e] sm:$0x1]  ;;  %v12685_v40 = vld [vmem:[#allocation2 + $0x6f] sm:$0x1]  ;;  %v12083_v1 = vcombine.low %v11418_v0, %v11419_v39 }
 0x2f1   : > { %21063 = vst [vmem:[#allocation74_spill] sm:$0xff] %v19574_v19  ;;  %v13219_v58 = vcombine.low %v13211_v47, %v13218_v22  ;;  %v12064_v55 = vcombine.low %v12055_v18, %v12062_v34  ;;  %v13237_v21 = vrot.slane %v13221_v59, %v17729_v7  ;;  %v12071_v32 = vrot.slane %v12063_v48, %v17729_v7  ;;  %v12686_v47 = vld [vmem:[#allocation2 + $0x70] sm:$0x1]  ;;  %v12687_v22 = vld [vmem:[#allocation2 + $0x71] sm:$0x1] }
 0x2f2   : > { %v13244_v42 = vrot.slane %v13222_v51, %v17729_v7  ;;  %v13251_v30 = vrot.slane %v13223_v36, %v17729_v7  ;;  %v19580_v62 = vpop.f32.mrf.mxu1  ;;  %v12080_v18 = vcombine.low %v11412_v63, %v11413_v57  ;;  %v12081_v48 = vcombine.low %v11414_v16, %v11415_v33  ;;  %v12688_v36 = vld [vmem:[#allocation2 + $0x72] sm:$0x1]  ;;  %v12689_v19 = vld [vmem:[#allocation2 + $0x73] sm:$0x1]  ;;  %v12690_v45 = vld [vmem:[#allocation2 + $0x74] sm:$0x1] }
 0x2f3   : > { %21064 = vst [vmem:[#allocation75_spill] sm:$0xff] %v19580_v62  ;;  %17502 = vmatprep.mubr.msk.bf16.mxu0 %vm4846_vm4, %v13219_v58  ;;  %v12078_v25 = vrot.slane %v12064_v55, %v17729_v7  ;;  %v13252_v50 = vcombine.low %v13230_v52, %v13237_v21  ;;  %v19584_v34 = vpop.f32.mrf.mxu0  ;;  %v12082_v51 = vcombine.low %v11416_v44, %v11417_v17  ;;  %v11420_v44 = vld [vmem:[#allocation2 + $0x86] sm:$0x1]  ;;  %v11421_v17 = vld [vmem:[#allocation2 + $0x87] sm:$0x1] }
 0x2f4   : > { %21065 = vst [vmem:[#allocation76_spill] sm:$0xff] %v19584_v34  ;;  %v13253_v59 = vcombine.low %v13244_v42, %v13251_v30  ;;  %v12090_v58 = vrot.slane %v12080_v18, %v17729_v7  ;;  %v13269_v55 = vcombine.low %v12683_v23, %v12684_v53  ;;  %v19590_v63 = vpop.f32.mrf.mxu1  ;;  %v12097_v21 = vrot.slane %v12081_v48, %v17729_v7  ;;  %v11423_v23 = vld [vmem:[#allocation2 + $0x89] sm:$0x1]  ;;  %v11424_v53 = vld [vmem:[#allocation2 + $0x8a] sm:$0x1] }
 0x2f5   : > { %v12079_v38 = vcombine.low %v12071_v32, %v12078_v25  ;;  %v13260_v62 = vrot.slane %v13252_v50, %v17729_v7  ;;  %v19588_v52 = vpop.f32.mrf.mxu0  ;;  %21067 = vst [vmem:[#allocation78_spill] sm:$0xff] %v19590_v63  ;;  %v12104_v16 = vrot.slane %v12082_v51, %v17729_v7  ;;  %v12111_v33 = vrot.slane %v12083_v1, %v17729_v7  ;;  %v11422_v32 = vld [vmem:[#allocation2 + $0x88] sm:$0x1]  ;;  %v11425_v25 = vld [vmem:[#allocation2 + $0x8b] sm:$0x1] }
 0x2f6   : > { %21066 = vst [vmem:[#allocation77_spill] sm:$0xff] %v19588_v52  ;;  %v13267_v57 = vrot.slane %v13253_v59, %v17729_v7  ;;  %v13270_v0 = vcombine.low %v12685_v40, %v12686_v47  ;;  %v13271_v39 = vcombine.low %v12687_v22, %v12688_v36  ;;  %v13272_v42 = vcombine.low %v12689_v19, %v12690_v45  ;;  %v11426_v48 = vld [vmem:[#allocation2 + $0x8c] sm:$0x1]  ;;  %v11427_v51 = vld [vmem:[#allocation2 + $0x8d] sm:$0x1]  ;;  %v19603_v47 = vpop.f32.mrf.mxu1 }
 0x2f7   : > { %17473 = vmatmul.mubr.msk.bf16.gmra.mxu1 %vm4846_vm4, %v12079_v38  ;;  %v13279_v30 = vrot.slane %v13269_v55, %v17729_v7  ;;  %v12112_v18 = vcombine.low %v12090_v58, %v12097_v21  ;;  %v12113_v59 = vcombine.low %v12104_v16, %v12111_v33  ;;  %v19598_v63 = vpop.f32.mrf.mxu0  ;;  %v12129_v40 = vcombine.low %v11420_v44, %v11421_v17  ;;  %v12691_v45 = vld [vmem:[#allocation2 + $0x75] sm:$0x1]  ;;  %v12692_v19 = vld [vmem:[#allocation2 + $0x76] sm:$0x1]  ;;  %v12693_v55 = vld [vmem:[#allocation2 + $0x77] sm:$0x1] }
 0x2f8   : > { %v13268_v50 = vcombine.low %v13260_v62, %v13267_v57  ;;  %21068 = vst [vmem:[#allocation79_spill] sm:$0xff] %v19598_v63  ;;  %v13286_v1 = vrot.slane %v13270_v0, %v17729_v7  ;;  %v13293_v52 = vrot.slane %v13271_v39, %v17729_v7  ;;  %v13300_v38 = vrot.slane %v13272_v42, %v17729_v7  ;;  %v12694_v57 = vld [vmem:[#allocation2 + $0x78] sm:$0x1]  ;;  %v12695_v21 = vld [vmem:[#allocation2 + $0x79] sm:$0x1] }
 0x2f9   : > { %21069 = vst [vmem:[#allocation80_spill] sm:$0xff] %v19603_v47  ;;  %v12120_v62 = vrot.slane %v12112_v18, %v17729_v7  ;;  %v12127_v22 = vrot.slane %v12113_v59, %v17729_v7  ;;  %v12130_v36 = vcombine.low %v11422_v32, %v11423_v23  ;;  %v12131_v58 = vcombine.low %v11424_v53, %v11425_v25  ;;  %v12696_v17 = vld [vmem:[#allocation2 + $0x7a] sm:$0x1]  ;;  %v12697_v39 = vld [vmem:[#allocation2 + $0x7b] sm:$0x1]  ;;  %v19611_v59 = vpop.f32.mrf.mxu0 }
 0x2fa   : > { %17503 = vmatmul.mubr.msk.bf16.gmra.mxu0 %vm4846_vm4, %v13268_v50  ;;  %v13301_v16 = vcombine.low %v13279_v30, %v13286_v1  ;;  %v13302_v33 = vcombine.low %v13293_v52, %v13300_v38  ;;  %v12132_v0 = vcombine.low %v11426_v48, %v11427_v51  ;;  %v12139_v44 = vrot.slane %v12129_v40, %v17729_v7  ;;  %v12698_v42 = vld [vmem:[#allocation2 + $0x7c] sm:$0x1]  ;;  %v11428_v53 = vld [vmem:[#allocation2 + $0x90] sm:$0x1]  ;;  %v11429_v25 = vld [vmem:[#allocation2 + $0x91] sm:$0x1] }
 0x2fb   : > { %v12128_v47 = vcombine.low %v12120_v62, %v12127_v22  ;;  %v12146_v50 = vrot.slane %v12130_v36, %v17729_v7  ;;  %v12153_v18 = vrot.slane %v12131_v58, %v17729_v7  ;;  %v13318_v63 = vcombine.low %v12691_v45, %v12692_v19  ;;  %21070 = vst [vmem:[#allocation81_spill] sm:$0xff] %v19611_v59  ;;  %v11430_v45 = vld [vmem:[#allocation2 + $0x92] sm:$0x1]  ;;  %v11431_v19 = vld [vmem:[#allocation2 + $0x93] sm:$0x1] }
 0x2fc   : > { %v13309_v32 = vrot.slane %v13301_v16, %v17729_v7  ;;  %v13316_v23 = vrot.slane %v13302_v33, %v17729_v7  ;;  %v12160_v52 = vrot.slane %v12132_v0, %v17729_v7  ;;  %v13319_v30 = vcombine.low %v12693_v55, %v12694_v57  ;;  %v11432_v62 = vld [vmem:[#allocation2 + $0x94] sm:$0x1]  ;;  %v11433_v16 = vld [vmem:[#allocation2 + $0x95] sm:$0x1]  ;;  %v11434_v55 = vld [vmem:[#allocation2 + $0x96] sm:$0x1] }
 0x2fd   : > { %v19616_v48 = vpop.f32.mrf.mxu1  ;;  %17476 = vmatprep.mubr.msk.bf16.mxu1 %vm4846_vm4, %v12128_v47  ;;  %v12161_v51 = vcombine.low %v12139_v44, %v12146_v50  ;;  %v13320_v1 = vcombine.low %v12695_v21, %v12696_v17  ;;  %v13321_v38 = vcombine.low %v12697_v39, %v12698_v42  ;;  %v13328_v40 = vrot.slane %v13318_v63, %v17729_v7  ;;  %v11435_v57 = vld [vmem:[#allocation2 + $0x97] sm:$0x1]  ;;  %v12699_v44 = vld [vmem:[#allocation2 + $0x7f] sm:$0x1]  ;;  %v12700_v63 = vld [vmem:[#allocation2 + $0x80] sm:$0x1] }
 0x2fe   : > { %21071 = vst [vmem:[#allocation82_spill] sm:$0xff] %v19616_v48  ;;  %v13317_v22 = vcombine.low %v13309_v32, %v13316_v23  ;;  %v12162_v36 = vcombine.low %v12153_v18, %v12160_v52  ;;  %v13335_v58 = vrot.slane %v13319_v30, %v17729_v7  ;;  %v12178_v50 = vcombine.low %v11428_v53, %v11429_v25  ;;  %v12701_v18 = vld [vmem:[#allocation2 + $0x81] sm:$0x1]  ;;  %v12702_v32 = vld [vmem:[#allocation2 + $0x82] sm:$0x1] }
 0x2ff   : > { %v19621_v33 = vpop.f32.mrf.mxu1  ;;  %v12169_v0 = vrot.slane %v12161_v51, %v17729_v7  ;;  %v13342_v47 = vrot.slane %v13320_v1, %v17729_v7  ;;  %v13349_v21 = vrot.slane %v13321_v38, %v17729_v7  ;;  %v12703_v23 = vld [vmem:[#allocation2 + $0x83] sm:$0x1]  ;;  %v12179_v30 = vcombine.low %v11430_v45, %v11431_v19  ;;  %v12704_v1 = vld [vmem:[#allocation2 + $0x84] sm:$0x1]  ;;  %v12706_v38 = vld [vmem:[#allocation2 + $0x86] sm:$0x1] }
 0x300   : > { %21072 = vst [vmem:[#allocation83_spill] sm:$0xff] %v19621_v33  ;;  %v19626_v17 = vpop.f32.mrf.mxu0  ;;  %17506 = vmatprep.mubr.msk.bf16.mxu0 %vm4846_vm4, %v13317_v22  ;;  %v12176_v39 = vrot.slane %v12162_v36, %v17729_v7  ;;  %v13350_v42 = vcombine.low %v13328_v40, %v13335_v58  ;;  %v12180_v51 = vcombine.low %v11432_v62, %v11433_v16  ;;  %v12705_v33 = vld [vmem:[#allocation2 + $0x85] sm:$0x1]  ;;  %v11436_v62 = vld [vmem:[#allocation2 + $0x98] sm:$0x1] }
 0x301   : > { %21073 = vst [vmem:[#allocation84_spill] sm:$0xff] %v19626_v17  ;;  %v13351_v52 = vcombine.low %v13342_v47, %v13349_v21  ;;  %v12181_v59 = vcombine.low %v11434_v55, %v11435_v57  ;;  %v19632_v34 = vpop.f32.mrf.mxu1  ;;  %v12188_v40 = vrot.slane %v12178_v50, %v17729_v7  ;;  %v13367_v53 = vcombine.low %v12699_v44, %v12700_v63  ;;  %v11437_v58 = vld [vmem:[#allocation2 + $0x99] sm:$0x1]  ;;  %v11438_v16 = vld [vmem:[#allocation2 + $0x9a] sm:$0x1] }
 0x302   : > { %v19630_v48 = vpop.f32.mrf.mxu0  ;;  %21075 = vst [vmem:[#allocation86_spill] sm:$0xff] %v19632_v34  ;;  %v12177_v17 = vcombine.low %v12169_v0, %v12176_v39  ;;  %v13358_v22 = vrot.slane %v13350_v42, %v17729_v7  ;;  %v12195_v36 = vrot.slane %v12179_v30, %v17729_v7  ;;  %v12202_v45 = vrot.slane %v12180_v51, %v17729_v7  ;;  %v11439_v21 = vld [vmem:[#allocation2 + $0x9b] sm:$0x1]  ;;  %v11440_v44 = vld [vmem:[#allocation2 + $0x9c] sm:$0x1] }
 0x303   : > { %21074 = vst [vmem:[#allocation85_spill] sm:$0xff] %v19630_v48  ;;  %v13365_v25 = vrot.slane %v13351_v52, %v17729_v7  ;;  %v12209_v19 = vrot.slane %v12181_v59, %v17729_v7  ;;  %v13368_v55 = vcombine.low %v12701_v18, %v12702_v32  ;;  %v13369_v57 = vcombine.low %v12703_v23, %v12704_v1  ;;  %v11441_v63 = vld [vmem:[#allocation2 + $0x9d] sm:$0x1]  ;;  %v11442_v30 = vld [vmem:[#allocation2 + $0x9e] sm:$0x1]  ;;  %v19644_v51 = vpop.f32.mrf.mxu1 }
 0x304   : > { %17477 = vmatmul.mubr.msk.bf16.gmra.mxu1 %vm4846_vm4, %v12177_v17  ;;  %v13370_v0 = vcombine.low %v12705_v33, %v12706_v38  ;;  %v13377_v47 = vrot.slane %v13367_v53, %v17729_v7  ;;  %v19642_v39 = vpop.f32.mrf.mxu0  ;;  %v12210_v50 = vcombine.low %v12188_v40, %v12195_v36  ;;  %v11443_v59 = vld [vmem:[#allocation2 + $0x9f] sm:$0x1]  ;;  %21077 = vst [vmem:[#allocation88_spill] sm:$0xff] %v19644_v51  ;;  %v12707_v32 = vld [vmem:[#allocation2 + $0x87] sm:$0x1] }
 0x305   : > { %21076 = vst [vmem:[#allocation87_spill] sm:$0xff] %v19642_v39  ;;  %v13366_v42 = vcombine.low %v13358_v22, %v13365_v25  ;;  %v12211_v52 = vcombine.low %v12202_v45, %v12209_v19  ;;  %v13384_v34 = vrot.slane %v13368_v55, %v17729_v7  ;;  %v13391_v17 = vrot.slane %v13369_v57, %v17729_v7  ;;  %v12708_v23 = vld [vmem:[#allocation2 + $0x88] sm:$0x1]  ;;  %v12709_v53 = vld [vmem:[#allocation2 + $0x89] sm:$0x1] }
 0x306   : > { %v13398_v33 = vrot.slane %v13370_v0, %v17729_v7  ;;  %v12227_v18 = vcombine.low %v11436_v62, %v11437_v58  ;;  %v12218_v1 = vrot.slane %v12210_v50, %v17729_v7  ;;  %v12228_v22 = vcombine.low %v11438_v16, %v11439_v21  ;;  %v12710_v25 = vld [vmem:[#allocation2 + $0x8a] sm:$0x1]  ;;  %v12711_v36 = vld [vmem:[#allocation2 + $0x8b] sm:$0x1]  ;;  %v12712_v0 = vld [vmem:[#allocation2 + $0x8c] sm:$0x1]  ;;  %v19653_v51 = vpop.f32.mrf.mxu0 }
 0x307   : > { %17507 = vmatmul.mubr.msk.bf16.gmra.mxu0 %vm4846_vm4, %v13366_v42  ;;  %v12225_v38 = vrot.slane %v12211_v52, %v17729_v7  ;;  %v12229_v40 = vcombine.low %v11440_v44, %v11441_v63  ;;  %v13399_v45 = vcombine.low %v13377_v47, %v13384_v34  ;;  %v12230_v55 = vcombine.low %v11442_v30, %v11443_v59  ;;  %v12713_v62 = vld [vmem:[#allocation2 + $0x8d] sm:$0x1]  ;;  %v12714_v58 = vld [vmem:[#allocation2 + $0x8e] sm:$0x1]  ;;  %v11444_v30 = vld [vmem:[#allocation2 + $0xa2] sm:$0x1] }
 0x308   : > { %v13400_v19 = vcombine.low %v13391_v17, %v13398_v33  ;;  %v12237_v57 = vrot.slane %v12227_v18, %v17729_v7  ;;  %21078 = vst [vmem:[#allocation89_spill] sm:$0xff] %v19653_v51  ;;  %v12244_v50 = vrot.slane %v12228_v22, %v17729_v7  ;;  %v13416_v16 = vcombine.low %v12707_v32, %v12708_v23  ;;  %v11445_v59 = vld [vmem:[#allocation2 + $0xa3] sm:$0x1]  ;;  %v11447_v32 = vld [vmem:[#allocation2 + $0xa5] sm:$0x1] }
 0x309   : > { %v12226_v42 = vcombine.low %v12218_v1, %v12225_v38  ;;  %v12251_v52 = vrot.slane %v12229_v40, %v17729_v7  ;;  %v13407_v44 = vrot.slane %v13399_v45, %v17729_v7  ;;  %v12258_v47 = vrot.slane %v12230_v55, %v17729_v7  ;;  %v11446_v38 = vld [vmem:[#allocation2 + $0xa4] sm:$0x1]  ;;  %v11448_v23 = vld [vmem:[#allocation2 + $0xa6] sm:$0x1]  ;;  %v11450_v51 = vld [vmem:[#allocation2 + $0xa8] sm:$0x1] }
 0x30a   : > { %v19657_v21 = vpop.f32.mrf.mxu1  ;;  %v13414_v34 = vrot.slane %v13400_v19, %v17729_v7  ;;  %v13417_v63 = vcombine.low %v12709_v53, %v12710_v25  ;;  %v12259_v17 = vcombine.low %v12237_v57, %v12244_v50  ;;  %v13418_v33 = vcombine.low %v12711_v36, %v12712_v0  ;;  %v11449_v19 = vld [vmem:[#allocation2 + $0xa7] sm:$0x1]  ;;  %v11451_v55 = vld [vmem:[#allocation2 + $0xa9] sm:$0x1]  ;;  %v12715_v0 = vld [vmem:[#allocation2 + $0x91] sm:$0x1] }
 0x30b   : > { %21079 = vst [vmem:[#allocation90_spill] sm:$0xff] %v19657_v21  ;;  %17480 = vmatprep.mubr.msk.bf16.mxu1 %vm4846_vm4, %v12226_v42  ;;  %v13419_v18 = vcombine.low %v12713_v62, %v12714_v58  ;;  %v13426_v1 = vrot.slane %v13416_v16, %v17729_v7  ;;  %v12260_v40 = vcombine.low %v12251_v52, %v12258_v47  ;;  %v12716_v62 = vld [vmem:[#allocation2 + $0x92] sm:$0x1]  ;;  %v12717_v16 = vld [vmem:[#allocation2 + $0x93] sm:$0x1] }
 0x30c   : > { %v13415_v22 = vcombine.low %v13407_v44, %v13414_v34  ;;  %v13433_v45 = vrot.slane %v13417_v63, %v17729_v7  ;;  %v12267_v25 = vrot.slane %v12259_v17, %v17729_v7  ;;  %v13440_v57 = vrot.slane %v13418_v33, %v17729_v7  ;;  %v19670_v58 = vpop.f32.mrf.mxu1  ;;  %v12718_v44 = vld [vmem:[#allocation2 + $0x94] sm:$0x1]  ;;  %v12719_v34 = vld [vmem:[#allocation2 + $0x95] sm:$0x1]  ;;  %v12722_v39 = vld [vmem:[#allocation2 + $0x98] sm:$0x1] }
 0x30d   : > { %v19665_v53 = vpop.f32.mrf.mxu0  ;;  %v13447_v36 = vrot.slane %v13419_v18, %v17729_v7  ;;  %21081 = vst [vmem:[#allocation92_spill] sm:$0xff] %v19670_v58  ;;  %v12274_v42 = vrot.slane %v12260_v40, %v17729_v7  ;;  %v12276_v52 = vcombine.low %v11444_v30, %v11445_v59  ;;  %v12277_v17 = vcombine.low %v11446_v38, %v11447_v32  ;;  %v12720_v18 = vld [vmem:[#allocation2 + $0x96] sm:$0x1]  ;;  %v11453_v32 = vld [vmem:[#allocation2 + $0xab] sm:$0x1] }
 0x30e   : > { %21080 = vst [vmem:[#allocation91_spill] sm:$0xff] %v19665_v53  ;;  %17510 = vmatprep.mubr.msk.bf16.mxu0 %vm4846_vm4, %v13415_v22  ;;  %v13448_v50 = vcombine.low %v13426_v1, %v13433_v45  ;;  %v12278_v33 = vcombine.low %v11448_v23, %v11449_v19  ;;  %v12279_v21 = vcombine.low %v11450_v51, %v11451_v55  ;;  %v12721_v53 = vld [vmem:[#allocation2 + $0x97] sm:$0x1]  ;;  %v11452_v51 = vld [vmem:[#allocation2 + $0xaa] sm:$0x1]  ;;  %v19684_v19 = vpop.f32.mrf.mxu1 }
 0x30f   : > { %v19674_v47 = vpop.f32.mrf.mxu0  ;;  %v13449_v63 = vcombine.low %v13440_v57, %v13447_v36  ;;  %v12275_v48 = vcombine.low %v12267_v25, %v12274_v42  ;;  %v12286_v22 = vrot.slane %v12276_v52, %v17729_v7  ;;  %v13465_v40 = vcombine.low %v12715_v0, %v12716_v62  ;;  %v11454_v23 = vld [vmem:[#allocation2 + $0xac] sm:$0x1]  ;;  %21084 = vst [vmem:[#allocation95_spill] sm:$0xff] %v19684_v19  ;;  %v11455_v0 = vld [vmem:[#allocation2 + $0xad] sm:$0x1] }
 0x310   : > { %21082 = vst [vmem:[#allocation93_spill] sm:$0xff] %v19674_v47  ;;  %v13456_v58 = vrot.slane %v13448_v50, %v17729_v7  ;;  %v12293_v59 = vrot.slane %v12277_v17, %v17729_v7  ;;  %v12300_v45 = vrot.slane %v12278_v33, %v17729_v7  ;;  %v12307_v38 = vrot.slane %v12279_v21, %v17729_v7  ;;  %v11456_v62 = vld [vmem:[#allocation2 + $0xae] sm:$0x1]  ;;  %v11457_v42 = vld [vmem:[#allocation2 + $0xaf] sm:$0x1] }
 0x311   : > { %v19678_v1 = vpop.f32.mrf.mxu0  ;;  %v13463_v30 = vrot.slane %v13449_v63, %v17729_v7  ;;  %17481 = vmatmul.mubr.msk.bf16.gmra.mxu1 %vm4846_vm4, %v12275_v48  ;;  %v13466_v55 = vcombine.low %v12717_v16, %v12718_v44  ;;  %v13467_v25 = vcombine.low %v12719_v34, %v12720_v18  ;;  %v13468_v57 = vcombine.low %v12721_v53, %v12722_v39  ;;  %v11458_v17 = vld [vmem:[#allocation2 + $0xb0] sm:$0x1]  ;;  %v11459_v33 = vld [vmem:[#allocation2 + $0xb1] sm:$0x1]  ;;  %v12723_v39 = vld [vmem:[#allocation2 + $0x99] sm:$0x1] }
 0x312   : > { %21083 = vst [vmem:[#allocation94_spill] sm:$0xff] %v19678_v1  ;;  %v13475_v36 = vrot.slane %v13465_v40, %v17729_v7  ;;  %v12308_v63 = vcombine.low %v12286_v22, %v12293_v59  ;;  %v12309_v21 = vcombine.low %v12300_v45, %v12307_v38  ;;  %v12325_v16 = vcombine.low %v11452_v51, %v11453_v32  ;;  %v12724_v53 = vld [vmem:[#allocation2 + $0x9a] sm:$0x1]  ;;  %v12725_v44 = vld [vmem:[#allocation2 + $0x9b] sm:$0x1]  ;;  %v19696_v45 = vpop.f32.mrf.mxu1 }
 0x313   : > { %v19688_v50 = vpop.f32.mrf.mxu0  ;;  %v13464_v52 = vcombine.low %v13456_v58, %v13463_v30  ;;  %v13482_v1 = vrot.slane %v13466_v55, %v17729_v7  ;;  %v13489_v19 = vrot.slane %v13467_v25, %v17729_v7  ;;  %v13496_v48 = vrot.slane %v13468_v57, %v17729_v7  ;;  %v12726_v40 = vld [vmem:[#allocation2 + $0x9c] sm:$0x1]  ;;  %v12727_v30 = vld [vmem:[#allocation2 + $0x9d] sm:$0x1]  ;;  %v12728_v59 = vld [vmem:[#allocation2 + $0x9e] sm:$0x1] }
 0x314   : > { %21085 = vst [vmem:[#allocation96_spill] sm:$0xff] %v19688_v50  ;;  %v12316_v34 = vrot.slane %v12308_v63, %v17729_v7  ;;  %v12323_v58 = vrot.slane %v12309_v21, %v17729_v7  ;;  %v12326_v18 = vcombine.low %v11454_v23, %v11455_v0  ;;  %v12327_v22 = vcombine.low %v11456_v62, %v11457_v42  ;;  %v12729_v32 = vld [vmem:[#allocation2 + $0x9f] sm:$0x1]  ;;  %v12730_v57 = vld [vmem:[#allocation2 + $0xa0] sm:$0x1] }
 0x315   : > { %17511 = vmatmul.mubr.msk.bf16.gmra.mxu0 %vm4846_vm4, %v13464_v52  ;;  %21086 = vst [vmem:[#allocation97_spill] sm:$0xff] %v19696_v45  ;;  %v13497_v38 = vcombine.low %v13475_v36, %v13482_v1  ;;  %v13498_v55 = vcombine.low %v13489_v19, %v13496_v48  ;;  %v12328_v25 = vcombine.low %v11458_v17, %v11459_v33  ;;  %v15279_v52 = vld [vmem:[%s20987_s7] sm:$0x1]  ;;  %v12731_v21 = vld [vmem:[#allocation2 + $0xa3] sm:$0x1] }
 0x316   : > { %v12335_v51 = vrot.slane %v12325_v16, %v17729_v7  ;;  %v12324_v23 = vcombine.low %v12316_v34, %v12323_v58  ;;  %v12342_v0 = vrot.slane %v12326_v18, %v17729_v7  ;;  %v12349_v62 = vrot.slane %v12327_v22, %v17729_v7  ;;  %17605 = vmatprep.subr.msk.bf16.mxu0 %vm4895_vm3, %v15279_v52  ;;  %v12732_v17 = vld [vmem:[#allocation2 + $0xa4] sm:$0x1]  ;;  %v12733_v58 = vld [vmem:[#allocation2 + $0xa5] sm:$0x1] }
 0x317   : > { %v19699_v50 = vpop.f32.mrf.mxu0  ;;  %v13514_v42 = vcombine.low %v12723_v39, %v12724_v53  ;;  %v13505_v1 = vrot.slane %v13497_v38, %v17729_v7  ;;  %v13512_v19 = vrot.slane %v13498_v55, %v17729_v7  ;;  %v12356_v36 = vrot.slane %v12328_v25, %v17729_v7  ;;  %v12734_v39 = vld [vmem:[#allocation2 + $0xa6] sm:$0x1]  ;;  %v12735_v53 = vld [vmem:[#allocation2 + $0xa7] sm:$0x1]  ;;  %v12736_v25 = vld [vmem:[#allocation2 + $0xa8] sm:$0x1] }
 0x318   : > { %21087 = vst [vmem:[#allocation98_spill] sm:$0xff] %v19699_v50  ;;  %v13515_v63 = vcombine.low %v12725_v44, %v12726_v40  ;;  %17484 = vmatprep.mubr.msk.bf16.mxu1 %vm4846_vm4, %v12324_v23  ;;  %v12357_v33 = vcombine.low %v12335_v51, %v12342_v0  ;;  %v13516_v48 = vcombine.low %v12727_v30, %v12728_v59  ;;  %v12737_v44 = vld [vmem:[#allocation2 + $0xa9] sm:$0x1]  ;;  %v12738_v40 = vld [vmem:[#allocation2 + $0xaa] sm:$0x1] }
 0x319   : > { %v13517_v16 = vcombine.low %v12729_v32, %v12730_v57  ;;  %v13524_v34 = vrot.slane %v13514_v42, %v17729_v7  ;;  %v13513_v22 = vcombine.low %v13505_v1, %v13512_v19  ;;  %v12358_v38 = vcombine.low %v12349_v62, %v12356_v36  ;;  %v19715_v52 = vpop.f32.mrf.mxu0  ;;  %v13906_v32 = vld [vmem:[#allocation2 + $0x26] sm:$0x1]  ;;  %v13907_v57 = vld [vmem:[#allocation2 + $0x27] sm:$0x1]  ;;  %v13908_v1 = vld [vmem:[#allocation2 + $0x28] sm:$0x1] }
 0x31a   : > { %v13531_v55 = vrot.slane %v13515_v63, %v17729_v7  ;;  %21089 = vst [vmem:[#allocation100_spill] sm:$0xff] %v19715_v52  ;;  %v12365_v51 = vrot.slane %v12357_v33, %v17729_v7  ;;  %v13538_v30 = vrot.slane %v13516_v48, %v17729_v7  ;;  %v13563_v42 = vcombine.low %v12731_v21, %v12732_v17  ;;  %v13909_v19 = vld [vmem:[#allocation2 + $0x29] sm:$0x1]  ;;  %v13910_v36 = vld [vmem:[#allocation2 + $0x2a] sm:$0x1] }
 0x31b   : > { %v19712_v18 = vpop.f32.mrf.mxu1  ;;  %v13545_v59 = vrot.slane %v13517_v16, %v17729_v7  ;;  %17514 = vmatprep.mubr.msk.bf16.mxu0 %vm4846_vm4, %v13513_v22  ;;  %v12372_v0 = vrot.slane %v12358_v38, %v17729_v7  ;;  %v13565_v33 = vcombine.low %v12735_v53, %v12736_v25  ;;  %v13566_v45 = vcombine.low %v12737_v44, %v12738_v40  ;;  %v13911_v48 = vld [vmem:[#allocation2 + $0x2b] sm:$0x1]  ;;  %v13912_v52 = vld [vmem:[#allocation2 + $0x2c] sm:$0x1]  ;;  %v13913_v16 = vld [vmem:[#allocation2 + $0x2d] sm:$0x1] }
 0x31c   : > { %21088 = vst [vmem:[#allocation99_spill] sm:$0xff] %v19712_v18  ;;  %v13546_v62 = vcombine.low %v13524_v34, %v13531_v55  ;;  %v13564_v18 = vcombine.low %v12733_v58, %v12734_v39  ;;  %v13573_v22 = vrot.slane %v13563_v42, %v17729_v7  ;;  %v14164_v38 = vcombine.low %v13906_v32, %v13907_v57  ;;  %v19728_v34 = vpop.f32.mrf.mxu0  ;;  %v12739_v53 = vld [vmem:[#allocation2 + $0xab] sm:$0x1]  ;;  %v12740_v55 = vld [vmem:[#allocation2 + $0xac] sm:$0x1] }
 0x31d   : > { %v19720_v23 = vpop.f32.mrf.mxu1  ;;  %v13547_v63 = vcombine.low %v13538_v30, %v13545_v59  ;;  %v12373_v47 = vcombine.low %v12365_v51, %v12372_v0  ;;  %21092 = vst [vmem:[#allocation103_spill] sm:$0xff] %v19728_v34  ;;  %v13587_v58 = vrot.slane %v13565_v33, %v17729_v7  ;;  %v13594_v39 = vrot.slane %v13566_v45, %v17729_v7  ;;  %v12741_v59 = vld [vmem:[#allocation2 + $0xad] sm:$0x1]  ;;  %v12742_v32 = vld [vmem:[#allocation2 + $0xae] sm:$0x1] }
 0x31e   : > { %21090 = vst [vmem:[#allocation101_spill] sm:$0xff] %v19720_v23  ;;  %v13554_v23 = vrot.slane %v13546_v62, %v17729_v7  ;;  %v13580_v17 = vrot.slane %v13564_v18, %v17729_v7  ;;  %v14165_v44 = vcombine.low %v13908_v1, %v13909_v19  ;;  %v14166_v40 = vcombine.low %v13910_v36, %v13911_v48  ;;  %v12743_v57 = vld [vmem:[#allocation2 + $0xaf] sm:$0x1]  ;;  %v12744_v42 = vld [vmem:[#allocation2 + $0xb0] sm:$0x1] }
 0x31f   : > { %v19724_v50 = vpop.f32.mrf.mxu1  ;;  %v13561_v21 = vrot.slane %v13547_v63, %v17729_v7  ;;  %17485 = vmatmul.mubr.msk.bf16.gmra.mxu1 %vm4846_vm4, %v12373_v47  ;;  %v14167_v51 = vcombine.low %v13912_v52, %v13913_v16  ;;  %v14174_v30 = vrot.slane %v14164_v38, %v17729_v7  ;;  %v13596_v62 = vcombine.low %v13587_v58, %v13594_v39  ;;  %v12745_v63 = vld [vmem:[#allocation2 + $0xb1] sm:$0x1]  ;;  %v12746_v45 = vld [vmem:[#allocation2 + $0xb2] sm:$0x1]  ;;  %v13914_v1 = vld [vmem:[#allocation2 + $0x2e] sm:$0x1]  ;;  %v19741_v52 = vpop.f32.mrf.mxu0 }
 0x320   : > { %21091 = vst [vmem:[#allocation102_spill] sm:$0xff] %v19724_v50  ;;  %v13595_v18 = vcombine.low %v13573_v22, %v13580_v17  ;;  %v14181_v33 = vrot.slane %v14165_v44, %v17729_v7  ;;  %v13915_v19 = vld [vmem:[#allocation2 + $0x2f] sm:$0x1]  ;;  %21094 = vst [vmem:[#allocation105_spill] sm:$0xff] %v19741_v52  ;;  %v13612_v48 = vcombine.low %v12739_v53, %v12740_v55  ;;  %v13916_v22 = vld [vmem:[#allocation2 + $0x30] sm:$0x1] }
 0x321   : > { %v19734_v25 = vpop.f32.mrf.mxu1  ;;  %v13562_v0 = vcombine.low %v13554_v23, %v13561_v21  ;;  %v14195_v47 = vrot.slane %v14167_v51, %v17729_v7  ;;  %v13610_v23 = vrot.slane %v13596_v62, %v17729_v7  ;;  %v13613_v16 = vcombine.low %v12741_v59, %v12742_v32  ;;  %v13917_v38 = vld [vmem:[#allocation2 + $0x31] sm:$0x1]  ;;  %v13918_v21 = vld [vmem:[#allocation2 + $0x32] sm:$0x1]  ;;  %v13919_v51 = vld [vmem:[#allocation2 + $0x33] sm:$0x1] }
 0x322   : > { %21093 = vst [vmem:[#allocation104_spill] sm:$0xff] %v19734_v25  ;;  %v14188_v25 = vrot.slane %v14166_v40, %v17729_v7  ;;  %v13603_v36 = vrot.slane %v13595_v18, %v17729_v7  ;;  %v14196_v58 = vcombine.low %v14174_v30, %v14181_v33  ;;  %v13614_v44 = vcombine.low %v12743_v57, %v12744_v42  ;;  %v13920_v50 = vld [vmem:[#allocation2 + $0x34] sm:$0x1]  ;;  %v13921_v52 = vld [vmem:[#allocation2 + $0x35] sm:$0x1] }
 0x323   : > { %17515 = vmatmul.mubr.msk.bf16.gmra.mxu0 %vm4846_vm4, %v13562_v0  ;;  %v13615_v40 = vcombine.low %v12745_v63, %v12746_v45  ;;  %v13622_v0 = vrot.slane %v13612_v48, %v17729_v7  ;;  %v13629_v18 = vrot.slane %v13613_v16, %v17729_v7  ;;  %v14213_v62 = vcombine.low %v13914_v1, %v13915_v19  ;;  %v13922_v19 = vld [vmem:[#allocation2 + $0x38] sm:$0x1] }
 0x324   : > { %v14197_v39 = vcombine.low %v14188_v25, %v14195_v47  ;;  %v13611_v34 = vcombine.low %v13603_v36, %v13610_v23  ;;  %v14204_v55 = vrot.slane %v14196_v58, %v17729_v7  ;;  %v13636_v30 = vrot.slane %v13614_v44, %v17729_v7  ;;  %v13923_v36 = vld [vmem:[#allocation2 + $0x39] sm:$0x1]  ;;  %v13924_v23 = vld [vmem:[#allocation2 + $0x3a] sm:$0x1]  ;;  %v13928_v44 = vld [vmem:[#allocation2 + $0x3e] sm:$0x1] }
 0x325   : > { %v19746_v17 = vpop.f32.mrf.mxu1  ;;  %v13643_v25 = vrot.slane %v13615_v40, %v17729_v7  ;;  %v13644_v57 = vcombine.low %v13622_v0, %v13629_v18  ;;  %v14214_v42 = vcombine.low %v13916_v22, %v13917_v38  ;;  %v14215_v63 = vcombine.low %v13918_v21, %v13919_v51  ;;  %v13927_v38 = vld [vmem:[#allocation2 + $0x3d] sm:$0x1]  ;;  %v13929_v40 = vld [vmem:[#allocation2 + $0x3f] sm:$0x1]  ;;  %v13930_v18 = vld [vmem:[#allocation2 + $0x40] sm:$0x1] }
 0x326   : > { %21095 = vst [vmem:[#allocation106_spill] sm:$0xff] %v19746_v17  ;;  %v14211_v59 = vrot.slane %v14197_v39, %v17729_v7  ;;  %17518 = vmatprep.mubr.msk.bf16.mxu0 %vm4846_vm4, %v13611_v34  ;;  %v14216_v45 = vcombine.low %v13920_v50, %v13921_v52  ;;  %v14223_v1 = vrot.slane %v14213_v62, %v17729_v7  ;;  %v13925_v50 = vld [vmem:[#allocation2 + $0x3b] sm:$0x1]  ;;  %v13926_v52 = vld [vmem:[#allocation2 + $0x3c] sm:$0x1] }
 0x327   : > { %v19750_v53 = vpop.f32.mrf.mxu1  ;;  %v13645_v47 = vcombine.low %v13636_v30, %v13643_v25  ;;  %v13652_v58 = vrot.slane %v13644_v57, %v17729_v7  ;;  %v14230_v39 = vrot.slane %v14214_v42, %v17729_v7  ;;  %v14237_v34 = vrot.slane %v14215_v63, %v17729_v7  ;;  %v13931_v62 = vld [vmem:[#allocation2 + $0x41] sm:$0x1]  ;;  %v13932_v42 = vld [vmem:[#allocation2 + $0x42] sm:$0x1]  ;;  %v13933_v63 = vld [vmem:[#allocation2 + $0x43] sm:$0x1] }
 0x328   : > { %21096 = vst [vmem:[#allocation107_spill] sm:$0xff] %v19750_v53  ;;  %v19756_v32 = vpop.f32.mrf.mxu0  ;;  %v14212_v33 = vcombine.low %v14204_v55, %v14211_v59  ;;  %v14244_v22 = vrot.slane %v14216_v45, %v17729_v7  ;;  %v14262_v30 = vcombine.low %v13922_v19, %v13923_v36  ;;  %v14263_v25 = vcombine.low %v13924_v23, %v13925_v50  ;;  %v13934_v45 = vld [vmem:[#allocation2 + $0x44] sm:$0x1]  ;;  %v13950_v53 = vld [vmem:[#allocation2 + $0x56] sm:$0x1] }
 0x329   : > { %21097 = vst [vmem:[#allocation108_spill] sm:$0xff] %v19756_v32  ;;  %v19762_v16 = vpop.f32.mrf.mxu1  ;;  %v13659_v21 = vrot.slane %v13645_v47, %v17729_v7  ;;  %v14245_v51 = vcombine.low %v14223_v1, %v14230_v39  ;;  %v14264_v57 = vcombine.low %v13926_v52, %v13927_v38  ;;  %v13935_v1 = vld [vmem:[#allocation2 + $0x45] sm:$0x1]  ;;  %v13936_v39 = vld [vmem:[#allocation2 + $0x46] sm:$0x1]  ;;  %v14311_v50 = vcombine.low %v13930_v18, %v13931_v62 }
 0x32a   : > { %v19760_v48 = vpop.f32.mrf.mxu0  ;;  %21099 = vst [vmem:[#allocation110_spill] sm:$0xff] %v19762_v16  ;;  %17524 = vmatprep.mubr.msk.bf16.mxu1 %vm4846_vm4, %v14212_v33  ;;  %v14246_v0 = vcombine.low %v14237_v34, %v14244_v22  ;;  %v14265_v16 = vcombine.low %v13928_v44, %v13929_v40  ;;  %v13937_v34 = vld [vmem:[#allocation2 + $0x47] sm:$0x1]  ;;  %v14279_v19 = vrot.slane %v14263_v25, %v17729_v7  ;;  %v13942_v18 = vld [vmem:[#allocation2 + $0x4e] sm:$0x1] }
 0x32b   : > { %21098 = vst [vmem:[#allocation109_spill] sm:$0xff] %v19760_v48  ;;  %v13660_v59 = vcombine.low %v13652_v58, %v13659_v21  ;;  %v19772_v32 = vpop.f32.mrf.mxu1  ;;  %v14253_v33 = vrot.slane %v14245_v51, %v17729_v7  ;;  %v14272_v58 = vrot.slane %v14262_v30, %v17729_v7  ;;  %v14286_v36 = vrot.slane %v14264_v57, %v17729_v7  ;;  %v13938_v51 = vld [vmem:[#allocation2 + $0x4a] sm:$0x1]  ;;  %v13940_v57 = vld [vmem:[#allocation2 + $0x4c] sm:$0x1] }
 0x32c   : > { %v19770_v55 = vpop.f32.mrf.mxu0  ;;  %21101 = vst [vmem:[#allocation112_spill] sm:$0xff] %v19772_v32  ;;  %v14260_v47 = vrot.slane %v14246_v0, %v17729_v7  ;;  %v14293_v22 = vrot.slane %v14265_v16, %v17729_v7  ;;  %v14312_v52 = vcombine.low %v13932_v42, %v13933_v63  ;;  %v14313_v44 = vcombine.low %v13934_v45, %v13935_v1  ;;  %v13939_v0 = vld [vmem:[#allocation2 + $0x4b] sm:$0x1]  ;;  %v13941_v16 = vld [vmem:[#allocation2 + $0x4d] sm:$0x1] }
 0x32d   : > { %21100 = vst [vmem:[#allocation111_spill] sm:$0xff] %v19770_v55  ;;  %17519 = vmatmul.mubr.msk.bf16.gmra.mxu0 %vm4846_vm4, %v13660_v59  ;;  %v14294_v21 = vcombine.low %v14272_v58, %v14279_v19  ;;  %v14314_v40 = vcombine.low %v13936_v39, %v13937_v34  ;;  %v14321_v30 = vrot.slane %v14311_v50, %v17729_v7  ;;  %v13943_v45 = vld [vmem:[#allocation2 + $0x4f] sm:$0x1]  ;;  %v13947_v50 = vld [vmem:[#allocation2 + $0x53] sm:$0x1] }
 0x32e   : > { %v14261_v23 = vcombine.low %v14253_v33, %v14260_v47  ;;  %v19781_v38 = vpop.f32.mrf.mxu0  ;;  %v14295_v59 = vcombine.low %v14286_v36, %v14293_v22  ;;  %v14328_v25 = vrot.slane %v14312_v52, %v17729_v7  ;;  %v14335_v42 = vrot.slane %v14313_v44, %v17729_v7  ;;  %v13944_v33 = vld [vmem:[#allocation2 + $0x50] sm:$0x1]  ;;  %v13945_v47 = vld [vmem:[#allocation2 + $0x51] sm:$0x1]  ;;  %v13946_v22 = vld [vmem:[#allocation2 + $0x52] sm:$0x1] }
 0x32f   : > { %21102 = vst [vmem:[#allocation113_spill] sm:$0xff] %v19781_v38  ;;  %v14302_v62 = vrot.slane %v14294_v21, %v17729_v7  ;;  %v14342_v63 = vrot.slane %v14314_v40, %v17729_v7  ;;  %v14360_v36 = vcombine.low %v13938_v51, %v13939_v0  ;;  %v13948_v52 = vld [vmem:[#allocation2 + $0x54] sm:$0x1]  ;;  %v14362_v40 = vcombine.low %v13942_v18, %v13943_v45  ;;  %v13949_v55 = vld [vmem:[#allocation2 + $0x55] sm:$0x1] }
 0x330   : > { %17525 = vmatmul.mubr.msk.bf16.vlgmr.msra.gmra.mxu1 %vm4846_vm4, %v14261_v23  ;;  %v14309_v39 = vrot.slane %v14295_v59, %v17729_v7  ;;  %v14343_v34 = vcombine.low %v14321_v30, %v14328_v25  ;;  %v14361_v23 = vcombine.low %v13940_v57, %v13941_v16  ;;  %v14363_v38 = vcombine.low %v13944_v33, %v13945_v47  ;;  %v13951_v17 = vld [vmem:[#allocation2 + $0x57] sm:$0x1]  ;;  %v13952_v25 = vld [vmem:[#allocation2 + $0x58] sm:$0x1]  ;;  %v13953_v57 = vld [vmem:[#allocation2 + $0x59] sm:$0x1] }
 0x331   : > { %v14344_v19 = vcombine.low %v14335_v42, %v14342_v63  ;;  %v14370_v51 = vrot.slane %v14360_v36, %v17729_v7  ;;  %v14384_v16 = vrot.slane %v14362_v40, %v17729_v7  ;;  %v14410_v45 = vcombine.low %v13948_v52, %v13949_v55  ;;  %v13954_v36 = vld [vmem:[#allocation2 + $0x5c] sm:$0x1]  ;;  %v13961_v40 = vld [vmem:[#allocation2 + $0x63] sm:$0x1] }
 0x332   : > { %v19783_v32 = vpop.f32.mrf.mxu1  ;;  %v14310_v21 = vcombine.low %v14302_v62, %v14309_v39  ;;  %v14351_v44 = vrot.slane %v14343_v34, %v17729_v7  ;;  %v14377_v0 = vrot.slane %v14361_v23, %v17729_v7  ;;  %v14391_v18 = vrot.slane %v14363_v38, %v17729_v7  ;;  %v13955_v23 = vld [vmem:[#allocation2 + $0x5d] sm:$0x1] }
 0x333   : > { %v14358_v30 = vrot.slane %v14344_v19, %v17729_v7  ;;  %v14409_v62 = vcombine.low %v13946_v22, %v13947_v50  ;;  %v14411_v33 = vcombine.low %v13950_v53, %v13951_v17  ;;  %v14412_v34 = vcombine.low %v13952_v25, %v13953_v57  ;;  %v13957_v17 = vld [vmem:[#allocation2 + $0x5f] sm:$0x1]  ;;  %v13958_v53 = vld [vmem:[#allocation2 + $0x60] sm:$0x1]  ;;  %v13959_v50 = vld [vmem:[#allocation2 + $0x61] sm:$0x1] }
 0x334   : > { %v19791_v1 = vpop.f32.mrf.mxu1  ;;  %17528 = vmatprep.mubr.msk.bf16.mxu1 %vm4846_vm4, %v14310_v21  ;;  %v14392_v63 = vcombine.low %v14370_v51, %v14377_v0  ;;  %v14393_v39 = vcombine.low %v14384_v16, %v14391_v18  ;;  %v14426_v22 = vrot.slane %v14410_v45, %v17729_v7  ;;  %v14458_v51 = vcombine.low %v13954_v36, %v13955_v23  ;;  %v13962_v0 = vld [vmem:[#allocation2 + $0x64] sm:$0x1]  ;;  %v13963_v25 = vld [vmem:[#allocation2 + $0x65] sm:$0x1]  ;;  %v13964_v57 = vld [vmem:[#allocation2 + $0x66] sm:$0x1] }
 0x335   : > { %v14359_v42 = vcombine.low %v14351_v44, %v14358_v30  ;;  %v14419_v19 = vrot.slane %v14409_v62, %v17729_v7  ;;  %v14433_v55 = vrot.slane %v14411_v33, %v17729_v7  ;;  %v14440_v21 = vrot.slane %v14412_v34, %v17729_v7  ;;  %v13960_v44 = vld [vmem:[#allocation2 + $0x62] sm:$0x1]  ;;  %v13965_v45 = vld [vmem:[#allocation2 + $0x67] sm:$0x1]  ;;  %v13966_v33 = vld [vmem:[#allocation2 + $0x68] sm:$0x1] }
 0x336   : > { %v19794_v58 = vpop.f32.mrf.mxu0  ;;  %v19799_v59 = vpop.f32.mrf.mxu1  ;;  %v14400_v38 = vrot.slane %v14392_v63, %v17729_v7  ;;  %v14407_v52 = vrot.slane %v14393_v39, %v17729_v7  ;;  %v14460_v63 = vcombine.low %v13958_v53, %v13959_v50  ;;  %v14461_v34 = vcombine.low %v13960_v44, %v13961_v40  ;;  %v13968_v36 = vld [vmem:[#allocation2 + $0x6a] sm:$0x1]  ;;  %v13969_v23 = vld [vmem:[#allocation2 + $0x6b] sm:$0x1] }
 0x337   : > { %21103 = vst [vmem:[#allocation114_spill] sm:$0xff] %v19794_v58  ;;  %21105 = vst [vmem:[#allocation116_spill] sm:$0xff] %v19799_v59  ;;  %v14441_v30 = vcombine.low %v14419_v19, %v14426_v22  ;;  %v14442_v62 = vcombine.low %v14433_v55, %v14440_v21  ;;  %v14468_v19 = vrot.slane %v14458_v51, %v17729_v7  ;;  %v13970_v51 = vld [vmem:[#allocation2 + $0x6e] sm:$0x1] }
 0x338   : > { %v19797_v48 = vpop.f32.mrf.mxu0  ;;  %v19810_v58 = vpop.f32.mrf.mxu1  ;;  %17529 = vmatmul.mubr.msk.bf16.gmra.mxu1 %vm4846_vm4, %v14359_v42  ;;  %v14408_v18 = vcombine.low %v14400_v38, %v14407_v52  ;;  %v14507_v53 = vcombine.low %v13962_v0, %v13963_v25  ;;  %v14508_v50 = vcombine.low %v13964_v57, %v13965_v45  ;;  %v13975_v45 = vld [vmem:[#allocation2 + $0x73] sm:$0x1] }
 0x339   : > { %21104 = vst [vmem:[#allocation115_spill] sm:$0xff] %v19797_v48  ;;  %v13956_v48 = vld [vmem:[#allocation2 + $0x5e] sm:$0x1]  ;;  %21107 = vst [vmem:[#allocation118_spill] sm:$0xff] %v19810_v58  ;;  %v13967_v58 = vld [vmem:[#allocation2 + $0x69] sm:$0x1]  ;;  %v14449_v39 = vrot.slane %v14441_v30, %v17729_v7  ;;  %v14456_v22 = vrot.slane %v14442_v62, %v17729_v7  ;;  %v14510_v30 = vcombine.low %v13968_v36, %v13969_v23 }
 0x33a   : > { %v19807_v47 = vpop.f32.mrf.mxu0  ;;  %v14459_v42 = vcombine.low %v13956_v48, %v13957_v17  ;;  %17532 = vmatprep.mubr.msk.bf16.mxu1 %vm4846_vm4, %v14408_v18  ;;  %v14482_v48 = vrot.slane %v14460_v63, %v17729_v7  ;;  %v14489_v17 = vrot.slane %v14461_v34, %v17729_v7  ;;  %v14509_v52 = vcombine.low %v13966_v33, %v13967_v58  ;;  %v13971_v18 = vld [vmem:[#allocation2 + $0x6f] sm:$0x1]  ;;  %v13974_v34 = vld [vmem:[#allocation2 + $0x72] sm:$0x1]  ;;  %v13976_v33 = vld [vmem:[#allocation2 + $0x74] sm:$0x1] }
 0x33b   : > { %21106 = vst [vmem:[#allocation117_spill] sm:$0xff] %v19807_v47  ;;  %v14457_v44 = vcombine.low %v14449_v39, %v14456_v22  ;;  %v14517_v62 = vrot.slane %v14507_v53, %v17729_v7  ;;  %v14538_v57 = vrot.slane %v14510_v30, %v17729_v7  ;;  %v13977_v39 = vld [vmem:[#allocation2 + $0x75] sm:$0x1]  ;;  %v14556_v22 = vcombine.low %v13970_v51, %v13971_v18  ;;  %v13980_v53 = vld [vmem:[#allocation2 + $0x78] sm:$0x1] }
 0x33c   : > { %v19818_v16 = vpop.f32.mrf.mxu0  ;;  %v14475_v38 = vrot.slane %v14459_v42, %v17729_v7  ;;  %v14524_v42 = vrot.slane %v14508_v50, %v17729_v7  ;;  %v14531_v63 = vrot.slane %v14509_v52, %v17729_v7  ;;  %v13981_v30 = vld [vmem:[#allocation2 + $0x79] sm:$0x1]  ;;  %v13985_v18 = vld [vmem:[#allocation2 + $0x7d] sm:$0x1] }
 0x33d   : > { %21108 = vst [vmem:[#allocation119_spill] sm:$0xff] %v19818_v16  ;;  %v14491_v16 = vcombine.low %v14482_v48, %v14489_v17  ;;  %v13978_v48 = vld [vmem:[#allocation2 + $0x76] sm:$0x1]  ;;  %v13979_v17 = vld [vmem:[#allocation2 + $0x77] sm:$0x1]  ;;  %v14566_v51 = vrot.slane %v14556_v22, %v17729_v7 }
 0x33e   : > { %v14490_v40 = vcombine.low %v14468_v19, %v14475_v38  ;;  %v14539_v36 = vcombine.low %v14517_v62, %v14524_v42  ;;  %v14540_v23 = vcombine.low %v14531_v63, %v14538_v57  ;;  %v14605_v63 = vcombine.low %v13978_v48, %v13979_v17  ;;  %v13987_v22 = vld [vmem:[#allocation2 + $0x81] sm:$0x1] }
 0x33f   : > { %v19820_v47 = vpop.f32.mrf.mxu1  ;;  %v14505_v19 = vrot.slane %v14491_v16, %v17729_v7  ;;  %v14606_v57 = vcombine.low %v13980_v53, %v13981_v30  ;;  %v13991_v53 = vld [vmem:[#allocation2 + $0x85] sm:$0x1]  ;;  %v13993_v30 = vld [vmem:[#allocation2 + $0x87] sm:$0x1] }
 0x340   : > { %21109 = vst [vmem:[#allocation120_spill] sm:$0xff] %v19820_v47  ;;  %v13973_v47 = vld [vmem:[#allocation2 + $0x71] sm:$0x1]  ;;  %17533 = vmatmul.mubr.msk.bf16.gmra.mxu1 %vm4846_vm4, %v14457_v44  ;;  %v14498_v25 = vrot.slane %v14490_v40, %v17729_v7  ;;  %v14547_v44 = vrot.slane %v14539_v36, %v17729_v7  ;;  %v14558_v40 = vcombine.low %v13974_v34, %v13975_v45 }
 0x341   : > { %v19828_v55 = vpop.f32.mrf.mxu1  ;;  %v14554_v16 = vrot.slane %v14540_v23, %v17729_v7  ;;  %v14615_v36 = vrot.slane %v14605_v63, %v17729_v7  ;;  %v13986_v23 = vld [vmem:[#allocation2 + $0x80] sm:$0x1]  ;;  %v14622_v48 = vrot.slane %v14606_v57, %v17729_v7 }
 0x342   : > { %21110 = vst [vmem:[#allocation121_spill] sm:$0xff] %v19828_v55  ;;  %v13972_v55 = vld [vmem:[#allocation2 + $0x70] sm:$0x1]  ;;  %v14506_v52 = vcombine.low %v14498_v25, %v14505_v19  ;;  %v14580_v62 = vrot.slane %v14558_v40, %v17729_v7  ;;  %v13992_v40 = vld [vmem:[#allocation2 + $0x86] sm:$0x1] }
 0x343   : > { %v19831_v21 = vpop.f32.mrf.mxu0  ;;  %v19838_v58 = vpop.f32.mrf.mxu1  ;;  %v14557_v38 = vcombine.low %v13972_v55, %v13973_v47  ;;  %v13984_v55 = vld [vmem:[#allocation2 + $0x7c] sm:$0x1]  ;;  %v14555_v34 = vcombine.low %v14547_v44, %v14554_v16 }
 0x344   : > { %21111 = vst [vmem:[#allocation122_spill] sm:$0xff] %v19831_v21  ;;  %21113 = vst [vmem:[#allocation124_spill] sm:$0xff] %v19838_v58  ;;  %v14559_v58 = vcombine.low %v13976_v33, %v13977_v39  ;;  %v13983_v21 = vld [vmem:[#allocation2 + $0x7b] sm:$0x1]  ;;  %17536 = vmatprep.mubr.msk.bf16.mxu1 %vm4846_vm4, %v14506_v52  ;;  %v14608_v19 = vcombine.low %v13984_v55, %v13985_v18  ;;  %v13994_v55 = vld [vmem:[#allocation2 + $0x88] sm:$0x1] }
 0x345   : > { %v19836_v0 = vpop.f32.mrf.mxu0  ;;  %v19847_v59 = vpop.f32.mrf.mxu1  ;;  %v14573_v47 = vrot.slane %v14557_v38, %v17729_v7  ;;  %v13988_v38 = vld [vmem:[#allocation2 + $0x82] sm:$0x1]  ;;  %v13995_v18 = vld [vmem:[#allocation2 + $0x89] sm:$0x1] }
 0x346   : > { %21112 = vst [vmem:[#allocation123_spill] sm:$0xff] %v19836_v0  ;;  %v13982_v0 = vld [vmem:[#allocation2 + $0x7a] sm:$0x1]  ;;  %21115 = vst [vmem:[#allocation126_spill] sm:$0xff] %v19847_v59  ;;  %v14587_v42 = vrot.slane %v14559_v58, %v17729_v7  ;;  %v14636_v44 = vrot.slane %v14608_v19, %v17729_v7 }
 0x347   : > { %v19844_v50 = vpop.f32.mrf.mxu0  ;;  %v14588_v25 = vcombine.low %v14566_v51, %v14573_v47  ;;  %v14607_v45 = vcombine.low %v13982_v0, %v13983_v21  ;;  %v13989_v21 = vld [vmem:[#allocation2 + $0x83] sm:$0x1]  ;;  %v13990_v0 = vld [vmem:[#allocation2 + $0x84] sm:$0x1]  ;;  %v14637_v51 = vcombine.low %v14615_v36, %v14622_v48  ;;  %v14654_v47 = vcombine.low %v13986_v23, %v13987_v22  ;;  %v14001_v36 = vld [vmem:[#allocation2 + $0x8f] sm:$0x1] }
 0x348   : > { %21114 = vst [vmem:[#allocation125_spill] sm:$0xff] %v19844_v50  ;;  %v14589_v39 = vcombine.low %v14580_v62, %v14587_v42  ;;  %17537 = vmatmul.mubr.msk.bf16.gmra.mxu1 %vm4846_vm4, %v14555_v34  ;;  %v13996_v62 = vld [vmem:[#allocation2 + $0x8a] sm:$0x1]  ;;  %v14656_v57 = vcombine.low %v13990_v0, %v13991_v53 }
 0x349   : > { %v19855_v33 = vpop.f32.mrf.mxu0  ;;  %v14596_v58 = vrot.slane %v14588_v25, %v17729_v7  ;;  %v14629_v17 = vrot.slane %v14607_v45, %v17729_v7  ;;  %v14655_v25 = vcombine.low %v13988_v38, %v13989_v21  ;;  %v13997_v45 = vld [vmem:[#allocation2 + $0x8b] sm:$0x1]  ;;  %v14645_v19 = vrot.slane %v14637_v51, %v17729_v7  ;;  %v14003_v51 = vld [vmem:[#allocation2 + $0x93] sm:$0x1] }
 0x34a   : > { %21116 = vst [vmem:[#allocation127_spill] sm:$0xff] %v19855_v33  ;;  %v14603_v52 = vrot.slane %v14589_v39, %v17729_v7  ;;  %v13998_v33 = vld [vmem:[#allocation2 + $0x8c] sm:$0x1]  ;;  %v13999_v39 = vld [vmem:[#allocation2 + $0x8d] sm:$0x1]  ;;  %v14664_v50 = vrot.slane %v14654_v47, %v17729_v7  ;;  %v14678_v48 = vrot.slane %v14656_v57, %v17729_v7  ;;  %v14703_v21 = vcombine.low %v13994_v55, %v13995_v18 }
 0x34b   : > { %v14638_v34 = vcombine.low %v14629_v17, %v14636_v44  ;;  %v14671_v38 = vrot.slane %v14655_v25, %v17729_v7  ;;  %v14704_v0 = vcombine.low %v13996_v62, %v13997_v45  ;;  %v14705_v53 = vcombine.low %v13998_v33, %v13999_v39  ;;  %v14004_v57 = vld [vmem:[#allocation2 + $0x94] sm:$0x1]  ;;  %v14007_v18 = vld [vmem:[#allocation2 + $0x97] sm:$0x1]  ;;  %v14008_v62 = vld [vmem:[#allocation2 + $0x98] sm:$0x1] }
 0x34c   : > { %v19858_v59 = vpop.f32.mrf.mxu1  ;;  %v14604_v63 = vcombine.low %v14596_v58, %v14603_v52  ;;  %v14009_v45 = vld [vmem:[#allocation2 + $0x99] sm:$0x1]  ;;  %v19897_v39 = vadd.f32 %v19138_v9, %v19084_v37 }
 0x34d   : > { %21117 = vst [vmem:[#allocation128_spill] sm:$0xff] %v19858_v59  ;;  %v14657_v59 = vcombine.low %v13992_v40, %v13993_v30  ;;  %v14652_v58 = vrot.slane %v14638_v34, %v17729_v7  ;;  %v14686_v44 = vcombine.low %v14664_v50, %v14671_v38  ;;  %v14002_v30 = vld [vmem:[#allocation2 + $0x92] sm:$0x1]  ;;  %v14720_v34 = vrot.slane %v14704_v0, %v17729_v7  ;;  %v14012_v0 = vld [vmem:[#allocation2 + $0x9c] sm:$0x1] }
 0x34e   : > { %v19866_v16 = vpop.f32.mrf.mxu1  ;;  %17540 = vmatprep.mubr.msk.bf16.mxu1 %vm4846_vm4, %v14604_v63  ;;  %v14713_v63 = vrot.slane %v14703_v21, %v17729_v7  ;;  %v14727_v25 = vrot.slane %v14705_v53, %v17729_v7  ;;  %v19890_v50 = vadd.f32 %v19132_v31, %v19077_v27  ;;  %v14752_v38 = vcombine.low %v14002_v30, %v14003_v51  ;;  %v14011_v21 = vld [vmem:[#allocation2 + $0x9b] sm:$0x1]  ;;  %v14016_v51 = vld [vmem:[#allocation2 + $0xa0] sm:$0x1] }
 0x34f   : > { %21118 = vst [vmem:[#allocation129_spill] sm:$0xff] %v19866_v16  ;;  %v14000_v16 = vld [vmem:[#allocation2 + $0x8e] sm:$0x1]  ;;  %v14685_v17 = vrot.slane %v14657_v59, %v17729_v7  ;;  %v14653_v52 = vcombine.low %v14645_v19, %v14652_v58  ;;  %v14006_v59 = vld [vmem:[#allocation2 + $0x96] sm:$0x1]  ;;  %v14694_v33 = vrot.slane %v14686_v44, %v17729_v7  ;;  %v19901_v19 = vadd.f32 %v19149_v15, %v19096_v3 }
 0x350   : > { %v19868_v42 = vpop.f32.mrf.mxu0  ;;  %v19874_v22 = vpop.f32.mrf.mxu1  ;;  %v14706_v40 = vcombine.low %v14000_v16, %v14001_v36  ;;  %v14735_v31 = vcombine.low %v14713_v63, %v14720_v34  ;;  %v19906_v36 = vadd.f32 %v19188_v26, %v19121_v24  ;;  %v14754_v3 = vcombine.low %v14006_v59, %v14007_v18  ;;  %v14015_v44 = vld [vmem:[#allocation2 + $0x9f] sm:$0x1]  ;;  %v14017_v63 = vld [vmem:[#allocation2 + $0xa1] sm:$0x1] }
 0x351   : > { %21120 = vst [vmem:[#allocation131_spill] sm:$0xff] %v19874_v22  ;;  %v14687_v22 = vcombine.low %v14678_v48, %v14685_v17  ;;  %17541 = vmatmul.mubr.msk.bf16.gmra.mxu1 %vm4846_vm4, %v14653_v52  ;;  %v14010_v17 = vld [vmem:[#allocation2 + $0x9a] sm:$0x1]  ;;  %v14755_v15 = vcombine.low %v14008_v62, %v14009_v45  ;;  %v14013_v52 = vld [vmem:[#allocation2 + $0x9d] sm:$0x1]  ;;  %v19915_v24 = vadd.f32 %v19196_v54, %v19128_v12 }
 0x352   : > { %v19872_v23 = vpop.f32.mrf.mxu0  ;;  %v19886_v55 = vpop.f32.mrf.mxu1  ;;  %v14734_v16 = vrot.slane %v14706_v40, %v17729_v7  ;;  %v14743_v9 = vrot.slane %v14735_v31, %v17729_v7  ;;  %v19922_v34 = vadd.f32 %v19207_v29, %v19140_v10  ;;  %v14801_v12 = vcombine.low %v14010_v17, %v14011_v21  ;;  %v14018_v31 = vld [vmem:[#allocation2 + $0xa4] sm:$0x1] }
 0x353   : > { %21119 = vst [vmem:[#allocation130_spill] sm:$0xff] %v19872_v23  ;;  %v14005_v23 = vld [vmem:[#allocation2 + $0x95] sm:$0x1]  ;;  %v14701_v27 = vrot.slane %v14687_v22, %v17729_v7  ;;  %v14014_v22 = vld [vmem:[#allocation2 + $0x9e] sm:$0x1]  ;;  %v19933_v45 = vadd.f32 %v19234_v11, %v19172_v41  ;;  %v14804_v29 = vcombine.low %v14016_v51, %v14017_v63 }
 0x354   : > { %v19881_v47 = vpop.f32.mrf.mxu0  ;;  %v14736_v58 = vcombine.low %v14727_v25, %v14734_v16  ;;  %v14753_v48 = vcombine.low %v14004_v57, %v14005_v23  ;;  %v14762_v23 = vrot.slane %v14752_v38, %v17729_v7  ;;  %v14776_v25 = vrot.slane %v14754_v3, %v17729_v7  ;;  %v14020_v38 = vld [vmem:[#allocation2 + $0xa6] sm:$0x1]  ;;  %v14021_v11 = vld [vmem:[#allocation2 + $0xa7] sm:$0x1]  ;;  %v14027_v51 = vld [vmem:[#allocation2 + $0xad] sm:$0x1] }
 0x355   : > { %v14702_v37 = vcombine.low %v14694_v33, %v14701_v27  ;;  %v14783_v57 = vrot.slane %v14755_v15, %v17729_v7  ;;  %v14802_v16 = vcombine.low %v14012_v0, %v14013_v52  ;;  %v14803_v18 = vcombine.low %v14014_v22, %v14015_v44  ;;  %v14022_v0 = vld [vmem:[#allocation2 + $0xa8] sm:$0x1]  ;;  %v14024_v22 = vld [vmem:[#allocation2 + $0xaa] sm:$0x1]  ;;  %v14025_v44 = vld [vmem:[#allocation2 + $0xab] sm:$0x1] }
 0x356   : > { %v19908_v53 = vpop.f32.mrf.mxu0  ;;  %v14750_v26 = vrot.slane %v14736_v58, %v17729_v7  ;;  %v14769_v30 = vrot.slane %v14753_v48, %v17729_v7  ;;  %v14811_v27 = vrot.slane %v14801_v12, %v17729_v7  ;;  %v14019_v58 = vld [vmem:[#allocation2 + $0xa5] sm:$0x1]  ;;  %v19938_v48 = vadd.f32 %v19240_v20, %v19179_v13  ;;  %v14029_v12 = vld [vmem:[#allocation2 + $0xaf] sm:$0x1] }
 0x357   : > { %17544 = vmatprep.mubr.msk.bf16.mxu1 %vm4846_vm4, %v14702_v37  ;;  %v14785_v10 = vcombine.low %v14776_v25, %v14783_v57  ;;  %v14818_v21 = vrot.slane %v14802_v16, %v17729_v7  ;;  %v14825_v41 = vrot.slane %v14803_v18, %v17729_v7  ;;  %v14023_v37 = vld [vmem:[#allocation2 + $0xa9] sm:$0x1]  ;;  %v19950_v15 = vadd.f32 %v19251_v8, %v19198_v5  ;;  %v14032_v18 = vld [vmem:[#allocation2 + $0xb2] sm:$0x1] }
 0x358   : > { %v14751_v59 = vcombine.low %v14743_v9, %v14750_v26  ;;  %v14784_v33 = vcombine.low %v14762_v23, %v14769_v30  ;;  %v19954_v13 = vadd.f32 %v19278_v14, %v19223_v49  ;;  %v14832_v52 = vrot.slane %v14804_v29, %v17729_v7  ;;  %v14026_v30 = vld [vmem:[#allocation2 + $0xac] sm:$0x1]  ;;  %v14028_v49 = vld [vmem:[#allocation2 + $0xae] sm:$0x1] }
 0x359   : > { %v19911_v40 = vpop.f32.mrf.mxu1  ;;  %v14799_v20 = vrot.slane %v14785_v10, %v17729_v7  ;;  %v19960_v26 = vadd.f32 %v19284_v2, %v19230_v43  ;;  %v19964_v23 = vadd.f32 %v19295_v56, %v19242_v6  ;;  %v14833_v5 = vcombine.low %v14811_v27, %v14818_v21  ;;  %v14033_v10 = vld [vmem:[#allocation2 + $0xb3] sm:$0x1] }
 0x35a   : > { %17545 = vmatmul.mubr.msk.bf16.gmra.mxu1 %vm4846_vm4, %v14751_v59  ;;  %v14792_v17 = vrot.slane %v14784_v33, %v17729_v7  ;;  %v14850_v8 = vcombine.low %v14018_v31, %v14019_v58  ;;  %v14834_v63 = vcombine.low %v14825_v41, %v14832_v52  ;;  %v14851_v25 = vcombine.low %v14020_v38, %v14021_v11  ;;  %v14030_v59 = vld [vmem:[#allocation2 + $0xb0] sm:$0x1]  ;;  %v14031_v33 = vld [vmem:[#allocation2 + $0xb1] sm:$0x1]  ;;  %v21121_v41 = vld [vmem:[#allocation27_spill] sm:$0xff] }
 0x35b   : > { %v19927_v54 = vpop.f32.mrf.mxu1  ;;  %v14852_v57 = vcombine.low %v14022_v0, %v14023_v37  ;;  %v19970_v43 = vadd.f32 %v19320_v60, %v19267_v28  ;;  %v14841_v56 = vrot.slane %v14833_v5, %v17729_v7  ;;  %v14853_v6 = vcombine.low %v14024_v22, %v14025_v44  ;;  %v21122_v11 = vld [vmem:[#allocation32_spill] sm:$0xff] }
 0x35c   : > { %v14800_v14 = vcombine.low %v14792_v17, %v14799_v20  ;;  %v14860_v2 = vrot.slane %v14850_v8, %v17729_v7  ;;  %v19978_v27 = vadd.f32 %v19328_v46, %v19274_v35  ;;  %v14848_v31 = vrot.slane %v14834_v63, %v17729_v7 }
 0x35d   : > { %v19929_v62 = vpop.f32.mrf.mxu0  ;;  %v19946_v3 = vpop.f32.mrf.mxu1  ;;  %v14867_v28 = vrot.slane %v14851_v25, %v17729_v7  ;;  %v14874_v60 = vrot.slane %v14852_v57, %v17729_v7  ;;  %v14881_v58 = vrot.slane %v14853_v6, %v17729_v7  ;;  %v14899_v38 = vcombine.low %v14026_v30, %v14027_v51  ;;  %v21123_v30 = vld [vmem:[#allocation28_spill] sm:$0xff]  ;;  %v21124_v25 = vld [vmem:[#allocation51_spill] sm:$0xff]  ;;  %v21126_v6 = vld [vmem:[#allocation58_spill] sm:$0xff] }
 0x35e   : > { %17548 = vmatprep.mubr.msk.bf16.mxu1 %vm4846_vm4, %v14800_v14  ;;  %v14900_v17 = vcombine.low %v14028_v49, %v14029_v12  ;;  %v14901_v21 = vcombine.low %v14030_v59, %v14031_v33  ;;  %v19987_v0 = vadd.f32 %v21122_v11, %v21121_v41  ;;  %v14849_v37 = vcombine.low %v14841_v56, %v14848_v31  ;;  %v21125_v12 = vld [vmem:[#allocation54_spill] sm:$0xff] }
 0x35f   : > { %v19944_v9 = vpop.f32.mrf.mxu0  ;;  %v19974_v29 = vpop.f32.mrf.mxu1  ;;  %v14882_v35 = vcombine.low %v14860_v2, %v14867_v28  ;;  %v14902_v46 = vcombine.low %v14032_v18, %v14033_v10  ;;  %v14883_v52 = vcombine.low %v14874_v60, %v14881_v58  ;;  %v14909_v22 = vrot.slane %v14899_v38, %v17729_v7  ;;  %v21128_v18 = vld [vmem:[#allocation59_spill] sm:$0xff]  ;;  %v21129_v60 = vld [vmem:[#allocation61_spill] sm:$0xff]  ;;  %v21130_v58 = vld [vmem:[#allocation62_spill] sm:$0xff] }
 0x360   : > { %v14916_v44 = vrot.slane %v14900_v17, %v17729_v7  ;;  %v14923_v5 = vrot.slane %v14901_v21, %v17729_v7  ;;  %v19998_v51 = vadd.f32 %v19344_v4, %v21123_v30  ;;  %v7449_v49 = vadd.f32 %v19448_v61, %v19890_v50  ;;  %v21127_v50 = vld [vmem:[#allocation60_spill] sm:$0xff]  ;;  %v21131_v21 = vld [vmem:[#allocation63_spill] sm:$0xff]  ;;  %v21132_v11 = vld [vmem:[#allocation66_spill] sm:$0xff] }
 0x361   : > { %v19966_v16 = vpop.f32.mrf.mxu0  ;;  %v14890_v14 = vrot.slane %v14882_v35, %v17729_v7  ;;  %v14930_v63 = vrot.slane %v14902_v46, %v17729_v7  ;;  %v7447_v57 = vadd.f32 %v21124_v25, %v19897_v39  ;;  %v7450_v59 = vadd.f32 %v21125_v12, %v19901_v19 }
 0x362   : > { %17549 = vmatmul.mubr.msk.bf16.gmra.mxu1 %vm4846_vm4, %v14849_v37  ;;  %v14897_v33 = vrot.slane %v14883_v52, %v17729_v7  ;;  %v14931_v56 = vcombine.low %v14909_v22, %v14916_v44  ;;  %v7453_v61 = vadd.f32 %v21126_v6, %v19906_v36  ;;  %v8736_v2 = vadd.f32 %v21127_v50, %v7449_v49  ;;  %v21133_v37 = vld [vmem:[#allocation68_spill] sm:$0xff]  ;;  %v21134_v52 = vld [vmem:[#allocation67_spill] sm:$0xff]  ;;  %v21135_v44 = vld [vmem:[#allocation69_spill] sm:$0xff] }
 0x363   : > { %v19989_v20 = vpop.f32.mrf.mxu0  ;;  %v7451_v10 = vadd.f32 %v21128_v18, %v19915_v24  ;;  %v14932_v31 = vcombine.low %v14923_v5, %v14930_v63  ;;  %v8734_v39 = vadd.f32 %v21129_v60, %v7447_v57  ;;  %v7454_v19 = vadd.f32 %v21130_v58, %v19922_v34  ;;  %v21136_v34 = vld [vmem:[#allocation70_spill] sm:$0xff]  ;;  %v21137_v49 = vld [vmem:[#allocation71_spill] sm:$0xff]  ;;  %v21139_v57 = vld [vmem:[#allocation76_spill] sm:$0xff] }
 0x364   : > { %v14898_v38 = vcombine.low %v14890_v14, %v14897_v33  ;;  %v14939_v17 = vrot.slane %v14931_v56, %v17729_v7  ;;  %v8737_v41 = vadd.f32 %v21131_v21, %v7450_v59  ;;  %v7457_v36 = vadd.f32 %v21132_v11, %v19933_v45  ;;  %v21138_v45 = vld [vmem:[#allocation74_spill] sm:$0xff] }
 0x365   : > { %v8740_v35 = vadd.f32 %v21133_v37, %v7453_v61  ;;  %v14946_v46 = vrot.slane %v14932_v31, %v17729_v7  ;;  %v7455_v22 = vadd.f32 %v21134_v52, %v19938_v48  ;;  %v8738_v5 = vadd.f32 %v21135_v44, %v7451_v10  ;;  %v21140_v7 = vld [vmem:[#allocation75_spill] sm:$0xff]  ;;  %v21141_v48 = vld [vmem:[#allocation77_spill] sm:$0xff]  ;;  %v21142_v6 = vld [vmem:[#allocation78_spill] sm:$0xff] }
 0x366   : > { %v19994_v8 = vpop.f32.mrf.mxu1  ;;  %v7458_v30 = vadd.f32 %v21136_v34, %v19950_v15  ;;  %v8741_v14 = vadd.f32 %v21137_v49, %v7454_v19  ;;  %17552 = vmatprep.mubr.msk.bf16.mxu1 %vm4846_vm4, %v14898_v38  ;;  %v7461_v25 = vadd.f32 %v21138_v45, %v19954_v13  ;;  %v8744_v12 = vadd.f32 %v21139_v57, %v7457_v36  ;;  %v21143_v15 = vld [vmem:[#allocation79_spill] sm:$0xff]  ;;  %v21144_v31 = vld [vmem:[#allocation82_spill] sm:$0xff]  ;;  %v21145_v13 = vld [vmem:[#allocation84_spill] sm:$0xff] }
 0x367   : > { %v7459_v59 = vadd.f32 %v21140_v7, %v19960_v26  ;;  %v14947_v33 = vcombine.low %v14939_v17, %v14946_v46  ;;  %v8742_v56 = vadd.f32 %v21141_v48, %v7455_v22  ;;  %v7462_v61 = vadd.f32 %v21142_v6, %v19964_v23  ;;  %v21146_v19 = vld [vmem:[#allocation116_spill] sm:$0xff]  ;;  %v21147_v17 = vld [vmem:[#allocation83_spill] sm:$0xff]  ;;  %v21148_v23 = vld [vmem:[#allocation85_spill] sm:$0xff] }
 0x368   : > { %v20010_v4 = vpop.f32.mrf.mxu1  ;;  %v8745_v50 = vadd.f32 %v21143_v15, %v7458_v30  ;;  %v10022_v18 = vadd.f32 %v19783_v32, %v8736_v2  ;;  %v7465_v60 = vadd.f32 %v21144_v31, %v19970_v43  ;;  %v8748_v58 = vadd.f32 %v21145_v13, %v7461_v25  ;;  %v21149_v36 = vld [vmem:[#allocation120_spill] sm:$0xff]  ;;  %v21150_v32 = vld [vmem:[#allocation122_spill] sm:$0xff]  ;;  %v21151_v43 = vld [vmem:[#allocation121_spill] sm:$0xff] }
 0x369   : > { %v10020_v26 = vadd.f32 %v19791_v1, %v8734_v39  ;;  %v10023_v38 = vadd.f32 %v21146_v19, %v8737_v41  ;;  %v7463_v21 = vadd.f32 %v21147_v17, %v19978_v27  ;;  %v8746_v11 = vadd.f32 %v21148_v23, %v7459_v59  ;;  %v21152_v22 = vld [vmem:[#allocation123_spill] sm:$0xff]  ;;  %v21153_v34 = vld [vmem:[#allocation124_spill] sm:$0xff]  ;;  %v21154_v39 = vld [vmem:[#allocation125_spill] sm:$0xff] }
 0x36a   : > { %v17444_v28 = vpop.f32.mrf.mxu0  ;;  %v17415_v63 = vpop.f32.mrf.mxu1  ;;  %17553 = vmatmul.mubr.msk.bf16.gmra.mxu1 %vm4846_vm4, %v14947_v33  ;;  %v10026_v37 = vadd.f32 %v21149_v36, %v8740_v35  ;;  %v20054_v2 = vadd.f32 %v21150_v32, %v10022_v18  ;;  %v10024_v52 = vadd.f32 %v21151_v43, %v8738_v5  ;;  %v10027_v1 = vadd.f32 %v21153_v34, %v8741_v14  ;;  %v21155_v27 = vld [vmem:[#allocation86_spill] sm:$0xff]  ;;  %v21156_v49 = vld [vmem:[#allocation87_spill] sm:$0xff]  ;;  %v21157_v35 = vld [vmem:[#allocation128_spill] sm:$0xff] }
 0x36b   : > { %v20058_v44 = vadd.f32 %v21152_v22, %v10020_v26  ;;  %v20062_v41 = vadd.f32 %v21154_v39, %v10023_v38  ;;  %v7466_v30 = vadd.f32 %v21155_v27, %v19987_v0  ;;  %v8749_v45 = vadd.f32 %v21156_v49, %v7462_v61  ;;  %v21158_v5 = vld [vmem:[#allocation129_spill] sm:$0xff]  ;;  %v21159_v33 = vld [vmem:[#allocation130_spill] sm:$0xff]  ;;  %v21160_v14 = vld [vmem:[#allocation131_spill] sm:$0xff] }
 0x36c   : > { %v11252_v24 = vpop.f32.mrf.mxu0  ;;  %v9984_v46 = vpop.f32.mrf.mxu1  ;;  %v10030_v25 = vadd.f32 %v21157_v35, %v8744_v12  ;;  %v20069_v57 = vadd.f32 %v19868_v42, %v10026_v37  ;;  %v10028_v59 = vadd.f32 %v21158_v5, %v8742_v56  ;;  %v20075_v48 = vadd.f32 %v21159_v33, %v10024_v52  ;;  %v21161_v0 = vld [vmem:[#allocation91_spill] sm:$0xff]  ;;  %v21162_v61 = vld [vmem:[#allocation93_spill] sm:$0xff]  ;;  %v21167_v37 = vld [vmem:[#allocation96_spill] sm:$0xff] }
 0x36d   : > { %v10031_v6 = vadd.f32 %v21160_v14, %v8745_v50  ;;  %v20079_v15 = vadd.f32 %v19881_v47, %v10027_v1  ;;  %v8752_v18 = vadd.f32 %v21161_v0, %v7465_v60  ;;  %v8750_v31 = vadd.f32 %v21162_v61, %v7463_v21  ;;  %v21163_v60 = vld [vmem:[#allocation88_spill] sm:$0xff]  ;;  %v21166_v23 = vld [vmem:[#allocation35_spill] sm:$0xff]  ;;  %v21169_v52 = vld [vmem:[#allocation37_spill] sm:$0xff] }
 0x36e   : > { %v17445_v10 = vpop.f32.mrf.mxu0  ;;  %v10034_v12 = vadd.f32 %v19911_v40, %v8748_v58  ;;  %v20085_v42 = vadd.f32 %v19929_v62, %v10030_v25  ;;  %v10032_v56 = vadd.f32 %v19927_v54, %v8746_v11  ;;  %v20089_v26 = vadd.f32 %v19944_v9, %v10028_v59  ;;  %v21164_v58 = vld [vmem:[#allocation94_spill] sm:$0xff]  ;;  %v21168_v43 = vld [vmem:[#allocation31_spill] sm:$0xff]  ;;  %v21173_v25 = vld [vmem:[#allocation33_spill] sm:$0xff] }
 0x36f   : > { %v10035_v50 = vadd.f32 %v19946_v3, %v8749_v45  ;;  %v20093_v47 = vadd.f32 %v19966_v16, %v10031_v6  ;;  %v7464_v19 = vadd.f32 %v21163_v60, %v19998_v51  ;;  %v10038_v38 = vadd.f32 %v19994_v8, %v8752_v18  ;;  %v21165_v3 = vld [vmem:[#allocation30_spill] sm:$0xff]  ;;  %v21174_v5 = vld [vmem:[#allocation40_spill] sm:$0xff] }
 0x370   : > { %v20071_v7 = vpop.f32.mrf.mxu0  ;;  %v20098_v40 = vadd.f32 %v17444_v28, %v10034_v12  ;;  %v8753_v17 = vadd.f32 %v21164_v58, %v7466_v30  ;;  %v10036_v54 = vadd.f32 %v20010_v4, %v8750_v31  ;;  %v20102_v21 = vadd.f32 %v11252_v24, %v10032_v56  ;;  %v17619_v4 = vld [vmem:[%s20987_s7] sm:$0x1]  ;;  %v21170_v34 = vld [vmem:[#allocation90_spill] sm:$0xff]  ;;  %v21171_v30 = vld [vmem:[#allocation5_spill] sm:$0xff] }
 0x371   : > { %v20104_v9 = vadd.f32 %v17445_v10, %v10035_v50  ;;  %v6178_v16 = vadd.f32 %v21166_v23, %v21165_v3  ;;  %v8751_v8 = vadd.f32 %v21167_v37, %v7464_v19  ;;  %v15336_v24 = vsel %vm4895_vm3, %v17619_v4, 0  ;;  %v21175_v33 = vld [vmem:[#allocation92_spill] sm:$0xff]  ;;  %v21176_v6 = vld [vmem:[#allocation98_spill] sm:$0xff]  ;;  %v21180_v50 = vld [vmem:[#allocation95_spill] sm:$0xff] }
 0x372   : > { %v10039_v28 = vadd.f32 %v17415_v63, %v8753_v17  ;;  %17557 = vmatpush3.bf16.msra.mxu0 %v15336_v24  ;;  %v6170_v22 = vadd.f32 %v21169_v52, %v21168_v43  ;;  %v21172_v63 = vld [vmem:[#allocation11_spill] sm:$0xff]  ;;  %v6181_v59 = vadd.f32 %v21174_v5, %v21173_v25  ;;  %v21177_v61 = vld [vmem:[#allocation38_spill] sm:$0xff]  ;;  %v21181_v19 = vld [vmem:[#allocation100_spill] sm:$0xff] }
 0x373   : > { %v7469_v1 = vadd.f32 %v21170_v34, %v6178_v16  ;;  %v10037_v39 = vadd.f32 %v9984_v46, %v8751_v8  ;;  %v6058_v49 = vadd.f32 %v21172_v63, %v21171_v30  ;;  %v21178_v12 = vld [vmem:[#allocation34_spill] sm:$0xff]  ;;  %v21183_v23 = vld [vmem:[#allocation97_spill] sm:$0xff]  ;;  %v21188_v30 = vld [vmem:[#allocation16_spill] sm:$0xff] }
 0x374   : > { %v17418_v13 = vpop.f32.mrf.mxu1  ;;  %v7467_v14 = vadd.f32 %v21175_v33, %v6170_v22  ;;  %v21179_v46 = vld [vmem:[#allocation42_spill] sm:$0xff]  ;;  %v7470_v60 = vadd.f32 %v21180_v50, %v6181_v59  ;;  %v21185_v24 = vld [vmem:[#allocation101_spill] sm:$0xff] }
 0x375   : > { %v8756_v0 = vadd.f32 %v21176_v6, %v7469_v1  ;;  %v7439_v31 = vadd.f32 %v21177_v61, %v6058_v49  ;;  %v6173_v56 = vadd.f32 %v21179_v46, %v21178_v12  ;;  %v21182_v58 = vld [vmem:[#allocation46_spill] sm:$0xff]  ;;  %v21186_v43 = vld [vmem:[#allocation105_spill] sm:$0xff]  ;;  %v21193_v46 = vld [vmem:[#allocation12_spill] sm:$0xff] }
 0x376   : > { %v9997_v36 = vpop.f32.mrf.mxu1  ;;  %v21189_v49 = vld [vmem:[#allocation109_spill] sm:$0xff] }
 0x377   : > { %v17448_v62 = vpop.f32.mrf.mxu0  ;;  %v8726_v17 = vadd.f32 %v21182_v58, %v7439_v31  ;;  %v7468_v16 = vadd.f32 %v21183_v23, %v6173_v56  ;;  %v21190_v33 = vld [vmem:[#allocation9_spill] sm:$0xff]  ;;  %v21194_v56 = vld [vmem:[#allocation18_spill] sm:$0xff] }
 0x378   : > { %v20108_v11 = vadd.f32 %v17448_v62, %v10038_v38  ;;  %v17419_v45 = vpop.f32.mrf.mxu1  ;;  %v8754_v38 = vadd.f32 %v21181_v19, %v7467_v14  ;;  %v10042_v62 = vadd.f32 %v17418_v13, %v8756_v0  ;;  %v21191_v14 = vld [vmem:[#allocation17_spill] sm:$0xff]  ;;  %v21192_v0 = vld [vmem:[#allocation43_spill] sm:$0xff]  ;;  %v6085_v50 = vadd.f32 %v21194_v56, %v21193_v46 }
 0x379   : > { %v11268_v51 = vpop.f32.mrf.mxu0  ;;  %v8755_v52 = vadd.f32 %v21186_v43, %v7468_v16  ;;  %v6074_v6 = vadd.f32 %v21191_v14, %v21190_v33  ;;  %v21199_v16 = vld [vmem:[#allocation106_spill] sm:$0xff] }
 0x37a   : > { %v20111_v32 = vadd.f32 %v11268_v51, %v10036_v54  ;;  %v10000_v54 = vpop.f32.mrf.mxu1  ;;  %v21184_v51 = vld [vmem:[#allocation103_spill] sm:$0xff]  ;;  %v10040_v8 = vadd.f32 %v9997_v36, %v8754_v38  ;;  %v21196_v38 = vld [vmem:[#allocation52_spill] sm:$0xff] }
 0x37b   : > { %v17449_v10 = vpop.f32.mrf.mxu0  ;;  %v8757_v37 = vadd.f32 %v21184_v51, %v7470_v60  ;;  %v10041_v25 = vadd.f32 %v10000_v54, %v8755_v52  ;;  %v21195_v60 = vld [vmem:[#allocation44_spill] sm:$0xff] }
 0x37c   : > { %v20120_v27 = vadd.f32 %v17449_v10, %v10039_v28  ;;  %v10012_v10 = vadd.f32 %v21185_v24, %v8726_v17  ;;  %v7443_v19 = vadd.f32 %v21195_v60, %v6074_v6  ;;  %v21197_v17 = vld [vmem:[#allocation47_spill] sm:$0xff] }
 0x37d   : > { %v11271_v35 = vpop.f32.mrf.mxu0  ;;  %v10043_v22 = vadd.f32 %v17419_v45, %v8757_v37  ;;  %v7446_v54 = vadd.f32 %v21197_v17, %v6085_v50  ;;  %v21200_v37 = vld [vmem:[#allocation55_spill] sm:$0xff] }
 0x37e   : > { %v20128_v18 = vadd.f32 %v11271_v35, %v10037_v39  ;;  %v21187_v39 = vld [vmem:[#allocation8_spill] sm:$0xff]  ;;  %v11299_v35 = vadd.f32 %v21189_v49, %v10012_v10  ;;  %v21202_v10 = vld [vmem:[#allocation114_spill] sm:$0xff] }
 0x37f   : > { %v6082_v63 = vadd.f32 %v21188_v30, %v21187_v39  ;;  %v21204_v39 = vld [vmem:[#allocation115_spill] sm:$0xff] }
 0x381   : > { %v17452_v3 = vpop.f32.mrf.mxu0  ;;  %v7445_v45 = vadd.f32 %v21192_v0, %v6082_v63 }
 0x382   : > { %v20138_v28 = vadd.f32 %v17452_v3, %v10042_v62  ;;  %v21198_v3 = vld [vmem:[#allocation53_spill] sm:$0xff] }
 0x383   : > { %v11284_v4 = vpop.f32.mrf.mxu0  ;;  %v8732_v62 = vadd.f32 %v21196_v38, %v7445_v45  ;;  %v8730_v23 = vadd.f32 %v21198_v3, %v7443_v19 }
 0x384   : > { %v20142_v34 = vadd.f32 %v11284_v4, %v10040_v8  ;;  %v20144_v13 = vpop.f32.mrf.mxu1  ;;  %v8733_v8 = vadd.f32 %v21200_v37, %v7446_v54  ;;  %v21201_v4 = vld [vmem:[#allocation107_spill] sm:$0xff] }
 0x385   : > { %v17453_v1 = vpop.f32.mrf.mxu0  ;;  %v10018_v51 = vadd.f32 %v21199_v16, %v8732_v62  ;;  %v10016_v24 = vadd.f32 %v21201_v4, %v8730_v23 }
 0x386   : > { %v20149_v36 = vadd.f32 %v17453_v1, %v10043_v22  ;;  %v12459_v5 = vpop.f32.mrf.mxu1  ;;  %v21203_v22 = vld [vmem:[#allocation110_spill] sm:$0xff] }
 0x387   : > { %v11287_v59 = vpop.f32.mrf.mxu0  ;;  %v20154_v61 = vadd.f32 %v12459_v5, %v11299_v35  ;;  %v11305_v43 = vadd.f32 %v21202_v10, %v10018_v51  ;;  %v10019_v1 = vadd.f32 %v21203_v22, %v8733_v8  ;;  %v11303_v30 = vadd.f32 %v21204_v39, %v10016_v24  ;;  %v21205_v35 = vld [vmem:[#allocation117_spill] sm:$0xff] }
 0x388   : > { %v20156_v31 = vadd.f32 %v11287_v59, %v10041_v25  ;;  %v20158_v12 = vpop.f32.mrf.mxu1 }
 0x389   : > { %v11306_v25 = vadd.f32 %v21205_v35, %v10019_v1 }
 0x38a   : > { %v20164_v58 = vpop.f32.mrf.mxu1 }
 0x38e   : > { %v17462_v52 = vpop.f32.mrf.mxu1 }
 0x38f   : > { %v20174_v63 = vadd.f32 %v17462_v52, %v11305_v43 }
 0x390   : > { %v12475_v49 = vpop.f32.mrf.mxu1 }
 0x391   : > { %v20177_v5 = vadd.f32 %v12475_v49, %v11303_v30 }
 0x392   : > { %v17463_v59 = vpop.f32.mrf.mxu1  ;;  %v20205_v3 = vpop.f32.mrf.mxu0 }
 0x393   : > { %v20179_v33 = vadd.f32 %v17463_v59, %v11306_v25 }
 0x394   : > { %v20181_v14 = vpop.f32.mrf.mxu1  ;;  %v13746_v23 = vpop.f32.mrf.mxu0 }
 0x39c   : > { %v17466_v6 = vpop.f32.mrf.mxu1 }
 0x39d   : > { %v20184_v0 = vadd.f32 %v17466_v6, %v20054_v2 }
 0x39e   : > { %v12491_v45 = vpop.f32.mrf.mxu1 }
 0x39f   : > { %v20187_v46 = vadd.f32 %v12491_v45, %v20058_v44 }
 0x3a0   : > { %v17467_v56 = vpop.f32.mrf.mxu1 }
 0x3a1   : > { %v20190_v50 = vadd.f32 %v17467_v56, %v20062_v41 }
 0x3a2   : > { %v20192_v60 = vpop.f32.mrf.mxu1 }
 0x3a9   : > { %v17470_v19 = vpop.f32.mrf.mxu1 }
 0x3aa   : > { %v20195_v38 = vadd.f32 %v17470_v19, %v20069_v57 }
 0x3ab   : > { %v12507_v62 = vpop.f32.mrf.mxu1 }
 0x3ac   : > { %v20198_v17 = vadd.f32 %v12507_v62, %v20075_v48  ;;  %v20213_v48 = vpop.f32.mrf.mxu0 }
 0x3ad   : > { %v17471_v2 = vpop.f32.mrf.mxu1 }
 0x3ae   : > { %v20201_v54 = vadd.f32 %v17471_v2, %v20079_v15  ;;  %v20218_v15 = vpop.f32.mrf.mxu0 }
 0x3af   : > { %v20203_v44 = vpop.f32.mrf.mxu1 }
 0x3b0   : > { %v20222_v24 = vpop.f32.mrf.mxu0 }
 0x3b2   : > { %v20227_v52 = vpop.f32.mrf.mxu0 }
 0x3b4   : > { %v20235_v1 = vpop.f32.mrf.mxu0 }
 0x3b6   : > { %v20239_v30 = vpop.f32.mrf.mxu0 }
 0x3b7   : > { %v17474_v41 = vpop.f32.mrf.mxu1 }
 0x3b8   : > { %v20208_v16 = vadd.f32 %v17474_v41, %v20085_v42  ;;  %v20241_v35 = vpop.f32.mrf.mxu0 }
 0x3b9   : > { %v12523_v51 = vpop.f32.mrf.mxu1 }
 0x3ba   : > { %v20211_v57 = vadd.f32 %v12523_v51, %v20089_v26  ;;  %v20249_v6 = vpop.f32.mrf.mxu0 }
 0x3bb   : > { %v17475_v37 = vpop.f32.mrf.mxu1 }
 0x3bc   : > { %v20216_v8 = vadd.f32 %v17475_v37, %v20093_v47  ;;  %v20257_v19 = vpop.f32.mrf.mxu0 }
 0x3bd   : > { %v20220_v4 = vpop.f32.mrf.mxu1 }
 0x3be   : > { %v20259_v62 = vpop.f32.mrf.mxu0 }
 0x3c0   : > { %v20264_v41 = vpop.f32.mrf.mxu0 }
 0x3c4   : > { %v17478_v10 = vpop.f32.mrf.mxu1 }
 0x3c5   : > { %v20225_v42 = vadd.f32 %v17478_v10, %v20098_v40  ;;  %v21215_v10 = vld [vmem:[#allocation4_spill] sm:$0xff] }
 0x3c6   : > { %v12539_v43 = vpop.f32.mrf.mxu1 }
 0x3c7   : > { %v20230_v26 = vadd.f32 %v12539_v43, %v20102_v21  ;;  %v21216_v43 = vld [vmem:[#allocation10_spill] sm:$0xff] }
 0x3c8   : > { %v17479_v22 = vpop.f32.mrf.mxu1 }
 0x3c9   : > { %v20233_v47 = vadd.f32 %v17479_v22, %v20104_v9  ;;  %v6066_v22 = vadd.f32 %v21216_v43, %v21215_v10  ;;  %v21225_v10 = vld [vmem:[#allocation41_spill] sm:$0xff] }
 0x3ca   : > { %v20237_v39 = vpop.f32.mrf.mxu1 }
 0x3cb   : > { %21206 = vst [vmem:[#allocation27_spill] sm:$0xff] %v20233_v47  ;;  %21207 = vst [vmem:[#allocation32_spill] sm:$0xff] %v20237_v39 }
 0x3d1   : > { %v17482_v49 = vpop.f32.mrf.mxu1 }
 0x3d2   : > { %v20244_v40 = vadd.f32 %v17482_v49, %v20108_v11  ;;  %v20274_v49 = vpop.f32.mrf.mxu0 }
 0x3d3   : > { %v12555_v25 = vpop.f32.mrf.mxu1 }
 0x3d4   : > { %21208 = vst [vmem:[#allocation28_spill] sm:$0xff] %v20244_v40  ;;  %v20247_v21 = vadd.f32 %v12555_v25, %v20111_v32 }
 0x3d5   : > { %v17483_v59 = vpop.f32.mrf.mxu1 }
 0x3d6   : > { %21209 = vst [vmem:[#allocation51_spill] sm:$0xff] %v20247_v21  ;;  %v20252_v9 = vadd.f32 %v17483_v59, %v20120_v27  ;;  %v21219_v59 = vld [vmem:[#allocation13_spill] sm:$0xff]  ;;  %v21226_v21 = vld [vmem:[#allocation48_spill] sm:$0xff] }
 0x3d7   : > { %v12558_v45 = vpop.f32.mrf.mxu1 }
 0x3d8   : > { %21210 = vst [vmem:[#allocation54_spill] sm:$0xff] %v20252_v9  ;;  %v20255_v56 = vadd.f32 %v12558_v45, %v20128_v18  ;;  %v20286_v9 = vpop.f32.mrf.mxu0 }
 0x3da   : > { %21211 = vst [vmem:[#allocation58_spill] sm:$0xff] %v20255_v56  ;;  %v21223_v56 = vld [vmem:[#allocation39_spill] sm:$0xff]  ;;  %v20294_v39 = vpop.f32.mrf.mxu0 }
 0x3df   : > { %v17486_v11 = vpop.f32.mrf.mxu1 }
 0x3e0   : > { %v20262_v2 = vadd.f32 %v17486_v11, %v20138_v28  ;;  %v21218_v28 = vld [vmem:[#allocation6_spill] sm:$0xff]  ;;  %v21220_v11 = vld [vmem:[#allocation36_spill] sm:$0xff] }
 0x3e1   : > { %v12571_v32 = vpop.f32.mrf.mxu1  ;;  %v6069_v45 = vadd.f32 %v21219_v59, %v21218_v28  ;;  %v21229_v28 = vld [vmem:[#allocation102_spill] sm:$0xff] }
 0x3e2   : > { %21212 = vst [vmem:[#allocation60_spill] sm:$0xff] %v20262_v2  ;;  %v20267_v51 = vadd.f32 %v12571_v32, %v20142_v34  ;;  %v7441_v2 = vadd.f32 %v21220_v11, %v6066_v22  ;;  %v21221_v34 = vld [vmem:[#allocation7_spill] sm:$0xff]  ;;  %v21230_v22 = vld [vmem:[#allocation108_spill] sm:$0xff] }
 0x3e3   : > { %v17487_v27 = vpop.f32.mrf.mxu1  ;;  %v21222_v32 = vld [vmem:[#allocation15_spill] sm:$0xff] }
 0x3e4   : > { %21213 = vst [vmem:[#allocation59_spill] sm:$0xff] %v20267_v51  ;;  %v20270_v37 = vadd.f32 %v17487_v27, %v20149_v36  ;;  %v6061_v51 = vadd.f32 %v21222_v32, %v21221_v34  ;;  %v7442_v36 = vadd.f32 %v21223_v56, %v6069_v45  ;;  %v21224_v27 = vld [vmem:[#allocation45_spill] sm:$0xff]  ;;  %v21231_v34 = vld [vmem:[#allocation104_spill] sm:$0xff]  ;;  %v21232_v45 = vld [vmem:[#allocation111_spill] sm:$0xff] }
 0x3e5   : > { %v12574_v18 = vpop.f32.mrf.mxu1 }
 0x3e6   : > { %21214 = vst [vmem:[#allocation61_spill] sm:$0xff] %v20270_v37  ;;  %v20277_v25 = vadd.f32 %v12574_v18, %v20156_v31  ;;  %v8728_v37 = vadd.f32 %v21224_v27, %v7441_v2  ;;  %v7440_v43 = vadd.f32 %v21225_v10, %v6061_v51  ;;  %v8729_v40 = vadd.f32 %v21226_v21, %v7442_v36  ;;  %v21227_v31 = vld [vmem:[#allocation99_spill] sm:$0xff]  ;;  %v21233_v51 = vld [vmem:[#allocation113_spill] sm:$0xff]  ;;  %v21235_v36 = vld [vmem:[#allocation20_spill] sm:$0xff] }
 0x3e8   : > { %21217 = vst [vmem:[#allocation62_spill] sm:$0xff] %v20277_v25  ;;  %v10014_v18 = vadd.f32 %v21227_v31, %v8728_v37  ;;  %v21228_v25 = vld [vmem:[#allocation50_spill] sm:$0xff]  ;;  %v10015_v59 = vadd.f32 %v21229_v28, %v8729_v40  ;;  %v13873_v37 = vadd.f32 %v13746_v23, %v20154_v61  ;;  %v20305_v31 = vpop.f32.mrf.mxu0  ;;  %v20314_v61 = vld [vmem:[%s20986_s6] ss:$0 sm:$0xff]  ;;  %v21237_v23 = vld [vmem:[#allocation57_spill] sm:$0xff] }
 0x3e9   : > { %v8727_v47 = vadd.f32 %v21228_v25, %v7440_v43  ;;  %v21234_v25 = vld [vmem:[#allocation14_spill] sm:$0xff] }
 0x3ea   : > { %v11301_v11 = vadd.f32 %v21230_v22, %v10014_v18  ;;  %v11302_v2 = vadd.f32 %v21232_v45, %v10015_v59  ;;  %v6077_v40 = vadd.f32 %v21235_v36, %v21234_v25  ;;  %v21236_v59 = vld [vmem:[#allocation49_spill] sm:$0xff]  ;;  %v20317_v45 = vpop.f32.mrf.mxu0  ;;  %v21239_v25 = vld [vmem:[#allocation119_spill] sm:$0xff] }
 0x3eb   : > { %v10013_v56 = vadd.f32 %v21231_v34, %v8727_v47 }
 0x3ec   : > { %v12588_v32 = vadd.f32 %v20144_v13, %v11301_v11  ;;  %v12589_v21 = vadd.f32 %v20158_v12, %v11302_v2  ;;  %v7444_v22 = vadd.f32 %v21236_v59, %v6077_v40  ;;  %v13877_v40 = vadd.f32 %v20227_v52, %v20177_v5 }
 0x3ed   : > { %v11300_v10 = vadd.f32 %v21233_v51, %v10013_v56 }
 0x3ee   : > { %v13875_v43 = vadd.f32 %v20205_v3, %v12588_v32  ;;  %v13876_v28 = vadd.f32 %v20213_v48, %v12589_v21  ;;  %v8731_v56 = vadd.f32 %v21237_v23, %v7444_v22  ;;  %v21242_v23 = vld [vmem:[#allocation56_spill] sm:$0xff] }
 0x3ef   : > { %v12587_v47 = vadd.f32 %v20164_v58, %v11300_v10 }
 0x3f0   : > { %v17526_v27 = vpop.f32.mrf.mxu1 }
 0x3f1   : > { %v15162_v11 = vadd.f32 %v17526_v27, %v13875_v43  ;;  %v13874_v12 = vadd.f32 %v20218_v15, %v12587_v47  ;;  %v21238_v27 = vld [vmem:[#allocation112_spill] sm:$0xff]  ;;  %v13879_v15 = vadd.f32 %v20222_v24, %v20174_v63  ;;  %v20329_v43 = vpop.f32.mrf.mxu0 }
 0x3f2   : > { %v15033_v18 = vpop.f32.mrf.mxu1  ;;  %v10017_v51 = vadd.f32 %v21238_v27, %v8731_v56 }
 0x3f3   : > { %v15160_v13 = vadd.f32 %v15033_v18, %v13873_v37  ;;  %v15201_v10 = vadd.f32 %v20314_v61, %v15162_v11  ;;  %v13880_v11 = vadd.f32 %v20235_v1, %v20179_v33 }
 0x3f4   : > { %v17527_v34 = vpop.f32.mrf.mxu1  ;;  %v11304_v36 = vadd.f32 %v21239_v25, %v10017_v51  ;;  %v21243_v51 = vld [vmem:[#allocation65_spill] sm:$0xff] }
 0x3f5   : > { %v15163_v3 = vadd.f32 %v17527_v34, %v13876_v28  ;;  %v15199_v48 = vadd.f32 %v20314_v61, %v15160_v13  ;;  %v21240_v28 = vld [vmem:[#allocation19_spill] sm:$0xff]  ;;  %v21241_v13 = vld [vmem:[#allocation22_spill] sm:$0xff]  ;;  %v21245_v25 = vld [vmem:[#allocation21_spill] sm:$0xff] }
 0x3f6   : > { %v15036_v58 = vpop.f32.mrf.mxu1  ;;  %v6093_v59 = vadd.f32 %v21241_v13, %v21240_v28  ;;  %v12591_v24 = vadd.f32 %v20181_v14, %v11304_v36  ;;  %v21246_v36 = vld [vmem:[#allocation24_spill] sm:$0xff] }
 0x3f7   : > { %v15202_v2 = vadd.f32 %v20314_v61, %v15163_v3  ;;  %v15161_v32 = vadd.f32 %v15036_v58, %v13874_v12  ;;  %v15231_v22 = vmax.f32 %v15199_v48, 0.0  ;;  %v15233_v12 = vmax.f32 %v15201_v10, 0.0 }
 0x3f8   : > { %v17530_v37 = vpop.f32.mrf.mxu1  ;;  %v7448_v56 = vadd.f32 %v21242_v23, %v6093_v59  ;;  %v13878_v58 = vadd.f32 %v20239_v30, %v12591_v24 }
 0x3f9   : > { %v15200_v21 = vadd.f32 %v20314_v61, %v15161_v32  ;;  %v15234_v18 = vmax.f32 %v15202_v2, 0.0  ;;  %v15166_v47 = vadd.f32 %v17530_v37, %v13879_v15  ;;  %v20338_v2 = vpop.f32.mrf.mxu0  ;;  %v13883_v37 = vadd.f32 %v20241_v35, %v20184_v0 }
 0x3fa   : > { %v15049_v63 = vpop.f32.mrf.mxu1  ;;  %v8735_v15 = vadd.f32 %v21243_v51, %v7448_v56 }
 0x3fb   : > { %v15232_v34 = vmax.f32 %v15200_v21, 0.0  ;;  %v15164_v3 = vadd.f32 %v15049_v63, %v13877_v40  ;;  %v15264_v32 = vpack.c.bf16 %v15234_v18, %v15233_v12  ;;  %v15205_v48 = vadd.f32 %v20314_v61, %v15166_v47  ;;  %v21244_v21 = vld [vmem:[#allocation118_spill] sm:$0xff]  ;;  %v20351_v18 = vpop.f32.mrf.mxu0 }
 0x3fc   : > { %v17531_v52 = vpop.f32.mrf.mxu1  ;;  %v10021_v30 = vadd.f32 %v21244_v21, %v8735_v15  ;;  %v6109_v40 = vadd.f32 %v21246_v36, %v21245_v25  ;;  %v13881_v63 = vadd.f32 %v20249_v6, %v20187_v46  ;;  %v13885_v21 = vadd.f32 %v20274_v49, %v20198_v17 }
 0x3fd   : > { %v15263_v5 = vpack.c.bf16 %v15232_v34, %v15231_v22  ;;  %v15167_v27 = vadd.f32 %v17531_v52, %v13880_v11  ;;  %v15203_v33 = vadd.f32 %v20314_v61, %v15164_v3  ;;  %v15237_v47 = vmax.f32 %v15205_v48, 0.0  ;;  %v21247_v22 = vld [vmem:[#allocation127_spill] sm:$0xff]  ;;  %v21248_v11 = vld [vmem:[#allocation64_spill] sm:$0xff]  ;;  %v20362_v48 = vpop.f32.mrf.mxu0 }
 0x3fe   : > { %v15052_v14 = vpop.f32.mrf.mxu1  ;;  %v11308_v34 = vadd.f32 %v21247_v22, %v10021_v30  ;;  %v7452_v12 = vadd.f32 %v21248_v11, %v6109_v40 }
 0x3ff   : > { %17558 = vmatprep.mubr.msk.bf16.mxu0 %vm4846_vm4, %v15263_v5  ;;  %v15206_v1 = vadd.f32 %v20314_v61, %v15167_v27  ;;  %v15165_v10 = vadd.f32 %v15052_v14, %v13878_v58  ;;  %v15235_v3 = vmax.f32 %v15203_v33, 0.0  ;;  %v13884_v5 = vadd.f32 %v20257_v19, %v20190_v50  ;;  %v21249_v58 = vld [vmem:[#allocation73_spill] sm:$0xff]  ;;  %v21250_v14 = vld [vmem:[#allocation126_spill] sm:$0xff]  ;;  %v20376_v30 = vpop.f32.mrf.mxu0 }
 0x400   : > { %17559 = vmatmul.mubr.msk.bf16.vlgmr.msra.gmra.mxu0 %vm4846_vm4, %v15264_v32  ;;  %v17534_v59 = vpop.f32.mrf.mxu1  ;;  %v12595_v56 = vadd.f32 %v20192_v60, %v11308_v34  ;;  %v8739_v32 = vadd.f32 %v21249_v58, %v7452_v12  ;;  %v13887_v50 = vadd.f32 %v20264_v41, %v20195_v38  ;;  %v21251_v41 = vld [vmem:[#allocation23_spill] sm:$0xff] }
 0x401   : > { %v15238_v28 = vmax.f32 %v15206_v1, 0.0  ;;  %v15204_v13 = vadd.f32 %v20314_v61, %v15165_v10  ;;  %v15170_v24 = vadd.f32 %v17534_v59, %v13883_v37  ;;  %v13888_v59 = vadd.f32 %v20286_v9, %v20201_v54  ;;  %v20385_v11 = vpop.f32.mrf.mxu0 }
 0x402   : > { %v15065_v23 = vpop.f32.mrf.mxu1  ;;  %v13882_v46 = vadd.f32 %v20259_v62, %v12595_v56  ;;  %v10025_v33 = vadd.f32 %v21250_v14, %v8739_v32  ;;  %v13891_v32 = vadd.f32 %v20305_v31, %v20208_v16 }
 0x403   : > { %v15266_v0 = vpack.c.bf16 %v15238_v28, %v15237_v47  ;;  %v15236_v35 = vmax.f32 %v15204_v13, 0.0  ;;  %v15168_v52 = vadd.f32 %v15065_v23, %v13881_v63  ;;  %v15209_v6 = vadd.f32 %v20314_v61, %v15170_v24  ;;  %v21252_v47 = vld [vmem:[#allocation26_spill] sm:$0xff]  ;;  %v21253_v63 = vld [vmem:[#allocation72_spill] sm:$0xff] }
 0x404   : > { %v17535_v51 = vpop.f32.mrf.mxu1  ;;  %v11312_v62 = vadd.f32 %v19908_v53, %v10025_v33  ;;  %v6125_v28 = vadd.f32 %v21252_v47, %v21251_v41 }
 0x405   : > { %v15265_v27 = vpack.c.bf16 %v15236_v35, %v15235_v3  ;;  %v15171_v15 = vadd.f32 %v17535_v51, %v13884_v5  ;;  %v15207_v60 = vadd.f32 %v20314_v61, %v15168_v52  ;;  %v15241_v25 = vmax.f32 %v15209_v6, 0.0  ;;  %v21256_v51 = vld [vmem:[#allocation29_spill] sm:$0xff] }
 0x406   : > { %v15068_v1 = vpop.f32.mrf.mxu1  ;;  %v12599_v13 = vadd.f32 %v20203_v44, %v11312_v62  ;;  %v7456_v24 = vadd.f32 %v21253_v63, %v6125_v28  ;;  %v21254_v44 = vld [vmem:[#allocation81_spill] sm:$0xff] }
 0x407   : > { %17562 = vmatprep.mubr.msk.bf16.mxu0 %vm4846_vm4, %v15265_v27  ;;  %v15210_v19 = vadd.f32 %v20314_v61, %v15171_v15  ;;  %v15169_v10 = vadd.f32 %v15068_v1, %v13882_v46  ;;  %v15239_v22 = vmax.f32 %v15207_v60, 0.0  ;;  %v21255_v27 = vld [vmem:[#allocation25_spill] sm:$0xff]  ;;  %v21257_v60 = vld [vmem:[#allocation80_spill] sm:$0xff] }
 0x408   : > { %17563 = vmatmul.mubr.msk.bf16.gmra.mxu0 %vm4846_vm4, %v15266_v0  ;;  %v17538_v37 = vpop.f32.mrf.mxu1  ;;  %v13886_v3 = vadd.f32 %v20294_v39, %v12599_v13  ;;  %v8743_v56 = vadd.f32 %v21254_v44, %v7456_v24  ;;  %v17516_v39 = vpop.f32.mrf.mxu0  ;;  %v6141_v46 = vadd.f32 %v21256_v51, %v21255_v27  ;;  %v21260_v24 = vld [vmem:[#allocation27_spill] sm:$0xff]  ;;  %v21261_v27 = vld [vmem:[#allocation28_spill] sm:$0xff] }
 0x409   : > { %v15242_v36 = vmax.f32 %v15210_v19, 0.0  ;;  %v15208_v40 = vadd.f32 %v20314_v61, %v15169_v10  ;;  %v15174_v38 = vadd.f32 %v17538_v37, %v13887_v50  ;;  %v13889_v50 = vadd.f32 %v20317_v45, %v20211_v57 }
 0x40a   : > { %v15081_v53 = vpop.f32.mrf.mxu1  ;;  %v10029_v58 = vadd.f32 %v19886_v55, %v8743_v56  ;;  %v7460_v19 = vadd.f32 %v21257_v60, %v6141_v46  ;;  %v13892_v37 = vadd.f32 %v20329_v43, %v20216_v8  ;;  %v13899_v51 = vadd.f32 %v17516_v39, %v21261_v27 }
 0x40b   : > { %v15268_v34 = vpack.c.bf16 %v15242_v36, %v15241_v25  ;;  %v15240_v17 = vmax.f32 %v15208_v40, 0.0  ;;  %v15172_v49 = vadd.f32 %v15081_v53, %v13885_v21  ;;  %v15213_v35 = vadd.f32 %v20314_v61, %v15174_v38  ;;  %v13842_v25 = vpop.f32.mrf.mxu0  ;;  %v21258_v40 = vld [vmem:[#allocation89_spill] sm:$0xff] }
 0x40c   : > { %v17539_v12 = vpop.f32.mrf.mxu1  ;;  %v11316_v1 = vadd.f32 %v19989_v20, %v10029_v58  ;;  %v8747_v38 = vadd.f32 %v21258_v40, %v7460_v19 }
 0x40d   : > { %v15267_v0 = vpack.c.bf16 %v15240_v17, %v15239_v22  ;;  %v15175_v23 = vadd.f32 %v17539_v12, %v13888_v59  ;;  %v15211_v54 = vadd.f32 %v20314_v61, %v15172_v49  ;;  %v15245_v6 = vmax.f32 %v15213_v35, 0.0  ;;  %v17517_v8 = vpop.f32.mrf.mxu0 }
 0x40e   : > { %v15084_v5 = vpop.f32.mrf.mxu1  ;;  %v12603_v21 = vadd.f32 %v20220_v4, %v11316_v1  ;;  %v10033_v28 = vadd.f32 %v19974_v29, %v8747_v38  ;;  %v13895_v4 = vadd.f32 %v20351_v18, %v20225_v42  ;;  %v13893_v22 = vadd.f32 %v20362_v48, %v20230_v26  ;;  %v21259_v42 = vld [vmem:[#allocation32_spill] sm:$0xff] }
 0x40f   : > { %v15214_v9 = vadd.f32 %v20314_v61, %v15175_v23  ;;  %v15173_v52 = vadd.f32 %v15084_v5, %v13886_v3  ;;  %17566 = vmatprep.mubr.msk.bf16.mxu0 %vm4846_vm4, %v15267_v0  ;;  %v15243_v16 = vmax.f32 %v15211_v54, 0.0  ;;  %v13896_v12 = vadd.f32 %v20376_v30, %v21260_v24  ;;  %v13845_v0 = vpop.f32.mrf.mxu0 }
 0x410   : > { %17567 = vmatmul.mubr.msk.bf16.gmra.mxu0 %vm4846_vm4, %v15268_v34  ;;  %v13890_v57 = vadd.f32 %v20338_v2, %v12603_v21  ;;  %v11320_v2 = vadd.f32 %v20071_v7, %v10033_v28 }
 0x411   : > { %v15246_v15 = vmax.f32 %v15214_v9, 0.0  ;;  %v15212_v14 = vadd.f32 %v20314_v61, %v15173_v52  ;;  %v17542_v33 = vpop.f32.mrf.mxu1  ;;  %v17520_v52 = vpop.f32.mrf.mxu0 }
 0x412   : > { %v15178_v55 = vadd.f32 %v17542_v33, %v13891_v32  ;;  %v12607_v18 = vadd.f32 %v21259_v42, %v11320_v2 }
 0x413   : > { %v15270_v31 = vpack.c.bf16 %v15246_v15, %v15245_v6  ;;  %v15244_v10 = vmax.f32 %v15212_v14, 0.0  ;;  %v15097_v62 = vpop.f32.mrf.mxu1  ;;  %v21262_v14 = vld [vmem:[#allocation51_spill] sm:$0xff] }
 0x414   : > { %v15176_v36 = vadd.f32 %v15097_v62, %v13889_v50  ;;  %v15217_v45 = vadd.f32 %v20314_v61, %v15178_v55  ;;  %v13894_v26 = vadd.f32 %v20385_v11, %v12607_v18  ;;  %v13897_v33 = vadd.f32 %v13842_v25, %v21262_v14  ;;  %v13858_v50 = vpop.f32.mrf.mxu0  ;;  %v21265_v25 = vld [vmem:[#allocation60_spill] sm:$0xff]  ;;  %v16211_v14 = vld [vmem:[%s17721_s18 + $0x10] sm:$0x3] }
 0x415   : > { %v15269_v20 = vpack.c.bf16 %v15244_v10, %v15243_v16  ;;  %v17543_v41 = vpop.f32.mrf.mxu1 }
 0x416   : > { %v15179_v47 = vadd.f32 %v17543_v41, %v13892_v37  ;;  %v15215_v43 = vadd.f32 %v20314_v61, %v15176_v36  ;;  %v15249_v34 = vmax.f32 %v15217_v45, 0.0  ;;  %v21264_v37 = vld [vmem:[#allocation58_spill] sm:$0xff] }
 0x417   : > { %v15100_v13 = vpop.f32.mrf.mxu1  ;;  %17570 = vmatprep.mubr.msk.bf16.mxu0 %vm4846_vm4, %v15269_v20  ;;  %v13898_v36 = vadd.f32 %v13845_v0, %v21264_v37  ;;  %v17521_v20 = vpop.f32.mrf.mxu0  ;;  %v16214_v37 = vld [vmem:[%s17721_s18 + $0x16] sm:$0x3] }
 0x418   : > { %v15218_v59 = vadd.f32 %v20314_v61, %v15179_v47  ;;  %v15177_v53 = vadd.f32 %v15100_v13, %v13890_v57  ;;  %17571 = vmatmul.mubr.msk.bf16.gmra.mxu0 %vm4846_vm4, %v15270_v31  ;;  %v15247_v35 = vmax.f32 %v15215_v43, 0.0  ;;  %v21263_v31 = vld [vmem:[#allocation54_spill] sm:$0xff]  ;;  %v13903_v57 = vadd.f32 %v17520_v52, %v21265_v25  ;;  %v21266_v13 = vld [vmem:[#allocation59_spill] sm:$0xff] }
 0x419   : > { %v13900_v10 = vadd.f32 %v17517_v8, %v21263_v31 }
 0x41a   : > { %v17546_v29 = vpop.f32.mrf.mxu1  ;;  %v15250_v17 = vmax.f32 %v15218_v59, 0.0  ;;  %v15216_v49 = vadd.f32 %v20314_v61, %v15177_v53 }
 0x41b   : > { %v15182_v63 = vadd.f32 %v17546_v29, %v13895_v4  ;;  %v13901_v4 = vadd.f32 %v13858_v50, %v21266_v13 }
 0x41c   : > { %v15113_v3 = vpop.f32.mrf.mxu1  ;;  %v15272_v23 = vpack.c.bf16 %v15250_v17, %v15249_v34  ;;  %v15248_v44 = vmax.f32 %v15216_v49, 0.0  ;;  %v13861_v34 = vpop.f32.mrf.mxu0 }
 0x41d   : > { %v15180_v7 = vadd.f32 %v15113_v3, %v13893_v22  ;;  %v15221_v5 = vadd.f32 %v20314_v61, %v15182_v63  ;;  %v21267_v22 = vld [vmem:[#allocation61_spill] sm:$0xff] }
 0x41e   : > { %v17547_v56 = vpop.f32.mrf.mxu1  ;;  %v15271_v48 = vpack.c.bf16 %v15248_v44, %v15247_v35  ;;  %v13904_v29 = vadd.f32 %v17521_v20, %v21267_v22 }
 0x41f   : > { %v15183_v54 = vadd.f32 %v17547_v56, %v13896_v12  ;;  %v15219_v58 = vadd.f32 %v20314_v61, %v15180_v7  ;;  %v15253_v46 = vmax.f32 %v15221_v5, 0.0  ;;  %v21268_v12 = vld [vmem:[#allocation62_spill] sm:$0xff] }
 0x420   : > { %v15116_v9 = vpop.f32.mrf.mxu1  ;;  %17574 = vmatprep.mubr.msk.bf16.mxu0 %vm4846_vm4, %v15271_v48  ;;  %v13902_v3 = vadd.f32 %v13861_v34, %v21268_v12  ;;  %v16217_v34 = vld [vmem:[%s17721_s18 + $0x1c] sm:$0x3]  ;;  %v16207_v12 = vld [vmem:[%s17721_s18 + $0x8] sm:$0x3] }
 0x421   : > { %v15222_v32 = vadd.f32 %v20314_v61, %v15183_v54  ;;  %v15181_v30 = vadd.f32 %v15116_v9, %v13894_v26  ;;  %17575 = vmatmul.mubr.msk.bf16.gmra.mxu0 %vm4846_vm4, %v15272_v23  ;;  %v15251_v55 = vmax.f32 %v15219_v58, 0.0 }
 0x422   : > { %v17550_v15 = vpop.f32.mrf.mxu1 }
 0x423   : > { %v15254_v6 = vmax.f32 %v15222_v32, 0.0  ;;  %v15220_v11 = vadd.f32 %v20314_v61, %v15181_v30  ;;  %v15186_v1 = vadd.f32 %v17550_v15, %v13899_v51  ;;  %v17633_v30 = vmov 1983009808  }
 0x424   : > { %v15129_v16 = vpop.f32.mrf.mxu1  ;;  %v15533_v27 = vunpack.c.l.s4 %v17633_v30 }
 0x425   : > { %v15274_v60 = vpack.c.bf16 %v15254_v6, %v15253_v46  ;;  %v15252_v19 = vmax.f32 %v15220_v11, 0.0  ;;  %v15184_v62 = vadd.f32 %v15129_v16, %v13897_v33  ;;  %v15225_v40 = vadd.f32 %v20314_v61, %v15186_v1  ;;  %v20456_v46 = vld [vmem:[%s20988_s8] ss:$0 sm:$0xff]  ;;  %v21269_v6 = vld [vmem:[#allocation3_spill] sm:$0xff] }
 0x426   : > { %v17551_v39 = vpop.f32.mrf.mxu1  ;;  %v15534_v51 = vunpack.c.0.s8 %v15533_v27  ;;  %v16227_v27 = vld [vmem:[%s17721_s18 + $0x30] sm:$0x3] }
 0x427   : > { %v15273_v21 = vpack.c.bf16 %v15252_v19, %v15251_v55  ;;  %v15187_v38 = vadd.f32 %v17551_v39, %v13900_v10  ;;  %v15223_v45 = vadd.f32 %v20314_v61, %v15184_v62  ;;  %v15257_v43 = vmax.f32 %v15225_v40, 0.0  ;;  %v16213_v19 = vld [vmem:[%s17721_s18 + $0x14] sm:$0x3]  ;;  %v16203_v39 = vld [vmem:[%s17721_s18] sm:$0x3] }
 0x428   : > { %v15132_v41 = vpop.f32.mrf.mxu1  ;;  %v16205_v40 = vld [vmem:[%s17721_s18 + $0x4] sm:$0x3] }
 0x429   : > { %17578 = vmatprep.mubr.msk.bf16.mxu0 %vm4846_vm4, %v15273_v21  ;;  %v15226_v47 = vadd.f32 %v20314_v61, %v15187_v38  ;;  %v15185_v28 = vadd.f32 %v15132_v41, %v13898_v36  ;;  %v15255_v49 = vmax.f32 %v15223_v45, 0.0 }
 0x42a   : > { %17579 = vmatmul.mubr.msk.bf16.gmra.mxu0 %vm4846_vm4, %v15274_v60  ;;  %v17554_v8 = vpop.f32.mrf.mxu1  ;;  %v16212_v60 = vld [vmem:[%s17721_s18 + $0x12] sm:$0x3] }
 0x42b   : > { %v15258_v59 = vmax.f32 %v15226_v47, 0.0  ;;  %v15224_v53 = vadd.f32 %v20314_v61, %v15185_v28  ;;  %v15190_v2 = vadd.f32 %v17554_v8, %v13903_v57  ;;  %v16204_v47 = vld [vmem:[%s17721_s18 + $0x2] sm:$0x3]  ;;  %v16215_v28 = vld [vmem:[%s17721_s18 + $0x18] sm:$0x3] }
 0x42c   : > { %v15145_v17 = vpop.f32.mrf.mxu1 }
 0x42d   : > { %v15276_v63 = vpack.c.bf16 %v15258_v59, %v15257_v43  ;;  %v15256_v42 = vmax.f32 %v15224_v53, 0.0  ;;  %v15188_v18 = vadd.f32 %v15145_v17, %v13901_v4  ;;  %v15229_v35 = vadd.f32 %v20314_v61, %v15190_v2  ;;  %v16206_v4 = vld [vmem:[%s17721_s18 + $0x6] sm:$0x3] }
 0x42e   : > { %v17555_v24 = vpop.f32.mrf.mxu1 }
 0x42f   : > { %v15275_v0 = vpack.c.bf16 %v15256_v42, %v15255_v49  ;;  %v15191_v23 = vadd.f32 %v17555_v24, %v13904_v29  ;;  %v15227_v7 = vadd.f32 %v20314_v61, %v15188_v18  ;;  %v15261_v48 = vmax.f32 %v15229_v35, 0.0  ;;  %v16216_v29 = vld [vmem:[%s17721_s18 + $0x1a] sm:$0x3] }
 0x430   : > { %v15148_v44 = vpop.f32.mrf.mxu1 }
 0x431   : > { %v15230_v56 = vadd.f32 %v20314_v61, %v15191_v23  ;;  %v15189_v26 = vadd.f32 %v15148_v44, %v13902_v3  ;;  %17582 = vmatprep.mubr.msk.bf16.mxu0 %vm4846_vm4, %v15275_v0  ;;  %v15259_v9 = vmax.f32 %v15227_v7, 0.0  ;;  %v16218_v0 = vld [vmem:[%s17721_s18 + $0x1e] sm:$0x3] }
 0x432   : > { %17583 = vmatmul.mubr.msk.bf16.gmra.mxu0 %vm4846_vm4, %v15276_v63 }
 0x433   : > { %v15262_v5 = vmax.f32 %v15230_v56, 0.0  ;;  %v15228_v54 = vadd.f32 %v20314_v61, %v15189_v26  ;;  %v20459_v61 = vsub.s32 %v15534_v51, %v21269_v6 }
 0x435   : > { %v15278_v52 = vpack.c.bf16 %v15262_v5, %v15261_v48  ;;  %v15260_v58 = vmax.f32 %v15228_v54, 0.0  ;;  %v16208_v5 = vld [vmem:[%s17721_s18 + $0xa] sm:$0x3]  ;;  %v16209_v54 = vld [vmem:[%s17721_s18 + $0xc] sm:$0x3] }
 0x437   : > { %v15277_v32 = vpack.c.bf16 %v15260_v58, %v15259_v9 }
 0x439   : > { %17586 = vmatprep.mubr.msk.bf16.mxu0 %vm4846_vm4, %v15277_v32 }
 0x43a   : > { %17587 = vmatmul.mubr.msk.bf16.gmra.mxu0 %vm4846_vm4, %v15278_v52 }
 0x4c0   : > { %v17560_v11 = vpop.f32.mrf.mxu0 }
 0x4c1   : > { %v15381_v15 = vadd.f32 %v17560_v11, %v20456_v46  ;;  %v16210_v11 = vld [vmem:[%s17721_s18 + $0xe] sm:$0x3] }
 0x4c2   : > { %v15372_v33 = vpop.f32.mrf.mxu0 }
 0x4c3   : > { %v15565_v1 = vcombine.high %v15381_v15, %v15381_v15  ;;  %v15572_v50 = vrot.slane %v15381_v15, %v20459_v61  ;;  %v15373_v55 = vadd.f32 %v20456_v46, %v15372_v33 }
 0x4c4   : > { %v17561_v16 = vpop.f32.mrf.mxu0 }
 0x4c5   : > { %v15579_v31 = vrot.slane %v15565_v1, %v20459_v61  ;;  %v15580_v10 = vcombine.high %v15572_v50, %v15572_v50  ;;  %v16339_v62 = vadd.f32 %v16211_v14, %v15572_v50  ;;  %v15531_v21 = vcombine.high %v15373_v55, %v15373_v55  ;;  %v16229_v14 = vld [vmem:[%s17721_s18 + $0x34] sm:$0x3]  ;;  %v16219_v50 = vld [vmem:[%s17721_s18 + $0x20] sm:$0x3] }
 0x4c6   : > { %v15538_v36 = vrot.slane %v15373_v55, %v20459_v61  ;;  %v15384_v38 = vadd.f32 %v17561_v16, %v20456_v46  ;;  %v15375_v20 = vpop.f32.mrf.mxu0 }
 0x4c7   : > { %v15581_v41 = vcombine.high %v15579_v31, %v15579_v31  ;;  %v16340_v25 = vadd.f32 %v16212_v60, %v15580_v10  ;;  %v16341_v57 = vadd.f32 %v16213_v19, %v15579_v31  ;;  %16468 = vst.msk [vmem:[%s17726_s21 + $0x10] sm:$0x3] %vm16459_vm5, %v16339_v62  ;;  %v15545_v45 = vrot.slane %v15531_v21, %v20459_v61  ;;  %v16228_v31 = vld [vmem:[%s17721_s18 + $0x32] sm:$0x3]  ;;  %v16220_v10 = vld [vmem:[%s17721_s18 + $0x22] sm:$0x3] }
 0x4c8   : > { %v15546_v13 = vcombine.high %v15538_v36, %v15538_v36  ;;  %v16331_v8 = vadd.f32 %v16203_v39, %v15538_v36  ;;  %v15582_v43 = vcombine.high %v15384_v38, %v15384_v38  ;;  %v15589_v59 = vrot.slane %v15384_v38, %v20459_v61  ;;  %v17564_v49 = vpop.f32.mrf.mxu0  ;;  %v16221_v62 = vld [vmem:[%s17721_s18 + $0x24] sm:$0x3] }
 0x4c9   : > { %v16342_v53 = vadd.f32 %v16214_v37, %v15581_v41  ;;  %16469 = vst.msk [vmem:[%s17726_s21 + $0x12] sm:$0x3] %vm16459_vm5, %v16340_v25  ;;  %16470 = vst.msk [vmem:[%s17726_s21 + $0x14] sm:$0x3] %vm16459_vm5, %v16341_v57  ;;  %v15547_v2 = vcombine.high %v15545_v45, %v15545_v45  ;;  %v16333_v22 = vadd.f32 %v16205_v40, %v15545_v45  ;;  %v16230_v37 = vld [vmem:[%s17721_s18 + $0x36] sm:$0x3] }
 0x4ca   : > { %v15376_v17 = vadd.f32 %v20456_v46, %v15375_v20  ;;  %v16332_v63 = vadd.f32 %v16204_v47, %v15546_v13  ;;  %16460 = vst.msk [vmem:[%s17726_s21] sm:$0x3] %vm16459_vm5, %v16331_v8  ;;  %v15596_v42 = vrot.slane %v15582_v43, %v20459_v61  ;;  %v15597_v18 = vcombine.high %v15589_v59, %v15589_v59  ;;  %v15388_v7 = vpop.f32.mrf.mxu0  ;;  %v16222_v57 = vld [vmem:[%s17721_s18 + $0x26] sm:$0x3] }
 0x4cb   : > { %v16343_v24 = vadd.f32 %v16215_v28, %v15589_v59  ;;  %16471 = vst.msk [vmem:[%s17726_s21 + $0x16] sm:$0x3] %vm16459_vm5, %v16342_v53  ;;  %v16334_v3 = vadd.f32 %v16206_v4, %v15547_v2  ;;  %16462 = vst.msk [vmem:[%s17726_s21 + $0x4] sm:$0x3] %vm16459_vm5, %v16333_v22  ;;  %v15397_v44 = vadd.f32 %v17564_v49, %v20456_v46 }
 0x4cc   : > { %v15548_v35 = vcombine.high %v15376_v17, %v15376_v17  ;;  %v15555_v23 = vrot.slane %v15376_v17, %v20459_v61  ;;  %16461 = vst.msk [vmem:[%s17726_s21 + $0x2] sm:$0x3] %vm16459_vm5, %v16332_v63  ;;  %v15598_v56 = vcombine.high %v15596_v42, %v15596_v42  ;;  %v16344_v26 = vadd.f32 %v16216_v29, %v15597_v18  ;;  %v17565_v51 = vpop.f32.mrf.mxu0  ;;  %v16231_v29 = vld [vmem:[%s17721_s18 + $0x38] sm:$0x3]  ;;  %v16223_v18 = vld [vmem:[%s17721_s18 + $0x28] sm:$0x3] }
 0x4cd   : > { %v16345_v48 = vadd.f32 %v16217_v34, %v15596_v42  ;;  %16472 = vst.msk [vmem:[%s17726_s21 + $0x18] sm:$0x3] %vm16459_vm5, %v16343_v24  ;;  %v15389_v9 = vadd.f32 %v20456_v46, %v15388_v7  ;;  %16463 = vst.msk [vmem:[%s17726_s21 + $0x6] sm:$0x3] %vm16459_vm5, %v16334_v3  ;;  %v15633_v30 = vcombine.high %v15397_v44, %v15397_v44  ;;  %v16232_v24 = vld [vmem:[%s17721_s18 + $0x3a] sm:$0x3] }
 0x4ce   : > { %v15562_v52 = vrot.slane %v15548_v35, %v20459_v61  ;;  %v15563_v58 = vcombine.high %v15555_v23, %v15555_v23  ;;  %v16335_v32 = vadd.f32 %v16207_v12, %v15555_v23  ;;  %v16346_v6 = vadd.f32 %v16218_v0, %v15598_v56  ;;  %16473 = vst.msk [vmem:[%s17726_s21 + $0x1a] sm:$0x3] %vm16459_vm5, %v16344_v26  ;;  %v15391_v21 = vpop.f32.mrf.mxu0  ;;  %v16233_v12 = vld [vmem:[%s17721_s18 + $0x3c] sm:$0x3]  ;;  %v16234_v3 = vld [vmem:[%s17721_s18 + $0x3e] sm:$0x3] }
 0x4cf   : > { %16474 = vst.msk [vmem:[%s17726_s21 + $0x1c] sm:$0x3] %vm16459_vm5, %v16345_v48  ;;  %v15640_v15 = vrot.slane %v15397_v44, %v20459_v61  ;;  %v15599_v33 = vcombine.high %v15389_v9, %v15389_v9  ;;  %v15606_v1 = vrot.slane %v15389_v9, %v20459_v61  ;;  %v15647_v16 = vrot.slane %v15633_v30, %v20459_v61  ;;  %v16243_v9 = vld [vmem:[%s17721_s18 + $0x50] sm:$0x3] }
 0x4d0   : > { %v15564_v55 = vcombine.high %v15562_v52, %v15562_v52  ;;  %v16336_v60 = vadd.f32 %v16208_v5, %v15563_v58  ;;  %v16337_v19 = vadd.f32 %v16209_v54, %v15562_v52  ;;  %16464 = vst.msk [vmem:[%s17726_s21 + $0x8] sm:$0x3] %vm16459_vm5, %v16335_v32  ;;  %16475 = vst.msk [vmem:[%s17726_s21 + $0x1e] sm:$0x3] %vm16459_vm5, %v16346_v6  ;;  %v17568_v8 = vpop.f32.mrf.mxu0  ;;  %v16224_v5 = vld [vmem:[%s17721_s18 + $0x2a] sm:$0x3] }
 0x4d1   : > { %v15648_v39 = vcombine.high %v15640_v15, %v15640_v15  ;;  %v16355_v36 = vadd.f32 %v16227_v27, %v15640_v15  ;;  %v15613_v40 = vrot.slane %v15599_v33, %v20459_v61  ;;  %v15614_v38 = vcombine.high %v15606_v1, %v15606_v1  ;;  %v16225_v54 = vld [vmem:[%s17721_s18 + $0x2c] sm:$0x3]  ;;  %v16226_v58 = vld [vmem:[%s17721_s18 + $0x2e] sm:$0x3]  ;;  %v16245_v6 = vld [vmem:[%s17721_s18 + $0x54] sm:$0x3] }
 0x4d2   : > { %v16338_v20 = vadd.f32 %v16210_v11, %v15564_v55  ;;  %16465 = vst.msk [vmem:[%s17726_s21 + $0xa] sm:$0x3] %vm16459_vm5, %v16336_v60  ;;  %16466 = vst.msk [vmem:[%s17726_s21 + $0xc] sm:$0x3] %vm16459_vm5, %v16337_v19  ;;  %v15649_v41 = vcombine.high %v15647_v16, %v15647_v16  ;;  %v16357_v25 = vadd.f32 %v16229_v14, %v15647_v16  ;;  %v15404_v34 = vpop.f32.mrf.mxu0 }
 0x4d3   : > { %v16347_v45 = vadd.f32 %v16219_v50, %v15606_v1  ;;  %v16356_v47 = vadd.f32 %v16228_v31, %v15648_v39  ;;  %16484 = vst.msk [vmem:[%s17726_s21 + $0x30] sm:$0x3] %vm16459_vm5, %v16355_v36  ;;  %v15615_v28 = vcombine.high %v15613_v40, %v15613_v40  ;;  %v16348_v13 = vadd.f32 %v16220_v10, %v15614_v38  ;;  %v16246_v50 = vld [vmem:[%s17721_s18 + $0x56] sm:$0x3] }
 0x4d4   : > { %v16349_v4 = vadd.f32 %v16221_v62, %v15613_v40  ;;  %16467 = vst.msk [vmem:[%s17726_s21 + $0xe] sm:$0x3] %vm16459_vm5, %v16338_v20  ;;  %v16358_v43 = vadd.f32 %v16230_v37, %v15649_v41  ;;  %16486 = vst.msk [vmem:[%s17726_s21 + $0x34] sm:$0x3] %vm16459_vm5, %v16357_v25  ;;  %v15400_v59 = vadd.f32 %v17565_v51, %v20456_v46  ;;  %v17569_v44 = vpop.f32.mrf.mxu0  ;;  %v16244_v51 = vld [vmem:[%s17721_s18 + $0x52] sm:$0x3] }
 0x4d5   : > { %16476 = vst.msk [vmem:[%s17726_s21 + $0x20] sm:$0x3] %vm16459_vm5, %v16347_v45  ;;  %v15392_v53 = vadd.f32 %v20456_v46, %v15391_v21  ;;  %v15413_v2 = vadd.f32 %v17568_v8, %v20456_v46  ;;  %16485 = vst.msk [vmem:[%s17726_s21 + $0x32] sm:$0x3] %vm16459_vm5, %v16356_v47  ;;  %v16350_v22 = vadd.f32 %v16222_v57, %v15615_v28  ;;  %v16235_v37 = vld [vmem:[%s17721_s18 + $0x40] sm:$0x3] }
 0x4d6   : > { %16477 = vst.msk [vmem:[%s17726_s21 + $0x22] sm:$0x3] %vm16459_vm5, %v16348_v13  ;;  %16478 = vst.msk [vmem:[%s17726_s21 + $0x24] sm:$0x3] %vm16459_vm5, %v16349_v4  ;;  %v15650_v17 = vcombine.high %v15400_v59, %v15400_v59  ;;  %v15657_v49 = vrot.slane %v15400_v59, %v20459_v61  ;;  %v15405_v23 = vadd.f32 %v20456_v46, %v15404_v34  ;;  %v15407_v11 = vpop.f32.mrf.mxu0  ;;  %v16236_v25 = vld [vmem:[%s17721_s18 + $0x42] sm:$0x3] }
 0x4d7   : > { %16487 = vst.msk [vmem:[%s17726_s21 + $0x36] sm:$0x3] %vm16459_vm5, %v16358_v43  ;;  %v15616_v63 = vcombine.high %v15392_v53, %v15392_v53  ;;  %v15623_v42 = vrot.slane %v15392_v53, %v20459_v61  ;;  %16479 = vst.msk [vmem:[%s17726_s21 + $0x26] sm:$0x3] %vm16459_vm5, %v16350_v22  ;;  %v15701_v0 = vcombine.high %v15413_v2, %v15413_v2  ;;  %v16237_v57 = vld [vmem:[%s17721_s18 + $0x44] sm:$0x3] }
 0x4d8   : > { %v15708_v35 = vrot.slane %v15413_v2, %v20459_v61  ;;  %v15664_v7 = vrot.slane %v15650_v17, %v20459_v61  ;;  %v15665_v56 = vcombine.high %v15657_v49, %v15657_v49  ;;  %v16359_v26 = vadd.f32 %v16231_v29, %v15657_v49  ;;  %v17572_v31 = vpop.f32.mrf.mxu0  ;;  %v16247_v59 = vld [vmem:[%s17721_s18 + $0x58] sm:$0x3]  ;;  %v16238_v2 = vld [vmem:[%s17721_s18 + $0x46] sm:$0x3]  ;;  %v16249_v29 = vld [vmem:[%s17721_s18 + $0x5c] sm:$0x3] }
 0x4d9   : > { %v15630_v48 = vrot.slane %v15616_v63, %v20459_v61  ;;  %v15631_v52 = vcombine.high %v15623_v42, %v15623_v42  ;;  %v16351_v32 = vadd.f32 %v16223_v18, %v15623_v42  ;;  %v15715_v30 = vrot.slane %v15701_v0, %v20459_v61  ;;  %v16239_v49 = vld [vmem:[%s17721_s18 + $0x48] sm:$0x3]  ;;  %v16240_v0 = vld [vmem:[%s17721_s18 + $0x4a] sm:$0x3] }
 0x4da   : > { %v15716_v27 = vcombine.high %v15708_v35, %v15708_v35  ;;  %v15666_v15 = vcombine.high %v15664_v7, %v15664_v7  ;;  %v16360_v14 = vadd.f32 %v16232_v24, %v15665_v56  ;;  %v16361_v33 = vadd.f32 %v16233_v12, %v15664_v7  ;;  %16488 = vst.msk [vmem:[%s17726_s21 + $0x38] sm:$0x3] %vm16459_vm5, %v16359_v26  ;;  %v15420_v41 = vpop.f32.mrf.mxu0  ;;  %v16250_v7 = vld [vmem:[%s17721_s18 + $0x5e] sm:$0x3] }
 0x4db   : > { %v15632_v1 = vcombine.high %v15630_v48, %v15630_v48  ;;  %v16352_v55 = vadd.f32 %v16224_v5, %v15631_v52  ;;  %v16353_v60 = vadd.f32 %v16225_v54, %v15630_v48  ;;  %16480 = vst.msk [vmem:[%s17726_s21 + $0x28] sm:$0x3] %vm16459_vm5, %v16351_v32  ;;  %v15717_v19 = vcombine.high %v15715_v30, %v15715_v30  ;;  %v16242_v52 = vld [vmem:[%s17721_s18 + $0x4e] sm:$0x3] }
 0x4dc   : > { %v16371_v16 = vadd.f32 %v16243_v9, %v15708_v35  ;;  %v16362_v10 = vadd.f32 %v16234_v3, %v15666_v15  ;;  %16489 = vst.msk [vmem:[%s17726_s21 + $0x3a] sm:$0x3] %vm16459_vm5, %v16360_v14  ;;  %16490 = vst.msk [vmem:[%s17726_s21 + $0x3c] sm:$0x3] %vm16459_vm5, %v16361_v33  ;;  %v16372_v21 = vadd.f32 %v16244_v51, %v15716_v27  ;;  %v17573_v53 = vpop.f32.mrf.mxu0  ;;  %v16248_v3 = vld [vmem:[%s17721_s18 + $0x5a] sm:$0x3] }
 0x4dd   : > { %v16354_v62 = vadd.f32 %v16226_v58, %v15632_v1  ;;  %v16373_v39 = vadd.f32 %v16245_v6, %v15715_v30  ;;  %16481 = vst.msk [vmem:[%s17726_s21 + $0x2a] sm:$0x3] %vm16459_vm5, %v16352_v55  ;;  %16482 = vst.msk [vmem:[%s17726_s21 + $0x2c] sm:$0x3] %vm16459_vm5, %v16353_v60  ;;  %v16374_v36 = vadd.f32 %v16246_v50, %v15717_v19  ;;  %v16241_v35 = vld [vmem:[%s17721_s18 + $0x4c] sm:$0x3] }
 0x4de   : > { %16500 = vst.msk [vmem:[%s17726_s21 + $0x50] sm:$0x3] %vm16459_vm5, %v16371_v16  ;;  %v15667_v40 = vcombine.high %v15405_v23, %v15405_v23  ;;  %v15674_v38 = vrot.slane %v15405_v23, %v20459_v61  ;;  %v15416_v20 = vadd.f32 %v17569_v44, %v20456_v46  ;;  %16491 = vst.msk [vmem:[%s17726_s21 + $0x3e] sm:$0x3] %vm16459_vm5, %v16362_v10  ;;  %v15423_v23 = vpop.f32.mrf.mxu0  ;;  %v16259_v6 = vld [vmem:[%s17721_s18 + $0x70] sm:$0x3] }
 0x4df   : > { %16483 = vst.msk [vmem:[%s17726_s21 + $0x2e] sm:$0x3] %vm16459_vm5, %v16354_v62  ;;  %16501 = vst.msk [vmem:[%s17726_s21 + $0x52] sm:$0x3] %vm16459_vm5, %v16372_v21  ;;  %v15408_v45 = vadd.f32 %v20456_v46, %v15407_v11  ;;  %v15429_v47 = vadd.f32 %v17572_v31, %v20456_v46  ;;  %v20603_v28 = vadd.f32 %v20456_v46, %v15420_v41  ;;  %v16261_v11 = vld [vmem:[%s17721_s18 + $0x74] sm:$0x3] }
 0x4e0   : > { %16502 = vst.msk [vmem:[%s17726_s21 + $0x54] sm:$0x3] %vm16459_vm5, %v16373_v39  ;;  %16503 = vst.msk [vmem:[%s17726_s21 + $0x56] sm:$0x3] %vm16459_vm5, %v16374_v36  ;;  %v15681_v13 = vrot.slane %v15667_v40, %v20459_v61  ;;  %v15682_v4 = vcombine.high %v15674_v38, %v15674_v38  ;;  %v16363_v8 = vadd.f32 %v16235_v37, %v15674_v38  ;;  %v16251_v55 = vld [vmem:[%s17721_s18 + $0x60] sm:$0x3] }
 0x4e1   : > { %v15718_v43 = vcombine.high %v15416_v20, %v15416_v20  ;;  %v15725_v22 = vrot.slane %v15416_v20, %v20459_v61  ;;  %v15684_v34 = vcombine.high %v15408_v45, %v15408_v45  ;;  %v15691_v17 = vrot.slane %v15408_v45, %v20459_v61  ;;  %v20631_v15 = vpop.f32.mrf.mxu0  ;;  %v16260_v19 = vld [vmem:[%s17721_s18 + $0x72] sm:$0x3]  ;;  %v16262_v16 = vld [vmem:[%s17721_s18 + $0x76] sm:$0x3]  ;;  %v16252_v38 = vld [vmem:[%s17721_s18 + $0x62] sm:$0x3] }
 0x4e2   : > { %v15769_v63 = vcombine.high %v15429_v47, %v15429_v47  ;;  %v15683_v42 = vcombine.high %v15681_v13, %v15681_v13  ;;  %v16364_v18 = vadd.f32 %v16236_v25, %v15682_v4  ;;  %v16365_v24 = vadd.f32 %v16237_v57, %v15681_v13  ;;  %16492 = vst.msk [vmem:[%s17726_s21 + $0x40] sm:$0x3] %vm16459_vm5, %v16363_v8  ;;  %v16253_v20 = vld [vmem:[%s17721_s18 + $0x64] sm:$0x3]  ;;  %v16254_v8 = vld [vmem:[%s17721_s18 + $0x66] sm:$0x3] }
 0x4e3   : > { %v15732_v12 = vrot.slane %v15718_v43, %v20459_v61  ;;  %v15733_v44 = vcombine.high %v15725_v22, %v15725_v22  ;;  %v16375_v56 = vadd.f32 %v16247_v59, %v15725_v22  ;;  %v15698_v26 = vrot.slane %v15684_v34, %v20459_v61  ;;  %v20656_v21 = vpop.f32.mrf.mxu0  ;;  %v16265_v59 = vld [vmem:[%s17721_s18 + $0x7c] sm:$0x3] }
 0x4e4   : > { %v15699_v48 = vcombine.high %v15691_v17, %v15691_v17  ;;  %v16366_v5 = vadd.f32 %v16238_v2, %v15683_v42  ;;  %16493 = vst.msk [vmem:[%s17726_s21 + $0x42] sm:$0x3] %vm16459_vm5, %v16364_v18  ;;  %16494 = vst.msk [vmem:[%s17726_s21 + $0x44] sm:$0x3] %vm16459_vm5, %v16365_v24  ;;  %v16367_v58 = vadd.f32 %v16239_v49, %v15691_v17  ;;  %v16264_v17 = vld [vmem:[%s17721_s18 + $0x7a] sm:$0x3] }
 0x4e5   : > { %v15734_v54 = vcombine.high %v15732_v12, %v15732_v12  ;;  %v16377_v9 = vadd.f32 %v16249_v29, %v15732_v12  ;;  %v16376_v32 = vadd.f32 %v16248_v3, %v15733_v44  ;;  %16504 = vst.msk [vmem:[%s17726_s21 + $0x58] sm:$0x3] %vm16459_vm5, %v16375_v56  ;;  %v15700_v30 = vcombine.high %v15698_v26, %v15698_v26  ;;  %v16255_v49 = vld [vmem:[%s17721_s18 + $0x68] sm:$0x3]  ;;  %v16266_v18 = vld [vmem:[%s17721_s18 + $0x7e] sm:$0x3] }
 0x4e6   : > { %v16368_v27 = vadd.f32 %v16240_v0, %v15699_v48  ;;  %v16369_v51 = vadd.f32 %v16241_v35, %v15698_v26  ;;  %16495 = vst.msk [vmem:[%s17726_s21 + $0x46] sm:$0x3] %vm16459_vm5, %v16366_v5  ;;  %16496 = vst.msk [vmem:[%s17726_s21 + $0x48] sm:$0x3] %vm16459_vm5, %v16367_v58  ;;  %v15776_v33 = vrot.slane %v15429_v47, %v20459_v61  ;;  %v16263_v47 = vld [vmem:[%s17721_s18 + $0x78] sm:$0x3] }
 0x4e7   : > { %v16378_v14 = vadd.f32 %v16250_v7, %v15734_v54  ;;  %16506 = vst.msk [vmem:[%s17726_s21 + $0x5c] sm:$0x3] %vm16459_vm5, %v16377_v9  ;;  %v15783_v1 = vrot.slane %v15769_v63, %v20459_v61  ;;  %v15735_v50 = vcombine.high %v20603_v28, %v20603_v28  ;;  %16505 = vst.msk [vmem:[%s17726_s21 + $0x5a] sm:$0x3] %vm16459_vm5, %v16376_v32  ;;  %v16257_v0 = vld [vmem:[%s17721_s18 + $0x6c] sm:$0x3] }
 0x4e8   : > { %v16370_v60 = vadd.f32 %v16242_v52, %v15700_v30  ;;  %16497 = vst.msk [vmem:[%s17726_s21 + $0x4a] sm:$0x3] %vm16459_vm5, %v16368_v27  ;;  %16498 = vst.msk [vmem:[%s17726_s21 + $0x4c] sm:$0x3] %vm16459_vm5, %v16369_v51  ;;  %v15742_v31 = vrot.slane %v20603_v28, %v20459_v61  ;;  %v15432_v10 = vadd.f32 %v17573_v53, %v20456_v46  ;;  %v17577_v28 = vpop.f32.mrf.mxu0  ;;  %v16256_v7 = vld [vmem:[%s17721_s18 + $0x6a] sm:$0x3] }
 0x4e9   : > { %v15424_v62 = vadd.f32 %v20456_v46, %v15423_v23  ;;  %16507 = vst.msk [vmem:[%s17726_s21 + $0x5e] sm:$0x3] %vm16459_vm5, %v16378_v14  ;;  %v15784_v39 = vcombine.high %v15776_v33, %v15776_v33  ;;  %v15785_v37 = vcombine.high %v15783_v1, %v15783_v1  ;;  %v16387_v36 = vadd.f32 %v16259_v6, %v15776_v33  ;;  %v16258_v56 = vld [vmem:[%s17721_s18 + $0x6e] sm:$0x3]  ;;  %v16275_v58 = vld [vmem:[%s17721_s18 + $0x90] sm:$0x3] }
 0x4ea   : > { %v16389_v40 = vadd.f32 %v16261_v11, %v15783_v1  ;;  %16499 = vst.msk [vmem:[%s17726_s21 + $0x4e] sm:$0x3] %vm16459_vm5, %v16370_v60  ;;  %v15749_v41 = vrot.slane %v15735_v50, %v20459_v61  ;;  %v15750_v25 = vcombine.high %v15742_v31, %v15742_v31  ;;  %v16379_v57 = vadd.f32 %v16251_v55, %v15742_v31  ;;  %v15439_v63 = vpop.f32.mrf.mxu0  ;;  %v16276_v14 = vld [vmem:[%s17721_s18 + $0x92] sm:$0x3]  ;;  %v16277_v33 = vld [vmem:[%s17721_s18 + $0x94] sm:$0x3] }
 0x4eb   : > { %v15786_v45 = vcombine.high %v15432_v10, %v15432_v10  ;;  %v16388_v13 = vadd.f32 %v16260_v19, %v15784_v39  ;;  %v16390_v4 = vadd.f32 %v16262_v16, %v15785_v37  ;;  %16516 = vst.msk [vmem:[%s17726_s21 + $0x70] sm:$0x3] %vm16459_vm5, %v16387_v36  ;;  %v15793_v43 = vrot.slane %v15432_v10, %v20459_v61  ;;  %v16267_v16 = vld [vmem:[%s17721_s18 + $0x80] sm:$0x3] }
 0x4ec   : > { %16518 = vst.msk [vmem:[%s17726_s21 + $0x74] sm:$0x3] %vm16459_vm5, %v16389_v40  ;;  %v15752_v53 = vcombine.high %v15424_v62, %v15424_v62  ;;  %v15751_v2 = vcombine.high %v15749_v41, %v15749_v41  ;;  %v16380_v22 = vadd.f32 %v16252_v38, %v15750_v25  ;;  %v16381_v29 = vadd.f32 %v16253_v20, %v15749_v41  ;;  %v20694_v48 = vpop.f32.mrf.mxu0  ;;  %v16279_v40 = vld [vmem:[%s17721_s18 + $0x98] sm:$0x3]  ;;  %v16268_v25 = vld [vmem:[%s17721_s18 + $0x82] sm:$0x3] }
 0x4ed   : > { %16508 = vst.msk [vmem:[%s17726_s21 + $0x60] sm:$0x3] %vm16459_vm5, %v16379_v57  ;;  %v15800_v34 = vrot.slane %v15786_v45, %v20459_v61  ;;  %16517 = vst.msk [vmem:[%s17726_s21 + $0x72] sm:$0x3] %vm16459_vm5, %v16388_v13  ;;  %v15801_v42 = vcombine.high %v15793_v43, %v15793_v43  ;;  %v16391_v24 = vadd.f32 %v16263_v47, %v15793_v43  ;;  %v16269_v57 = vld [vmem:[%s17721_s18 + $0x84] sm:$0x3] }
 0x4ee   : > { %16519 = vst.msk [vmem:[%s17726_s21 + $0x76] sm:$0x3] %vm16459_vm5, %v16390_v4  ;;  %v15759_v12 = vrot.slane %v15424_v62, %v20459_v61  ;;  %v15766_v3 = vrot.slane %v15752_v53, %v20459_v61  ;;  %v16382_v35 = vadd.f32 %v16254_v8, %v15751_v2  ;;  %16509 = vst.msk [vmem:[%s17726_s21 + $0x62] sm:$0x3] %vm16459_vm5, %v16380_v22  ;;  %v20704_v6 = vpop.f32.mrf.mxu0  ;;  %v16278_v62 = vld [vmem:[%s17721_s18 + $0x96] sm:$0x3] }
 0x4ef   : > { %16510 = vst.msk [vmem:[%s17726_s21 + $0x64] sm:$0x3] %vm16459_vm5, %v16381_v29  ;;  %v15802_v23 = vcombine.high %v15800_v34, %v15800_v34  ;;  %v16393_v44 = vadd.f32 %v16265_v59, %v15800_v34  ;;  %v15445_v26 = vadd.f32 %v20631_v15, %v20456_v46  ;;  %v16392_v5 = vadd.f32 %v16264_v17, %v15801_v42  ;;  %v16280_v43 = vld [vmem:[%s17721_s18 + $0x9a] sm:$0x3]  ;;  %v16281_v59 = vld [vmem:[%s17721_s18 + $0x9c] sm:$0x3] }
 0x4f0   : > { %16520 = vst.msk [vmem:[%s17726_s21 + $0x78] sm:$0x3] %vm16459_vm5, %v16391_v24  ;;  %v15767_v54 = vcombine.high %v15759_v12, %v15759_v12  ;;  %v15768_v9 = vcombine.high %v15766_v3, %v15766_v3  ;;  %v16383_v52 = vadd.f32 %v16255_v49, %v15759_v12  ;;  %16511 = vst.msk [vmem:[%s17726_s21 + $0x66] sm:$0x3] %vm16459_vm5, %v16382_v35  ;;  %v20722_v10 = vpop.f32.mrf.mxu0  ;;  %v16270_v2 = vld [vmem:[%s17721_s18 + $0x86] sm:$0x3] }
 0x4f1   : > { %v16394_v32 = vadd.f32 %v16266_v18, %v15802_v23  ;;  %16522 = vst.msk [vmem:[%s17726_s21 + $0x7c] sm:$0x3] %vm16459_vm5, %v16393_v44  ;;  %v16385_v30 = vadd.f32 %v16257_v0, %v15766_v3  ;;  %v15837_v27 = vcombine.high %v15445_v26, %v15445_v26  ;;  %v15844_v51 = vrot.slane %v15445_v26, %v20459_v61  ;;  %v16282_v29 = vld [vmem:[%s17721_s18 + $0x9e] sm:$0x3]  ;;  %v16271_v49 = vld [vmem:[%s17721_s18 + $0x88] sm:$0x3] }
 0x4f2   : > { %16521 = vst.msk [vmem:[%s17726_s21 + $0x7a] sm:$0x3] %vm16459_vm5, %v16392_v5  ;;  %v16384_v11 = vadd.f32 %v16256_v7, %v15767_v54  ;;  %v16386_v15 = vadd.f32 %v16258_v56, %v15768_v9  ;;  %16512 = vst.msk [vmem:[%s17726_s21 + $0x68] sm:$0x3] %vm16459_vm5, %v16383_v52  ;;  %v15437_v1 = vadd.f32 %v20456_v46, %v20656_v21  ;;  %v15455_v47 = vpop.f32.mrf.mxu0  ;;  %v16272_v12 = vld [vmem:[%s17721_s18 + $0x8a] sm:$0x3] }
 0x4f3   : > { %v15448_v50 = vadd.f32 %v17577_v28, %v20456_v46  ;;  %16523 = vst.msk [vmem:[%s17726_s21 + $0x7e] sm:$0x3] %vm16459_vm5, %v16394_v32  ;;  %16514 = vst.msk [vmem:[%s17726_s21 + $0x6c] sm:$0x3] %vm16459_vm5, %v16385_v30  ;;  %v15851_v55 = vrot.slane %v15837_v27, %v20459_v61  ;;  %v15852_v60 = vcombine.high %v15844_v51, %v15844_v51  ;;  %v16273_v3 = vld [vmem:[%s17721_s18 + $0x8c] sm:$0x3] }
 0x4f4   : > { %v16403_v19 = vadd.f32 %v16275_v58, %v15844_v51  ;;  %v15440_v31 = vadd.f32 %v20456_v46, %v15439_v63  ;;  %16513 = vst.msk [vmem:[%s17726_s21 + $0x6a] sm:$0x3] %vm16459_vm5, %v16384_v11  ;;  %16515 = vst.msk [vmem:[%s17726_s21 + $0x6e] sm:$0x3] %vm16459_vm5, %v16386_v15  ;;  %v15803_v21 = vcombine.high %v15437_v1, %v15437_v1  ;;  %v17584_v0 = vpop.f32.mrf.mxu0  ;;  %v16274_v5 = vld [vmem:[%s17721_s18 + $0x8e] sm:$0x3] }
 0x4f5   : > { %v15810_v39 = vrot.slane %v15437_v1, %v20459_v61  ;;  %v15854_v37 = vcombine.high %v15448_v50, %v15448_v50  ;;  %v15861_v36 = vrot.slane %v15448_v50, %v20459_v61  ;;  %v15853_v38 = vcombine.high %v15851_v55, %v15851_v55  ;;  %v16291_v27 = vld [vmem:[%s17721_s18 + $0xb0] sm:$0x3]  ;;  %v16283_v15 = vld [vmem:[%s17721_s18 + $0xa0] sm:$0x3]  ;;  %v16292_v1 = vld [vmem:[%s17721_s18 + $0xb2] sm:$0x3] }
 0x4f6   : > { %v16404_v20 = vadd.f32 %v16276_v14, %v15852_v60  ;;  %v16405_v41 = vadd.f32 %v16277_v33, %v15851_v55  ;;  %16532 = vst.msk [vmem:[%s17726_s21 + $0x90] sm:$0x3] %vm16459_vm5, %v16403_v19  ;;  %v15820_v45 = vcombine.high %v15440_v31, %v15440_v31  ;;  %v15817_v28 = vrot.slane %v15803_v21, %v20459_v61  ;;  %v20764_v52 = vpop.f32.mrf.mxu0  ;;  %v16293_v50 = vld [vmem:[%s17721_s18 + $0xb4] sm:$0x3]  ;;  %v16284_v21 = vld [vmem:[%s17721_s18 + $0xa2] sm:$0x3] }
 0x4f7   : > { %v15818_v13 = vcombine.high %v15810_v39, %v15810_v39  ;;  %v16395_v4 = vadd.f32 %v16267_v16, %v15810_v39  ;;  %v15868_v8 = vrot.slane %v15854_v37, %v20459_v61  ;;  %v16406_v53 = vadd.f32 %v16278_v62, %v15853_v38  ;;  %v16285_v39 = vld [vmem:[%s17721_s18 + $0xa4] sm:$0x3] }
 0x4f8   : > { %16533 = vst.msk [vmem:[%s17726_s21 + $0x92] sm:$0x3] %vm16459_vm5, %v16404_v20  ;;  %16534 = vst.msk [vmem:[%s17726_s21 + $0x94] sm:$0x3] %vm16459_vm5, %v16405_v41  ;;  %v15869_v22 = vcombine.high %v15861_v36, %v15861_v36  ;;  %v16407_v34 = vadd.f32 %v16279_v40, %v15861_v36  ;;  %v15827_v17 = vrot.slane %v15440_v31, %v20459_v61  ;;  %v17585_v16 = vpop.f32.mrf.mxu0  ;;  %v16294_v36 = vld [vmem:[%s17721_s18 + $0xb6] sm:$0x3] }
 0x4f9   : > { %v15819_v63 = vcombine.high %v15817_v28, %v15817_v28  ;;  %v16396_v42 = vadd.f32 %v16268_v25, %v15818_v13  ;;  %v16397_v18 = vadd.f32 %v16269_v57, %v15817_v28  ;;  %16524 = vst.msk [vmem:[%s17726_s21 + $0x80] sm:$0x3] %vm16459_vm5, %v16395_v4  ;;  %v15870_v24 = vcombine.high %v15868_v8, %v15868_v8  ;;  %v16295_v25 = vld [vmem:[%s17721_s18 + $0xb8] sm:$0x3]  ;;  %v16297_v57 = vld [vmem:[%s17721_s18 + $0xbc] sm:$0x3] }
 0x4fa   : > { %16535 = vst.msk [vmem:[%s17726_s21 + $0x96] sm:$0x3] %vm16459_vm5, %v16406_v53  ;;  %v16408_v35 = vadd.f32 %v16280_v43, %v15869_v22  ;;  %v16409_v23 = vadd.f32 %v16281_v59, %v15868_v8  ;;  %16536 = vst.msk [vmem:[%s17726_s21 + $0x98] sm:$0x3] %vm16459_vm5, %v16407_v34  ;;  %v15834_v44 = vrot.slane %v15820_v45, %v20459_v61  ;;  %v16286_v13 = vld [vmem:[%s17721_s18 + $0xa6] sm:$0x3] }
 0x4fb   : > { %v15835_v7 = vcombine.high %v15827_v17, %v15827_v17  ;;  %v16398_v56 = vadd.f32 %v16270_v2, %v15819_v63  ;;  %16525 = vst.msk [vmem:[%s17726_s21 + $0x82] sm:$0x3] %vm16459_vm5, %v16396_v42  ;;  %16526 = vst.msk [vmem:[%s17726_s21 + $0x84] sm:$0x3] %vm16459_vm5, %v16397_v18  ;;  %v16410_v26 = vadd.f32 %v16282_v29, %v15870_v24  ;;  %v16296_v8 = vld [vmem:[%s17721_s18 + $0xba] sm:$0x3]  ;;  %v20814_v29 = vpop.f32.mrf.mxu0 }
 0x4fc   : > { %v16399_v54 = vadd.f32 %v16271_v49, %v15827_v17  ;;  %v15461_v9 = vadd.f32 %v20694_v48, %v20456_v46  ;;  %16537 = vst.msk [vmem:[%s17726_s21 + $0x9a] sm:$0x3] %vm16459_vm5, %v16408_v35  ;;  %16538 = vst.msk [vmem:[%s17726_s21 + $0x9c] sm:$0x3] %vm16459_vm5, %v16409_v23  ;;  %v15836_v58 = vcombine.high %v15834_v44, %v15834_v44  ;;  %v16298_v22 = vld [vmem:[%s17721_s18 + $0xbe] sm:$0x3] }
 0x4fd   : > { %v16400_v32 = vadd.f32 %v16272_v12, %v15835_v7  ;;  %v16401_v30 = vadd.f32 %v16273_v3, %v15834_v44  ;;  %v15453_v51 = vadd.f32 %v20456_v46, %v20704_v6  ;;  %16527 = vst.msk [vmem:[%s17726_s21 + $0x86] sm:$0x3] %vm16459_vm5, %v16398_v56  ;;  %16539 = vst.msk [vmem:[%s17726_s21 + $0x9e] sm:$0x3] %vm16459_vm5, %v16410_v26  ;;  %v16287_v42 = vld [vmem:[%s17721_s18 + $0xa8] sm:$0x3] }
 0x4fe   : > { %16528 = vst.msk [vmem:[%s17726_s21 + $0x88] sm:$0x3] %vm16459_vm5, %v16399_v54  ;;  %v15905_v48 = vcombine.high %v15461_v9, %v15461_v9  ;;  %v15912_v11 = vrot.slane %v15461_v9, %v20459_v61  ;;  %v15464_v14 = vadd.f32 %v20722_v10, %v20456_v46  ;;  %v20784_v33 = vadd.f32 %v20456_v46, %v15455_v47  ;;  %v16288_v23 = vld [vmem:[%s17721_s18 + $0xaa] sm:$0x3]  ;;  %v16289_v44 = vld [vmem:[%s17721_s18 + $0xac] sm:$0x3] }
 0x4ff   : > { %v16402_v6 = vadd.f32 %v16274_v5, %v15836_v58  ;;  %16529 = vst.msk [vmem:[%s17726_s21 + $0x8a] sm:$0x3] %vm16459_vm5, %v16400_v32  ;;  %16530 = vst.msk [vmem:[%s17726_s21 + $0x8c] sm:$0x3] %vm16459_vm5, %v16401_v30  ;;  %v15871_v55 = vcombine.high %v15453_v51, %v15453_v51  ;;  %v15878_v60 = vrot.slane %v15453_v51, %v20459_v61  ;;  %v16308_v58 = vld [vmem:[%s17721_s18 + $0xd2] sm:$0x3] }
 0x500   : > { %v20794_v19 = vadd.f32 %v17584_v0, %v20456_v46  ;;  %v15919_v31 = vrot.slane %v15905_v48, %v20459_v61  ;;  %v15920_v10 = vcombine.high %v15912_v11, %v15912_v11  ;;  %v16419_v62 = vadd.f32 %v16291_v27, %v15912_v11  ;;  %v16307_v0 = vld [vmem:[%s17721_s18 + $0xd0] sm:$0x3]  ;;  %v16309_v32 = vld [vmem:[%s17721_s18 + $0xd4] sm:$0x3]  ;;  %v17588_v27 = vpop.f32.mrf.mxu0 }
 0x501   : > { %v15922_v37 = vcombine.high %v15464_v14, %v15464_v14  ;;  %16531 = vst.msk [vmem:[%s17726_s21 + $0x8e] sm:$0x3] %vm16459_vm5, %v16402_v6  ;;  %v15885_v40 = vrot.slane %v15871_v55, %v20459_v61  ;;  %v15886_v38 = vcombine.high %v15878_v60, %v15878_v60  ;;  %v16411_v20 = vadd.f32 %v16283_v15, %v15878_v60  ;;  %v16301_v60 = vld [vmem:[%s17721_s18 + $0xc4] sm:$0x3] }
 0x502   : > { %v15929_v41 = vrot.slane %v15464_v14, %v20459_v61  ;;  %v15921_v45 = vcombine.high %v15919_v31, %v15919_v31  ;;  %v16420_v47 = vadd.f32 %v16292_v1, %v15920_v10  ;;  %v16421_v28 = vadd.f32 %v16293_v50, %v15919_v31  ;;  %16548 = vst.msk [vmem:[%s17726_s21 + $0xb0] sm:$0x3] %vm16459_vm5, %v16419_v62  ;;  %v16299_v14 = vld [vmem:[%s17721_s18 + $0xc0] sm:$0x3]  ;;  %v16310_v50 = vld [vmem:[%s17721_s18 + $0xd6] sm:$0x3] }
 0x503   : > { %v15936_v4 = vrot.slane %v15922_v37, %v20459_v61  ;;  %v15887_v43 = vcombine.high %v15885_v40, %v15885_v40  ;;  %v16412_v59 = vadd.f32 %v16284_v21, %v15886_v38  ;;  %v16413_v53 = vadd.f32 %v16285_v39, %v15885_v40  ;;  %16540 = vst.msk [vmem:[%s17726_s21 + $0xa0] sm:$0x3] %vm16459_vm5, %v16411_v20  ;;  %v16300_v62 = vld [vmem:[%s17721_s18 + $0xc2] sm:$0x3]  ;;  %v16302_v37 = vld [vmem:[%s17721_s18 + $0xc6] sm:$0x3]  ;;  %v15484_v20 = vpop.f32.mrf.mxu0 }
 0x504   : > { %v15937_v2 = vcombine.high %v15929_v41, %v15929_v41  ;;  %v16422_v34 = vadd.f32 %v16294_v36, %v15921_v45  ;;  %16549 = vst.msk [vmem:[%s17726_s21 + $0xb2] sm:$0x3] %vm16459_vm5, %v16420_v47  ;;  %16550 = vst.msk [vmem:[%s17726_s21 + $0xb4] sm:$0x3] %vm16459_vm5, %v16421_v28  ;;  %v16423_v49 = vadd.f32 %v16295_v25, %v15929_v41  ;;  %v16311_v38 = vld [vmem:[%s17721_s18 + $0xd8] sm:$0x3] }
 0x505   : > { %v15938_v17 = vcombine.high %v15936_v4, %v15936_v4  ;;  %v16425_v63 = vadd.f32 %v16297_v57, %v15936_v4  ;;  %v16414_v18 = vadd.f32 %v16286_v13, %v15887_v43  ;;  %16541 = vst.msk [vmem:[%s17726_s21 + $0xa2] sm:$0x3] %vm16459_vm5, %v16412_v59  ;;  %16542 = vst.msk [vmem:[%s17726_s21 + $0xa4] sm:$0x3] %vm16459_vm5, %v16413_v53  ;;  %v16313_v47 = vld [vmem:[%s17721_s18 + $0xdc] sm:$0x3] }
 0x506   : > { %v16424_v24 = vadd.f32 %v16296_v8, %v15937_v2  ;;  %v15888_v12 = vcombine.high %v20784_v33, %v20784_v33  ;;  %v15895_v3 = vrot.slane %v20784_v33, %v20459_v61  ;;  %16551 = vst.msk [vmem:[%s17726_s21 + $0xb6] sm:$0x3] %vm16459_vm5, %v16422_v34  ;;  %16552 = vst.msk [vmem:[%s17726_s21 + $0xb8] sm:$0x3] %vm16459_vm5, %v16423_v49  ;;  %v16312_v4 = vld [vmem:[%s17721_s18 + $0xda] sm:$0x3] }
 0x507   : > { %v16426_v35 = vadd.f32 %v16298_v22, %v15938_v17  ;;  %16554 = vst.msk [vmem:[%s17726_s21 + $0xbc] sm:$0x3] %vm16459_vm5, %v16425_v63  ;;  %v15973_v7 = vcombine.high %v20794_v19, %v20794_v19  ;;  %v15980_v56 = vrot.slane %v20794_v19, %v20459_v61  ;;  %v15469_v26 = vadd.f32 %v20456_v46, %v20764_v52  ;;  %v16290_v52 = vld [vmem:[%s17721_s18 + $0xae] sm:$0x3]  ;;  %v16314_v2 = vld [vmem:[%s17721_s18 + $0xde] sm:$0x3] }
 0x508   : > { %16543 = vst.msk [vmem:[%s17726_s21 + $0xa6] sm:$0x3] %vm16459_vm5, %v16414_v18  ;;  %16553 = vst.msk [vmem:[%s17726_s21 + $0xba] sm:$0x3] %vm16459_vm5, %v16424_v24  ;;  %v15902_v5 = vrot.slane %v15888_v12, %v20459_v61  ;;  %v15903_v54 = vcombine.high %v15895_v3, %v15895_v3  ;;  %v16415_v9 = vadd.f32 %v16287_v42, %v15895_v3  ;;  %v16303_v34 = vld [vmem:[%s17721_s18 + $0xc8] sm:$0x3]  ;;  %v17589_v24 = vpop.f32.mrf.mxu0 }
 0x509   : > { %v15480_v30 = vadd.f32 %v17585_v16, %v20456_v46  ;;  %16555 = vst.msk [vmem:[%s17726_s21 + $0xbe] sm:$0x3] %vm16459_vm5, %v16426_v35  ;;  %v15987_v51 = vrot.slane %v15973_v7, %v20459_v61  ;;  %v15988_v48 = vcombine.high %v15980_v56, %v15980_v56  ;;  %v16435_v11 = vadd.f32 %v16307_v0, %v15980_v56  ;;  %v16323_v18 = vld [vmem:[%s17721_s18 + $0xf0] sm:$0x3]  ;;  %v16304_v3 = vld [vmem:[%s17721_s18 + $0xca] sm:$0x3] }
 0x50a   : > { %v15939_v15 = vcombine.high %v15469_v26, %v15469_v26  ;;  %v15904_v33 = vcombine.high %v15902_v5, %v15902_v5  ;;  %v16416_v6 = vadd.f32 %v16288_v23, %v15903_v54  ;;  %v16417_v1 = vadd.f32 %v16289_v44, %v15902_v5  ;;  %16544 = vst.msk [vmem:[%s17726_s21 + $0xa8] sm:$0x3] %vm16459_vm5, %v16415_v9  ;;  %v16305_v0 = vld [vmem:[%s17721_s18 + $0xcc] sm:$0x3]  ;;  %v16324_v54 = vld [vmem:[%s17721_s18 + $0xf2] sm:$0x3] }
 0x50b   : > { %v15946_v55 = vrot.slane %v15469_v26, %v20459_v61  ;;  %v15989_v19 = vcombine.high %v15987_v51, %v15987_v51  ;;  %v16436_v16 = vadd.f32 %v16308_v58, %v15988_v48  ;;  %v16437_v31 = vadd.f32 %v16309_v32, %v15987_v51  ;;  %16564 = vst.msk [vmem:[%s17726_s21 + $0xd0] sm:$0x3] %vm16459_vm5, %v16435_v11  ;;  %v16325_v9 = vld [vmem:[%s17721_s18 + $0xf4] sm:$0x3]  ;;  %v16306_v58 = vld [vmem:[%s17721_s18 + $0xce] sm:$0x3] }
 0x50c   : > { %v15953_v10 = vrot.slane %v15939_v15, %v20459_v61  ;;  %v16418_v21 = vadd.f32 %v16290_v52, %v15904_v33  ;;  %16545 = vst.msk [vmem:[%s17726_s21 + $0xaa] sm:$0x3] %vm16459_vm5, %v16416_v6  ;;  %16546 = vst.msk [vmem:[%s17726_s21 + $0xac] sm:$0x3] %vm16459_vm5, %v16417_v1  ;;  %v15990_v40 = vcombine.high %v15480_v30, %v15480_v30  ;;  %v16315_v51 = vld [vmem:[%s17721_s18 + $0xe0] sm:$0x3] }
 0x50d   : > { %v15954_v39 = vcombine.high %v15946_v55, %v15946_v55  ;;  %v16427_v36 = vadd.f32 %v16299_v14, %v15946_v55  ;;  %v16438_v41 = vadd.f32 %v16310_v50, %v15989_v19  ;;  %16565 = vst.msk [vmem:[%s17726_s21 + $0xd2] sm:$0x3] %vm16459_vm5, %v16436_v16  ;;  %16566 = vst.msk [vmem:[%s17726_s21 + $0xd4] sm:$0x3] %vm16459_vm5, %v16437_v31  ;;  %v16317_v48 = vld [vmem:[%s17721_s18 + $0xe4] sm:$0x3]  ;;  %v15487_v50 = vpop.f32.mrf.mxu0 }
 0x50e   : > { %v15955_v25 = vcombine.high %v15953_v10, %v15953_v10  ;;  %v16429_v57 = vadd.f32 %v16301_v60, %v15953_v10  ;;  %v15997_v45 = vrot.slane %v15480_v30, %v20459_v61  ;;  %16547 = vst.msk [vmem:[%s17726_s21 + $0xae] sm:$0x3] %vm16459_vm5, %v16418_v21  ;;  %v16004_v13 = vrot.slane %v15990_v40, %v20459_v61  ;;  %v16326_v33 = vld [vmem:[%s17721_s18 + $0xf6] sm:$0x3]  ;;  %v16316_v1 = vld [vmem:[%s17721_s18 + $0xe2] sm:$0x3] }
 0x50f   : > { %v16428_v28 = vadd.f32 %v16300_v62, %v15954_v39  ;;  %16556 = vst.msk [vmem:[%s17726_s21 + $0xc0] sm:$0x3] %vm16459_vm5, %v16427_v36  ;;  %v15472_v8 = vadd.f32 %v20456_v46, %v20814_v29  ;;  %v15493_v43 = vadd.f32 %v17588_v27, %v20456_v46  ;;  %16567 = vst.msk [vmem:[%s17726_s21 + $0xd6] sm:$0x3] %vm16459_vm5, %v16438_v41  ;;  %v17620_v29 = vld [vmem:[%s20988_s8] ss:$0 sm:$0xff] }
 0x510   : > { %v16430_v59 = vadd.f32 %v16302_v37, %v15955_v25  ;;  %16558 = vst.msk [vmem:[%s17726_s21 + $0xc4] sm:$0x3] %vm16459_vm5, %v16429_v57  ;;  %v16005_v53 = vcombine.high %v15997_v45, %v15997_v45  ;;  %v16439_v22 = vadd.f32 %v16311_v38, %v15997_v45  ;;  %v15485_v17 = vadd.f32 %v17620_v29, %v15484_v20  ;;  %v16318_v31 = vld [vmem:[%s17721_s18 + $0xe6] sm:$0x3]  ;;  %v16327_v41 = vld [vmem:[%s17721_s18 + $0xf8] sm:$0x3] }
 0x511   : > { %16557 = vst.msk [vmem:[%s17726_s21 + $0xc2] sm:$0x3] %vm16459_vm5, %v16428_v28  ;;  %v16006_v46 = vcombine.high %v16004_v13, %v16004_v13  ;;  %v16441_v49 = vadd.f32 %v16313_v47, %v16004_v13  ;;  %v15956_v63 = vcombine.high %v15472_v8, %v15472_v8  ;;  %v15963_v42 = vrot.slane %v15472_v8, %v20459_v61  ;;  %v16319_v28 = vld [vmem:[%s17721_s18 + $0xe8] sm:$0x3]  ;;  %v16328_v13 = vld [vmem:[%s17721_s18 + $0xfa] sm:$0x3] }
 0x512   : > { %16559 = vst.msk [vmem:[%s17726_s21 + $0xc6] sm:$0x3] %vm16459_vm5, %v16430_v59  ;;  %v16440_v12 = vadd.f32 %v16312_v4, %v16005_v53  ;;  %16568 = vst.msk [vmem:[%s17726_s21 + $0xd8] sm:$0x3] %vm16459_vm5, %v16439_v22  ;;  %v16041_v35 = vcombine.high %v15493_v43, %v15493_v43  ;;  %v16048_v23 = vrot.slane %v15493_v43, %v20459_v61  ;;  %v16329_v4 = vld [vmem:[%s17721_s18 + $0xfc] sm:$0x3] }
 0x513   : > { %v16007_v44 = vcombine.high %v15485_v17, %v15485_v17  ;;  %v16442_v7 = vadd.f32 %v16314_v2, %v16006_v46  ;;  %16570 = vst.msk [vmem:[%s17726_s21 + $0xdc] sm:$0x3] %vm16459_vm5, %v16441_v49  ;;  %v15970_v56 = vrot.slane %v15956_v63, %v20459_v61  ;;  %v15971_v26 = vcombine.high %v15963_v42, %v15963_v42  ;;  %v16320_v2 = vld [vmem:[%s17721_s18 + $0xea] sm:$0x3]  ;;  %v16321_v22 = vld [vmem:[%s17721_s18 + $0xec] sm:$0x3] }
 0x514   : > { %v16431_v5 = vadd.f32 %v16303_v34, %v15963_v42  ;;  %16569 = vst.msk [vmem:[%s17726_s21 + $0xda] sm:$0x3] %vm16459_vm5, %v16440_v12  ;;  %v16055_v32 = vrot.slane %v16041_v35, %v20459_v61  ;;  %v16056_v30 = vcombine.high %v16048_v23, %v16048_v23  ;;  %v16451_v27 = vadd.f32 %v16323_v18, %v16048_v23  ;;  %v16330_v34 = vld [vmem:[%s17721_s18 + $0xfe] sm:$0x3] }
 0x515   : > { %v16014_v52 = vrot.slane %v15485_v17, %v20459_v61  ;;  %16571 = vst.msk [vmem:[%s17726_s21 + $0xde] sm:$0x3] %vm16459_vm5, %v16442_v7  ;;  %v15972_v11 = vcombine.high %v15970_v56, %v15970_v56  ;;  %v16432_v15 = vadd.f32 %v16304_v3, %v15971_v26  ;;  %v16433_v14 = vadd.f32 %v16305_v0, %v15970_v56  ;;  %v16322_v17 = vld [vmem:[%s17721_s18 + $0xee] sm:$0x3] }
 0x516   : > { %16560 = vst.msk [vmem:[%s17726_s21 + $0xc8] sm:$0x3] %vm16459_vm5, %v16431_v5  ;;  %v16021_v6 = vrot.slane %v16007_v44, %v20459_v61  ;;  %v16057_v55 = vcombine.high %v16055_v32, %v16055_v32  ;;  %v16452_v60 = vadd.f32 %v16324_v54, %v16056_v30  ;;  %v16453_v19 = vadd.f32 %v16325_v9, %v16055_v32 }
 0x517   : > { %16580 = vst.msk [vmem:[%s17726_s21 + $0xf0] sm:$0x3] %vm16459_vm5, %v16451_v27  ;;  %v16022_v16 = vcombine.high %v16014_v52, %v16014_v52  ;;  %v16434_v10 = vadd.f32 %v16306_v58, %v15972_v11  ;;  %16561 = vst.msk [vmem:[%s17726_s21 + $0xca] sm:$0x3] %vm16459_vm5, %v16432_v15  ;;  %v16443_v21 = vadd.f32 %v16315_v51, %v16014_v52 }
 0x518   : > { %16562 = vst.msk [vmem:[%s17726_s21 + $0xcc] sm:$0x3] %vm16459_vm5, %v16433_v14  ;;  %v16023_v62 = vcombine.high %v16021_v6, %v16021_v6  ;;  %v16445_v39 = vadd.f32 %v16317_v48, %v16021_v6  ;;  %v16454_v37 = vadd.f32 %v16326_v33, %v16057_v55  ;;  %16581 = vst.msk [vmem:[%s17726_s21 + $0xf2] sm:$0x3] %vm16459_vm5, %v16452_v60 }
 0x519   : > { %16582 = vst.msk [vmem:[%s17726_s21 + $0xf4] sm:$0x3] %vm16459_vm5, %v16453_v19  ;;  %v16444_v36 = vadd.f32 %v16316_v1, %v16022_v16  ;;  %v15496_v40 = vadd.f32 %v17620_v29, %v17589_v24  ;;  %v15488_v38 = vadd.f32 %v17620_v29, %v15487_v50  ;;  %16563 = vst.msk [vmem:[%s17726_s21 + $0xce] sm:$0x3] %vm16459_vm5, %v16434_v10 }
 0x51a   : > { %v16446_v20 = vadd.f32 %v16318_v31, %v16023_v62  ;;  %16572 = vst.msk [vmem:[%s17726_s21 + $0xe0] sm:$0x3] %vm16459_vm5, %v16443_v21  ;;  %16574 = vst.msk [vmem:[%s17726_s21 + $0xe4] sm:$0x3] %vm16459_vm5, %v16445_v39 }
 0x51b   : > { %16583 = vst.msk [vmem:[%s17726_s21 + $0xf6] sm:$0x3] %vm16459_vm5, %v16454_v37  ;;  %16573 = vst.msk [vmem:[%s17726_s21 + $0xe2] sm:$0x3] %vm16459_vm5, %v16444_v36  ;;  %v16058_v25 = vcombine.high %v15496_v40, %v15496_v40  ;;  %v16065_v57 = vrot.slane %v15496_v40, %v20459_v61  ;;  %v16024_v45 = vcombine.high %v15488_v38, %v15488_v38 }
 0x51c   : > { %v16031_v47 = vrot.slane %v15488_v38, %v20459_v61  ;;  %16575 = vst.msk [vmem:[%s17726_s21 + $0xe6] sm:$0x3] %vm16459_vm5, %v16446_v20 }
 0x51d   : > { %v16072_v8 = vrot.slane %v16058_v25, %v20459_v61  ;;  %v16073_v43 = vcombine.high %v16065_v57, %v16065_v57  ;;  %v16455_v59 = vadd.f32 %v16327_v41, %v16065_v57  ;;  %v16038_v53 = vrot.slane %v16024_v45, %v20459_v61 }
 0x51e   : > { %v16039_v29 = vcombine.high %v16031_v47, %v16031_v47  ;;  %v16447_v46 = vadd.f32 %v16319_v28, %v16031_v47 }
 0x51f   : > { %v16074_v49 = vcombine.high %v16072_v8, %v16072_v8  ;;  %v16456_v63 = vadd.f32 %v16328_v13, %v16073_v43  ;;  %v16457_v42 = vadd.f32 %v16329_v4, %v16072_v8  ;;  %16584 = vst.msk [vmem:[%s17726_s21 + $0xf8] sm:$0x3] %vm16459_vm5, %v16455_v59  ;;  %v16040_v18 = vcombine.high %v16038_v53, %v16038_v53 }
 0x520   : > { %v16448_v24 = vadd.f32 %v16320_v2, %v16039_v29  ;;  %v16449_v61 = vadd.f32 %v16321_v22, %v16038_v53  ;;  %16576 = vst.msk [vmem:[%s17726_s21 + $0xe8] sm:$0x3] %vm16459_vm5, %v16447_v46 }
 0x521   : > { %v16458_v12 = vadd.f32 %v16330_v34, %v16074_v49  ;;  %16585 = vst.msk [vmem:[%s17726_s21 + $0xfa] sm:$0x3] %vm16459_vm5, %v16456_v63  ;;  %16586 = vst.msk [vmem:[%s17726_s21 + $0xfc] sm:$0x3] %vm16459_vm5, %v16457_v42  ;;  %v16450_v3 = vadd.f32 %v16322_v17, %v16040_v18 }
 0x522   : > { %16577 = vst.msk [vmem:[%s17726_s21 + $0xea] sm:$0x3] %vm16459_vm5, %v16448_v24  ;;  %16578 = vst.msk [vmem:[%s17726_s21 + $0xec] sm:$0x3] %vm16459_vm5, %v16449_v61 }
 0x523   : > { %16587 = vst.msk [vmem:[%s17726_s21 + $0xfe] sm:$0x3] %vm16459_vm5, %v16458_v12  ;;  %16579 = vst.msk [vmem:[%s17726_s21 + $0xee] sm:$0x3] %vm16459_vm5, %v16450_v3 }
 0x524 PF: > { %s19_s30 = sadd.s32 1, %s17627_s30  }
 0x525   : > { %p16_p9 = scmp.ge.s32.totalorder %s19_s30, 4  }
 0x527   :  { %18 = sbr.rel (!%p16_p9) target bundleno = 1 (0x1), region = 118 }

</bundles_post_ra>
